<compile_context>
chip_gen: v7x
topology: tpu7x:2x2x1
jax: 0.10.0
libtpu: 0.0.40
codegen_flags: <defaults>
</compile_context>

<pallas_src>
import numpy as np
import jax
import jax.numpy as jnp
from jax import lax
from jax.experimental import pallas as pl
from jax.experimental.pallas import tpu as pltpu

HIDDEN = 128
FEATURE_SIZE = 24
NUM_LAYERS = 2
BPAD = 8          # batch padded to the f32 sublane tile
H = HIDDEN


# ----------------------------- Pallas kernel ------------------------------ #
def _sigmoid(x):
    # sigmoid(x) == 0.5 * (tanh(x/2) + 1): one EUP op instead of exp + divide.
    return 0.5 * (jnp.tanh(0.5 * x) + 1.0)


def _lstm_gates(g, c_prev):
    """PyTorch gate order (i, f, g, o); g: [BPAD, 4H] f32 preactivations."""
    i_g = _sigmoid(g[:, 0 * H:1 * H])
    f_g = _sigmoid(g[:, 1 * H:2 * H])
    g_g = jnp.tanh(g[:, 2 * H:3 * H])
    o_g = _sigmoid(g[:, 3 * H:4 * H])
    c_new = f_g * c_prev + i_g * g_g
    h_new = o_g * jnp.tanh(c_new)
    return h_new, c_new


def fused_bilstm_kernel(x_ref, wih1_ref, b1_ref, whh1f_ref, whh1r_ref,
                        wih2f_ref, wih2r_ref, whh2f_ref, b2f_ref, b2r_ref,
                        out_ref, x1p_ref, x2p_ref):
    """Whole 2-layer bidirectional LSTM forward; emits only the last-step output.

    x_ref:    [T*BPAD, F]   f32, time-major flattened (rows t*BPAD..t*BPAD+BPAD)
    wih1_ref: [F, 8H]       bf16, layer-1 input weights (fwd | rev)
    b1_ref:   [1, 8H]       f32,  layer-1 fused biases  (fwd | rev)
    whh1{f,r}_ref: [H, 4H]  bf16, layer-1 recurrent weights
    wih2{f,r}_ref: [2H, 4H] bf16, layer-2 input weights
    whh2f_ref:[H, 4H]       bf16, layer-2 fwd recurrent weights
    b2{f,r}_ref: [1, 4H]    f32,  layer-2 fused biases
    out_ref:  [BPAD, 2H]    f32   = output[:, -1, :]
    x1p_ref:  [T*BPAD, 8H]  f32 scratch, hoisted layer-1 x-projection
    x2p_ref:  [T*BPAD, 4H]  f32 scratch, layer-2 fwd x-projection (accumulated
                            incrementally inside the layer-1 loop)
    """
    T = x_ref.shape[0] // BPAD
    f32 = jnp.float32
    bf16 = jnp.bfloat16

    # ---- layer 1: hoisted input projection for BOTH directions (bias fused).
    #      bf16 cast of the input happens here (removed from the wrapper).
    x1p_ref[...] = (
        jnp.dot(x_ref[...].astype(bf16), wih1_ref[...],
                preferred_element_type=f32)
        + b1_ref[...]
    )
    # Seed the layer-2 fwd x-projection accumulator with its bias; the
    # per-time-step contributions are added inside the layer-1 loop below.
    x2p_ref[...] = jnp.broadcast_to(b2f_ref[...], x2p_ref.shape)

    # ---- layer 1: fwd and rev recurrences interleaved in one unrolled loop ---
    h1f = jnp.zeros((BPAD, H), f32)
    c1f = jnp.zeros((BPAD, H), f32)
    h1r = jnp.zeros((BPAD, H), f32)
    c1r = jnp.zeros((BPAD, H), f32)
    h1f_b = h1f.astype(bf16)
    h1r_b = h1r.astype(bf16)
    h1r_last_b = h1r_b
    for t in range(T):              # T is static and small -> fully unrolled
        # TODO(synk): if T grows, switch to lax.fori_loop(..., unroll=True)
        # over chunks and add pl.multiple_of on the pl.ds starts.
        rt = T - 1 - t
        gf = (x1p_ref[pl.ds(t * BPAD, BPAD), pl.ds(0, 4 * H)]
              + jnp.dot(h1f_b, whh1f_ref[...], preferred_element_type=f32))
        gr = (x1p_ref[pl.ds(rt * BPAD, BPAD), pl.ds(4 * H, 4 * H)]
              + jnp.dot(h1r_b, whh1r_ref[...], preferred_element_type=f32))
        h1f, c1f = _lstm_gates(gf, c1f)
        h1r, c1r = _lstm_gates(gr, c1r)
        h1f_b = h1f.astype(bf16)    # single cast per state per step; reused by
        h1r_b = h1r.astype(bf16)    # the folded x2p matmul AND next step's W_hh.
        if t == 0:
            h1r_last_b = h1r_b      # h1r at time T-1 (layer-2 rev input)
        # Fold the layer-2 fwd input projection into this loop.  The two extra
        # [8,128]x[128,512] matmuls are OFF the recurrence dependency chain, so
        # they hide in MXU slack instead of forming a standalone serial stage.
        x2p_ref[pl.ds(t * BPAD, BPAD), :] += jnp.dot(
            h1f_b, wih2f_ref[pl.ds(0, H), :], preferred_element_type=f32)
        x2p_ref[pl.ds(rt * BPAD, BPAD), :] += jnp.dot(
            h1r_b, wih2f_ref[pl.ds(H, H), :], preferred_element_type=f32)
    h1f_last_b = h1f_b              # h1f at time T-1 (layer-2 rev input)
    # TODO(synk): inter-layer dropout(p=0.3) is train-only; identity at inference.

    # ---- layer 2 fwd: x-projection already accumulated; walk the recurrence --
    h2f = jnp.zeros((BPAD, H), f32)
    c2f = jnp.zeros((BPAD, H), f32)
    h2f_b = h2f.astype(bf16)
    for t in range(T):
        g = (x2p_ref[pl.ds(t * BPAD, BPAD), :]
             + jnp.dot(h2f_b, whh2f_ref[...], preferred_element_type=f32))
        h2f, c2f = _lstm_gates(g, c2f)
        h2f_b = h2f.astype(bf16)

    # ---- layer 2 rev: output[:, -1] only needs ONE cell step (h0 = c0 = 0,
    #      so the h @ W_hh term vanishes) ------------------------------------
    x2_last_b = jnp.concatenate([h1f_last_b, h1r_last_b], axis=1)   # [BPAD, 2H]
    g2r = (jnp.dot(x2_last_b, wih2r_ref[...], preferred_element_type=f32)
           + b2r_ref[...])
    i2 = _sigmoid(g2r[:, 0 * H:1 * H])
    g2 = jnp.tanh(g2r[:, 2 * H:3 * H])
    o2 = _sigmoid(g2r[:, 3 * H:4 * H])
    c2r = i2 * g2
    h2r = o2 * jnp.tanh(c2r)

    out_ref[:, pl.ds(0, H)] = h2f
    out_ref[:, pl.ds(H, H)] = h2r


# ----------------------------- Forward wrapper ----------------------------- #
def rnn_metric_learner_forward(ws_padded_btf, kp):
    """ws_padded_btf: [B, T, F] (padded with -1.0) -> [B, 2*HIDDEN]."""
    B, T, F = ws_padded_btf.shape
    assert B <= BPAD
    # TODO(synk): add a batch-tile grid axis (dimension_semantics="parallel",
    # megacore on v7x) if the batch ever grows beyond one 8-row sublane tile.

    # Time-major, batch padded to BPAD rows, flattened so step t = rows
    # [t*BPAD, (t+1)*BPAD).  One expression -> a single XLA fusion under jit;
    # the f32->bf16 cast happens inside the kernel.  Batch-pad rows are
    # intentionally zero-filled (not -1.0): they are sliced off before return.
    x2d = (jnp.zeros((T, BPAD, F), jnp.float32)
           .at[:, :B, :].set(jnp.swapaxes(ws_padded_btf, 0, 1))
           .reshape(T * BPAD, F))

    args = (x2d, kp["wih1"], kp["b1"], kp["whh1f"], kp["whh1r"],
            kp["wih2f"], kp["wih2r"], kp["whh2f"], kp["b2f"], kp["b2r"])

    def full_spec(a):
        return pl.BlockSpec(a.shape, lambda i: (0, 0))

    # VMEM: scratch (256 + 128 KiB) + ~0.6 MiB inputs -- far below every
    # generation's limit at T=8.  For long sequences, store x1p/x2p in bf16
    # and/or tile the time axis rather than raising vmem_limit_bytes.
    out = pl.pallas_call(
        fused_bilstm_kernel,
        out_shape=jax.ShapeDtypeStruct((BPAD, 2 * HIDDEN), jnp.float32),
        grid=(1,),
        in_specs=[full_spec(a) for a in args],
        out_specs=pl.BlockSpec((BPAD, 2 * HIDDEN), lambda i: (0, 0)),
        scratch_shapes=[
            pltpu.VMEM((T * BPAD, 8 * HIDDEN), jnp.float32),  # layer-1 x-proj
            pltpu.VMEM((T * BPAD, 4 * HIDDEN), jnp.float32),  # layer-2 fwd x-proj
        ],
        compiler_params=pltpu.CompilerParams(
            dimension_semantics=("arbitrary",)),
    )(*args)
    return out[:B]


# --------------------------- Pure-JAX reference ---------------------------- #
def _lstm_dir_ref(x, wih_t, whh_t, b):
    Hh = whh_t.shape[0]
    B = x.shape[1]

    def step(carry, x_t):
        h, c = carry
        g = (jnp.dot(x_t, wih_t, precision=lax.Precision.HIGHEST)
             + jnp.dot(h, whh_t, precision=lax.Precision.HIGHEST) + b)
        i_g = jax.nn.sigmoid(g[:, 0 * Hh:1 * Hh])
        f_g = jax.nn.sigmoid(g[:, 1 * Hh:2 * Hh])
        g_g = jnp.tanh(g[:, 2 * Hh:3 * Hh])
        o_g = jax.nn.sigmoid(g[:, 3 * Hh:4 * Hh])
        c = f_g * c + i_g * g_g
        h = o_g * jnp.tanh(c)
        return (h, c), h

    init = (jnp.zeros((B, Hh), jnp.float32), jnp.zeros((B, Hh), jnp.float32))
    _, outs = lax.scan(step, init, x)
    return outs


def forward_ref(ws_padded_btf, params):
    x = jnp.transpose(ws_padded_btf, (1, 0, 2))
    layer_in = x
    for layer in range(NUM_LAYERS):
        out_f = _lstm_dir_ref(layer_in, *params[(layer, "fwd")])
        out_r = jnp.flip(
            _lstm_dir_ref(jnp.flip(layer_in, axis=0), *params[(layer, "rev")]),
            axis=0,
        )
        layer_in = jnp.concatenate([out_f, out_r], axis=-1)
    return layer_in[-1]


# ------------------------------- Utilities --------------------------------- #
def pad_sequence(ws, pad_value=-1.0):
    """torch.nn.utils.rnn.pad_sequence(batch_first=True, padding_value=-1.0)."""
    T = max(int(w.shape[0]) for w in ws)
    F = int(ws[0].shape[1])
    out = jnp.full((len(ws), T, F), pad_value, dtype=jnp.float32)
    for i, w in enumerate(ws):
        out = out.at[i, : w.shape[0]].set(w.astype(jnp.float32))
    return out


def init_params(key, feature_size=FEATURE_SIZE, hidden=HIDDEN):
    """PyTorch-LSTM-style init U(-1/sqrt(H), 1/sqrt(H)); ref layout (transposed W, fused b)."""
    bound = 1.0 / np.sqrt(hidden)
    in_sizes = [feature_size, 2 * hidden]
    params = {}
    for layer in range(NUM_LAYERS):
        for d in ("fwd", "rev"):
            key, k1, k2, k3, k4 = jax.random.split(key, 5)
            d_in = in_sizes[layer]
            w_ih = jax.random.uniform(k1, (4 * hidden, d_in), jnp.float32,
                                      -bound, bound)
            w_hh = jax.random.uniform(k2, (4 * hidden, hidden), jnp.float32,
                                      -bound, bound)
            b_ih = jax.random.uniform(k3, (4 * hidden,), jnp.float32, -bound, bound)
            b_hh = jax.random.uniform(k4, (4 * hidden,), jnp.float32, -bound, bound)
            params[(layer, d)] = (w_ih.T, w_hh.T, b_ih + b_hh)
    return params


def make_kernel_params(p):
    """Repack ref params into the fused-kernel layout (bf16 weights, f32 biases)."""
    bf16 = jnp.bfloat16
    return dict(
        wih1=jnp.concatenate([p[(0, "fwd")][0], p[(0, "rev")][0]],
                             axis=1).astype(bf16),                  # [F, 8H]
        b1=jnp.concatenate([p[(0, "fwd")][2], p[(0, "rev")][2]])[None, :],
        whh1f=p[(0, "fwd")][1].astype(bf16),                        # [H, 4H]
        whh1r=p[(0, "rev")][1].astype(bf16),
        wih2f=p[(1, "fwd")][0].astype(bf16),                        # [2H, 4H]
        wih2r=p[(1, "rev")][0].astype(bf16),
        whh2f=p[(1, "fwd")][1].astype(bf16),
        b2f=p[(1, "fwd")][2][None, :],
        b2r=p[(1, "rev")][2][None, :],
    )


# --------------------------------- Main ------------------------------------ #
if __name__ == "__main__":
    key = jax.random.PRNGKey(0)
    key, kp_key, kx1, kx2 = jax.random.split(key, 4)

    params = init_params(kp_key)
    kernel_params = make_kernel_params(params)

    # two variable-length sequences of panphon feature vectors (B=2, T<=8, F=24)
    ws = [
        jax.random.normal(kx1, (8, FEATURE_SIZE), jnp.float32),
        jax.random.normal(kx2, (5, FEATURE_SIZE), jnp.float32),
    ]
    ws_padded = pad_sequence(ws, pad_value=-1.0)        # [2, 8, 24]

    fwd = jax.jit(rnn_metric_learner_forward)
    out = jax.block_until_ready(fwd(ws_padded, kernel_params))   # [2, 256]
    ref = jax.block_until_ready(forward_ref(ws_padded, params))

    assert out.shape == (2, 2 * HIDDEN), out.shape
    # kernel uses bf16 matmul operands (f32 accumulation); ref is f32 HIGHEST.
    np.testing.assert_allclose(np.asarray(out), np.asarray(ref),
                               rtol=2e-2, atol=2e-2)
    print("KERNEL_OK")
</pallas_src>

<mosaic_0001>
module attributes {stable_mosaic.version = 11 : i64} {
  func.func @fused_bilstm_kernel(%arg0: i32, %arg1: memref<64x24xf32, #tpu.memory_space<vmem>>, %arg2: memref<24x1024xbf16, #tpu.memory_space<vmem>>, %arg3: memref<1x1024xf32, #tpu.memory_space<vmem>>, %arg4: memref<128x512xbf16, #tpu.memory_space<vmem>>, %arg5: memref<128x512xbf16, #tpu.memory_space<vmem>>, %arg6: memref<256x512xbf16, #tpu.memory_space<vmem>>, %arg7: memref<256x512xbf16, #tpu.memory_space<vmem>>, %arg8: memref<128x512xbf16, #tpu.memory_space<vmem>>, %arg9: memref<1x512xf32, #tpu.memory_space<vmem>>, %arg10: memref<1x512xf32, #tpu.memory_space<vmem>>, %arg11: memref<8x256xf32, #tpu.memory_space<vmem>>, %arg12: memref<64x1024xf32, #tpu.memory_space<vmem>>, %arg13: memref<64x512xf32, #tpu.memory_space<vmem>>) attributes {dimension_semantics = [#tpu.dimension_semantics<arbitrary>], iteration_bounds = array<i64: 1>, scalar_prefetch = 0 : i64, scratch_operands = 2 : i64, tpu.core_type = #tpu.core_type<tc>, window_params = [{pipeline_mode = #tpu.pipeline_mode<synchronous>, transform_indices = @transform_0, window_bounds = array<i64: 64, 24>}, {pipeline_mode = #tpu.pipeline_mode<synchronous>, transform_indices = @transform_1, window_bounds = array<i64: 24, 1024>}, {pipeline_mode = #tpu.pipeline_mode<synchronous>, transform_indices = @transform_2, window_bounds = array<i64: 1, 1024>}, {pipeline_mode = #tpu.pipeline_mode<synchronous>, transform_indices = @transform_3, window_bounds = array<i64: 128, 512>}, {pipeline_mode = #tpu.pipeline_mode<synchronous>, transform_indices = @transform_4, window_bounds = array<i64: 128, 512>}, {pipeline_mode = #tpu.pipeline_mode<synchronous>, transform_indices = @transform_5, window_bounds = array<i64: 256, 512>}, {pipeline_mode = #tpu.pipeline_mode<synchronous>, transform_indices = @transform_6, window_bounds = array<i64: 256, 512>}, {pipeline_mode = #tpu.pipeline_mode<synchronous>, transform_indices = @transform_7, window_bounds = array<i64: 128, 512>}, {pipeline_mode = #tpu.pipeline_mode<synchronous>, transform_indices = @transform_8, window_bounds = array<i64: 1, 512>}, {pipeline_mode = #tpu.pipeline_mode<synchronous>, transform_indices = @transform_9, window_bounds = array<i64: 1, 512>}, {pipeline_mode = #tpu.pipeline_mode<synchronous>, transform_indices = @transform_10, window_bounds = array<i64: 8, 256>}]} {
    %c0 = arith.constant 0 : index
    %c0_0 = arith.constant 0 : index
    %0 = vector.load %arg1[%c0, %c0_0] : memref<64x24xf32, #tpu.memory_space<vmem>>, vector<64x24xf32>
    %1 = arith.truncf %0 : vector<64x24xf32> to vector<64x24xbf16>
    %c0_1 = arith.constant 0 : index
    %c0_2 = arith.constant 0 : index
    %2 = vector.load %arg2[%c0_1, %c0_2] : memref<24x1024xbf16, #tpu.memory_space<vmem>>, vector<24x1024xbf16>
    %cst = arith.constant dense<0.000000e+00> : vector<64x1024xf32>
    %3 = tpu.matmul %1, %2, %cst {dimension_numbers = #tpu.dot_dimension_numbers<[1], [0], [0], [1], [0, 0, 1, 1], [], []>} : vector<64x24xbf16>, vector<24x1024xbf16>, vector<64x1024xf32> -> vector<64x1024xf32>
    %c0_3 = arith.constant 0 : index
    %c0_4 = arith.constant 0 : index
    %4 = vector.load %arg3[%c0_3, %c0_4] : memref<1x1024xf32, #tpu.memory_space<vmem>>, vector<1x1024xf32>
    %5 = vector.broadcast %4 : vector<1x1024xf32> to vector<64x1024xf32>
    %6 = arith.addf %3, %5 : vector<64x1024xf32>
    %c0_5 = arith.constant 0 : index
    %c0_6 = arith.constant 0 : index
    %7 = vector.load %arg12[%c0_5, %c0_6] : memref<64x1024xf32, #tpu.memory_space<vmem>>, vector<64x1024xf32>
    tpu.vector_store %arg12[%c0_5, %c0_6], %6 {strides = array<i32>} : memref<64x1024xf32, #tpu.memory_space<vmem>>, vector<64x1024xf32>,
    %c0_7 = arith.constant 0 : index
    %c0_8 = arith.constant 0 : index
    %8 = vector.load %arg9[%c0_7, %c0_8] : memref<1x512xf32, #tpu.memory_space<vmem>>, vector<1x512xf32>
    %9 = vector.shape_cast %8 : vector<1x512xf32> to vector<1x512xf32>
    %10 = vector.broadcast %9 : vector<1x512xf32> to vector<64x512xf32>
    %c0_9 = arith.constant 0 : index
    %c0_10 = arith.constant 0 : index
    %11 = vector.load %arg13[%c0_9, %c0_10] : memref<64x512xf32, #tpu.memory_space<vmem>>, vector<64x512xf32>
    tpu.vector_store %arg13[%c0_9, %c0_10], %10 {strides = array<i32>} : memref<64x512xf32, #tpu.memory_space<vmem>>, vector<64x512xf32>,
    %cst_11 = arith.constant 0.000000e+00 : f32
    %12 = vector.broadcast %cst_11 : f32 to vector<8x128xf32>
    %cst_12 = arith.constant 0.000000e+00 : f32
    %13 = vector.broadcast %cst_12 : f32 to vector<8x128xf32>
    %cst_13 = arith.constant 0.000000e+00 : f32
    %14 = vector.broadcast %cst_13 : f32 to vector<8x128xf32>
    %cst_14 = arith.constant 0.000000e+00 : f32
    %15 = vector.broadcast %cst_14 : f32 to vector<8x128xf32>
    %16 = arith.truncf %12 : vector<8x128xf32> to vector<8x128xbf16>
    %17 = arith.truncf %14 : vector<8x128xf32> to vector<8x128xbf16>
    %c0_15 = arith.constant 0 : index
    %c0_16 = arith.constant 0 : index
    %18 = vector.load %arg12[%c0_15, %c0_16] : memref<64x1024xf32, #tpu.memory_space<vmem>>, vector<8x512xf32>
    %c0_17 = arith.constant 0 : index
    %c0_18 = arith.constant 0 : index
    %19 = vector.load %arg4[%c0_17, %c0_18] : memref<128x512xbf16, #tpu.memory_space<vmem>>, vector<128x512xbf16>
    %cst_19 = arith.constant dense<0.000000e+00> : vector<8x512xf32>
    %20 = tpu.matmul %16, %19, %cst_19 {dimension_numbers = #tpu.dot_dimension_numbers<[1], [0], [0], [1], [0, 0, 1, 1], [], []>} : vector<8x128xbf16>, vector<128x512xbf16>, vector<8x512xf32> -> vector<8x512xf32>
    %21 = arith.addf %18, %20 : vector<8x512xf32>
    %c56 = arith.constant 56 : index
    %c512 = arith.constant 512 : index
    %22 = vector.load %arg12[%c56, %c512] : memref<64x1024xf32, #tpu.memory_space<vmem>>, vector<8x512xf32>
    %c0_20 = arith.constant 0 : index
    %c0_21 = arith.constant 0 : index
    %23 = vector.load %arg5[%c0_20, %c0_21] : memref<128x512xbf16, #tpu.memory_space<vmem>>, vector<128x512xbf16>
    %cst_22 = arith.constant dense<0.000000e+00> : vector<8x512xf32>
    %24 = tpu.matmul %17, %23, %cst_22 {dimension_numbers = #tpu.dot_dimension_numbers<[1], [0], [0], [1], [0, 0, 1, 1], [], []>} : vector<8x128xbf16>, vector<128x512xbf16>, vector<8x512xf32> -> vector<8x512xf32>
    %25 = arith.addf %22, %24 : vector<8x512xf32>
    %26 = vector.extract_strided_slice %21 {offsets = [0, 0], sizes = [8, 128], strides = [1, 1]} : vector<8x512xf32> to vector<8x128xf32>
    %cst_23 = arith.constant 5.000000e-01 : f32
    %27 = vector.broadcast %cst_23 : f32 to vector<8x128xf32>
    %28 = arith.mulf %27, %26 : vector<8x128xf32>
    %29 = math.tanh %28 : vector<8x128xf32>
    %cst_24 = arith.constant 1.000000e+00 : f32
    %30 = vector.broadcast %cst_24 : f32 to vector<8x128xf32>
    %31 = arith.addf %29, %30 : vector<8x128xf32>
    %cst_25 = arith.constant 5.000000e-01 : f32
    %32 = vector.broadcast %cst_25 : f32 to vector<8x128xf32>
    %33 = arith.mulf %32, %31 : vector<8x128xf32>
    %34 = vector.extract_strided_slice %21 {offsets = [0, 128], sizes = [8, 128], strides = [1, 1]} : vector<8x512xf32> to vector<8x128xf32>
    %cst_26 = arith.constant 5.000000e-01 : f32
    %35 = vector.broadcast %cst_26 : f32 to vector<8x128xf32>
    %36 = arith.mulf %35, %34 : vector<8x128xf32>
    %37 = math.tanh %36 : vector<8x128xf32>
    %cst_27 = arith.constant 1.000000e+00 : f32
    %38 = vector.broadcast %cst_27 : f32 to vector<8x128xf32>
    %39 = arith.addf %37, %38 : vector<8x128xf32>
    %cst_28 = arith.constant 5.000000e-01 : f32
    %40 = vector.broadcast %cst_28 : f32 to vector<8x128xf32>
    %41 = arith.mulf %40, %39 : vector<8x128xf32>
    %42 = vector.extract_strided_slice %21 {offsets = [0, 256], sizes = [8, 128], strides = [1, 1]} : vector<8x512xf32> to vector<8x128xf32>
    %43 = math.tanh %42 : vector<8x128xf32>
    %44 = vector.extract_strided_slice %21 {offsets = [0, 384], sizes = [8, 128], strides = [1, 1]} : vector<8x512xf32> to vector<8x128xf32>
    %cst_29 = arith.constant 5.000000e-01 : f32
    %45 = vector.broadcast %cst_29 : f32 to vector<8x128xf32>
    %46 = arith.mulf %45, %44 : vector<8x128xf32>
    %47 = math.tanh %46 : vector<8x128xf32>
    %cst_30 = arith.constant 1.000000e+00 : f32
    %48 = vector.broadcast %cst_30 : f32 to vector<8x128xf32>
    %49 = arith.addf %47, %48 : vector<8x128xf32>
    %cst_31 = arith.constant 5.000000e-01 : f32
    %50 = vector.broadcast %cst_31 : f32 to vector<8x128xf32>
    %51 = arith.mulf %50, %49 : vector<8x128xf32>
    %52 = arith.mulf %41, %13 : vector<8x128xf32>
    %53 = arith.mulf %33, %43 : vector<8x128xf32>
    %54 = arith.addf %52, %53 : vector<8x128xf32>
    %55 = math.tanh %54 : vector<8x128xf32>
    %56 = arith.mulf %51, %55 : vector<8x128xf32>
    %57 = vector.extract_strided_slice %25 {offsets = [0, 0], sizes = [8, 128], strides = [1, 1]} : vector<8x512xf32> to vector<8x128xf32>
    %cst_32 = arith.constant 5.000000e-01 : f32
    %58 = vector.broadcast %cst_32 : f32 to vector<8x128xf32>
    %59 = arith.mulf %58, %57 : vector<8x128xf32>
    %60 = math.tanh %59 : vector<8x128xf32>
    %cst_33 = arith.constant 1.000000e+00 : f32
    %61 = vector.broadcast %cst_33 : f32 to vector<8x128xf32>
    %62 = arith.addf %60, %61 : vector<8x128xf32>
    %cst_34 = arith.constant 5.000000e-01 : f32
    %63 = vector.broadcast %cst_34 : f32 to vector<8x128xf32>
    %64 = arith.mulf %63, %62 : vector<8x128xf32>
    %65 = vector.extract_strided_slice %25 {offsets = [0, 128], sizes = [8, 128], strides = [1, 1]} : vector<8x512xf32> to vector<8x128xf32>
    %cst_35 = arith.constant 5.000000e-01 : f32
    %66 = vector.broadcast %cst_35 : f32 to vector<8x128xf32>
    %67 = arith.mulf %66, %65 : vector<8x128xf32>
    %68 = math.tanh %67 : vector<8x128xf32>
    %cst_36 = arith.constant 1.000000e+00 : f32
    %69 = vector.broadcast %cst_36 : f32 to vector<8x128xf32>
    %70 = arith.addf %68, %69 : vector<8x128xf32>
    %cst_37 = arith.constant 5.000000e-01 : f32
    %71 = vector.broadcast %cst_37 : f32 to vector<8x128xf32>
    %72 = arith.mulf %71, %70 : vector<8x128xf32>
    %73 = vector.extract_strided_slice %25 {offsets = [0, 256], sizes = [8, 128], strides = [1, 1]} : vector<8x512xf32> to vector<8x128xf32>
    %74 = math.tanh %73 : vector<8x128xf32>
    %75 = vector.extract_strided_slice %25 {offsets = [0, 384], sizes = [8, 128], strides = [1, 1]} : vector<8x512xf32> to vector<8x128xf32>
    %cst_38 = arith.constant 5.000000e-01 : f32
    %76 = vector.broadcast %cst_38 : f32 to vector<8x128xf32>
    %77 = arith.mulf %76, %75 : vector<8x128xf32>
    %78 = math.tanh %77 : vector<8x128xf32>
    %cst_39 = arith.constant 1.000000e+00 : f32
    %79 = vector.broadcast %cst_39 : f32 to vector<8x128xf32>
    %80 = arith.addf %78, %79 : vector<8x128xf32>
    %cst_40 = arith.constant 5.000000e-01 : f32
    %81 = vector.broadcast %cst_40 : f32 to vector<8x128xf32>
    %82 = arith.mulf %81, %80 : vector<8x128xf32>
    %83 = arith.mulf %72, %15 : vector<8x128xf32>
    %84 = arith.mulf %64, %74 : vector<8x128xf32>
    %85 = arith.addf %83, %84 : vector<8x128xf32>
    %86 = math.tanh %85 : vector<8x128xf32>
    %87 = arith.mulf %82, %86 : vector<8x128xf32>
    %88 = arith.truncf %56 : vector<8x128xf32> to vector<8x128xbf16>
    %89 = arith.truncf %87 : vector<8x128xf32> to vector<8x128xbf16>
    %c0_41 = arith.constant 0 : index
    %c0_42 = arith.constant 0 : index
    %90 = vector.load %arg13[%c0_41, %c0_42] : memref<64x512xf32, #tpu.memory_space<vmem>>, vector<8x512xf32>
    %c0_43 = arith.constant 0 : index
    %c0_44 = arith.constant 0 : index
    %91 = vector.load %arg6[%c0_43, %c0_44] : memref<256x512xbf16, #tpu.memory_space<vmem>>, vector<128x512xbf16>
    %cst_45 = arith.constant dense<0.000000e+00> : vector<8x512xf32>
    %92 = tpu.matmul %88, %91, %cst_45 {dimension_numbers = #tpu.dot_dimension_numbers<[1], [0], [0], [1], [0, 0, 1, 1], [], []>} : vector<8x128xbf16>, vector<128x512xbf16>, vector<8x512xf32> -> vector<8x512xf32>
    %93 = arith.addf %90, %92 : vector<8x512xf32>
    %c0_46 = arith.constant 0 : index
    %c0_47 = arith.constant 0 : index
    %94 = vector.load %arg13[%c0_46, %c0_47] : memref<64x512xf32, #tpu.memory_space<vmem>>, vector<8x512xf32>
    tpu.vector_store %arg13[%c0_46, %c0_47], %93 {strides = array<i32>} : memref<64x512xf32, #tpu.memory_space<vmem>>, vector<8x512xf32>,
    %c56_48 = arith.constant 56 : index
    %c0_49 = arith.constant 0 : index
    %95 = vector.load %arg13[%c56_48, %c0_49] : memref<64x512xf32, #tpu.memory_space<vmem>>, vector<8x512xf32>
    %c128 = arith.constant 128 : index
    %c0_50 = arith.constant 0 : index
    %96 = vector.load %arg6[%c128, %c0_50] : memref<256x512xbf16, #tpu.memory_space<vmem>>, vector<128x512xbf16>
    %cst_51 = arith.constant dense<0.000000e+00> : vector<8x512xf32>
    %97 = tpu.matmul %89, %96, %cst_51 {dimension_numbers = #tpu.dot_dimension_numbers<[1], [0], [0], [1], [0, 0, 1, 1], [], []>} : vector<8x128xbf16>, vector<128x512xbf16>, vector<8x512xf32> -> vector<8x512xf32>
    %98 = arith.addf %95, %97 : vector<8x512xf32>
    %c56_52 = arith.constant 56 : index
    %c0_53 = arith.constant 0 : index
    %99 = vector.load %arg13[%c56_52, %c0_53] : memref<64x512xf32, #tpu.memory_space<vmem>>, vector<8x512xf32>
    tpu.vector_store %arg13[%c56_52, %c0_53], %98 {strides = array<i32>} : memref<64x512xf32, #tpu.memory_space<vmem>>, vector<8x512xf32>,
    %c8 = arith.constant 8 : index
    %c0_54 = arith.constant 0 : index
    %100 = vector.load %arg12[%c8, %c0_54] : memref<64x1024xf32, #tpu.memory_space<vmem>>, vector<8x512xf32>
    %c0_55 = arith.constant 0 : index
    %c0_56 = arith.constant 0 : index
    %101 = vector.load %arg4[%c0_55, %c0_56] : memref<128x512xbf16, #tpu.memory_space<vmem>>, vector<128x512xbf16>
    %cst_57 = arith.constant dense<0.000000e+00> : vector<8x512xf32>
    %102 = tpu.matmul %88, %101, %cst_57 {dimension_numbers = #tpu.dot_dimension_numbers<[1], [0], [0], [1], [0, 0, 1, 1], [], []>} : vector<8x128xbf16>, vector<128x512xbf16>, vector<8x512xf32> -> vector<8x512xf32>
    %103 = arith.addf %100, %102 : vector<8x512xf32>
    %c48 = arith.constant 48 : index
    %c512_58 = arith.constant 512 : index
    %104 = vector.load %arg12[%c48, %c512_58] : memref<64x1024xf32, #tpu.memory_space<vmem>>, vector<8x512xf32>
    %c0_59 = arith.constant 0 : index
    %c0_60 = arith.constant 0 : index
    %105 = vector.load %arg5[%c0_59, %c0_60] : memref<128x512xbf16, #tpu.memory_space<vmem>>, vector<128x512xbf16>
    %cst_61 = arith.constant dense<0.000000e+00> : vector<8x512xf32>
    %106 = tpu.matmul %89, %105, %cst_61 {dimension_numbers = #tpu.dot_dimension_numbers<[1], [0], [0], [1], [0, 0, 1, 1], [], []>} : vector<8x128xbf16>, vector<128x512xbf16>, vector<8x512xf32> -> vector<8x512xf32>
    %107 = arith.addf %104, %106 : vector<8x512xf32>
    %108 = vector.extract_strided_slice %103 {offsets = [0, 0], sizes = [8, 128], strides = [1, 1]} : vector<8x512xf32> to vector<8x128xf32>
    %cst_62 = arith.constant 5.000000e-01 : f32
    %109 = vector.broadcast %cst_62 : f32 to vector<8x128xf32>
    %110 = arith.mulf %109, %108 : vector<8x128xf32>
    %111 = math.tanh %110 : vector<8x128xf32>
    %cst_63 = arith.constant 1.000000e+00 : f32
    %112 = vector.broadcast %cst_63 : f32 to vector<8x128xf32>
    %113 = arith.addf %111, %112 : vector<8x128xf32>
    %cst_64 = arith.constant 5.000000e-01 : f32
    %114 = vector.broadcast %cst_64 : f32 to vector<8x128xf32>
    %115 = arith.mulf %114, %113 : vector<8x128xf32>
    %116 = vector.extract_strided_slice %103 {offsets = [0, 128], sizes = [8, 128], strides = [1, 1]} : vector<8x512xf32> to vector<8x128xf32>
    %cst_65 = arith.constant 5.000000e-01 : f32
    %117 = vector.broadcast %cst_65 : f32 to vector<8x128xf32>
    %118 = arith.mulf %117, %116 : vector<8x128xf32>
    %119 = math.tanh %118 : vector<8x128xf32>
    %cst_66 = arith.constant 1.000000e+00 : f32
    %120 = vector.broadcast %cst_66 : f32 to vector<8x128xf32>
    %121 = arith.addf %119, %120 : vector<8x128xf32>
    %cst_67 = arith.constant 5.000000e-01 : f32
    %122 = vector.broadcast %cst_67 : f32 to vector<8x128xf32>
    %123 = arith.mulf %122, %121 : vector<8x128xf32>
    %124 = vector.extract_strided_slice %103 {offsets = [0, 256], sizes = [8, 128], strides = [1, 1]} : vector<8x512xf32> to vector<8x128xf32>
    %125 = math.tanh %124 : vector<8x128xf32>
    %126 = vector.extract_strided_slice %103 {offsets = [0, 384], sizes = [8, 128], strides = [1, 1]} : vector<8x512xf32> to vector<8x128xf32>
    %cst_68 = arith.constant 5.000000e-01 : f32
    %127 = vector.broadcast %cst_68 : f32 to vector<8x128xf32>
    %128 = arith.mulf %127, %126 : vector<8x128xf32>
    %129 = math.tanh %128 : vector<8x128xf32>
    %cst_69 = arith.constant 1.000000e+00 : f32
    %130 = vector.broadcast %cst_69 : f32 to vector<8x128xf32>
    %131 = arith.addf %129, %130 : vector<8x128xf32>
    %cst_70 = arith.constant 5.000000e-01 : f32
    %132 = vector.broadcast %cst_70 : f32 to vector<8x128xf32>
    %133 = arith.mulf %132, %131 : vector<8x128xf32>
    %134 = arith.mulf %123, %54 : vector<8x128xf32>
    %135 = arith.mulf %115, %125 : vector<8x128xf32>
    %136 = arith.addf %134, %135 : vector<8x128xf32>
    %137 = math.tanh %136 : vector<8x128xf32>
    %138 = arith.mulf %133, %137 : vector<8x128xf32>
    %139 = vector.extract_strided_slice %107 {offsets = [0, 0], sizes = [8, 128], strides = [1, 1]} : vector<8x512xf32> to vector<8x128xf32>
    %cst_71 = arith.constant 5.000000e-01 : f32
    %140 = vector.broadcast %cst_71 : f32 to vector<8x128xf32>
    %141 = arith.mulf %140, %139 : vector<8x128xf32>
    %142 = math.tanh %141 : vector<8x128xf32>
    %cst_72 = arith.constant 1.000000e+00 : f32
    %143 = vector.broadcast %cst_72 : f32 to vector<8x128xf32>
    %144 = arith.addf %142, %143 : vector<8x128xf32>
    %cst_73 = arith.constant 5.000000e-01 : f32
    %145 = vector.broadcast %cst_73 : f32 to vector<8x128xf32>
    %146 = arith.mulf %145, %144 : vector<8x128xf32>
    %147 = vector.extract_strided_slice %107 {offsets = [0, 128], sizes = [8, 128], strides = [1, 1]} : vector<8x512xf32> to vector<8x128xf32>
    %cst_74 = arith.constant 5.000000e-01 : f32
    %148 = vector.broadcast %cst_74 : f32 to vector<8x128xf32>
    %149 = arith.mulf %148, %147 : vector<8x128xf32>
    %150 = math.tanh %149 : vector<8x128xf32>
    %cst_75 = arith.constant 1.000000e+00 : f32
    %151 = vector.broadcast %cst_75 : f32 to vector<8x128xf32>
    %152 = arith.addf %150, %151 : vector<8x128xf32>
    %cst_76 = arith.constant 5.000000e-01 : f32
    %153 = vector.broadcast %cst_76 : f32 to vector<8x128xf32>
    %154 = arith.mulf %153, %152 : vector<8x128xf32>
    %155 = vector.extract_strided_slice %107 {offsets = [0, 256], sizes = [8, 128], strides = [1, 1]} : vector<8x512xf32> to vector<8x128xf32>
    %156 = math.tanh %155 : vector<8x128xf32>
    %157 = vector.extract_strided_slice %107 {offsets = [0, 384], sizes = [8, 128], strides = [1, 1]} : vector<8x512xf32> to vector<8x128xf32>
    %cst_77 = arith.constant 5.000000e-01 : f32
    %158 = vector.broadcast %cst_77 : f32 to vector<8x128xf32>
    %159 = arith.mulf %158, %157 : vector<8x128xf32>
    %160 = math.tanh %159 : vector<8x128xf32>
    %cst_78 = arith.constant 1.000000e+00 : f32
    %161 = vector.broadcast %cst_78 : f32 to vector<8x128xf32>
    %162 = arith.addf %160, %161 : vector<8x128xf32>
    %cst_79 = arith.constant 5.000000e-01 : f32
    %163 = vector.broadcast %cst_79 : f32 to vector<8x128xf32>
    %164 = arith.mulf %163, %162 : vector<8x128xf32>
    %165 = arith.mulf %154, %85 : vector<8x128xf32>
    %166 = arith.mulf %146, %156 : vector<8x128xf32>
    %167 = arith.addf %165, %166 : vector<8x128xf32>
    %168 = math.tanh %167 : vector<8x128xf32>
    %169 = arith.mulf %164, %168 : vector<8x128xf32>
    %170 = arith.truncf %138 : vector<8x128xf32> to vector<8x128xbf16>
    %171 = arith.truncf %169 : vector<8x128xf32> to vector<8x128xbf16>
    %c8_80 = arith.constant 8 : index
    %c0_81 = arith.constant 0 : index
    %172 = vector.load %arg13[%c8_80, %c0_81] : memref<64x512xf32, #tpu.memory_space<vmem>>, vector<8x512xf32>
    %c0_82 = arith.constant 0 : index
    %c0_83 = arith.constant 0 : index
    %173 = vector.load %arg6[%c0_82, %c0_83] : memref<256x512xbf16, #tpu.memory_space<vmem>>, vector<128x512xbf16>
    %cst_84 = arith.constant dense<0.000000e+00> : vector<8x512xf32>
    %174 = tpu.matmul %170, %173, %cst_84 {dimension_numbers = #tpu.dot_dimension_numbers<[1], [0], [0], [1], [0, 0, 1, 1], [], []>} : vector<8x128xbf16>, vector<128x512xbf16>, vector<8x512xf32> -> vector<8x512xf32>
    %175 = arith.addf %172, %174 : vector<8x512xf32>
    %c8_85 = arith.constant 8 : index
    %c0_86 = arith.constant 0 : index
    %176 = vector.load %arg13[%c8_85, %c0_86] : memref<64x512xf32, #tpu.memory_space<vmem>>, vector<8x512xf32>
    tpu.vector_store %arg13[%c8_85, %c0_86], %175 {strides = array<i32>} : memref<64x512xf32, #tpu.memory_space<vmem>>, vector<8x512xf32>,
    %c48_87 = arith.constant 48 : index
    %c0_88 = arith.constant 0 : index
    %177 = vector.load %arg13[%c48_87, %c0_88] : memref<64x512xf32, #tpu.memory_space<vmem>>, vector<8x512xf32>
    %c128_89 = arith.constant 128 : index
    %c0_90 = arith.constant 0 : index
    %178 = vector.load %arg6[%c128_89, %c0_90] : memref<256x512xbf16, #tpu.memory_space<vmem>>, vector<128x512xbf16>
    %cst_91 = arith.constant dense<0.000000e+00> : vector<8x512xf32>
    %179 = tpu.matmul %171, %178, %cst_91 {dimension_numbers = #tpu.dot_dimension_numbers<[1], [0], [0], [1], [0, 0, 1, 1], [], []>} : vector<8x128xbf16>, vector<128x512xbf16>, vector<8x512xf32> -> vector<8x512xf32>
    %180 = arith.addf %177, %179 : vector<8x512xf32>
    %c48_92 = arith.constant 48 : index
    %c0_93 = arith.constant 0 : index
    %181 = vector.load %arg13[%c48_92, %c0_93] : memref<64x512xf32, #tpu.memory_space<vmem>>, vector<8x512xf32>
    tpu.vector_store %arg13[%c48_92, %c0_93], %180 {strides = array<i32>} : memref<64x512xf32, #tpu.memory_space<vmem>>, vector<8x512xf32>,
    %c16 = arith.constant 16 : index
    %c0_94 = arith.constant 0 : index
    %182 = vector.load %arg12[%c16, %c0_94] : memref<64x1024xf32, #tpu.memory_space<vmem>>, vector<8x512xf32>
    %c0_95 = arith.constant 0 : index
    %c0_96 = arith.constant 0 : index
    %183 = vector.load %arg4[%c0_95, %c0_96] : memref<128x512xbf16, #tpu.memory_space<vmem>>, vector<128x512xbf16>
    %cst_97 = arith.constant dense<0.000000e+00> : vector<8x512xf32>
    %184 = tpu.matmul %170, %183, %cst_97 {dimension_numbers = #tpu.dot_dimension_numbers<[1], [0], [0], [1], [0, 0, 1, 1], [], []>} : vector<8x128xbf16>, vector<128x512xbf16>, vector<8x512xf32> -> vector<8x512xf32>
    %185 = arith.addf %182, %184 : vector<8x512xf32>
    %c40 = arith.constant 40 : index
    %c512_98 = arith.constant 512 : index
    %186 = vector.load %arg12[%c40, %c512_98] : memref<64x1024xf32, #tpu.memory_space<vmem>>, vector<8x512xf32>
    %c0_99 = arith.constant 0 : index
    %c0_100 = arith.constant 0 : index
    %187 = vector.load %arg5[%c0_99, %c0_100] : memref<128x512xbf16, #tpu.memory_space<vmem>>, vector<128x512xbf16>
    %cst_101 = arith.constant dense<0.000000e+00> : vector<8x512xf32>
    %188 = tpu.matmul %171, %187, %cst_101 {dimension_numbers = #tpu.dot_dimension_numbers<[1], [0], [0], [1], [0, 0, 1, 1], [], []>} : vector<8x128xbf16>, vector<128x512xbf16>, vector<8x512xf32> -> vector<8x512xf32>
    %189 = arith.addf %186, %188 : vector<8x512xf32>
    %190 = vector.extract_strided_slice %185 {offsets = [0, 0], sizes = [8, 128], strides = [1, 1]} : vector<8x512xf32> to vector<8x128xf32>
    %cst_102 = arith.constant 5.000000e-01 : f32
    %191 = vector.broadcast %cst_102 : f32 to vector<8x128xf32>
    %192 = arith.mulf %191, %190 : vector<8x128xf32>
    %193 = math.tanh %192 : vector<8x128xf32>
    %cst_103 = arith.constant 1.000000e+00 : f32
    %194 = vector.broadcast %cst_103 : f32 to vector<8x128xf32>
    %195 = arith.addf %193, %194 : vector<8x128xf32>
    %cst_104 = arith.constant 5.000000e-01 : f32
    %196 = vector.broadcast %cst_104 : f32 to vector<8x128xf32>
    %197 = arith.mulf %196, %195 : vector<8x128xf32>
    %198 = vector.extract_strided_slice %185 {offsets = [0, 128], sizes = [8, 128], strides = [1, 1]} : vector<8x512xf32> to vector<8x128xf32>
    %cst_105 = arith.constant 5.000000e-01 : f32
    %199 = vector.broadcast %cst_105 : f32 to vector<8x128xf32>
    %200 = arith.mulf %199, %198 : vector<8x128xf32>
    %201 = math.tanh %200 : vector<8x128xf32>
    %cst_106 = arith.constant 1.000000e+00 : f32
    %202 = vector.broadcast %cst_106 : f32 to vector<8x128xf32>
    %203 = arith.addf %201, %202 : vector<8x128xf32>
    %cst_107 = arith.constant 5.000000e-01 : f32
    %204 = vector.broadcast %cst_107 : f32 to vector<8x128xf32>
    %205 = arith.mulf %204, %203 : vector<8x128xf32>
    %206 = vector.extract_strided_slice %185 {offsets = [0, 256], sizes = [8, 128], strides = [1, 1]} : vector<8x512xf32> to vector<8x128xf32>
    %207 = math.tanh %206 : vector<8x128xf32>
    %208 = vector.extract_strided_slice %185 {offsets = [0, 384], sizes = [8, 128], strides = [1, 1]} : vector<8x512xf32> to vector<8x128xf32>
    %cst_108 = arith.constant 5.000000e-01 : f32
    %209 = vector.broadcast %cst_108 : f32 to vector<8x128xf32>
    %210 = arith.mulf %209, %208 : vector<8x128xf32>
    %211 = math.tanh %210 : vector<8x128xf32>
    %cst_109 = arith.constant 1.000000e+00 : f32
    %212 = vector.broadcast %cst_109 : f32 to vector<8x128xf32>
    %213 = arith.addf %211, %212 : vector<8x128xf32>
    %cst_110 = arith.constant 5.000000e-01 : f32
    %214 = vector.broadcast %cst_110 : f32 to vector<8x128xf32>
    %215 = arith.mulf %214, %213 : vector<8x128xf32>
    %216 = arith.mulf %205, %136 : vector<8x128xf32>
    %217 = arith.mulf %197, %207 : vector<8x128xf32>
    %218 = arith.addf %216, %217 : vector<8x128xf32>
    %219 = math.tanh %218 : vector<8x128xf32>
    %220 = arith.mulf %215, %219 : vector<8x128xf32>
    %221 = vector.extract_strided_slice %189 {offsets = [0, 0], sizes = [8, 128], strides = [1, 1]} : vector<8x512xf32> to vector<8x128xf32>
    %cst_111 = arith.constant 5.000000e-01 : f32
    %222 = vector.broadcast %cst_111 : f32 to vector<8x128xf32>
    %223 = arith.mulf %222, %221 : vector<8x128xf32>
    %224 = math.tanh %223 : vector<8x128xf32>
    %cst_112 = arith.constant 1.000000e+00 : f32
    %225 = vector.broadcast %cst_112 : f32 to vector<8x128xf32>
    %226 = arith.addf %224, %225 : vector<8x128xf32>
    %cst_113 = arith.constant 5.000000e-01 : f32
    %227 = vector.broadcast %cst_113 : f32 to vector<8x128xf32>
    %228 = arith.mulf %227, %226 : vector<8x128xf32>
    %229 = vector.extract_strided_slice %189 {offsets = [0, 128], sizes = [8, 128], strides = [1, 1]} : vector<8x512xf32> to vector<8x128xf32>
    %cst_114 = arith.constant 5.000000e-01 : f32
    %230 = vector.broadcast %cst_114 : f32 to vector<8x128xf32>
    %231 = arith.mulf %230, %229 : vector<8x128xf32>
    %232 = math.tanh %231 : vector<8x128xf32>
    %cst_115 = arith.constant 1.000000e+00 : f32
    %233 = vector.broadcast %cst_115 : f32 to vector<8x128xf32>
    %234 = arith.addf %232, %233 : vector<8x128xf32>
    %cst_116 = arith.constant 5.000000e-01 : f32
    %235 = vector.broadcast %cst_116 : f32 to vector<8x128xf32>
    %236 = arith.mulf %235, %234 : vector<8x128xf32>
    %237 = vector.extract_strided_slice %189 {offsets = [0, 256], sizes = [8, 128], strides = [1, 1]} : vector<8x512xf32> to vector<8x128xf32>
    %238 = math.tanh %237 : vector<8x128xf32>
    %239 = vector.extract_strided_slice %189 {offsets = [0, 384], sizes = [8, 128], strides = [1, 1]} : vector<8x512xf32> to vector<8x128xf32>
    %cst_117 = arith.constant 5.000000e-01 : f32
    %240 = vector.broadcast %cst_117 : f32 to vector<8x128xf32>
    %241 = arith.mulf %240, %239 : vector<8x128xf32>
    %242 = math.tanh %241 : vector<8x128xf32>
    %cst_118 = arith.constant 1.000000e+00 : f32
    %243 = vector.broadcast %cst_118 : f32 to vector<8x128xf32>
    %244 = arith.addf %242, %243 : vector<8x128xf32>
    %cst_119 = arith.constant 5.000000e-01 : f32
    %245 = vector.broadcast %cst_119 : f32 to vector<8x128xf32>
    %246 = arith.mulf %245, %244 : vector<8x128xf32>
    %247 = arith.mulf %236, %167 : vector<8x128xf32>
    %248 = arith.mulf %228, %238 : vector<8x128xf32>
    %249 = arith.addf %247, %248 : vector<8x128xf32>
    %250 = math.tanh %249 : vector<8x128xf32>
    %251 = arith.mulf %246, %250 : vector<8x128xf32>
    %252 = arith.truncf %220 : vector<8x128xf32> to vector<8x128xbf16>
    %253 = arith.truncf %251 : vector<8x128xf32> to vector<8x128xbf16>
    %c16_120 = arith.constant 16 : index
    %c0_121 = arith.constant 0 : index
    %254 = vector.load %arg13[%c16_120, %c0_121] : memref<64x512xf32, #tpu.memory_space<vmem>>, vector<8x512xf32>
    %c0_122 = arith.constant 0 : index
    %c0_123 = arith.constant 0 : index
    %255 = vector.load %arg6[%c0_122, %c0_123] : memref<256x512xbf16, #tpu.memory_space<vmem>>, vector<128x512xbf16>
    %cst_124 = arith.constant dense<0.000000e+00> : vector<8x512xf32>
    %256 = tpu.matmul %252, %255, %cst_124 {dimension_numbers = #tpu.dot_dimension_numbers<[1], [0], [0], [1], [0, 0, 1, 1], [], []>} : vector<8x128xbf16>, vector<128x512xbf16>, vector<8x512xf32> -> vector<8x512xf32>
    %257 = arith.addf %254, %256 : vector<8x512xf32>
    %c16_125 = arith.constant 16 : index
    %c0_126 = arith.constant 0 : index
    %258 = vector.load %arg13[%c16_125, %c0_126] : memref<64x512xf32, #tpu.memory_space<vmem>>, vector<8x512xf32>
    tpu.vector_store %arg13[%c16_125, %c0_126], %257 {strides = array<i32>} : memref<64x512xf32, #tpu.memory_space<vmem>>, vector<8x512xf32>,
    %c40_127 = arith.constant 40 : index
    %c0_128 = arith.constant 0 : index
    %259 = vector.load %arg13[%c40_127, %c0_128] : memref<64x512xf32, #tpu.memory_space<vmem>>, vector<8x512xf32>
    %c128_129 = arith.constant 128 : index
    %c0_130 = arith.constant 0 : index
    %260 = vector.load %arg6[%c128_129, %c0_130] : memref<256x512xbf16, #tpu.memory_space<vmem>>, vector<128x512xbf16>
    %cst_131 = arith.constant dense<0.000000e+00> : vector<8x512xf32>
    %261 = tpu.matmul %253, %260, %cst_131 {dimension_numbers = #tpu.dot_dimension_numbers<[1], [0], [0], [1], [0, 0, 1, 1], [], []>} : vector<8x128xbf16>, vector<128x512xbf16>, vector<8x512xf32> -> vector<8x512xf32>
    %262 = arith.addf %259, %261 : vector<8x512xf32>
    %c40_132 = arith.constant 40 : index
    %c0_133 = arith.constant 0 : index
    %263 = vector.load %arg13[%c40_132, %c0_133] : memref<64x512xf32, #tpu.memory_space<vmem>>, vector<8x512xf32>
    tpu.vector_store %arg13[%c40_132, %c0_133], %262 {strides = array<i32>} : memref<64x512xf32, #tpu.memory_space<vmem>>, vector<8x512xf32>,
    %c24 = arith.constant 24 : index
    %c0_134 = arith.constant 0 : index
    %264 = vector.load %arg12[%c24, %c0_134] : memref<64x1024xf32, #tpu.memory_space<vmem>>, vector<8x512xf32>
    %c0_135 = arith.constant 0 : index
    %c0_136 = arith.constant 0 : index
    %265 = vector.load %arg4[%c0_135, %c0_136] : memref<128x512xbf16, #tpu.memory_space<vmem>>, vector<128x512xbf16>
    %cst_137 = arith.constant dense<0.000000e+00> : vector<8x512xf32>
    %266 = tpu.matmul %252, %265, %cst_137 {dimension_numbers = #tpu.dot_dimension_numbers<[1], [0], [0], [1], [0, 0, 1, 1], [], []>} : vector<8x128xbf16>, vector<128x512xbf16>, vector<8x512xf32> -> vector<8x512xf32>
    %267 = arith.addf %264, %266 : vector<8x512xf32>
    %c32 = arith.constant 32 : index
    %c512_138 = arith.constant 512 : index
    %268 = vector.load %arg12[%c32, %c512_138] : memref<64x1024xf32, #tpu.memory_space<vmem>>, vector<8x512xf32>
    %c0_139 = arith.constant 0 : index
    %c0_140 = arith.constant 0 : index
    %269 = vector.load %arg5[%c0_139, %c0_140] : memref<128x512xbf16, #tpu.memory_space<vmem>>, vector<128x512xbf16>
    %cst_141 = arith.constant dense<0.000000e+00> : vector<8x512xf32>
    %270 = tpu.matmul %253, %269, %cst_141 {dimension_numbers = #tpu.dot_dimension_numbers<[1], [0], [0], [1], [0, 0, 1, 1], [], []>} : vector<8x128xbf16>, vector<128x512xbf16>, vector<8x512xf32> -> vector<8x512xf32>
    %271 = arith.addf %268, %270 : vector<8x512xf32>
    %272 = vector.extract_strided_slice %267 {offsets = [0, 0], sizes = [8, 128], strides = [1, 1]} : vector<8x512xf32> to vector<8x128xf32>
    %cst_142 = arith.constant 5.000000e-01 : f32
    %273 = vector.broadcast %cst_142 : f32 to vector<8x128xf32>
    %274 = arith.mulf %273, %272 : vector<8x128xf32>
    %275 = math.tanh %274 : vector<8x128xf32>
    %cst_143 = arith.constant 1.000000e+00 : f32
    %276 = vector.broadcast %cst_143 : f32 to vector<8x128xf32>
    %277 = arith.addf %275, %276 : vector<8x128xf32>
    %cst_144 = arith.constant 5.000000e-01 : f32
    %278 = vector.broadcast %cst_144 : f32 to vector<8x128xf32>
    %279 = arith.mulf %278, %277 : vector<8x128xf32>
    %280 = vector.extract_strided_slice %267 {offsets = [0, 128], sizes = [8, 128], strides = [1, 1]} : vector<8x512xf32> to vector<8x128xf32>
    %cst_145 = arith.constant 5.000000e-01 : f32
    %281 = vector.broadcast %cst_145 : f32 to vector<8x128xf32>
    %282 = arith.mulf %281, %280 : vector<8x128xf32>
    %283 = math.tanh %282 : vector<8x128xf32>
    %cst_146 = arith.constant 1.000000e+00 : f32
    %284 = vector.broadcast %cst_146 : f32 to vector<8x128xf32>
    %285 = arith.addf %283, %284 : vector<8x128xf32>
    %cst_147 = arith.constant 5.000000e-01 : f32
    %286 = vector.broadcast %cst_147 : f32 to vector<8x128xf32>
    %287 = arith.mulf %286, %285 : vector<8x128xf32>
    %288 = vector.extract_strided_slice %267 {offsets = [0, 256], sizes = [8, 128], strides = [1, 1]} : vector<8x512xf32> to vector<8x128xf32>
    %289 = math.tanh %288 : vector<8x128xf32>
    %290 = vector.extract_strided_slice %267 {offsets = [0, 384], sizes = [8, 128], strides = [1, 1]} : vector<8x512xf32> to vector<8x128xf32>
    %cst_148 = arith.constant 5.000000e-01 : f32
    %291 = vector.broadcast %cst_148 : f32 to vector<8x128xf32>
    %292 = arith.mulf %291, %290 : vector<8x128xf32>
    %293 = math.tanh %292 : vector<8x128xf32>
    %cst_149 = arith.constant 1.000000e+00 : f32
    %294 = vector.broadcast %cst_149 : f32 to vector<8x128xf32>
    %295 = arith.addf %293, %294 : vector<8x128xf32>
    %cst_150 = arith.constant 5.000000e-01 : f32
    %296 = vector.broadcast %cst_150 : f32 to vector<8x128xf32>
    %297 = arith.mulf %296, %295 : vector<8x128xf32>
    %298 = arith.mulf %287, %218 : vector<8x128xf32>
    %299 = arith.mulf %279, %289 : vector<8x128xf32>
    %300 = arith.addf %298, %299 : vector<8x128xf32>
    %301 = math.tanh %300 : vector<8x128xf32>
    %302 = arith.mulf %297, %301 : vector<8x128xf32>
    %303 = vector.extract_strided_slice %271 {offsets = [0, 0], sizes = [8, 128], strides = [1, 1]} : vector<8x512xf32> to vector<8x128xf32>
    %cst_151 = arith.constant 5.000000e-01 : f32
    %304 = vector.broadcast %cst_151 : f32 to vector<8x128xf32>
    %305 = arith.mulf %304, %303 : vector<8x128xf32>
    %306 = math.tanh %305 : vector<8x128xf32>
    %cst_152 = arith.constant 1.000000e+00 : f32
    %307 = vector.broadcast %cst_152 : f32 to vector<8x128xf32>
    %308 = arith.addf %306, %307 : vector<8x128xf32>
    %cst_153 = arith.constant 5.000000e-01 : f32
    %309 = vector.broadcast %cst_153 : f32 to vector<8x128xf32>
    %310 = arith.mulf %309, %308 : vector<8x128xf32>
    %311 = vector.extract_strided_slice %271 {offsets = [0, 128], sizes = [8, 128], strides = [1, 1]} : vector<8x512xf32> to vector<8x128xf32>
    %cst_154 = arith.constant 5.000000e-01 : f32
    %312 = vector.broadcast %cst_154 : f32 to vector<8x128xf32>
    %313 = arith.mulf %312, %311 : vector<8x128xf32>
    %314 = math.tanh %313 : vector<8x128xf32>
    %cst_155 = arith.constant 1.000000e+00 : f32
    %315 = vector.broadcast %cst_155 : f32 to vector<8x128xf32>
    %316 = arith.addf %314, %315 : vector<8x128xf32>
    %cst_156 = arith.constant 5.000000e-01 : f32
    %317 = vector.broadcast %cst_156 : f32 to vector<8x128xf32>
    %318 = arith.mulf %317, %316 : vector<8x128xf32>
    %319 = vector.extract_strided_slice %271 {offsets = [0, 256], sizes = [8, 128], strides = [1, 1]} : vector<8x512xf32> to vector<8x128xf32>
    %320 = math.tanh %319 : vector<8x128xf32>
    %321 = vector.extract_strided_slice %271 {offsets = [0, 384], sizes = [8, 128], strides = [1, 1]} : vector<8x512xf32> to vector<8x128xf32>
    %cst_157 = arith.constant 5.000000e-01 : f32
    %322 = vector.broadcast %cst_157 : f32 to vector<8x128xf32>
    %323 = arith.mulf %322, %321 : vector<8x128xf32>
    %324 = math.tanh %323 : vector<8x128xf32>
    %cst_158 = arith.constant 1.000000e+00 : f32
    %325 = vector.broadcast %cst_158 : f32 to vector<8x128xf32>
    %326 = arith.addf %324, %325 : vector<8x128xf32>
    %cst_159 = arith.constant 5.000000e-01 : f32
    %327 = vector.broadcast %cst_159 : f32 to vector<8x128xf32>
    %328 = arith.mulf %327, %326 : vector<8x128xf32>
    %329 = arith.mulf %318, %249 : vector<8x128xf32>
    %330 = arith.mulf %310, %320 : vector<8x128xf32>
    %331 = arith.addf %329, %330 : vector<8x128xf32>
    %332 = math.tanh %331 : vector<8x128xf32>
    %333 = arith.mulf %328, %332 : vector<8x128xf32>
    %334 = arith.truncf %302 : vector<8x128xf32> to vector<8x128xbf16>
    %335 = arith.truncf %333 : vector<8x128xf32> to vector<8x128xbf16>
    %c24_160 = arith.constant 24 : index
    %c0_161 = arith.constant 0 : index
    %336 = vector.load %arg13[%c24_160, %c0_161] : memref<64x512xf32, #tpu.memory_space<vmem>>, vector<8x512xf32>
    %c0_162 = arith.constant 0 : index
    %c0_163 = arith.constant 0 : index
    %337 = vector.load %arg6[%c0_162, %c0_163] : memref<256x512xbf16, #tpu.memory_space<vmem>>, vector<128x512xbf16>
    %cst_164 = arith.constant dense<0.000000e+00> : vector<8x512xf32>
    %338 = tpu.matmul %334, %337, %cst_164 {dimension_numbers = #tpu.dot_dimension_numbers<[1], [0], [0], [1], [0, 0, 1, 1], [], []>} : vector<8x128xbf16>, vector<128x512xbf16>, vector<8x512xf32> -> vector<8x512xf32>
    %339 = arith.addf %336, %338 : vector<8x512xf32>
    %c24_165 = arith.constant 24 : index
    %c0_166 = arith.constant 0 : index
    %340 = vector.load %arg13[%c24_165, %c0_166] : memref<64x512xf32, #tpu.memory_space<vmem>>, vector<8x512xf32>
    tpu.vector_store %arg13[%c24_165, %c0_166], %339 {strides = array<i32>} : memref<64x512xf32, #tpu.memory_space<vmem>>, vector<8x512xf32>,
    %c32_167 = arith.constant 32 : index
    %c0_168 = arith.constant 0 : index
    %341 = vector.load %arg13[%c32_167, %c0_168] : memref<64x512xf32, #tpu.memory_space<vmem>>, vector<8x512xf32>
    %c128_169 = arith.constant 128 : index
    %c0_170 = arith.constant 0 : index
    %342 = vector.load %arg6[%c128_169, %c0_170] : memref<256x512xbf16, #tpu.memory_space<vmem>>, vector<128x512xbf16>
    %cst_171 = arith.constant dense<0.000000e+00> : vector<8x512xf32>
    %343 = tpu.matmul %335, %342, %cst_171 {dimension_numbers = #tpu.dot_dimension_numbers<[1], [0], [0], [1], [0, 0, 1, 1], [], []>} : vector<8x128xbf16>, vector<128x512xbf16>, vector<8x512xf32> -> vector<8x512xf32>
    %344 = arith.addf %341, %343 : vector<8x512xf32>
    %c32_172 = arith.constant 32 : index
    %c0_173 = arith.constant 0 : index
    %345 = vector.load %arg13[%c32_172, %c0_173] : memref<64x512xf32, #tpu.memory_space<vmem>>, vector<8x512xf32>
    tpu.vector_store %arg13[%c32_172, %c0_173], %344 {strides = array<i32>} : memref<64x512xf32, #tpu.memory_space<vmem>>, vector<8x512xf32>,
    %c32_174 = arith.constant 32 : index
    %c0_175 = arith.constant 0 : index
    %346 = vector.load %arg12[%c32_174, %c0_175] : memref<64x1024xf32, #tpu.memory_space<vmem>>, vector<8x512xf32>
    %c0_176 = arith.constant 0 : index
    %c0_177 = arith.constant 0 : index
    %347 = vector.load %arg4[%c0_176, %c0_177] : memref<128x512xbf16, #tpu.memory_space<vmem>>, vector<128x512xbf16>
    %cst_178 = arith.constant dense<0.000000e+00> : vector<8x512xf32>
    %348 = tpu.matmul %334, %347, %cst_178 {dimension_numbers = #tpu.dot_dimension_numbers<[1], [0], [0], [1], [0, 0, 1, 1], [], []>} : vector<8x128xbf16>, vector<128x512xbf16>, vector<8x512xf32> -> vector<8x512xf32>
    %349 = arith.addf %346, %348 : vector<8x512xf32>
    %c24_179 = arith.constant 24 : index
    %c512_180 = arith.constant 512 : index
    %350 = vector.load %arg12[%c24_179, %c512_180] : memref<64x1024xf32, #tpu.memory_space<vmem>>, vector<8x512xf32>
    %c0_181 = arith.constant 0 : index
    %c0_182 = arith.constant 0 : index
    %351 = vector.load %arg5[%c0_181, %c0_182] : memref<128x512xbf16, #tpu.memory_space<vmem>>, vector<128x512xbf16>
    %cst_183 = arith.constant dense<0.000000e+00> : vector<8x512xf32>
    %352 = tpu.matmul %335, %351, %cst_183 {dimension_numbers = #tpu.dot_dimension_numbers<[1], [0], [0], [1], [0, 0, 1, 1], [], []>} : vector<8x128xbf16>, vector<128x512xbf16>, vector<8x512xf32> -> vector<8x512xf32>
    %353 = arith.addf %350, %352 : vector<8x512xf32>
    %354 = vector.extract_strided_slice %349 {offsets = [0, 0], sizes = [8, 128], strides = [1, 1]} : vector<8x512xf32> to vector<8x128xf32>
    %cst_184 = arith.constant 5.000000e-01 : f32
    %355 = vector.broadcast %cst_184 : f32 to vector<8x128xf32>
    %356 = arith.mulf %355, %354 : vector<8x128xf32>
    %357 = math.tanh %356 : vector<8x128xf32>
    %cst_185 = arith.constant 1.000000e+00 : f32
    %358 = vector.broadcast %cst_185 : f32 to vector<8x128xf32>
    %359 = arith.addf %357, %358 : vector<8x128xf32>
    %cst_186 = arith.constant 5.000000e-01 : f32
    %360 = vector.broadcast %cst_186 : f32 to vector<8x128xf32>
    %361 = arith.mulf %360, %359 : vector<8x128xf32>
    %362 = vector.extract_strided_slice %349 {offsets = [0, 128], sizes = [8, 128], strides = [1, 1]} : vector<8x512xf32> to vector<8x128xf32>
    %cst_187 = arith.constant 5.000000e-01 : f32
    %363 = vector.broadcast %cst_187 : f32 to vector<8x128xf32>
    %364 = arith.mulf %363, %362 : vector<8x128xf32>
    %365 = math.tanh %364 : vector<8x128xf32>
    %cst_188 = arith.constant 1.000000e+00 : f32
    %366 = vector.broadcast %cst_188 : f32 to vector<8x128xf32>
    %367 = arith.addf %365, %366 : vector<8x128xf32>
    %cst_189 = arith.constant 5.000000e-01 : f32
    %368 = vector.broadcast %cst_189 : f32 to vector<8x128xf32>
    %369 = arith.mulf %368, %367 : vector<8x128xf32>
    %370 = vector.extract_strided_slice %349 {offsets = [0, 256], sizes = [8, 128], strides = [1, 1]} : vector<8x512xf32> to vector<8x128xf32>
    %371 = math.tanh %370 : vector<8x128xf32>
    %372 = vector.extract_strided_slice %349 {offsets = [0, 384], sizes = [8, 128], strides = [1, 1]} : vector<8x512xf32> to vector<8x128xf32>
    %cst_190 = arith.constant 5.000000e-01 : f32
    %373 = vector.broadcast %cst_190 : f32 to vector<8x128xf32>
    %374 = arith.mulf %373, %372 : vector<8x128xf32>
    %375 = math.tanh %374 : vector<8x128xf32>
    %cst_191 = arith.constant 1.000000e+00 : f32
    %376 = vector.broadcast %cst_191 : f32 to vector<8x128xf32>
    %377 = arith.addf %375, %376 : vector<8x128xf32>
    %cst_192 = arith.constant 5.000000e-01 : f32
    %378 = vector.broadcast %cst_192 : f32 to vector<8x128xf32>
    %379 = arith.mulf %378, %377 : vector<8x128xf32>
    %380 = arith.mulf %369, %300 : vector<8x128xf32>
    %381 = arith.mulf %361, %371 : vector<8x128xf32>
    %382 = arith.addf %380, %381 : vector<8x128xf32>
    %383 = math.tanh %382 : vector<8x128xf32>
    %384 = arith.mulf %379, %383 : vector<8x128xf32>
    %385 = vector.extract_strided_slice %353 {offsets = [0, 0], sizes = [8, 128], strides = [1, 1]} : vector<8x512xf32> to vector<8x128xf32>
    %cst_193 = arith.constant 5.000000e-01 : f32
    %386 = vector.broadcast %cst_193 : f32 to vector<8x128xf32>
    %387 = arith.mulf %386, %385 : vector<8x128xf32>
    %388 = math.tanh %387 : vector<8x128xf32>
    %cst_194 = arith.constant 1.000000e+00 : f32
    %389 = vector.broadcast %cst_194 : f32 to vector<8x128xf32>
    %390 = arith.addf %388, %389 : vector<8x128xf32>
    %cst_195 = arith.constant 5.000000e-01 : f32
    %391 = vector.broadcast %cst_195 : f32 to vector<8x128xf32>
    %392 = arith.mulf %391, %390 : vector<8x128xf32>
    %393 = vector.extract_strided_slice %353 {offsets = [0, 128], sizes = [8, 128], strides = [1, 1]} : vector<8x512xf32> to vector<8x128xf32>
    %cst_196 = arith.constant 5.000000e-01 : f32
    %394 = vector.broadcast %cst_196 : f32 to vector<8x128xf32>
    %395 = arith.mulf %394, %393 : vector<8x128xf32>
    %396 = math.tanh %395 : vector<8x128xf32>
    %cst_197 = arith.constant 1.000000e+00 : f32
    %397 = vector.broadcast %cst_197 : f32 to vector<8x128xf32>
    %398 = arith.addf %396, %397 : vector<8x128xf32>
    %cst_198 = arith.constant 5.000000e-01 : f32
    %399 = vector.broadcast %cst_198 : f32 to vector<8x128xf32>
    %400 = arith.mulf %399, %398 : vector<8x128xf32>
    %401 = vector.extract_strided_slice %353 {offsets = [0, 256], sizes = [8, 128], strides = [1, 1]} : vector<8x512xf32> to vector<8x128xf32>
    %402 = math.tanh %401 : vector<8x128xf32>
    %403 = vector.extract_strided_slice %353 {offsets = [0, 384], sizes = [8, 128], strides = [1, 1]} : vector<8x512xf32> to vector<8x128xf32>
    %cst_199 = arith.constant 5.000000e-01 : f32
    %404 = vector.broadcast %cst_199 : f32 to vector<8x128xf32>
    %405 = arith.mulf %404, %403 : vector<8x128xf32>
    %406 = math.tanh %405 : vector<8x128xf32>
    %cst_200 = arith.constant 1.000000e+00 : f32
    %407 = vector.broadcast %cst_200 : f32 to vector<8x128xf32>
    %408 = arith.addf %406, %407 : vector<8x128xf32>
    %cst_201 = arith.constant 5.000000e-01 : f32
    %409 = vector.broadcast %cst_201 : f32 to vector<8x128xf32>
    %410 = arith.mulf %409, %408 : vector<8x128xf32>
    %411 = arith.mulf %400, %331 : vector<8x128xf32>
    %412 = arith.mulf %392, %402 : vector<8x128xf32>
    %413 = arith.addf %411, %412 : vector<8x128xf32>
    %414 = math.tanh %413 : vector<8x128xf32>
    %415 = arith.mulf %410, %414 : vector<8x128xf32>
    %416 = arith.truncf %384 : vector<8x128xf32> to vector<8x128xbf16>
    %417 = arith.truncf %415 : vector<8x128xf32> to vector<8x128xbf16>
    %c32_202 = arith.constant 32 : index
    %c0_203 = arith.constant 0 : index
    %418 = vector.load %arg13[%c32_202, %c0_203] : memref<64x512xf32, #tpu.memory_space<vmem>>, vector<8x512xf32>
    %c0_204 = arith.constant 0 : index
    %c0_205 = arith.constant 0 : index
    %419 = vector.load %arg6[%c0_204, %c0_205] : memref<256x512xbf16, #tpu.memory_space<vmem>>, vector<128x512xbf16>
    %cst_206 = arith.constant dense<0.000000e+00> : vector<8x512xf32>
    %420 = tpu.matmul %416, %419, %cst_206 {dimension_numbers = #tpu.dot_dimension_numbers<[1], [0], [0], [1], [0, 0, 1, 1], [], []>} : vector<8x128xbf16>, vector<128x512xbf16>, vector<8x512xf32> -> vector<8x512xf32>
    %421 = arith.addf %418, %420 : vector<8x512xf32>
    %c32_207 = arith.constant 32 : index
    %c0_208 = arith.constant 0 : index
    %422 = vector.load %arg13[%c32_207, %c0_208] : memref<64x512xf32, #tpu.memory_space<vmem>>, vector<8x512xf32>
    tpu.vector_store %arg13[%c32_207, %c0_208], %421 {strides = array<i32>} : memref<64x512xf32, #tpu.memory_space<vmem>>, vector<8x512xf32>,
    %c24_209 = arith.constant 24 : index
    %c0_210 = arith.constant 0 : index
    %423 = vector.load %arg13[%c24_209, %c0_210] : memref<64x512xf32, #tpu.memory_space<vmem>>, vector<8x512xf32>
    %c128_211 = arith.constant 128 : index
    %c0_212 = arith.constant 0 : index
    %424 = vector.load %arg6[%c128_211, %c0_212] : memref<256x512xbf16, #tpu.memory_space<vmem>>, vector<128x512xbf16>
    %cst_213 = arith.constant dense<0.000000e+00> : vector<8x512xf32>
    %425 = tpu.matmul %417, %424, %cst_213 {dimension_numbers = #tpu.dot_dimension_numbers<[1], [0], [0], [1], [0, 0, 1, 1], [], []>} : vector<8x128xbf16>, vector<128x512xbf16>, vector<8x512xf32> -> vector<8x512xf32>
    %426 = arith.addf %423, %425 : vector<8x512xf32>
    %c24_214 = arith.constant 24 : index
    %c0_215 = arith.constant 0 : index
    %427 = vector.load %arg13[%c24_214, %c0_215] : memref<64x512xf32, #tpu.memory_space<vmem>>, vector<8x512xf32>
    tpu.vector_store %arg13[%c24_214, %c0_215], %426 {strides = array<i32>} : memref<64x512xf32, #tpu.memory_space<vmem>>, vector<8x512xf32>,
    %c40_216 = arith.constant 40 : index
    %c0_217 = arith.constant 0 : index
    %428 = vector.load %arg12[%c40_216, %c0_217] : memref<64x1024xf32, #tpu.memory_space<vmem>>, vector<8x512xf32>
    %c0_218 = arith.constant 0 : index
    %c0_219 = arith.constant 0 : index
    %429 = vector.load %arg4[%c0_218, %c0_219] : memref<128x512xbf16, #tpu.memory_space<vmem>>, vector<128x512xbf16>
    %cst_220 = arith.constant dense<0.000000e+00> : vector<8x512xf32>
    %430 = tpu.matmul %416, %429, %cst_220 {dimension_numbers = #tpu.dot_dimension_numbers<[1], [0], [0], [1], [0, 0, 1, 1], [], []>} : vector<8x128xbf16>, vector<128x512xbf16>, vector<8x512xf32> -> vector<8x512xf32>
    %431 = arith.addf %428, %430 : vector<8x512xf32>
    %c16_221 = arith.constant 16 : index
    %c512_222 = arith.constant 512 : index
    %432 = vector.load %arg12[%c16_221, %c512_222] : memref<64x1024xf32, #tpu.memory_space<vmem>>, vector<8x512xf32>
    %c0_223 = arith.constant 0 : index
    %c0_224 = arith.constant 0 : index
    %433 = vector.load %arg5[%c0_223, %c0_224] : memref<128x512xbf16, #tpu.memory_space<vmem>>, vector<128x512xbf16>
    %cst_225 = arith.constant dense<0.000000e+00> : vector<8x512xf32>
    %434 = tpu.matmul %417, %433, %cst_225 {dimension_numbers = #tpu.dot_dimension_numbers<[1], [0], [0], [1], [0, 0, 1, 1], [], []>} : vector<8x128xbf16>, vector<128x512xbf16>, vector<8x512xf32> -> vector<8x512xf32>
    %435 = arith.addf %432, %434 : vector<8x512xf32>
    %436 = vector.extract_strided_slice %431 {offsets = [0, 0], sizes = [8, 128], strides = [1, 1]} : vector<8x512xf32> to vector<8x128xf32>
    %cst_226 = arith.constant 5.000000e-01 : f32
    %437 = vector.broadcast %cst_226 : f32 to vector<8x128xf32>
    %438 = arith.mulf %437, %436 : vector<8x128xf32>
    %439 = math.tanh %438 : vector<8x128xf32>
    %cst_227 = arith.constant 1.000000e+00 : f32
    %440 = vector.broadcast %cst_227 : f32 to vector<8x128xf32>
    %441 = arith.addf %439, %440 : vector<8x128xf32>
    %cst_228 = arith.constant 5.000000e-01 : f32
    %442 = vector.broadcast %cst_228 : f32 to vector<8x128xf32>
    %443 = arith.mulf %442, %441 : vector<8x128xf32>
    %444 = vector.extract_strided_slice %431 {offsets = [0, 128], sizes = [8, 128], strides = [1, 1]} : vector<8x512xf32> to vector<8x128xf32>
    %cst_229 = arith.constant 5.000000e-01 : f32
    %445 = vector.broadcast %cst_229 : f32 to vector<8x128xf32>
    %446 = arith.mulf %445, %444 : vector<8x128xf32>
    %447 = math.tanh %446 : vector<8x128xf32>
    %cst_230 = arith.constant 1.000000e+00 : f32
    %448 = vector.broadcast %cst_230 : f32 to vector<8x128xf32>
    %449 = arith.addf %447, %448 : vector<8x128xf32>
    %cst_231 = arith.constant 5.000000e-01 : f32
    %450 = vector.broadcast %cst_231 : f32 to vector<8x128xf32>
    %451 = arith.mulf %450, %449 : vector<8x128xf32>
    %452 = vector.extract_strided_slice %431 {offsets = [0, 256], sizes = [8, 128], strides = [1, 1]} : vector<8x512xf32> to vector<8x128xf32>
    %453 = math.tanh %452 : vector<8x128xf32>
    %454 = vector.extract_strided_slice %431 {offsets = [0, 384], sizes = [8, 128], strides = [1, 1]} : vector<8x512xf32> to vector<8x128xf32>
    %cst_232 = arith.constant 5.000000e-01 : f32
    %455 = vector.broadcast %cst_232 : f32 to vector<8x128xf32>
    %456 = arith.mulf %455, %454 : vector<8x128xf32>
    %457 = math.tanh %456 : vector<8x128xf32>
    %cst_233 = arith.constant 1.000000e+00 : f32
    %458 = vector.broadcast %cst_233 : f32 to vector<8x128xf32>
    %459 = arith.addf %457, %458 : vector<8x128xf32>
    %cst_234 = arith.constant 5.000000e-01 : f32
    %460 = vector.broadcast %cst_234 : f32 to vector<8x128xf32>
    %461 = arith.mulf %460, %459 : vector<8x128xf32>
    %462 = arith.mulf %451, %382 : vector<8x128xf32>
    %463 = arith.mulf %443, %453 : vector<8x128xf32>
    %464 = arith.addf %462, %463 : vector<8x128xf32>
    %465 = math.tanh %464 : vector<8x128xf32>
    %466 = arith.mulf %461, %465 : vector<8x128xf32>
    %467 = vector.extract_strided_slice %435 {offsets = [0, 0], sizes = [8, 128], strides = [1, 1]} : vector<8x512xf32> to vector<8x128xf32>
    %cst_235 = arith.constant 5.000000e-01 : f32
    %468 = vector.broadcast %cst_235 : f32 to vector<8x128xf32>
    %469 = arith.mulf %468, %467 : vector<8x128xf32>
    %470 = math.tanh %469 : vector<8x128xf32>
    %cst_236 = arith.constant 1.000000e+00 : f32
    %471 = vector.broadcast %cst_236 : f32 to vector<8x128xf32>
    %472 = arith.addf %470, %471 : vector<8x128xf32>
    %cst_237 = arith.constant 5.000000e-01 : f32
    %473 = vector.broadcast %cst_237 : f32 to vector<8x128xf32>
    %474 = arith.mulf %473, %472 : vector<8x128xf32>
    %475 = vector.extract_strided_slice %435 {offsets = [0, 128], sizes = [8, 128], strides = [1, 1]} : vector<8x512xf32> to vector<8x128xf32>
    %cst_238 = arith.constant 5.000000e-01 : f32
    %476 = vector.broadcast %cst_238 : f32 to vector<8x128xf32>
    %477 = arith.mulf %476, %475 : vector<8x128xf32>
    %478 = math.tanh %477 : vector<8x128xf32>
    %cst_239 = arith.constant 1.000000e+00 : f32
    %479 = vector.broadcast %cst_239 : f32 to vector<8x128xf32>
    %480 = arith.addf %478, %479 : vector<8x128xf32>
    %cst_240 = arith.constant 5.000000e-01 : f32
    %481 = vector.broadcast %cst_240 : f32 to vector<8x128xf32>
    %482 = arith.mulf %481, %480 : vector<8x128xf32>
    %483 = vector.extract_strided_slice %435 {offsets = [0, 256], sizes = [8, 128], strides = [1, 1]} : vector<8x512xf32> to vector<8x128xf32>
    %484 = math.tanh %483 : vector<8x128xf32>
    %485 = vector.extract_strided_slice %435 {offsets = [0, 384], sizes = [8, 128], strides = [1, 1]} : vector<8x512xf32> to vector<8x128xf32>
    %cst_241 = arith.constant 5.000000e-01 : f32
    %486 = vector.broadcast %cst_241 : f32 to vector<8x128xf32>
    %487 = arith.mulf %486, %485 : vector<8x128xf32>
    %488 = math.tanh %487 : vector<8x128xf32>
    %cst_242 = arith.constant 1.000000e+00 : f32
    %489 = vector.broadcast %cst_242 : f32 to vector<8x128xf32>
    %490 = arith.addf %488, %489 : vector<8x128xf32>
    %cst_243 = arith.constant 5.000000e-01 : f32
    %491 = vector.broadcast %cst_243 : f32 to vector<8x128xf32>
    %492 = arith.mulf %491, %490 : vector<8x128xf32>
    %493 = arith.mulf %482, %413 : vector<8x128xf32>
    %494 = arith.mulf %474, %484 : vector<8x128xf32>
    %495 = arith.addf %493, %494 : vector<8x128xf32>
    %496 = math.tanh %495 : vector<8x128xf32>
    %497 = arith.mulf %492, %496 : vector<8x128xf32>
    %498 = arith.truncf %466 : vector<8x128xf32> to vector<8x128xbf16>
    %499 = arith.truncf %497 : vector<8x128xf32> to vector<8x128xbf16>
    %c40_244 = arith.constant 40 : index
    %c0_245 = arith.constant 0 : index
    %500 = vector.load %arg13[%c40_244, %c0_245] : memref<64x512xf32, #tpu.memory_space<vmem>>, vector<8x512xf32>
    %c0_246 = arith.constant 0 : index
    %c0_247 = arith.constant 0 : index
    %501 = vector.load %arg6[%c0_246, %c0_247] : memref<256x512xbf16, #tpu.memory_space<vmem>>, vector<128x512xbf16>
    %cst_248 = arith.constant dense<0.000000e+00> : vector<8x512xf32>
    %502 = tpu.matmul %498, %501, %cst_248 {dimension_numbers = #tpu.dot_dimension_numbers<[1], [0], [0], [1], [0, 0, 1, 1], [], []>} : vector<8x128xbf16>, vector<128x512xbf16>, vector<8x512xf32> -> vector<8x512xf32>
    %503 = arith.addf %500, %502 : vector<8x512xf32>
    %c40_249 = arith.constant 40 : index
    %c0_250 = arith.constant 0 : index
    %504 = vector.load %arg13[%c40_249, %c0_250] : memref<64x512xf32, #tpu.memory_space<vmem>>, vector<8x512xf32>
    tpu.vector_store %arg13[%c40_249, %c0_250], %503 {strides = array<i32>} : memref<64x512xf32, #tpu.memory_space<vmem>>, vector<8x512xf32>,
    %c16_251 = arith.constant 16 : index
    %c0_252 = arith.constant 0 : index
    %505 = vector.load %arg13[%c16_251, %c0_252] : memref<64x512xf32, #tpu.memory_space<vmem>>, vector<8x512xf32>
    %c128_253 = arith.constant 128 : index
    %c0_254 = arith.constant 0 : index
    %506 = vector.load %arg6[%c128_253, %c0_254] : memref<256x512xbf16, #tpu.memory_space<vmem>>, vector<128x512xbf16>
    %cst_255 = arith.constant dense<0.000000e+00> : vector<8x512xf32>
    %507 = tpu.matmul %499, %506, %cst_255 {dimension_numbers = #tpu.dot_dimension_numbers<[1], [0], [0], [1], [0, 0, 1, 1], [], []>} : vector<8x128xbf16>, vector<128x512xbf16>, vector<8x512xf32> -> vector<8x512xf32>
    %508 = arith.addf %505, %507 : vector<8x512xf32>
    %c16_256 = arith.constant 16 : index
    %c0_257 = arith.constant 0 : index
    %509 = vector.load %arg13[%c16_256, %c0_257] : memref<64x512xf32, #tpu.memory_space<vmem>>, vector<8x512xf32>
    tpu.vector_store %arg13[%c16_256, %c0_257], %508 {strides = array<i32>} : memref<64x512xf32, #tpu.memory_space<vmem>>, vector<8x512xf32>,
    %c48_258 = arith.constant 48 : index
    %c0_259 = arith.constant 0 : index
    %510 = vector.load %arg12[%c48_258, %c0_259] : memref<64x1024xf32, #tpu.memory_space<vmem>>, vector<8x512xf32>
    %c0_260 = arith.constant 0 : index
    %c0_261 = arith.constant 0 : index
    %511 = vector.load %arg4[%c0_260, %c0_261] : memref<128x512xbf16, #tpu.memory_space<vmem>>, vector<128x512xbf16>
    %cst_262 = arith.constant dense<0.000000e+00> : vector<8x512xf32>
    %512 = tpu.matmul %498, %511, %cst_262 {dimension_numbers = #tpu.dot_dimension_numbers<[1], [0], [0], [1], [0, 0, 1, 1], [], []>} : vector<8x128xbf16>, vector<128x512xbf16>, vector<8x512xf32> -> vector<8x512xf32>
    %513 = arith.addf %510, %512 : vector<8x512xf32>
    %c8_263 = arith.constant 8 : index
    %c512_264 = arith.constant 512 : index
    %514 = vector.load %arg12[%c8_263, %c512_264] : memref<64x1024xf32, #tpu.memory_space<vmem>>, vector<8x512xf32>
    %c0_265 = arith.constant 0 : index
    %c0_266 = arith.constant 0 : index
    %515 = vector.load %arg5[%c0_265, %c0_266] : memref<128x512xbf16, #tpu.memory_space<vmem>>, vector<128x512xbf16>
    %cst_267 = arith.constant dense<0.000000e+00> : vector<8x512xf32>
    %516 = tpu.matmul %499, %515, %cst_267 {dimension_numbers = #tpu.dot_dimension_numbers<[1], [0], [0], [1], [0, 0, 1, 1], [], []>} : vector<8x128xbf16>, vector<128x512xbf16>, vector<8x512xf32> -> vector<8x512xf32>
    %517 = arith.addf %514, %516 : vector<8x512xf32>
    %518 = vector.extract_strided_slice %513 {offsets = [0, 0], sizes = [8, 128], strides = [1, 1]} : vector<8x512xf32> to vector<8x128xf32>
    %cst_268 = arith.constant 5.000000e-01 : f32
    %519 = vector.broadcast %cst_268 : f32 to vector<8x128xf32>
    %520 = arith.mulf %519, %518 : vector<8x128xf32>
    %521 = math.tanh %520 : vector<8x128xf32>
    %cst_269 = arith.constant 1.000000e+00 : f32
    %522 = vector.broadcast %cst_269 : f32 to vector<8x128xf32>
    %523 = arith.addf %521, %522 : vector<8x128xf32>
    %cst_270 = arith.constant 5.000000e-01 : f32
    %524 = vector.broadcast %cst_270 : f32 to vector<8x128xf32>
    %525 = arith.mulf %524, %523 : vector<8x128xf32>
    %526 = vector.extract_strided_slice %513 {offsets = [0, 128], sizes = [8, 128], strides = [1, 1]} : vector<8x512xf32> to vector<8x128xf32>
    %cst_271 = arith.constant 5.000000e-01 : f32
    %527 = vector.broadcast %cst_271 : f32 to vector<8x128xf32>
    %528 = arith.mulf %527, %526 : vector<8x128xf32>
    %529 = math.tanh %528 : vector<8x128xf32>
    %cst_272 = arith.constant 1.000000e+00 : f32
    %530 = vector.broadcast %cst_272 : f32 to vector<8x128xf32>
    %531 = arith.addf %529, %530 : vector<8x128xf32>
    %cst_273 = arith.constant 5.000000e-01 : f32
    %532 = vector.broadcast %cst_273 : f32 to vector<8x128xf32>
    %533 = arith.mulf %532, %531 : vector<8x128xf32>
    %534 = vector.extract_strided_slice %513 {offsets = [0, 256], sizes = [8, 128], strides = [1, 1]} : vector<8x512xf32> to vector<8x128xf32>
    %535 = math.tanh %534 : vector<8x128xf32>
    %536 = vector.extract_strided_slice %513 {offsets = [0, 384], sizes = [8, 128], strides = [1, 1]} : vector<8x512xf32> to vector<8x128xf32>
    %cst_274 = arith.constant 5.000000e-01 : f32
    %537 = vector.broadcast %cst_274 : f32 to vector<8x128xf32>
    %538 = arith.mulf %537, %536 : vector<8x128xf32>
    %539 = math.tanh %538 : vector<8x128xf32>
    %cst_275 = arith.constant 1.000000e+00 : f32
    %540 = vector.broadcast %cst_275 : f32 to vector<8x128xf32>
    %541 = arith.addf %539, %540 : vector<8x128xf32>
    %cst_276 = arith.constant 5.000000e-01 : f32
    %542 = vector.broadcast %cst_276 : f32 to vector<8x128xf32>
    %543 = arith.mulf %542, %541 : vector<8x128xf32>
    %544 = arith.mulf %533, %464 : vector<8x128xf32>
    %545 = arith.mulf %525, %535 : vector<8x128xf32>
    %546 = arith.addf %544, %545 : vector<8x128xf32>
    %547 = math.tanh %546 : vector<8x128xf32>
    %548 = arith.mulf %543, %547 : vector<8x128xf32>
    %549 = vector.extract_strided_slice %517 {offsets = [0, 0], sizes = [8, 128], strides = [1, 1]} : vector<8x512xf32> to vector<8x128xf32>
    %cst_277 = arith.constant 5.000000e-01 : f32
    %550 = vector.broadcast %cst_277 : f32 to vector<8x128xf32>
    %551 = arith.mulf %550, %549 : vector<8x128xf32>
    %552 = math.tanh %551 : vector<8x128xf32>
    %cst_278 = arith.constant 1.000000e+00 : f32
    %553 = vector.broadcast %cst_278 : f32 to vector<8x128xf32>
    %554 = arith.addf %552, %553 : vector<8x128xf32>
    %cst_279 = arith.constant 5.000000e-01 : f32
    %555 = vector.broadcast %cst_279 : f32 to vector<8x128xf32>
    %556 = arith.mulf %555, %554 : vector<8x128xf32>
    %557 = vector.extract_strided_slice %517 {offsets = [0, 128], sizes = [8, 128], strides = [1, 1]} : vector<8x512xf32> to vector<8x128xf32>
    %cst_280 = arith.constant 5.000000e-01 : f32
    %558 = vector.broadcast %cst_280 : f32 to vector<8x128xf32>
    %559 = arith.mulf %558, %557 : vector<8x128xf32>
    %560 = math.tanh %559 : vector<8x128xf32>
    %cst_281 = arith.constant 1.000000e+00 : f32
    %561 = vector.broadcast %cst_281 : f32 to vector<8x128xf32>
    %562 = arith.addf %560, %561 : vector<8x128xf32>
    %cst_282 = arith.constant 5.000000e-01 : f32
    %563 = vector.broadcast %cst_282 : f32 to vector<8x128xf32>
    %564 = arith.mulf %563, %562 : vector<8x128xf32>
    %565 = vector.extract_strided_slice %517 {offsets = [0, 256], sizes = [8, 128], strides = [1, 1]} : vector<8x512xf32> to vector<8x128xf32>
    %566 = math.tanh %565 : vector<8x128xf32>
    %567 = vector.extract_strided_slice %517 {offsets = [0, 384], sizes = [8, 128], strides = [1, 1]} : vector<8x512xf32> to vector<8x128xf32>
    %cst_283 = arith.constant 5.000000e-01 : f32
    %568 = vector.broadcast %cst_283 : f32 to vector<8x128xf32>
    %569 = arith.mulf %568, %567 : vector<8x128xf32>
    %570 = math.tanh %569 : vector<8x128xf32>
    %cst_284 = arith.constant 1.000000e+00 : f32
    %571 = vector.broadcast %cst_284 : f32 to vector<8x128xf32>
    %572 = arith.addf %570, %571 : vector<8x128xf32>
    %cst_285 = arith.constant 5.000000e-01 : f32
    %573 = vector.broadcast %cst_285 : f32 to vector<8x128xf32>
    %574 = arith.mulf %573, %572 : vector<8x128xf32>
    %575 = arith.mulf %564, %495 : vector<8x128xf32>
    %576 = arith.mulf %556, %566 : vector<8x128xf32>
    %577 = arith.addf %575, %576 : vector<8x128xf32>
    %578 = math.tanh %577 : vector<8x128xf32>
    %579 = arith.mulf %574, %578 : vector<8x128xf32>
    %580 = arith.truncf %548 : vector<8x128xf32> to vector<8x128xbf16>
    %581 = arith.truncf %579 : vector<8x128xf32> to vector<8x128xbf16>
    %c48_286 = arith.constant 48 : index
    %c0_287 = arith.constant 0 : index
    %582 = vector.load %arg13[%c48_286, %c0_287] : memref<64x512xf32, #tpu.memory_space<vmem>>, vector<8x512xf32>
    %c0_288 = arith.constant 0 : index
    %c0_289 = arith.constant 0 : index
    %583 = vector.load %arg6[%c0_288, %c0_289] : memref<256x512xbf16, #tpu.memory_space<vmem>>, vector<128x512xbf16>
    %cst_290 = arith.constant dense<0.000000e+00> : vector<8x512xf32>
    %584 = tpu.matmul %580, %583, %cst_290 {dimension_numbers = #tpu.dot_dimension_numbers<[1], [0], [0], [1], [0, 0, 1, 1], [], []>} : vector<8x128xbf16>, vector<128x512xbf16>, vector<8x512xf32> -> vector<8x512xf32>
    %585 = arith.addf %582, %584 : vector<8x512xf32>
    %c48_291 = arith.constant 48 : index
    %c0_292 = arith.constant 0 : index
    %586 = vector.load %arg13[%c48_291, %c0_292] : memref<64x512xf32, #tpu.memory_space<vmem>>, vector<8x512xf32>
    tpu.vector_store %arg13[%c48_291, %c0_292], %585 {strides = array<i32>} : memref<64x512xf32, #tpu.memory_space<vmem>>, vector<8x512xf32>,
    %c8_293 = arith.constant 8 : index
    %c0_294 = arith.constant 0 : index
    %587 = vector.load %arg13[%c8_293, %c0_294] : memref<64x512xf32, #tpu.memory_space<vmem>>, vector<8x512xf32>
    %c128_295 = arith.constant 128 : index
    %c0_296 = arith.constant 0 : index
    %588 = vector.load %arg6[%c128_295, %c0_296] : memref<256x512xbf16, #tpu.memory_space<vmem>>, vector<128x512xbf16>
    %cst_297 = arith.constant dense<0.000000e+00> : vector<8x512xf32>
    %589 = tpu.matmul %581, %588, %cst_297 {dimension_numbers = #tpu.dot_dimension_numbers<[1], [0], [0], [1], [0, 0, 1, 1], [], []>} : vector<8x128xbf16>, vector<128x512xbf16>, vector<8x512xf32> -> vector<8x512xf32>
    %590 = arith.addf %587, %589 : vector<8x512xf32>
    %c8_298 = arith.constant 8 : index
    %c0_299 = arith.constant 0 : index
    %591 = vector.load %arg13[%c8_298, %c0_299] : memref<64x512xf32, #tpu.memory_space<vmem>>, vector<8x512xf32>
    tpu.vector_store %arg13[%c8_298, %c0_299], %590 {strides = array<i32>} : memref<64x512xf32, #tpu.memory_space<vmem>>, vector<8x512xf32>,
    %c56_300 = arith.constant 56 : index
    %c0_301 = arith.constant 0 : index
    %592 = vector.load %arg12[%c56_300, %c0_301] : memref<64x1024xf32, #tpu.memory_space<vmem>>, vector<8x512xf32>
    %c0_302 = arith.constant 0 : index
    %c0_303 = arith.constant 0 : index
    %593 = vector.load %arg4[%c0_302, %c0_303] : memref<128x512xbf16, #tpu.memory_space<vmem>>, vector<128x512xbf16>
    %cst_304 = arith.constant dense<0.000000e+00> : vector<8x512xf32>
    %594 = tpu.matmul %580, %593, %cst_304 {dimension_numbers = #tpu.dot_dimension_numbers<[1], [0], [0], [1], [0, 0, 1, 1], [], []>} : vector<8x128xbf16>, vector<128x512xbf16>, vector<8x512xf32> -> vector<8x512xf32>
    %595 = arith.addf %592, %594 : vector<8x512xf32>
    %c0_305 = arith.constant 0 : index
    %c512_306 = arith.constant 512 : index
    %596 = vector.load %arg12[%c0_305, %c512_306] : memref<64x1024xf32, #tpu.memory_space<vmem>>, vector<8x512xf32>
    %c0_307 = arith.constant 0 : index
    %c0_308 = arith.constant 0 : index
    %597 = vector.load %arg5[%c0_307, %c0_308] : memref<128x512xbf16, #tpu.memory_space<vmem>>, vector<128x512xbf16>
    %cst_309 = arith.constant dense<0.000000e+00> : vector<8x512xf32>
    %598 = tpu.matmul %581, %597, %cst_309 {dimension_numbers = #tpu.dot_dimension_numbers<[1], [0], [0], [1], [0, 0, 1, 1], [], []>} : vector<8x128xbf16>, vector<128x512xbf16>, vector<8x512xf32> -> vector<8x512xf32>
    %599 = arith.addf %596, %598 : vector<8x512xf32>
    %600 = vector.extract_strided_slice %595 {offsets = [0, 0], sizes = [8, 128], strides = [1, 1]} : vector<8x512xf32> to vector<8x128xf32>
    %cst_310 = arith.constant 5.000000e-01 : f32
    %601 = vector.broadcast %cst_310 : f32 to vector<8x128xf32>
    %602 = arith.mulf %601, %600 : vector<8x128xf32>
    %603 = math.tanh %602 : vector<8x128xf32>
    %cst_311 = arith.constant 1.000000e+00 : f32
    %604 = vector.broadcast %cst_311 : f32 to vector<8x128xf32>
    %605 = arith.addf %603, %604 : vector<8x128xf32>
    %cst_312 = arith.constant 5.000000e-01 : f32
    %606 = vector.broadcast %cst_312 : f32 to vector<8x128xf32>
    %607 = arith.mulf %606, %605 : vector<8x128xf32>
    %608 = vector.extract_strided_slice %595 {offsets = [0, 128], sizes = [8, 128], strides = [1, 1]} : vector<8x512xf32> to vector<8x128xf32>
    %cst_313 = arith.constant 5.000000e-01 : f32
    %609 = vector.broadcast %cst_313 : f32 to vector<8x128xf32>
    %610 = arith.mulf %609, %608 : vector<8x128xf32>
    %611 = math.tanh %610 : vector<8x128xf32>
    %cst_314 = arith.constant 1.000000e+00 : f32
    %612 = vector.broadcast %cst_314 : f32 to vector<8x128xf32>
    %613 = arith.addf %611, %612 : vector<8x128xf32>
    %cst_315 = arith.constant 5.000000e-01 : f32
    %614 = vector.broadcast %cst_315 : f32 to vector<8x128xf32>
    %615 = arith.mulf %614, %613 : vector<8x128xf32>
    %616 = vector.extract_strided_slice %595 {offsets = [0, 256], sizes = [8, 128], strides = [1, 1]} : vector<8x512xf32> to vector<8x128xf32>
    %617 = math.tanh %616 : vector<8x128xf32>
    %618 = vector.extract_strided_slice %595 {offsets = [0, 384], sizes = [8, 128], strides = [1, 1]} : vector<8x512xf32> to vector<8x128xf32>
    %cst_316 = arith.constant 5.000000e-01 : f32
    %619 = vector.broadcast %cst_316 : f32 to vector<8x128xf32>
    %620 = arith.mulf %619, %618 : vector<8x128xf32>
    %621 = math.tanh %620 : vector<8x128xf32>
    %cst_317 = arith.constant 1.000000e+00 : f32
    %622 = vector.broadcast %cst_317 : f32 to vector<8x128xf32>
    %623 = arith.addf %621, %622 : vector<8x128xf32>
    %cst_318 = arith.constant 5.000000e-01 : f32
    %624 = vector.broadcast %cst_318 : f32 to vector<8x128xf32>
    %625 = arith.mulf %624, %623 : vector<8x128xf32>
    %626 = arith.mulf %615, %546 : vector<8x128xf32>
    %627 = arith.mulf %607, %617 : vector<8x128xf32>
    %628 = arith.addf %626, %627 : vector<8x128xf32>
    %629 = math.tanh %628 : vector<8x128xf32>
    %630 = arith.mulf %625, %629 : vector<8x128xf32>
    %631 = vector.extract_strided_slice %599 {offsets = [0, 0], sizes = [8, 128], strides = [1, 1]} : vector<8x512xf32> to vector<8x128xf32>
    %cst_319 = arith.constant 5.000000e-01 : f32
    %632 = vector.broadcast %cst_319 : f32 to vector<8x128xf32>
    %633 = arith.mulf %632, %631 : vector<8x128xf32>
    %634 = math.tanh %633 : vector<8x128xf32>
    %cst_320 = arith.constant 1.000000e+00 : f32
    %635 = vector.broadcast %cst_320 : f32 to vector<8x128xf32>
    %636 = arith.addf %634, %635 : vector<8x128xf32>
    %cst_321 = arith.constant 5.000000e-01 : f32
    %637 = vector.broadcast %cst_321 : f32 to vector<8x128xf32>
    %638 = arith.mulf %637, %636 : vector<8x128xf32>
    %639 = vector.extract_strided_slice %599 {offsets = [0, 128], sizes = [8, 128], strides = [1, 1]} : vector<8x512xf32> to vector<8x128xf32>
    %cst_322 = arith.constant 5.000000e-01 : f32
    %640 = vector.broadcast %cst_322 : f32 to vector<8x128xf32>
    %641 = arith.mulf %640, %639 : vector<8x128xf32>
    %642 = math.tanh %641 : vector<8x128xf32>
    %cst_323 = arith.constant 1.000000e+00 : f32
    %643 = vector.broadcast %cst_323 : f32 to vector<8x128xf32>
    %644 = arith.addf %642, %643 : vector<8x128xf32>
    %cst_324 = arith.constant 5.000000e-01 : f32
    %645 = vector.broadcast %cst_324 : f32 to vector<8x128xf32>
    %646 = arith.mulf %645, %644 : vector<8x128xf32>
    %647 = vector.extract_strided_slice %599 {offsets = [0, 256], sizes = [8, 128], strides = [1, 1]} : vector<8x512xf32> to vector<8x128xf32>
    %648 = math.tanh %647 : vector<8x128xf32>
    %649 = vector.extract_strided_slice %599 {offsets = [0, 384], sizes = [8, 128], strides = [1, 1]} : vector<8x512xf32> to vector<8x128xf32>
    %cst_325 = arith.constant 5.000000e-01 : f32
    %650 = vector.broadcast %cst_325 : f32 to vector<8x128xf32>
    %651 = arith.mulf %650, %649 : vector<8x128xf32>
    %652 = math.tanh %651 : vector<8x128xf32>
    %cst_326 = arith.constant 1.000000e+00 : f32
    %653 = vector.broadcast %cst_326 : f32 to vector<8x128xf32>
    %654 = arith.addf %652, %653 : vector<8x128xf32>
    %cst_327 = arith.constant 5.000000e-01 : f32
    %655 = vector.broadcast %cst_327 : f32 to vector<8x128xf32>
    %656 = arith.mulf %655, %654 : vector<8x128xf32>
    %657 = arith.mulf %646, %577 : vector<8x128xf32>
    %658 = arith.mulf %638, %648 : vector<8x128xf32>
    %659 = arith.addf %657, %658 : vector<8x128xf32>
    %660 = math.tanh %659 : vector<8x128xf32>
    %661 = arith.mulf %656, %660 : vector<8x128xf32>
    %662 = arith.truncf %630 : vector<8x128xf32> to vector<8x128xbf16>
    %663 = arith.truncf %661 : vector<8x128xf32> to vector<8x128xbf16>
    %c56_328 = arith.constant 56 : index
    %c0_329 = arith.constant 0 : index
    %664 = vector.load %arg13[%c56_328, %c0_329] : memref<64x512xf32, #tpu.memory_space<vmem>>, vector<8x512xf32>
    %c0_330 = arith.constant 0 : index
    %c0_331 = arith.constant 0 : index
    %665 = vector.load %arg6[%c0_330, %c0_331] : memref<256x512xbf16, #tpu.memory_space<vmem>>, vector<128x512xbf16>
    %cst_332 = arith.constant dense<0.000000e+00> : vector<8x512xf32>
    %666 = tpu.matmul %662, %665, %cst_332 {dimension_numbers = #tpu.dot_dimension_numbers<[1], [0], [0], [1], [0, 0, 1, 1], [], []>} : vector<8x128xbf16>, vector<128x512xbf16>, vector<8x512xf32> -> vector<8x512xf32>
    %667 = arith.addf %664, %666 : vector<8x512xf32>
    %c56_333 = arith.constant 56 : index
    %c0_334 = arith.constant 0 : index
    %668 = vector.load %arg13[%c56_333, %c0_334] : memref<64x512xf32, #tpu.memory_space<vmem>>, vector<8x512xf32>
    tpu.vector_store %arg13[%c56_333, %c0_334], %667 {strides = array<i32>} : memref<64x512xf32, #tpu.memory_space<vmem>>, vector<8x512xf32>,
    %c0_335 = arith.constant 0 : index
    %c0_336 = arith.constant 0 : index
    %669 = vector.load %arg13[%c0_335, %c0_336] : memref<64x512xf32, #tpu.memory_space<vmem>>, vector<8x512xf32>
    %c128_337 = arith.constant 128 : index
    %c0_338 = arith.constant 0 : index
    %670 = vector.load %arg6[%c128_337, %c0_338] : memref<256x512xbf16, #tpu.memory_space<vmem>>, vector<128x512xbf16>
    %cst_339 = arith.constant dense<0.000000e+00> : vector<8x512xf32>
    %671 = tpu.matmul %663, %670, %cst_339 {dimension_numbers = #tpu.dot_dimension_numbers<[1], [0], [0], [1], [0, 0, 1, 1], [], []>} : vector<8x128xbf16>, vector<128x512xbf16>, vector<8x512xf32> -> vector<8x512xf32>
    %672 = arith.addf %669, %671 : vector<8x512xf32>
    %c0_340 = arith.constant 0 : index
    %c0_341 = arith.constant 0 : index
    %673 = vector.load %arg13[%c0_340, %c0_341] : memref<64x512xf32, #tpu.memory_space<vmem>>, vector<8x512xf32>
    tpu.vector_store %arg13[%c0_340, %c0_341], %672 {strides = array<i32>} : memref<64x512xf32, #tpu.memory_space<vmem>>, vector<8x512xf32>,
    %cst_342 = arith.constant 0.000000e+00 : f32
    %674 = vector.broadcast %cst_342 : f32 to vector<8x128xf32>
    %cst_343 = arith.constant 0.000000e+00 : f32
    %675 = vector.broadcast %cst_343 : f32 to vector<8x128xf32>
    %676 = arith.truncf %674 : vector<8x128xf32> to vector<8x128xbf16>
    %c0_344 = arith.constant 0 : index
    %c0_345 = arith.constant 0 : index
    %677 = vector.load %arg13[%c0_344, %c0_345] : memref<64x512xf32, #tpu.memory_space<vmem>>, vector<8x512xf32>
    %c0_346 = arith.constant 0 : index
    %c0_347 = arith.constant 0 : index
    %678 = vector.load %arg8[%c0_346, %c0_347] : memref<128x512xbf16, #tpu.memory_space<vmem>>, vector<128x512xbf16>
    %cst_348 = arith.constant dense<0.000000e+00> : vector<8x512xf32>
    %679 = tpu.matmul %676, %678, %cst_348 {dimension_numbers = #tpu.dot_dimension_numbers<[1], [0], [0], [1], [0, 0, 1, 1], [], []>} : vector<8x128xbf16>, vector<128x512xbf16>, vector<8x512xf32> -> vector<8x512xf32>
    %680 = arith.addf %677, %679 : vector<8x512xf32>
    %681 = vector.extract_strided_slice %680 {offsets = [0, 0], sizes = [8, 128], strides = [1, 1]} : vector<8x512xf32> to vector<8x128xf32>
    %cst_349 = arith.constant 5.000000e-01 : f32
    %682 = vector.broadcast %cst_349 : f32 to vector<8x128xf32>
    %683 = arith.mulf %682, %681 : vector<8x128xf32>
    %684 = math.tanh %683 : vector<8x128xf32>
    %cst_350 = arith.constant 1.000000e+00 : f32
    %685 = vector.broadcast %cst_350 : f32 to vector<8x128xf32>
    %686 = arith.addf %684, %685 : vector<8x128xf32>
    %cst_351 = arith.constant 5.000000e-01 : f32
    %687 = vector.broadcast %cst_351 : f32 to vector<8x128xf32>
    %688 = arith.mulf %687, %686 : vector<8x128xf32>
    %689 = vector.extract_strided_slice %680 {offsets = [0, 128], sizes = [8, 128], strides = [1, 1]} : vector<8x512xf32> to vector<8x128xf32>
    %cst_352 = arith.constant 5.000000e-01 : f32
    %690 = vector.broadcast %cst_352 : f32 to vector<8x128xf32>
    %691 = arith.mulf %690, %689 : vector<8x128xf32>
    %692 = math.tanh %691 : vector<8x128xf32>
    %cst_353 = arith.constant 1.000000e+00 : f32
    %693 = vector.broadcast %cst_353 : f32 to vector<8x128xf32>
    %694 = arith.addf %692, %693 : vector<8x128xf32>
    %cst_354 = arith.constant 5.000000e-01 : f32
    %695 = vector.broadcast %cst_354 : f32 to vector<8x128xf32>
    %696 = arith.mulf %695, %694 : vector<8x128xf32>
    %697 = vector.extract_strided_slice %680 {offsets = [0, 256], sizes = [8, 128], strides = [1, 1]} : vector<8x512xf32> to vector<8x128xf32>
    %698 = math.tanh %697 : vector<8x128xf32>
    %699 = vector.extract_strided_slice %680 {offsets = [0, 384], sizes = [8, 128], strides = [1, 1]} : vector<8x512xf32> to vector<8x128xf32>
    %cst_355 = arith.constant 5.000000e-01 : f32
    %700 = vector.broadcast %cst_355 : f32 to vector<8x128xf32>
    %701 = arith.mulf %700, %699 : vector<8x128xf32>
    %702 = math.tanh %701 : vector<8x128xf32>
    %cst_356 = arith.constant 1.000000e+00 : f32
    %703 = vector.broadcast %cst_356 : f32 to vector<8x128xf32>
    %704 = arith.addf %702, %703 : vector<8x128xf32>
    %cst_357 = arith.constant 5.000000e-01 : f32
    %705 = vector.broadcast %cst_357 : f32 to vector<8x128xf32>
    %706 = arith.mulf %705, %704 : vector<8x128xf32>
    %707 = arith.mulf %696, %675 : vector<8x128xf32>
    %708 = arith.mulf %688, %698 : vector<8x128xf32>
    %709 = arith.addf %707, %708 : vector<8x128xf32>
    %710 = math.tanh %709 : vector<8x128xf32>
    %711 = arith.mulf %706, %710 : vector<8x128xf32>
    %712 = arith.truncf %711 : vector<8x128xf32> to vector<8x128xbf16>
    %c8_358 = arith.constant 8 : index
    %c0_359 = arith.constant 0 : index
    %713 = vector.load %arg13[%c8_358, %c0_359] : memref<64x512xf32, #tpu.memory_space<vmem>>, vector<8x512xf32>
    %c0_360 = arith.constant 0 : index
    %c0_361 = arith.constant 0 : index
    %714 = vector.load %arg8[%c0_360, %c0_361] : memref<128x512xbf16, #tpu.memory_space<vmem>>, vector<128x512xbf16>
    %cst_362 = arith.constant dense<0.000000e+00> : vector<8x512xf32>
    %715 = tpu.matmul %712, %714, %cst_362 {dimension_numbers = #tpu.dot_dimension_numbers<[1], [0], [0], [1], [0, 0, 1, 1], [], []>} : vector<8x128xbf16>, vector<128x512xbf16>, vector<8x512xf32> -> vector<8x512xf32>
    %716 = arith.addf %713, %715 : vector<8x512xf32>
    %717 = vector.extract_strided_slice %716 {offsets = [0, 0], sizes = [8, 128], strides = [1, 1]} : vector<8x512xf32> to vector<8x128xf32>
    %cst_363 = arith.constant 5.000000e-01 : f32
    %718 = vector.broadcast %cst_363 : f32 to vector<8x128xf32>
    %719 = arith.mulf %718, %717 : vector<8x128xf32>
    %720 = math.tanh %719 : vector<8x128xf32>
    %cst_364 = arith.constant 1.000000e+00 : f32
    %721 = vector.broadcast %cst_364 : f32 to vector<8x128xf32>
    %722 = arith.addf %720, %721 : vector<8x128xf32>
    %cst_365 = arith.constant 5.000000e-01 : f32
    %723 = vector.broadcast %cst_365 : f32 to vector<8x128xf32>
    %724 = arith.mulf %723, %722 : vector<8x128xf32>
    %725 = vector.extract_strided_slice %716 {offsets = [0, 128], sizes = [8, 128], strides = [1, 1]} : vector<8x512xf32> to vector<8x128xf32>
    %cst_366 = arith.constant 5.000000e-01 : f32
    %726 = vector.broadcast %cst_366 : f32 to vector<8x128xf32>
    %727 = arith.mulf %726, %725 : vector<8x128xf32>
    %728 = math.tanh %727 : vector<8x128xf32>
    %cst_367 = arith.constant 1.000000e+00 : f32
    %729 = vector.broadcast %cst_367 : f32 to vector<8x128xf32>
    %730 = arith.addf %728, %729 : vector<8x128xf32>
    %cst_368 = arith.constant 5.000000e-01 : f32
    %731 = vector.broadcast %cst_368 : f32 to vector<8x128xf32>
    %732 = arith.mulf %731, %730 : vector<8x128xf32>
    %733 = vector.extract_strided_slice %716 {offsets = [0, 256], sizes = [8, 128], strides = [1, 1]} : vector<8x512xf32> to vector<8x128xf32>
    %734 = math.tanh %733 : vector<8x128xf32>
    %735 = vector.extract_strided_slice %716 {offsets = [0, 384], sizes = [8, 128], strides = [1, 1]} : vector<8x512xf32> to vector<8x128xf32>
    %cst_369 = arith.constant 5.000000e-01 : f32
    %736 = vector.broadcast %cst_369 : f32 to vector<8x128xf32>
    %737 = arith.mulf %736, %735 : vector<8x128xf32>
    %738 = math.tanh %737 : vector<8x128xf32>
    %cst_370 = arith.constant 1.000000e+00 : f32
    %739 = vector.broadcast %cst_370 : f32 to vector<8x128xf32>
    %740 = arith.addf %738, %739 : vector<8x128xf32>
    %cst_371 = arith.constant 5.000000e-01 : f32
    %741 = vector.broadcast %cst_371 : f32 to vector<8x128xf32>
    %742 = arith.mulf %741, %740 : vector<8x128xf32>
    %743 = arith.mulf %732, %709 : vector<8x128xf32>
    %744 = arith.mulf %724, %734 : vector<8x128xf32>
    %745 = arith.addf %743, %744 : vector<8x128xf32>
    %746 = math.tanh %745 : vector<8x128xf32>
    %747 = arith.mulf %742, %746 : vector<8x128xf32>
    %748 = arith.truncf %747 : vector<8x128xf32> to vector<8x128xbf16>
    %c16_372 = arith.constant 16 : index
    %c0_373 = arith.constant 0 : index
    %749 = vector.load %arg13[%c16_372, %c0_373] : memref<64x512xf32, #tpu.memory_space<vmem>>, vector<8x512xf32>
    %c0_374 = arith.constant 0 : index
    %c0_375 = arith.constant 0 : index
    %750 = vector.load %arg8[%c0_374, %c0_375] : memref<128x512xbf16, #tpu.memory_space<vmem>>, vector<128x512xbf16>
    %cst_376 = arith.constant dense<0.000000e+00> : vector<8x512xf32>
    %751 = tpu.matmul %748, %750, %cst_376 {dimension_numbers = #tpu.dot_dimension_numbers<[1], [0], [0], [1], [0, 0, 1, 1], [], []>} : vector<8x128xbf16>, vector<128x512xbf16>, vector<8x512xf32> -> vector<8x512xf32>
    %752 = arith.addf %749, %751 : vector<8x512xf32>
    %753 = vector.extract_strided_slice %752 {offsets = [0, 0], sizes = [8, 128], strides = [1, 1]} : vector<8x512xf32> to vector<8x128xf32>
    %cst_377 = arith.constant 5.000000e-01 : f32
    %754 = vector.broadcast %cst_377 : f32 to vector<8x128xf32>
    %755 = arith.mulf %754, %753 : vector<8x128xf32>
    %756 = math.tanh %755 : vector<8x128xf32>
    %cst_378 = arith.constant 1.000000e+00 : f32
    %757 = vector.broadcast %cst_378 : f32 to vector<8x128xf32>
    %758 = arith.addf %756, %757 : vector<8x128xf32>
    %cst_379 = arith.constant 5.000000e-01 : f32
    %759 = vector.broadcast %cst_379 : f32 to vector<8x128xf32>
    %760 = arith.mulf %759, %758 : vector<8x128xf32>
    %761 = vector.extract_strided_slice %752 {offsets = [0, 128], sizes = [8, 128], strides = [1, 1]} : vector<8x512xf32> to vector<8x128xf32>
    %cst_380 = arith.constant 5.000000e-01 : f32
    %762 = vector.broadcast %cst_380 : f32 to vector<8x128xf32>
    %763 = arith.mulf %762, %761 : vector<8x128xf32>
    %764 = math.tanh %763 : vector<8x128xf32>
    %cst_381 = arith.constant 1.000000e+00 : f32
    %765 = vector.broadcast %cst_381 : f32 to vector<8x128xf32>
    %766 = arith.addf %764, %765 : vector<8x128xf32>
    %cst_382 = arith.constant 5.000000e-01 : f32
    %767 = vector.broadcast %cst_382 : f32 to vector<8x128xf32>
    %768 = arith.mulf %767, %766 : vector<8x128xf32>
    %769 = vector.extract_strided_slice %752 {offsets = [0, 256], sizes = [8, 128], strides = [1, 1]} : vector<8x512xf32> to vector<8x128xf32>
    %770 = math.tanh %769 : vector<8x128xf32>
    %771 = vector.extract_strided_slice %752 {offsets = [0, 384], sizes = [8, 128], strides = [1, 1]} : vector<8x512xf32> to vector<8x128xf32>
    %cst_383 = arith.constant 5.000000e-01 : f32
    %772 = vector.broadcast %cst_383 : f32 to vector<8x128xf32>
    %773 = arith.mulf %772, %771 : vector<8x128xf32>
    %774 = math.tanh %773 : vector<8x128xf32>
    %cst_384 = arith.constant 1.000000e+00 : f32
    %775 = vector.broadcast %cst_384 : f32 to vector<8x128xf32>
    %776 = arith.addf %774, %775 : vector<8x128xf32>
    %cst_385 = arith.constant 5.000000e-01 : f32
    %777 = vector.broadcast %cst_385 : f32 to vector<8x128xf32>
    %778 = arith.mulf %777, %776 : vector<8x128xf32>
    %779 = arith.mulf %768, %745 : vector<8x128xf32>
    %780 = arith.mulf %760, %770 : vector<8x128xf32>
    %781 = arith.addf %779, %780 : vector<8x128xf32>
    %782 = math.tanh %781 : vector<8x128xf32>
    %783 = arith.mulf %778, %782 : vector<8x128xf32>
    %784 = arith.truncf %783 : vector<8x128xf32> to vector<8x128xbf16>
    %c24_386 = arith.constant 24 : index
    %c0_387 = arith.constant 0 : index
    %785 = vector.load %arg13[%c24_386, %c0_387] : memref<64x512xf32, #tpu.memory_space<vmem>>, vector<8x512xf32>
    %c0_388 = arith.constant 0 : index
    %c0_389 = arith.constant 0 : index
    %786 = vector.load %arg8[%c0_388, %c0_389] : memref<128x512xbf16, #tpu.memory_space<vmem>>, vector<128x512xbf16>
    %cst_390 = arith.constant dense<0.000000e+00> : vector<8x512xf32>
    %787 = tpu.matmul %784, %786, %cst_390 {dimension_numbers = #tpu.dot_dimension_numbers<[1], [0], [0], [1], [0, 0, 1, 1], [], []>} : vector<8x128xbf16>, vector<128x512xbf16>, vector<8x512xf32> -> vector<8x512xf32>
    %788 = arith.addf %785, %787 : vector<8x512xf32>
    %789 = vector.extract_strided_slice %788 {offsets = [0, 0], sizes = [8, 128], strides = [1, 1]} : vector<8x512xf32> to vector<8x128xf32>
    %cst_391 = arith.constant 5.000000e-01 : f32
    %790 = vector.broadcast %cst_391 : f32 to vector<8x128xf32>
    %791 = arith.mulf %790, %789 : vector<8x128xf32>
    %792 = math.tanh %791 : vector<8x128xf32>
    %cst_392 = arith.constant 1.000000e+00 : f32
    %793 = vector.broadcast %cst_392 : f32 to vector<8x128xf32>
    %794 = arith.addf %792, %793 : vector<8x128xf32>
    %cst_393 = arith.constant 5.000000e-01 : f32
    %795 = vector.broadcast %cst_393 : f32 to vector<8x128xf32>
    %796 = arith.mulf %795, %794 : vector<8x128xf32>
    %797 = vector.extract_strided_slice %788 {offsets = [0, 128], sizes = [8, 128], strides = [1, 1]} : vector<8x512xf32> to vector<8x128xf32>
    %cst_394 = arith.constant 5.000000e-01 : f32
    %798 = vector.broadcast %cst_394 : f32 to vector<8x128xf32>
    %799 = arith.mulf %798, %797 : vector<8x128xf32>
    %800 = math.tanh %799 : vector<8x128xf32>
    %cst_395 = arith.constant 1.000000e+00 : f32
    %801 = vector.broadcast %cst_395 : f32 to vector<8x128xf32>
    %802 = arith.addf %800, %801 : vector<8x128xf32>
    %cst_396 = arith.constant 5.000000e-01 : f32
    %803 = vector.broadcast %cst_396 : f32 to vector<8x128xf32>
    %804 = arith.mulf %803, %802 : vector<8x128xf32>
    %805 = vector.extract_strided_slice %788 {offsets = [0, 256], sizes = [8, 128], strides = [1, 1]} : vector<8x512xf32> to vector<8x128xf32>
    %806 = math.tanh %805 : vector<8x128xf32>
    %807 = vector.extract_strided_slice %788 {offsets = [0, 384], sizes = [8, 128], strides = [1, 1]} : vector<8x512xf32> to vector<8x128xf32>
    %cst_397 = arith.constant 5.000000e-01 : f32
    %808 = vector.broadcast %cst_397 : f32 to vector<8x128xf32>
    %809 = arith.mulf %808, %807 : vector<8x128xf32>
    %810 = math.tanh %809 : vector<8x128xf32>
    %cst_398 = arith.constant 1.000000e+00 : f32
    %811 = vector.broadcast %cst_398 : f32 to vector<8x128xf32>
    %812 = arith.addf %810, %811 : vector<8x128xf32>
    %cst_399 = arith.constant 5.000000e-01 : f32
    %813 = vector.broadcast %cst_399 : f32 to vector<8x128xf32>
    %814 = arith.mulf %813, %812 : vector<8x128xf32>
    %815 = arith.mulf %804, %781 : vector<8x128xf32>
    %816 = arith.mulf %796, %806 : vector<8x128xf32>
    %817 = arith.addf %815, %816 : vector<8x128xf32>
    %818 = math.tanh %817 : vector<8x128xf32>
    %819 = arith.mulf %814, %818 : vector<8x128xf32>
    %820 = arith.truncf %819 : vector<8x128xf32> to vector<8x128xbf16>
    %c32_400 = arith.constant 32 : index
    %c0_401 = arith.constant 0 : index
    %821 = vector.load %arg13[%c32_400, %c0_401] : memref<64x512xf32, #tpu.memory_space<vmem>>, vector<8x512xf32>
    %c0_402 = arith.constant 0 : index
    %c0_403 = arith.constant 0 : index
    %822 = vector.load %arg8[%c0_402, %c0_403] : memref<128x512xbf16, #tpu.memory_space<vmem>>, vector<128x512xbf16>
    %cst_404 = arith.constant dense<0.000000e+00> : vector<8x512xf32>
    %823 = tpu.matmul %820, %822, %cst_404 {dimension_numbers = #tpu.dot_dimension_numbers<[1], [0], [0], [1], [0, 0, 1, 1], [], []>} : vector<8x128xbf16>, vector<128x512xbf16>, vector<8x512xf32> -> vector<8x512xf32>
    %824 = arith.addf %821, %823 : vector<8x512xf32>
    %825 = vector.extract_strided_slice %824 {offsets = [0, 0], sizes = [8, 128], strides = [1, 1]} : vector<8x512xf32> to vector<8x128xf32>
    %cst_405 = arith.constant 5.000000e-01 : f32
    %826 = vector.broadcast %cst_405 : f32 to vector<8x128xf32>
    %827 = arith.mulf %826, %825 : vector<8x128xf32>
    %828 = math.tanh %827 : vector<8x128xf32>
    %cst_406 = arith.constant 1.000000e+00 : f32
    %829 = vector.broadcast %cst_406 : f32 to vector<8x128xf32>
    %830 = arith.addf %828, %829 : vector<8x128xf32>
    %cst_407 = arith.constant 5.000000e-01 : f32
    %831 = vector.broadcast %cst_407 : f32 to vector<8x128xf32>
    %832 = arith.mulf %831, %830 : vector<8x128xf32>
    %833 = vector.extract_strided_slice %824 {offsets = [0, 128], sizes = [8, 128], strides = [1, 1]} : vector<8x512xf32> to vector<8x128xf32>
    %cst_408 = arith.constant 5.000000e-01 : f32
    %834 = vector.broadcast %cst_408 : f32 to vector<8x128xf32>
    %835 = arith.mulf %834, %833 : vector<8x128xf32>
    %836 = math.tanh %835 : vector<8x128xf32>
    %cst_409 = arith.constant 1.000000e+00 : f32
    %837 = vector.broadcast %cst_409 : f32 to vector<8x128xf32>
    %838 = arith.addf %836, %837 : vector<8x128xf32>
    %cst_410 = arith.constant 5.000000e-01 : f32
    %839 = vector.broadcast %cst_410 : f32 to vector<8x128xf32>
    %840 = arith.mulf %839, %838 : vector<8x128xf32>
    %841 = vector.extract_strided_slice %824 {offsets = [0, 256], sizes = [8, 128], strides = [1, 1]} : vector<8x512xf32> to vector<8x128xf32>
    %842 = math.tanh %841 : vector<8x128xf32>
    %843 = vector.extract_strided_slice %824 {offsets = [0, 384], sizes = [8, 128], strides = [1, 1]} : vector<8x512xf32> to vector<8x128xf32>
    %cst_411 = arith.constant 5.000000e-01 : f32
    %844 = vector.broadcast %cst_411 : f32 to vector<8x128xf32>
    %845 = arith.mulf %844, %843 : vector<8x128xf32>
    %846 = math.tanh %845 : vector<8x128xf32>
    %cst_412 = arith.constant 1.000000e+00 : f32
    %847 = vector.broadcast %cst_412 : f32 to vector<8x128xf32>
    %848 = arith.addf %846, %847 : vector<8x128xf32>
    %cst_413 = arith.constant 5.000000e-01 : f32
    %849 = vector.broadcast %cst_413 : f32 to vector<8x128xf32>
    %850 = arith.mulf %849, %848 : vector<8x128xf32>
    %851 = arith.mulf %840, %817 : vector<8x128xf32>
    %852 = arith.mulf %832, %842 : vector<8x128xf32>
    %853 = arith.addf %851, %852 : vector<8x128xf32>
    %854 = math.tanh %853 : vector<8x128xf32>
    %855 = arith.mulf %850, %854 : vector<8x128xf32>
    %856 = arith.truncf %855 : vector<8x128xf32> to vector<8x128xbf16>
    %c40_414 = arith.constant 40 : index
    %c0_415 = arith.constant 0 : index
    %857 = vector.load %arg13[%c40_414, %c0_415] : memref<64x512xf32, #tpu.memory_space<vmem>>, vector<8x512xf32>
    %c0_416 = arith.constant 0 : index
    %c0_417 = arith.constant 0 : index
    %858 = vector.load %arg8[%c0_416, %c0_417] : memref<128x512xbf16, #tpu.memory_space<vmem>>, vector<128x512xbf16>
    %cst_418 = arith.constant dense<0.000000e+00> : vector<8x512xf32>
    %859 = tpu.matmul %856, %858, %cst_418 {dimension_numbers = #tpu.dot_dimension_numbers<[1], [0], [0], [1], [0, 0, 1, 1], [], []>} : vector<8x128xbf16>, vector<128x512xbf16>, vector<8x512xf32> -> vector<8x512xf32>
    %860 = arith.addf %857, %859 : vector<8x512xf32>
    %861 = vector.extract_strided_slice %860 {offsets = [0, 0], sizes = [8, 128], strides = [1, 1]} : vector<8x512xf32> to vector<8x128xf32>
    %cst_419 = arith.constant 5.000000e-01 : f32
    %862 = vector.broadcast %cst_419 : f32 to vector<8x128xf32>
    %863 = arith.mulf %862, %861 : vector<8x128xf32>
    %864 = math.tanh %863 : vector<8x128xf32>
    %cst_420 = arith.constant 1.000000e+00 : f32
    %865 = vector.broadcast %cst_420 : f32 to vector<8x128xf32>
    %866 = arith.addf %864, %865 : vector<8x128xf32>
    %cst_421 = arith.constant 5.000000e-01 : f32
    %867 = vector.broadcast %cst_421 : f32 to vector<8x128xf32>
    %868 = arith.mulf %867, %866 : vector<8x128xf32>
    %869 = vector.extract_strided_slice %860 {offsets = [0, 128], sizes = [8, 128], strides = [1, 1]} : vector<8x512xf32> to vector<8x128xf32>
    %cst_422 = arith.constant 5.000000e-01 : f32
    %870 = vector.broadcast %cst_422 : f32 to vector<8x128xf32>
    %871 = arith.mulf %870, %869 : vector<8x128xf32>
    %872 = math.tanh %871 : vector<8x128xf32>
    %cst_423 = arith.constant 1.000000e+00 : f32
    %873 = vector.broadcast %cst_423 : f32 to vector<8x128xf32>
    %874 = arith.addf %872, %873 : vector<8x128xf32>
    %cst_424 = arith.constant 5.000000e-01 : f32
    %875 = vector.broadcast %cst_424 : f32 to vector<8x128xf32>
    %876 = arith.mulf %875, %874 : vector<8x128xf32>
    %877 = vector.extract_strided_slice %860 {offsets = [0, 256], sizes = [8, 128], strides = [1, 1]} : vector<8x512xf32> to vector<8x128xf32>
    %878 = math.tanh %877 : vector<8x128xf32>
    %879 = vector.extract_strided_slice %860 {offsets = [0, 384], sizes = [8, 128], strides = [1, 1]} : vector<8x512xf32> to vector<8x128xf32>
    %cst_425 = arith.constant 5.000000e-01 : f32
    %880 = vector.broadcast %cst_425 : f32 to vector<8x128xf32>
    %881 = arith.mulf %880, %879 : vector<8x128xf32>
    %882 = math.tanh %881 : vector<8x128xf32>
    %cst_426 = arith.constant 1.000000e+00 : f32
    %883 = vector.broadcast %cst_426 : f32 to vector<8x128xf32>
    %884 = arith.addf %882, %883 : vector<8x128xf32>
    %cst_427 = arith.constant 5.000000e-01 : f32
    %885 = vector.broadcast %cst_427 : f32 to vector<8x128xf32>
    %886 = arith.mulf %885, %884 : vector<8x128xf32>
    %887 = arith.mulf %876, %853 : vector<8x128xf32>
    %888 = arith.mulf %868, %878 : vector<8x128xf32>
    %889 = arith.addf %887, %888 : vector<8x128xf32>
    %890 = math.tanh %889 : vector<8x128xf32>
    %891 = arith.mulf %886, %890 : vector<8x128xf32>
    %892 = arith.truncf %891 : vector<8x128xf32> to vector<8x128xbf16>
    %c48_428 = arith.constant 48 : index
    %c0_429 = arith.constant 0 : index
    %893 = vector.load %arg13[%c48_428, %c0_429] : memref<64x512xf32, #tpu.memory_space<vmem>>, vector<8x512xf32>
    %c0_430 = arith.constant 0 : index
    %c0_431 = arith.constant 0 : index
    %894 = vector.load %arg8[%c0_430, %c0_431] : memref<128x512xbf16, #tpu.memory_space<vmem>>, vector<128x512xbf16>
    %cst_432 = arith.constant dense<0.000000e+00> : vector<8x512xf32>
    %895 = tpu.matmul %892, %894, %cst_432 {dimension_numbers = #tpu.dot_dimension_numbers<[1], [0], [0], [1], [0, 0, 1, 1], [], []>} : vector<8x128xbf16>, vector<128x512xbf16>, vector<8x512xf32> -> vector<8x512xf32>
    %896 = arith.addf %893, %895 : vector<8x512xf32>
    %897 = vector.extract_strided_slice %896 {offsets = [0, 0], sizes = [8, 128], strides = [1, 1]} : vector<8x512xf32> to vector<8x128xf32>
    %cst_433 = arith.constant 5.000000e-01 : f32
    %898 = vector.broadcast %cst_433 : f32 to vector<8x128xf32>
    %899 = arith.mulf %898, %897 : vector<8x128xf32>
    %900 = math.tanh %899 : vector<8x128xf32>
    %cst_434 = arith.constant 1.000000e+00 : f32
    %901 = vector.broadcast %cst_434 : f32 to vector<8x128xf32>
    %902 = arith.addf %900, %901 : vector<8x128xf32>
    %cst_435 = arith.constant 5.000000e-01 : f32
    %903 = vector.broadcast %cst_435 : f32 to vector<8x128xf32>
    %904 = arith.mulf %903, %902 : vector<8x128xf32>
    %905 = vector.extract_strided_slice %896 {offsets = [0, 128], sizes = [8, 128], strides = [1, 1]} : vector<8x512xf32> to vector<8x128xf32>
    %cst_436 = arith.constant 5.000000e-01 : f32
    %906 = vector.broadcast %cst_436 : f32 to vector<8x128xf32>
    %907 = arith.mulf %906, %905 : vector<8x128xf32>
    %908 = math.tanh %907 : vector<8x128xf32>
    %cst_437 = arith.constant 1.000000e+00 : f32
    %909 = vector.broadcast %cst_437 : f32 to vector<8x128xf32>
    %910 = arith.addf %908, %909 : vector<8x128xf32>
    %cst_438 = arith.constant 5.000000e-01 : f32
    %911 = vector.broadcast %cst_438 : f32 to vector<8x128xf32>
    %912 = arith.mulf %911, %910 : vector<8x128xf32>
    %913 = vector.extract_strided_slice %896 {offsets = [0, 256], sizes = [8, 128], strides = [1, 1]} : vector<8x512xf32> to vector<8x128xf32>
    %914 = math.tanh %913 : vector<8x128xf32>
    %915 = vector.extract_strided_slice %896 {offsets = [0, 384], sizes = [8, 128], strides = [1, 1]} : vector<8x512xf32> to vector<8x128xf32>
    %cst_439 = arith.constant 5.000000e-01 : f32
    %916 = vector.broadcast %cst_439 : f32 to vector<8x128xf32>
    %917 = arith.mulf %916, %915 : vector<8x128xf32>
    %918 = math.tanh %917 : vector<8x128xf32>
    %cst_440 = arith.constant 1.000000e+00 : f32
    %919 = vector.broadcast %cst_440 : f32 to vector<8x128xf32>
    %920 = arith.addf %918, %919 : vector<8x128xf32>
    %cst_441 = arith.constant 5.000000e-01 : f32
    %921 = vector.broadcast %cst_441 : f32 to vector<8x128xf32>
    %922 = arith.mulf %921, %920 : vector<8x128xf32>
    %923 = arith.mulf %912, %889 : vector<8x128xf32>
    %924 = arith.mulf %904, %914 : vector<8x128xf32>
    %925 = arith.addf %923, %924 : vector<8x128xf32>
    %926 = math.tanh %925 : vector<8x128xf32>
    %927 = arith.mulf %922, %926 : vector<8x128xf32>
    %928 = arith.truncf %927 : vector<8x128xf32> to vector<8x128xbf16>
    %c56_442 = arith.constant 56 : index
    %c0_443 = arith.constant 0 : index
    %929 = vector.load %arg13[%c56_442, %c0_443] : memref<64x512xf32, #tpu.memory_space<vmem>>, vector<8x512xf32>
    %c0_444 = arith.constant 0 : index
    %c0_445 = arith.constant 0 : index
    %930 = vector.load %arg8[%c0_444, %c0_445] : memref<128x512xbf16, #tpu.memory_space<vmem>>, vector<128x512xbf16>
    %cst_446 = arith.constant dense<0.000000e+00> : vector<8x512xf32>
    %931 = tpu.matmul %928, %930, %cst_446 {dimension_numbers = #tpu.dot_dimension_numbers<[1], [0], [0], [1], [0, 0, 1, 1], [], []>} : vector<8x128xbf16>, vector<128x512xbf16>, vector<8x512xf32> -> vector<8x512xf32>
    %932 = arith.addf %929, %931 : vector<8x512xf32>
    %933 = vector.extract_strided_slice %932 {offsets = [0, 0], sizes = [8, 128], strides = [1, 1]} : vector<8x512xf32> to vector<8x128xf32>
    %cst_447 = arith.constant 5.000000e-01 : f32
    %934 = vector.broadcast %cst_447 : f32 to vector<8x128xf32>
    %935 = arith.mulf %934, %933 : vector<8x128xf32>
    %936 = math.tanh %935 : vector<8x128xf32>
    %cst_448 = arith.constant 1.000000e+00 : f32
    %937 = vector.broadcast %cst_448 : f32 to vector<8x128xf32>
    %938 = arith.addf %936, %937 : vector<8x128xf32>
    %cst_449 = arith.constant 5.000000e-01 : f32
    %939 = vector.broadcast %cst_449 : f32 to vector<8x128xf32>
    %940 = arith.mulf %939, %938 : vector<8x128xf32>
    %941 = vector.extract_strided_slice %932 {offsets = [0, 128], sizes = [8, 128], strides = [1, 1]} : vector<8x512xf32> to vector<8x128xf32>
    %cst_450 = arith.constant 5.000000e-01 : f32
    %942 = vector.broadcast %cst_450 : f32 to vector<8x128xf32>
    %943 = arith.mulf %942, %941 : vector<8x128xf32>
    %944 = math.tanh %943 : vector<8x128xf32>
    %cst_451 = arith.constant 1.000000e+00 : f32
    %945 = vector.broadcast %cst_451 : f32 to vector<8x128xf32>
    %946 = arith.addf %944, %945 : vector<8x128xf32>
    %cst_452 = arith.constant 5.000000e-01 : f32
    %947 = vector.broadcast %cst_452 : f32 to vector<8x128xf32>
    %948 = arith.mulf %947, %946 : vector<8x128xf32>
    %949 = vector.extract_strided_slice %932 {offsets = [0, 256], sizes = [8, 128], strides = [1, 1]} : vector<8x512xf32> to vector<8x128xf32>
    %950 = math.tanh %949 : vector<8x128xf32>
    %951 = vector.extract_strided_slice %932 {offsets = [0, 384], sizes = [8, 128], strides = [1, 1]} : vector<8x512xf32> to vector<8x128xf32>
    %cst_453 = arith.constant 5.000000e-01 : f32
    %952 = vector.broadcast %cst_453 : f32 to vector<8x128xf32>
    %953 = arith.mulf %952, %951 : vector<8x128xf32>
    %954 = math.tanh %953 : vector<8x128xf32>
    %cst_454 = arith.constant 1.000000e+00 : f32
    %955 = vector.broadcast %cst_454 : f32 to vector<8x128xf32>
    %956 = arith.addf %954, %955 : vector<8x128xf32>
    %cst_455 = arith.constant 5.000000e-01 : f32
    %957 = vector.broadcast %cst_455 : f32 to vector<8x128xf32>
    %958 = arith.mulf %957, %956 : vector<8x128xf32>
    %959 = arith.mulf %948, %925 : vector<8x128xf32>
    %960 = arith.mulf %940, %950 : vector<8x128xf32>
    %961 = arith.addf %959, %960 : vector<8x128xf32>
    %962 = math.tanh %961 : vector<8x128xf32>
    %963 = arith.mulf %958, %962 : vector<8x128xf32>
    %964 = tpu.concatenate %662, %89 in 1 : vector<8x128xbf16>, vector<8x128xbf16> -> vector<8x256xbf16>
    %c0_456 = arith.constant 0 : index
    %c0_457 = arith.constant 0 : index
    %965 = vector.load %arg7[%c0_456, %c0_457] : memref<256x512xbf16, #tpu.memory_space<vmem>>, vector<256x512xbf16>
    %cst_458 = arith.constant dense<0.000000e+00> : vector<8x512xf32>
    %966 = tpu.matmul %964, %965, %cst_458 {dimension_numbers = #tpu.dot_dimension_numbers<[1], [0], [0], [1], [0, 0, 1, 1], [], []>} : vector<8x256xbf16>, vector<256x512xbf16>, vector<8x512xf32> -> vector<8x512xf32>
    %c0_459 = arith.constant 0 : index
    %c0_460 = arith.constant 0 : index
    %967 = vector.load %arg10[%c0_459, %c0_460] : memref<1x512xf32, #tpu.memory_space<vmem>>, vector<1x512xf32>
    %968 = vector.broadcast %967 : vector<1x512xf32> to vector<8x512xf32>
    %969 = arith.addf %966, %968 : vector<8x512xf32>
    %970 = vector.extract_strided_slice %969 {offsets = [0, 0], sizes = [8, 128], strides = [1, 1]} : vector<8x512xf32> to vector<8x128xf32>
    %cst_461 = arith.constant 5.000000e-01 : f32
    %971 = vector.broadcast %cst_461 : f32 to vector<8x128xf32>
    %972 = arith.mulf %971, %970 : vector<8x128xf32>
    %973 = math.tanh %972 : vector<8x128xf32>
    %cst_462 = arith.constant 1.000000e+00 : f32
    %974 = vector.broadcast %cst_462 : f32 to vector<8x128xf32>
    %975 = arith.addf %973, %974 : vector<8x128xf32>
    %cst_463 = arith.constant 5.000000e-01 : f32
    %976 = vector.broadcast %cst_463 : f32 to vector<8x128xf32>
    %977 = arith.mulf %976, %975 : vector<8x128xf32>
    %978 = vector.extract_strided_slice %969 {offsets = [0, 256], sizes = [8, 128], strides = [1, 1]} : vector<8x512xf32> to vector<8x128xf32>
    %979 = math.tanh %978 : vector<8x128xf32>
    %980 = vector.extract_strided_slice %969 {offsets = [0, 384], sizes = [8, 128], strides = [1, 1]} : vector<8x512xf32> to vector<8x128xf32>
    %cst_464 = arith.constant 5.000000e-01 : f32
    %981 = vector.broadcast %cst_464 : f32 to vector<8x128xf32>
    %982 = arith.mulf %981, %980 : vector<8x128xf32>
    %983 = math.tanh %982 : vector<8x128xf32>
    %cst_465 = arith.constant 1.000000e+00 : f32
    %984 = vector.broadcast %cst_465 : f32 to vector<8x128xf32>
    %985 = arith.addf %983, %984 : vector<8x128xf32>
    %cst_466 = arith.constant 5.000000e-01 : f32
    %986 = vector.broadcast %cst_466 : f32 to vector<8x128xf32>
    %987 = arith.mulf %986, %985 : vector<8x128xf32>
    %988 = arith.mulf %977, %979 : vector<8x128xf32>
    %989 = math.tanh %988 : vector<8x128xf32>
    %990 = arith.mulf %987, %989 : vector<8x128xf32>
    %c0_467 = arith.constant 0 : index
    %c0_468 = arith.constant 0 : index
    %991 = vector.load %arg11[%c0_467, %c0_468] : memref<8x256xf32, #tpu.memory_space<vmem>>, vector<8x128xf32>
    tpu.vector_store %arg11[%c0_467, %c0_468], %963 {strides = array<i32>} : memref<8x256xf32, #tpu.memory_space<vmem>>, vector<8x128xf32>,
    %c0_469 = arith.constant 0 : index
    %c128_470 = arith.constant 128 : index
    %992 = vector.load %arg11[%c0_469, %c128_470] : memref<8x256xf32, #tpu.memory_space<vmem>>, vector<8x128xf32>
    tpu.vector_store %arg11[%c0_469, %c128_470], %990 {strides = array<i32>} : memref<8x256xf32, #tpu.memory_space<vmem>>, vector<8x128xf32>,
    return
  }
  func.func @transform_0(%arg0: i32) -> (i32, i32) {
    %c0_i32 = arith.constant 0 : i32
    %c0_i32_0 = arith.constant 0 : i32
    %c0_i32_1 = arith.constant 0 : i32
    return %c0_i32, %c0_i32_0 : i32, i32
  }
  func.func @transform_1(%arg0: i32) -> (i32, i32) {
    %c0_i32 = arith.constant 0 : i32
    %c0_i32_0 = arith.constant 0 : i32
    %c0_i32_1 = arith.constant 0 : i32
    return %c0_i32, %c0_i32_0 : i32, i32
  }
  func.func @transform_2(%arg0: i32) -> (i32, i32) {
    %c0_i32 = arith.constant 0 : i32
    %c0_i32_0 = arith.constant 0 : i32
    %c0_i32_1 = arith.constant 0 : i32
    return %c0_i32, %c0_i32_0 : i32, i32
  }
  func.func @transform_3(%arg0: i32) -> (i32, i32) {
    %c0_i32 = arith.constant 0 : i32
    %c0_i32_0 = arith.constant 0 : i32
    %c0_i32_1 = arith.constant 0 : i32
    return %c0_i32, %c0_i32_0 : i32, i32
  }
  func.func @transform_4(%arg0: i32) -> (i32, i32) {
    %c0_i32 = arith.constant 0 : i32
    %c0_i32_0 = arith.constant 0 : i32
    %c0_i32_1 = arith.constant 0 : i32
    return %c0_i32, %c0_i32_0 : i32, i32
  }
  func.func @transform_5(%arg0: i32) -> (i32, i32) {
    %c0_i32 = arith.constant 0 : i32
    %c0_i32_0 = arith.constant 0 : i32
    %c0_i32_1 = arith.constant 0 : i32
    return %c0_i32, %c0_i32_0 : i32, i32
  }
  func.func @transform_6(%arg0: i32) -> (i32, i32) {
    %c0_i32 = arith.constant 0 : i32
    %c0_i32_0 = arith.constant 0 : i32
    %c0_i32_1 = arith.constant 0 : i32
    return %c0_i32, %c0_i32_0 : i32, i32
  }
  func.func @transform_7(%arg0: i32) -> (i32, i32) {
    %c0_i32 = arith.constant 0 : i32
    %c0_i32_0 = arith.constant 0 : i32
    %c0_i32_1 = arith.constant 0 : i32
    return %c0_i32, %c0_i32_0 : i32, i32
  }
  func.func @transform_8(%arg0: i32) -> (i32, i32) {
    %c0_i32 = arith.constant 0 : i32
    %c0_i32_0 = arith.constant 0 : i32
    %c0_i32_1 = arith.constant 0 : i32
    return %c0_i32, %c0_i32_0 : i32, i32
  }
  func.func @transform_9(%arg0: i32) -> (i32, i32) {
    %c0_i32 = arith.constant 0 : i32
    %c0_i32_0 = arith.constant 0 : i32
    %c0_i32_1 = arith.constant 0 : i32
    return %c0_i32, %c0_i32_0 : i32, i32
  }
  func.func @transform_10(%arg0: i32) -> (i32, i32) {
    %c0_i32 = arith.constant 0 : i32
    %c0_i32_0 = arith.constant 0 : i32
    %c0_i32_1 = arith.constant 0 : i32
    return %c0_i32, %c0_i32_0 : i32, i32
  }
}

</mosaic_0001>

<bundles_post_ra>
// kernel: rnn_metric_learner_forward.1
= control target key start
LH: loop header
LB: loop body
LE: loop exit
PB: predicated region body
PF: predicated region fallthrough
CT: control target
= control target key end

     0   :  { %15 = vsyncpa [#allocation5], 0  ;;  %s17224_s0 = inlined_call_operand.vmem [shape: f32[64,24], index: 0, kind: input, shape index: {}]   ;;  %s17225_s1 = inlined_call_operand.vmem [shape: bf16[24,1024], index: 1, kind: input, shape index: {}]   ;;  %s17226_s2 = inlined_call_operand.vmem [shape: f32[1,1024], index: 2, kind: input, shape index: {}]   ;;  %s17227_s3 = inlined_call_operand.hbm [shape: bf16[128,512], index: 3, kind: input, shape index: {}]   ;;  %s17228_s4 = inlined_call_operand.hbm [shape: bf16[128,512], index: 4, kind: input, shape index: {}]   ;;  %s17229_s5 = inlined_call_operand.hbm [shape: bf16[256,512], index: 5, kind: input, shape index: {}]   ;;  %s17230_s6 = inlined_call_operand.hbm [shape: bf16[256,512], index: 6, kind: input, shape index: {}]   ;;  %s17231_s7 = inlined_call_operand.hbm [shape: bf16[128,512], index: 7, kind: input, shape index: {}]   ;;  %s17232_s8 = inlined_call_operand.vmem [shape: f32[1,512], index: 8, kind: input, shape index: {}]   ;;  %s17233_s9 = inlined_call_operand.vmem [shape: f32[1,512], index: 9, kind: input, shape index: {}]   ;;  %s17234_s10 = inlined_call_operand.vmem [shape: f32[8,256], index: 10, kind: output, shape index: {}]  }
   0x1   :  { %16 = vsyncpa [#allocation7], 0 }
   0x2   :  { %17 = vsyncpa [#allocation10], 0  ;;  %s14374_s13 = smov [#allocation6]   ;;  %s14375_s15 = smov [#allocation9]  }
   0x3   :  { %s41_s14 = sshll.u32 %s14374_s13, 4  ;;  %s65_s16 = sshll.u32 %s14375_s15, 4  ;;  %s42_s14 = int_to_ptr.vmem [resolvable:$true] %s41_s14  ;;  %s14437_s16 = int_to_ptr.vmem [resolvable:$true] %s65_s16 }
   0x4   :  { %s14258_s19 = scalar_lea.hbm %s17228_s4, 4096 }
   0x5   :  { %p14259_p0 = scmp.ne.s32.totalorder %s17228_s4, %s14258_s19  ;;  %p14262_p1 = scmp.lt.u32.totalorder %s14258_s19, %s17228_s4 }
   0x7   :  { %p14264_p2 = pnand %p14262_p1, %p14259_p0 }
   0x9   :  { %14267 = shalt.err (!%p14264_p2)
}
   0xa   :  { %s14268_s24 = scalar_lea.vmem %s42_s14, 4096  ;;  %p14273_p4 = scmp.lt.s32.totalorder %s42_s14, %s42_s14 }
   0xb   :  { %p14269_p3 = scmp.ne.s32.totalorder %s42_s14, %s14268_s24  ;;  %p14274_p5 = scmp.lt.s32.totalorder %s14268_s24, %s14268_s24 }
   0xd   :  { %p14275_p6 = por %p14274_p5, %p14273_p4 }
   0xf   :  { %p14276_p7 = pnand %p14275_p6, %p14269_p3 }
  0x11   :  { %14279 = shalt.err (!%p14276_p7)
}
  0x12   :  { %s14376_s25 = smov 256   ;;  %s14377_s26 = smov 16  }
  0x13   :  { %47 = dma.hbm_to_vmem [thread:$0]  %s17228_s4, 4096, %s42_s14, [#allocation7], %s14376_s25, %s14376_s25, %s14377_s26  }
  0x14   :  { %s14280_s11 = scalar_lea.hbm %s17230_s6, 8192 }
  0x15   :  { %p14281_p8 = scmp.ne.s32.totalorder %s17230_s6, %s14280_s11  ;;  %p14284_p9 = scmp.lt.u32.totalorder %s14280_s11, %s17230_s6 }
  0x17   :  { %p14286_p10 = pnand %p14284_p9, %p14281_p8 }
  0x19   :  { %14289 = shalt.err (!%p14286_p10)
}
  0x1a   :  { %s14290_s18 = scalar_lea.vmem %s14437_s16, 8192  ;;  %p14295_p12 = scmp.lt.s32.totalorder %s14437_s16, %s14437_s16 }
  0x1b   :  { %p14291_p11 = scmp.ne.s32.totalorder %s14437_s16, %s14290_s18  ;;  %p14296_p13 = scmp.lt.s32.totalorder %s14290_s18, %s14290_s18 }
  0x1d   :  { %p14297_p0 = por %p14296_p13, %p14295_p12 }
  0x1f   :  { %p14298_p1 = pnand %p14297_p0, %p14291_p11 }
  0x21   :  { %14301 = shalt.err (!%p14298_p1)
}
  0x22   :  { %71 = dma.hbm_to_vmem [thread:$0]  %s17230_s6, 8192, %s14437_s16, [#allocation10], %s14376_s25, %s14376_s25, %s14377_s26  }
  0x23   :  { %s14378_s19 = smov [#allocation4]   ;;  %s14379_s21 = smov [#allocation8]  }
  0x24   :  { %s29_s20 = sshll.u32 %s14378_s19, 4  ;;  %s53_s22 = sshll.u32 %s14379_s21, 4  ;;  %s30_s20 = int_to_ptr.vmem [resolvable:$true] %s29_s20  ;;  %s14474_s22 = int_to_ptr.vmem [resolvable:$true] %s53_s22 }
  0x25   :  { %s14302_s27 = scalar_lea.hbm %s17227_s3, 4096 }
  0x26   :  { %p14303_p2 = scmp.ne.s32.totalorder %s17227_s3, %s14302_s27  ;;  %p14306_p3 = scmp.lt.u32.totalorder %s14302_s27, %s17227_s3 }
  0x28   :  { %p14308_p4 = pnand %p14306_p3, %p14303_p2 }
  0x2a   :  { %14311 = shalt.err (!%p14308_p4)
}
  0x2b   :  { %s14312_s6 = scalar_lea.vmem %s30_s20, 4096  ;;  %p14317_p6 = scmp.lt.s32.totalorder %s30_s20, %s30_s20 }
  0x2c   :  { %p14313_p5 = scmp.ne.s32.totalorder %s30_s20, %s14312_s6  ;;  %p14318_p7 = scmp.lt.s32.totalorder %s14312_s6, %s14312_s6 }
  0x2e   :  { %p14319_p8 = por %p14318_p7, %p14317_p6 }
  0x30   :  { %p14320_p9 = pnand %p14319_p8, %p14313_p5 }
  0x32   :  { %14323 = shalt.err (!%p14320_p9)
}
  0x33   :  { %35 = dma.hbm_to_vmem [thread:$0]  %s17227_s3, 4096, %s30_s20, [#allocation5], %s14376_s25, %s14376_s25, %s14377_s26  }
  0x34   :  { %s14324_s17 = scalar_lea.hbm %s17229_s5, 8192 }
  0x35   :  { %p14325_p10 = scmp.ne.s32.totalorder %s17229_s5, %s14324_s17  ;;  %p14328_p11 = scmp.lt.u32.totalorder %s14324_s17, %s17229_s5 }
  0x37   :  { %p14330_p12 = pnand %p14328_p11, %p14325_p10 }
  0x39   :  { %14333 = shalt.err (!%p14330_p12)
}
  0x3a   :  { %s14334_s21 = scalar_lea.vmem %s14474_s22, 8192  ;;  %p14339_p0 = scmp.lt.s32.totalorder %s14474_s22, %s14474_s22 }
  0x3b   :  { %p14335_p13 = scmp.ne.s32.totalorder %s14474_s22, %s14334_s21  ;;  %p14340_p1 = scmp.lt.s32.totalorder %s14334_s21, %s14334_s21 }
  0x3d   :  { %p14341_p2 = por %p14340_p1, %p14339_p0 }
  0x3f   :  { %p14342_p3 = pnand %p14341_p2, %p14335_p13 }
  0x41   :  { %14345 = shalt.err (!%p14342_p3)
}
  0x42   :  { %59 = dma.hbm_to_vmem [thread:$0]  %s17229_s5, 8192, %s14474_s22, [#allocation7], %s14376_s25, %s14376_s25, %s14377_s26  }
  0x43   :  { %s14380_s23 = smov [#allocation11]   ;;  %s14346_s29 = scalar_lea.hbm %s17231_s7, 4096 }
  0x44   :  { %s77_s24 = sshll.u32 %s14380_s23, 4  ;;  %p14347_p4 = scmp.ne.s32.totalorder %s17231_s7, %s14346_s29  ;;  %s78_s24 = int_to_ptr.vmem [resolvable:$true] %s77_s24 }
  0x45   :  { %p14350_p5 = scmp.lt.u32.totalorder %s14346_s29, %s17231_s7 }
  0x47   :  { %p14352_p6 = pnand %p14350_p5, %p14347_p4 }
  0x49   :  { %14355 = shalt.err (!%p14352_p6)
}
  0x4a   :  { %s14356_s12 = scalar_lea.vmem %s78_s24, 4096  ;;  %p14361_p8 = scmp.lt.s32.totalorder %s78_s24, %s78_s24 }
  0x4b   :  { %p14357_p7 = scmp.ne.s32.totalorder %s78_s24, %s14356_s12  ;;  %p14362_p9 = scmp.lt.s32.totalorder %s14356_s12, %s14356_s12 }
  0x4d   :  { %p14363_p10 = por %p14362_p9, %p14361_p8 }
  0x4f   :  { %p14364_p11 = pnand %p14363_p10, %p14357_p7 }
  0x51   :  { %14367 = shalt.err (!%p14364_p11)
}
  0x52   :  { %83 = dma.hbm_to_vmem [thread:$0]  %s17231_s7, 4096, %s78_s24, [#allocation10], %s14376_s25, %s14376_s25, %s14377_s26  }
  0x53   :  { %14368 = dma.done.wait [#allocation5], 4096  }
  0x54   :  { %14369 = vsyncadd [#allocation5], 4294963200 }
  0x55   :  { %14370 = dma.done.wait [#allocation7], 12288  }
  0x56   :  { %14371 = vsyncadd [#allocation7], 4294955008 }
  0x57   :  { %14372 = dma.done.wait [#allocation10], 12288  }
  0x58   :  { %14373 = vsyncadd [#allocation10], 4294955008  ;;  %v17236_v0 = vmov 0   ;;  %v116_v1 = vld [vmem:[%s17225_s1] sm:$0xff]  ;;  %v117_v3 = vld [vmem:[%s17225_s1 + $0x8] sm:$0xff]  ;;  %vm243_vm0 = vcmask 1043456  }
  0x59   :  { %300 = vmatprep.mubr.bf16.mxu0 %v17236_v0  ;;  %373 = vmatprep.mubr.bf16.mxu1 %v17236_v0  ;;  %v120_v2 = vld [vmem:[%s17225_s1 + $0x20] sm:$0xff]  ;;  %v121_v5 = vld [vmem:[%s17225_s1 + $0x28] sm:$0xff]  ;;  %v118_v13 = vld [vmem:[%s17225_s1 + $0x10] sm:$0xff]  ;;  %vm230_vm1 = vcmask 195584  }
  0x5a   :  { %v11637_v4 = vcombine.high %v116_v1, %v120_v2  ;;  %v11636_v6 = vcombine.low %v116_v1, %v120_v2  ;;  %v124_v7 = vld [vmem:[%s17225_s1 + $0x40] sm:$0xff]  ;;  %v125_v8 = vld [vmem:[%s17225_s1 + $0x48] sm:$0xff]  ;;  %v11639_v9 = vcombine.high %v117_v3, %v121_v5  ;;  %v11638_v10 = vcombine.low %v117_v3, %v121_v5  ;;  %v122_v16 = vld [vmem:[%s17225_s1 + $0x30] sm:$0xff] }
  0x5b   :  { %v11645_v11 = vcombine.high %v124_v7, %v124_v7  ;;  %v11647_v12 = vcombine.high %v125_v8, %v125_v8  ;;  %v11644_v14 = vcombine.low %v124_v7, %v124_v7  ;;  %v11646_v15 = vcombine.low %v125_v8, %v125_v8  ;;  %v119_v17 = vld [vmem:[%s17225_s1 + $0x18] sm:$0xff]  ;;  %v104_v19 = vld [vmem:[%s17224_s0] sm:$0xff]  ;;  %v105_v20 = vld [vmem:[%s17224_s0 + $0x8] sm:$0xff] }
  0x5c   :  { %268 = vmatprep.subr.bf16.mxu0 %v11637_v4  ;;  %v123_v18 = vld [vmem:[%s17225_s1 + $0x38] sm:$0xff]  ;;  %341 = vmatprep.subr.bf16.mxu1 %v11639_v9  ;;  %v11641_v22 = vcombine.high %v118_v13, %v122_v16  ;;  %v126_v25 = vld [vmem:[%s17225_s1 + $0x50] sm:$0xff]  ;;  %v112_v26 = vpack.c.bf16 %v105_v20, %v104_v19  ;;  %v11640_v27 = vcombine.low %v118_v13, %v122_v16  ;;  %v108_v41 = vld [vmem:[%s17224_s0 + $0x20] sm:$0xff] }
  0x5d   :  { %269 = vmatpush1.bf16.msra.mxu0 %v11636_v6  ;;  %342 = vmatpush1.bf16.msra.mxu1 %v11638_v10  ;;  %v245_v21 = vsel %vm243_vm0, %v11644_v14, 0  ;;  %v251_v23 = vsel %vm243_vm0, %v11646_v15, 0  ;;  %v11643_v24 = vcombine.high %v119_v17, %v123_v18  ;;  %v127_v28 = vld [vmem:[%s17225_s1 + $0x58] sm:$0xff]  ;;  %v11648_v29 = vcombine.low %v126_v25, %v126_v25  ;;  %v106_v32 = vld [vmem:[%s17224_s0 + $0x10] sm:$0xff]  ;;  %v109_v42 = vld [vmem:[%s17224_s0 + $0x28] sm:$0xff] }
  0x5e   :  { %11652 = vmatprep.subr.msk.bf16.mxu0 %vm243_vm0, %v11645_v11  ;;  %11657 = vmatprep.subr.msk.bf16.mxu1 %vm243_vm0, %v11647_v12  ;;  %v11642_v30 = vcombine.low %v119_v17, %v123_v18  ;;  %v11649_v31 = vcombine.high %v126_v25, %v126_v25  ;;  %v11651_v33 = vcombine.high %v127_v28, %v127_v28  ;;  %v107_v35 = vld [vmem:[%s17224_s0 + $0x18] sm:$0xff]  ;;  %v12970_v37 = vld [vmem:[#allocation4 + $0x4] ss:$16 sps:$4 sm:$0xff]   ;;  %v12968_v47 = vld [vmem:[#allocation4] ss:$16 sps:$4 sm:$0xff]  }
  0x5f   :  { %v11650_v34 = vcombine.low %v127_v28, %v127_v28  ;;  %v257_v36 = vsel %vm243_vm0, %v11648_v29, 0  ;;  %v113_v38 = vpack.c.bf16 %v107_v35, %v106_v32  ;;  %v12973_v40 = vld [vmem:[#allocation4 + $0xc] ss:$16 sps:$4 sm:$0xff]   ;;  %v114_v43 = vpack.c.bf16 %v109_v42, %v108_v41  ;;  %v110_v44 = vld [vmem:[%s17224_s0 + $0x30] sm:$0xff]  ;;  %v12971_v48 = vld [vmem:[#allocation4 + $0x8] ss:$16 sps:$4 sm:$0xff]  }
  0x60   :  { %v111_v45 = vld [vmem:[%s17224_s0 + $0x38] sm:$0xff]  ;;  %v12976_v49 = vld [vmem:[#allocation4 + $0x24] ss:$16 sps:$4 sm:$0xff]   ;;  %v12974_v51 = vld [vmem:[#allocation4 + $0x20] ss:$16 sps:$4 sm:$0xff]  }
  0x61   :  { %271 = vmatpush1.bf16.msra.mxu0 %v245_v21  ;;  %344 = vmatpush1.bf16.msra.mxu1 %v251_v23  ;;  %v263_v39 = vsel %vm243_vm0, %v11650_v34, 0  ;;  %v14608_v46 = vpack.c.bf16 %v111_v45, %v110_v44  ;;  %v12979_v50 = vld [vmem:[#allocation4 + $0x2c] ss:$16 sps:$4 sm:$0xff]   ;;  %v12977_v52 = vld [vmem:[#allocation4 + $0x28] ss:$16 sps:$4 sm:$0xff]  }
  0x62   :  { %414 = vmatprep.subr.bf16.mxu0 %v11641_v22  ;;  %487 = vmatprep.subr.bf16.mxu1 %v11643_v24  ;;  %v12982_v53 = vld [vmem:[#allocation4 + $0x44] ss:$16 sps:$4 sm:$0xff]   ;;  %v12985_v54 = vld [vmem:[#allocation4 + $0x4c] ss:$16 sps:$4 sm:$0xff]   ;;  %v12980_v55 = vld [vmem:[#allocation4 + $0x40] ss:$16 sps:$4 sm:$0xff]  }
  0x63   :  { %v12983_v56 = vld [vmem:[#allocation4 + $0x48] ss:$16 sps:$4 sm:$0xff]   ;;  %v12988_v57 = vld [vmem:[#allocation4 + $0x64] ss:$16 sps:$4 sm:$0xff]   ;;  %v12991_v58 = vld [vmem:[#allocation4 + $0x6c] ss:$16 sps:$4 sm:$0xff]  }
  0x64   :  { %11653 = vmatmul.mubr.msk.bf16.vlgmr.msra.gmra.mrb[0].mxu0 %vm230_vm1, %v112_v26  ;;  %11658 = vmatmul.mubr.msk.bf16.vlgmr.msra.gmra.mrb[0].mxu1 %vm230_vm1, %v112_v26  ;;  %v12986_v59 = vld [vmem:[#allocation4 + $0x60] ss:$16 sps:$4 sm:$0xff]   ;;  %v12989_v60 = vld [vmem:[#allocation4 + $0x68] ss:$16 sps:$4 sm:$0xff]   ;;  %v12994_v61 = vld [vmem:[#allocation4 + $0x84] ss:$16 sps:$4 sm:$0xff]  }
  0x65   :  { %415 = vmatpush1.bf16.msra.mxu0 %v11640_v27  ;;  %310 = vmatprep.mubr.bf16.mxu0 %v17236_v0  ;;  %v12997_v62 = vld [vmem:[#allocation4 + $0x8c] ss:$16 sps:$4 sm:$0xff]   ;;  %v12992_v63 = vld [vmem:[#allocation4 + $0x80] ss:$16 sps:$4 sm:$0xff]   ;;  %v12995_v1 = vld [vmem:[#allocation4 + $0x88] ss:$16 sps:$4 sm:$0xff]  }
  0x66   :  { %383 = vmatprep.mubr.bf16.mxu1 %v17236_v0  ;;  %488 = vmatpush1.bf16.msra.mxu1 %v11642_v30  ;;  %v13000_v2 = vld [vmem:[#allocation4 + $0xa4] ss:$16 sps:$4 sm:$0xff]   ;;  %v13003_v3 = vld [vmem:[#allocation4 + $0xac] ss:$16 sps:$4 sm:$0xff]   ;;  %v12998_v4 = vld [vmem:[#allocation4 + $0xa0] ss:$16 sps:$4 sm:$0xff]  }
  0x67   :  { %11662 = vmatprep.subr.msk.bf16.mxu0 %vm243_vm0, %v11649_v31  ;;  %11667 = vmatprep.subr.msk.bf16.mxu1 %vm243_vm0, %v11651_v33  ;;  %v13001_v5 = vld [vmem:[#allocation4 + $0xa8] ss:$16 sps:$4 sm:$0xff]   ;;  %v13006_v6 = vld [vmem:[#allocation4 + $0xc4] ss:$16 sps:$4 sm:$0xff]   ;;  %v13009_v7 = vld [vmem:[#allocation4 + $0xcc] ss:$16 sps:$4 sm:$0xff]  }
  0x68   :  { %v13004_v8 = vld [vmem:[#allocation4 + $0xc0] ss:$16 sps:$4 sm:$0xff]   ;;  %v13007_v9 = vld [vmem:[#allocation4 + $0xc8] ss:$16 sps:$4 sm:$0xff]   ;;  %v13012_v10 = vld [vmem:[#allocation4 + $0xe4] ss:$16 sps:$4 sm:$0xff]  }
  0x69   :  { %417 = vmatpush1.bf16.msra.mxu0 %v257_v36  ;;  %v13015_v11 = vld [vmem:[#allocation4 + $0xec] ss:$16 sps:$4 sm:$0xff]   ;;  %v13010_v12 = vld [vmem:[#allocation4 + $0xe0] ss:$16 sps:$4 sm:$0xff]   ;;  %v13013_v13 = vld [vmem:[#allocation4 + $0xe8] ss:$16 sps:$4 sm:$0xff]  }
  0x6a   :  { %874 = vmatprep.subr.bf16.mxu0 %v12970_v37  ;;  %490 = vmatpush1.bf16.msra.mxu1 %v263_v39  ;;  %v13018_v14 = vld [vmem:[#allocation6 + $0x4] ss:$16 sps:$4 sm:$0xff]   ;;  %v13021_v15 = vld [vmem:[#allocation6 + $0xc] ss:$16 sps:$4 sm:$0xff]   ;;  %v13016_v16 = vld [vmem:[#allocation6] ss:$16 sps:$4 sm:$0xff]  }
  0x6b   :  { %915 = vmatprep.subr.bf16.mxu1 %v12973_v40  ;;  %v13019_v17 = vld [vmem:[#allocation6 + $0x8] ss:$16 sps:$4 sm:$0xff]   ;;  %v13024_v18 = vld [vmem:[#allocation6 + $0x24] ss:$16 sps:$4 sm:$0xff]   ;;  %v13027_v19 = vld [vmem:[#allocation6 + $0x2c] ss:$16 sps:$4 sm:$0xff]  }
  0x6c   :  { %11654 = vmatmul.mubr.msk.bf16.gmra.mrb[4].mxu0 %vm230_vm1, %v113_v38  ;;  %11659 = vmatmul.mubr.msk.bf16.gmra.mrb[4].mxu1 %vm230_vm1, %v113_v38  ;;  %v13022_v20 = vld [vmem:[#allocation6 + $0x20] ss:$16 sps:$4 sm:$0xff]   ;;  %v13025_v21 = vld [vmem:[#allocation6 + $0x28] ss:$16 sps:$4 sm:$0xff]   ;;  %v13030_v22 = vld [vmem:[#allocation6 + $0x44] ss:$16 sps:$4 sm:$0xff]  }
  0x6d   :  { %320 = vmatprep.mubr.bf16.mxu0 %v17236_v0  ;;  %393 = vmatprep.mubr.bf16.mxu1 %v17236_v0  ;;  %v13033_v23 = vld [vmem:[#allocation6 + $0x4c] ss:$16 sps:$4 sm:$0xff]   ;;  %v13028_v24 = vld [vmem:[#allocation6 + $0x40] ss:$16 sps:$4 sm:$0xff]   ;;  %v13031_v25 = vld [vmem:[#allocation6 + $0x48] ss:$16 sps:$4 sm:$0xff]  }
  0x6e   :  { %v13039_v27 = vld [vmem:[#allocation6 + $0x6c] ss:$16 sps:$4 sm:$0xff]   ;;  %v13034_v28 = vld [vmem:[#allocation6 + $0x60] ss:$16 sps:$4 sm:$0xff]   ;;  %v13037_v29 = vld [vmem:[#allocation6 + $0x68] ss:$16 sps:$4 sm:$0xff]  }
  0x6f   :  { %v13042_v30 = vld [vmem:[#allocation6 + $0x84] ss:$16 sps:$4 sm:$0xff]   ;;  %v13045_v31 = vld [vmem:[#allocation6 + $0x8c] ss:$16 sps:$4 sm:$0xff]   ;;  %v13040_v32 = vld [vmem:[#allocation6 + $0x80] ss:$16 sps:$4 sm:$0xff]  }
  0x70   :  { %v13043_v33 = vld [vmem:[#allocation6 + $0x88] ss:$16 sps:$4 sm:$0xff]   ;;  %v13048_v34 = vld [vmem:[#allocation6 + $0xa4] ss:$16 sps:$4 sm:$0xff]   ;;  %v13051_v35 = vld [vmem:[#allocation6 + $0xac] ss:$16 sps:$4 sm:$0xff]  }
  0x71   :  { %v13046_v36 = vld [vmem:[#allocation6 + $0xa0] ss:$16 sps:$4 sm:$0xff]   ;;  %v13049_v37 = vld [vmem:[#allocation6 + $0xa8] ss:$16 sps:$4 sm:$0xff]   ;;  %v13057_v39 = vld [vmem:[#allocation6 + $0xcc] ss:$16 sps:$4 sm:$0xff]  }
  0x72   :  { %v13052_v40 = vld [vmem:[#allocation6 + $0xc0] ss:$16 sps:$4 sm:$0xff]   ;;  %v13055_v41 = vld [vmem:[#allocation6 + $0xc8] ss:$16 sps:$4 sm:$0xff]   ;;  %v13060_v42 = vld [vmem:[#allocation6 + $0xe4] ss:$16 sps:$4 sm:$0xff]  }
  0x73   :  { %v13058_v44 = vld [vmem:[#allocation6 + $0xe0] ss:$16 sps:$4 sm:$0xff]   ;;  %v13061_v45 = vld [vmem:[#allocation6 + $0xe8] ss:$16 sps:$4 sm:$0xff]  }
  0x74   :  { %11655 = vmatmul.mubr.msk.bf16.gmra.mrb[8].mxu0 %vm230_vm1, %v114_v43  ;;  %11660 = vmatmul.mubr.msk.bf16.gmra.mrb[8].mxu1 %vm230_vm1, %v114_v43 }
  0x75   :  { %330 = vmatprep.mubr.bf16.mxu0 %v17236_v0  ;;  %403 = vmatprep.mubr.bf16.mxu1 %v17236_v0 }
  0x7c   :  { %11656 = vmatmul.mubr.msk.bf16.gmra.mrb[12].mxu0 %vm230_vm1, %v14608_v46  ;;  %11661 = vmatmul.mubr.msk.bf16.gmra.mrb[12].mxu1 %vm230_vm1, %v14608_v46 }
  0x7d   :  { %446 = vmatprep.mubr.bf16.mxu0 %v17236_v0  ;;  %519 = vmatprep.mubr.bf16.mxu1 %v17236_v0 }
  0x84   :  { %11663 = vmatmul.mubr.msk.bf16.vlgmr.msra.gmra.mrb[16].mxu0 %vm230_vm1, %v112_v26  ;;  %11668 = vmatmul.mubr.msk.bf16.vlgmr.msra.gmra.mrb[16].mxu1 %vm230_vm1, %v112_v26  ;;  %v13036_v26 = vld [vmem:[#allocation6 + $0x64] ss:$16 sps:$4 sm:$0xff]  }
  0x85   :  { %875 = vmatpush1.bf16.msra.mxu0 %v12968_v47  ;;  %916 = vmatpush1.bf16.msra.mxu1 %v12971_v48  ;;  %v13069_v47 = vld [vmem:[#allocation8 + $0xc] ss:$16 sps:$4 sm:$0xff]   ;;  %v13064_v48 = vld [vmem:[#allocation8] ss:$16 sps:$4 sm:$0xff]  }
  0x86   :  { %876 = vmatprep.subr.bf16.mxu0 %v12976_v49  ;;  %917 = vmatprep.subr.bf16.mxu1 %v12979_v50  ;;  %v13067_v49 = vld [vmem:[#allocation8 + $0x8] ss:$16 sps:$4 sm:$0xff]   ;;  %v13072_v50 = vld [vmem:[#allocation8 + $0x24] ss:$16 sps:$4 sm:$0xff]  }
  0x87   :  { %456 = vmatprep.mubr.bf16.mxu0 %v17236_v0  ;;  %529 = vmatprep.mubr.bf16.mxu1 %v17236_v0 }
  0x89   :  { %877 = vmatpush1.bf16.msra.mxu0 %v12974_v51  ;;  %918 = vmatpush1.bf16.msra.mxu1 %v12977_v52  ;;  %v13075_v51 = vld [vmem:[#allocation8 + $0x2c] ss:$16 sps:$4 sm:$0xff]   ;;  %v13070_v52 = vld [vmem:[#allocation8 + $0x20] ss:$16 sps:$4 sm:$0xff]  }
  0x8a   :  { %878 = vmatprep.subr.bf16.mxu0 %v12982_v53  ;;  %919 = vmatprep.subr.bf16.mxu1 %v12985_v54  ;;  %v13073_v53 = vld [vmem:[#allocation8 + $0x28] ss:$16 sps:$4 sm:$0xff]   ;;  %v13078_v54 = vld [vmem:[#allocation8 + $0x44] ss:$16 sps:$4 sm:$0xff]  }
  0x8c   :  { %11664 = vmatmul.mubr.msk.bf16.gmra.mrb[20].mxu0 %vm230_vm1, %v113_v38  ;;  %11669 = vmatmul.mubr.msk.bf16.gmra.mrb[20].mxu1 %vm230_vm1, %v113_v38  ;;  %v13054_v38 = vld [vmem:[#allocation6 + $0xc4] ss:$16 sps:$4 sm:$0xff]  }
  0x8d   :  { %879 = vmatpush1.bf16.msra.mxu0 %v12980_v55  ;;  %920 = vmatpush1.bf16.msra.mxu1 %v12983_v56  ;;  %v13081_v55 = vld [vmem:[#allocation8 + $0x4c] ss:$16 sps:$4 sm:$0xff]   ;;  %v13076_v56 = vld [vmem:[#allocation8 + $0x40] ss:$16 sps:$4 sm:$0xff]  }
  0x8e   :  { %880 = vmatprep.subr.bf16.mxu0 %v12988_v57  ;;  %921 = vmatprep.subr.bf16.mxu1 %v12991_v58  ;;  %v13079_v57 = vld [vmem:[#allocation8 + $0x48] ss:$16 sps:$4 sm:$0xff]   ;;  %v13084_v58 = vld [vmem:[#allocation8 + $0x64] ss:$16 sps:$4 sm:$0xff]  }
  0x8f   :  { %466 = vmatprep.mubr.bf16.mxu0 %v17236_v0  ;;  %539 = vmatprep.mubr.bf16.mxu1 %v17236_v0 }
  0x91   :  { %881 = vmatpush1.bf16.msra.mxu0 %v12986_v59  ;;  %922 = vmatpush1.bf16.msra.mxu1 %v12989_v60  ;;  %v13087_v59 = vld [vmem:[#allocation8 + $0x6c] ss:$16 sps:$4 sm:$0xff]   ;;  %v13082_v60 = vld [vmem:[#allocation8 + $0x60] ss:$16 sps:$4 sm:$0xff]  }
  0x92   :  { %882 = vmatprep.subr.bf16.mxu0 %v12994_v61  ;;  %923 = vmatprep.subr.bf16.mxu1 %v12997_v62  ;;  %v13085_v61 = vld [vmem:[#allocation8 + $0x68] ss:$16 sps:$4 sm:$0xff]   ;;  %v13090_v62 = vld [vmem:[#allocation8 + $0x84] ss:$16 sps:$4 sm:$0xff]  }
  0x94   :  { %11665 = vmatmul.mubr.msk.bf16.gmra.mrb[24].mxu0 %vm230_vm1, %v114_v43  ;;  %11670 = vmatmul.mubr.msk.bf16.gmra.mrb[24].mxu1 %vm230_vm1, %v114_v43  ;;  %v13063_v43 = vld [vmem:[#allocation6 + $0xec] ss:$16 sps:$4 sm:$0xff]  }
  0x95   :  { %883 = vmatpush1.bf16.msra.mxu0 %v12992_v63  ;;  %924 = vmatpush1.bf16.msra.mxu1 %v12995_v1  ;;  %v13093_v63 = vld [vmem:[#allocation8 + $0x8c] ss:$16 sps:$4 sm:$0xff]   ;;  %v13088_v1 = vld [vmem:[#allocation8 + $0x80] ss:$16 sps:$4 sm:$0xff]  }
  0x96   :  { %884 = vmatprep.subr.bf16.mxu0 %v13000_v2  ;;  %925 = vmatprep.subr.bf16.mxu1 %v13003_v3  ;;  %v13091_v2 = vld [vmem:[#allocation8 + $0x88] ss:$16 sps:$4 sm:$0xff]   ;;  %v13096_v3 = vld [vmem:[#allocation8 + $0xa4] ss:$16 sps:$4 sm:$0xff]  }
  0x97   :  { %476 = vmatprep.mubr.bf16.mxu0 %v17236_v0  ;;  %549 = vmatprep.mubr.bf16.mxu1 %v17236_v0 }
  0x99   :  { %885 = vmatpush1.bf16.msra.mxu0 %v12998_v4  ;;  %926 = vmatpush1.bf16.msra.mxu1 %v13001_v5  ;;  %v13099_v4 = vld [vmem:[#allocation8 + $0xac] ss:$16 sps:$4 sm:$0xff]   ;;  %v13094_v5 = vld [vmem:[#allocation8 + $0xa0] ss:$16 sps:$4 sm:$0xff]  }
  0x9a   :  { %886 = vmatprep.subr.bf16.mxu0 %v13006_v6  ;;  %927 = vmatprep.subr.bf16.mxu1 %v13009_v7  ;;  %v13097_v6 = vld [vmem:[#allocation8 + $0xa8] ss:$16 sps:$4 sm:$0xff]   ;;  %v13102_v7 = vld [vmem:[#allocation8 + $0xc4] ss:$16 sps:$4 sm:$0xff]  }
  0x9c   :  { %11666 = vmatmul.mubr.msk.bf16.gmra.mrb[28].mxu0 %vm230_vm1, %v14608_v46  ;;  %11671 = vmatmul.mubr.msk.bf16.gmra.mrb[28].mxu1 %vm230_vm1, %v14608_v46  ;;  %v13066_v46 = vld [vmem:[#allocation8 + $0x4] ss:$16 sps:$4 sm:$0xff]  }
  0x9d   :  { %887 = vmatpush1.bf16.msra.mxu0 %v13004_v8  ;;  %928 = vmatpush1.bf16.msra.mxu1 %v13007_v9  ;;  %v13105_v8 = vld [vmem:[#allocation8 + $0xcc] ss:$16 sps:$4 sm:$0xff]   ;;  %v13100_v9 = vld [vmem:[#allocation8 + $0xc0] ss:$16 sps:$4 sm:$0xff]  }
  0x9e   :  { %888 = vmatprep.subr.bf16.mxu0 %v13012_v10  ;;  %929 = vmatprep.subr.bf16.mxu1 %v13015_v11  ;;  %v13103_v10 = vld [vmem:[#allocation8 + $0xc8] ss:$16 sps:$4 sm:$0xff]   ;;  %v13108_v11 = vld [vmem:[#allocation8 + $0xe4] ss:$16 sps:$4 sm:$0xff]  }
  0x9f   :  { %906 = vmatprep.mubr.bf16.mxu0 %v17236_v0  ;;  %947 = vmatprep.mubr.bf16.mxu1 %v17236_v0 }
  0xa1   :  { %889 = vmatpush1.bf16.msra.mxu0 %v13010_v12  ;;  %930 = vmatpush1.bf16.msra.mxu1 %v13013_v13  ;;  %v13111_v12 = vld [vmem:[#allocation8 + $0xec] ss:$16 sps:$4 sm:$0xff]   ;;  %v13106_v13 = vld [vmem:[#allocation8 + $0xe0] ss:$16 sps:$4 sm:$0xff]  }
  0xa2   :  { %1156 = vmatprep.subr.bf16.mxu0 %v13018_v14  ;;  %1197 = vmatprep.subr.bf16.mxu1 %v13021_v15  ;;  %v13109_v14 = vld [vmem:[#allocation8 + $0xe8] ss:$16 sps:$4 sm:$0xff]   ;;  %v13114_v15 = vld [vmem:[#allocation8 + $0x104] ss:$16 sps:$4 sm:$0xff]  }
  0xa4   :  { %907 = vmatmul.mubr.bf16.vlgmr.msra.gmra.mrb[32].mxu0 %v17236_v0  ;;  %948 = vmatmul.mubr.bf16.vlgmr.msra.gmra.mrb[32].mxu1 %v17236_v0 }
  0xa5   :  { %1157 = vmatpush1.bf16.msra.mxu0 %v13016_v16  ;;  %1198 = vmatpush1.bf16.msra.mxu1 %v13019_v17  ;;  %v13117_v16 = vld [vmem:[#allocation8 + $0x10c] ss:$16 sps:$4 sm:$0xff]   ;;  %v130_v17 = vlaneseq }
  0xa6   :  { %1158 = vmatprep.subr.bf16.mxu0 %v13024_v18  ;;  %1199 = vmatprep.subr.bf16.mxu1 %v13027_v19  ;;  %v14647_v19 = vld [vmem:[%s17226_s2] sm:$0xff] }
  0xa7   :  { %1188 = vmatprep.mubr.bf16.mxu0 %v17236_v0  ;;  %1229 = vmatprep.mubr.bf16.mxu1 %v17236_v0  ;;  %v14642_v18 = vshrl.u32 %v130_v17, 7 }
  0xa9   :  { %1159 = vmatpush1.bf16.msra.mxu0 %v13022_v20  ;;  %1200 = vmatpush1.bf16.msra.mxu1 %v13025_v21  ;;  %17460 = vst [vmem:[#allocation15_spill] sm:$0xff] %v14642_v18  ;;  %v14650_v20 = vsub.s32 2, %v14642_v18  ;;  %v14653_v21 = vsub.s32 0, %v14642_v18 }
  0xaa   :  { %1160 = vmatprep.subr.bf16.mxu0 %v13030_v22  ;;  %1201 = vmatprep.subr.bf16.mxu1 %v13033_v23  ;;  %v14656_v22 = vsub.s32 3, %v14642_v18  ;;  %v17235_v23 = vsub.s32 1, %v14642_v18 }
  0xab   :  { %17461 = vst [vmem:[#allocation16_spill] sm:$0xff] %v14650_v20  ;;  %17462 = vst [vmem:[#allocation17_spill] sm:$0xff] %v14653_v21 }
  0xac   :  { %17463 = vst [vmem:[#allocation18_spill] sm:$0xff] %v14656_v22 }
  0xad   :  { %1161 = vmatpush1.bf16.msra.mxu0 %v13028_v24  ;;  %1202 = vmatpush1.bf16.msra.mxu1 %v13031_v25  ;;  %v14663_v25 = vrot.slane %v14647_v19, %v14650_v20 }
  0xae   :  { %1162 = vmatprep.subr.bf16.mxu0 %v13036_v26  ;;  %1203 = vmatprep.subr.bf16.mxu1 %v13039_v27  ;;  %v14667_v26 = vrot.slane %v14647_v19, %v14653_v21 }
  0xb1   :  { %1163 = vmatpush1.bf16.msra.mxu0 %v13034_v28  ;;  %1204 = vmatpush1.bf16.msra.mxu1 %v13037_v29  ;;  %v14675_v29 = vrot.slane %v14647_v19, %v14656_v22 }
  0xb2   :  { %1164 = vmatprep.subr.bf16.mxu0 %v13042_v30  ;;  %1205 = vmatprep.subr.bf16.mxu1 %v13045_v31  ;;  %v14680_v30 = vrot.slane %v14647_v19, %v17235_v23 }
  0xb5   :  { %1165 = vmatpush1.bf16.msra.mxu0 %v13040_v32  ;;  %1206 = vmatpush1.bf16.msra.mxu1 %v13043_v33 }
  0xb6   :  { %1166 = vmatprep.subr.bf16.mxu0 %v13048_v34  ;;  %1207 = vmatprep.subr.bf16.mxu1 %v13051_v35 }
  0xb9   :  { %1167 = vmatpush1.bf16.msra.mxu0 %v13046_v36  ;;  %1208 = vmatpush1.bf16.msra.mxu1 %v13049_v37 }
  0xba   :  { %1168 = vmatprep.subr.bf16.mxu0 %v13054_v38  ;;  %1209 = vmatprep.subr.bf16.mxu1 %v13057_v39 }
  0xbd   :  { %1169 = vmatpush1.bf16.msra.mxu0 %v13052_v40  ;;  %1210 = vmatpush1.bf16.msra.mxu1 %v13055_v41 }
  0xbe   :  { %1170 = vmatprep.subr.bf16.mxu0 %v13060_v42  ;;  %1211 = vmatprep.subr.bf16.mxu1 %v13063_v43 }
  0xc1   :  { %1171 = vmatpush1.bf16.msra.mxu0 %v13058_v44  ;;  %1212 = vmatpush1.bf16.msra.mxu1 %v13061_v45 }
  0xc2   :  { %1476 = vmatprep.subr.bf16.mxu0 %v13066_v46  ;;  %1517 = vmatprep.subr.bf16.mxu1 %v13069_v47 }
  0xc4   :  { %1189 = vmatmul.mubr.bf16.vlgmr.msra.gmra.mrb[36].mxu0 %v17236_v0  ;;  %1230 = vmatmul.mubr.bf16.vlgmr.msra.gmra.mrb[36].mxu1 %v17236_v0 }
  0xc5   :  { %1508 = vmatprep.mubr.bf16.mxu0 %v17236_v0  ;;  %1549 = vmatprep.mubr.bf16.mxu1 %v17236_v0 }
  0xc6   :  { %1477 = vmatpush1.bf16.msra.mxu0 %v13064_v48  ;;  %1518 = vmatpush1.bf16.msra.mxu1 %v13067_v49 }
  0xc7   :  { %1478 = vmatprep.subr.bf16.mxu0 %v13072_v50  ;;  %1519 = vmatprep.subr.bf16.mxu1 %v13075_v51 }
  0xca   :  { %1479 = vmatpush1.bf16.msra.mxu0 %v13070_v52  ;;  %1520 = vmatpush1.bf16.msra.mxu1 %v13073_v53 }
  0xcb   :  { %1480 = vmatprep.subr.bf16.mxu0 %v13078_v54  ;;  %1521 = vmatprep.subr.bf16.mxu1 %v13081_v55 }
  0xce   :  { %1481 = vmatpush1.bf16.msra.mxu0 %v13076_v56  ;;  %1522 = vmatpush1.bf16.msra.mxu1 %v13079_v57 }
  0xcf   :  { %1482 = vmatprep.subr.bf16.mxu0 %v13084_v58  ;;  %1523 = vmatprep.subr.bf16.mxu1 %v13087_v59 }
  0xd2   :  { %1483 = vmatpush1.bf16.msra.mxu0 %v13082_v60  ;;  %1524 = vmatpush1.bf16.msra.mxu1 %v13085_v61 }
  0xd3   :  { %1484 = vmatprep.subr.bf16.mxu0 %v13090_v62  ;;  %1525 = vmatprep.subr.bf16.mxu1 %v13093_v63 }
  0xd6   :  { %1485 = vmatpush1.bf16.msra.mxu0 %v13088_v1  ;;  %1526 = vmatpush1.bf16.msra.mxu1 %v13091_v2 }
  0xd7   :  { %1486 = vmatprep.subr.bf16.mxu0 %v13096_v3  ;;  %1527 = vmatprep.subr.bf16.mxu1 %v13099_v4 }
  0xda   :  { %1487 = vmatpush1.bf16.msra.mxu0 %v13094_v5  ;;  %1528 = vmatpush1.bf16.msra.mxu1 %v13097_v6 }
  0xdb   :  { %1488 = vmatprep.subr.bf16.mxu0 %v13102_v7  ;;  %1529 = vmatprep.subr.bf16.mxu1 %v13105_v8 }
  0xde   :  { %1489 = vmatpush1.bf16.msra.mxu0 %v13100_v9  ;;  %1530 = vmatpush1.bf16.msra.mxu1 %v13103_v10 }
  0xdf   :  { %1490 = vmatprep.subr.bf16.mxu0 %v13108_v11  ;;  %1531 = vmatprep.subr.bf16.mxu1 %v13111_v12 }
  0xe2   :  { %1491 = vmatpush1.bf16.msra.mxu0 %v13106_v13  ;;  %1532 = vmatpush1.bf16.msra.mxu1 %v13109_v14  ;;  %v148_v13 = vsub.s32 4, %v14642_v18 }
  0xe3   :  { %1762 = vmatprep.subr.bf16.mxu0 %v13114_v15  ;;  %1803 = vmatprep.subr.bf16.mxu1 %v13117_v16 }
 0x137   :  { %v14659_v24 = vpop.f32.mrb[0].mxu0  ;;  %v14671_v28 = vpop.f32.mrb[0].mxu1 }
 0x138   :  { %v14669_v27 = vpop.f32.mrb[1].mxu0  ;;  %v14682_v32 = vpop.f32.mrb[1].mxu1 }
 0x139   :  { %v306_v31 = vpop.f32.mrb[2].mxu0  ;;  %v379_v35 = vpop.f32.mrb[2].mxu1 }
 0x13a   :  { %v14685_v33 = vadd.f32 %v306_v31, %v14667_v26  ;;  %v308_v34 = vpop.f32.mrb[3].mxu0  ;;  %v14691_v37 = vadd.f32 %v379_v35, %v14663_v25  ;;  %v381_v38 = vpop.f32.mrb[3].mxu1  ;;  %v152_v31 = vsub.s32 5, %v14642_v18 }
 0x13b   :  { %v14688_v36 = vadd.f32 %v308_v34, %v14680_v30  ;;  %v14694_v39 = vadd.f32 %v381_v38, %v14675_v29  ;;  %v156_v34 = vsub.s32 6, %v14642_v18 }
 0x13f   :  { %v312_v40 = vpop.f32.mrb[4].mxu0  ;;  %v385_v43 = vpop.f32.mrb[4].mxu1 }
 0x140   :  { %v14697_v41 = vadd.f32 %v312_v40, %v14667_v26  ;;  %v314_v42 = vpop.f32.mrb[5].mxu0  ;;  %v14703_v46 = vadd.f32 %v385_v43, %v14663_v25  ;;  %v387_v47 = vpop.f32.mrb[5].mxu1  ;;  %v160_v43 = vsub.s32 7, %v14642_v18 }
 0x141   :  { %v14700_v44 = vadd.f32 %v314_v42, %v14680_v30  ;;  %v316_v45 = vpop.f32.mrb[6].mxu0  ;;  %v14709_v50 = vadd.f32 %v387_v47, %v14675_v29  ;;  %v389_v51 = vpop.f32.mrb[6].mxu1 }
 0x142   :  { %17464 = vst [vmem:[#allocation19_spill] sm:$0xff] %v14697_v41  ;;  %17466 = vst [vmem:[#allocation21_spill] sm:$0xff] %v14703_v46  ;;  %v14706_v48 = vadd.f32 %v316_v45, %v14667_v26  ;;  %v318_v49 = vpop.f32.mrb[7].mxu0  ;;  %v14715_v53 = vadd.f32 %v389_v51, %v14663_v25  ;;  %v391_v54 = vpop.f32.mrb[7].mxu1  ;;  %v15042_v46 = vld [vmem:[#allocation4 + $0x88] ss:$16 sps:$4 sm:$0xff]  }
 0x143   :  { %17465 = vst [vmem:[#allocation20_spill] sm:$0xff] %v14700_v44  ;;  %17468 = vst [vmem:[#allocation23_spill] sm:$0xff] %v14709_v50  ;;  %v14712_v52 = vadd.f32 %v318_v49, %v14680_v30  ;;  %v14718_v55 = vadd.f32 %v391_v54, %v14675_v29  ;;  %v14773_v54 = vrot.slane %v14647_v19, %v148_v13  ;;  %v15036_v50 = vld [vmem:[#allocation4 + $0x8c] ss:$16 sps:$4 sm:$0xff]   ;;  %v15040_v44 = vld [vmem:[#allocation4 + $0x80] ss:$16 sps:$4 sm:$0xff]  }
 0x144   :  { %17467 = vst [vmem:[#allocation22_spill] sm:$0xff] %v14706_v48  ;;  %17470 = vst [vmem:[#allocation25_spill] sm:$0xff] %v14715_v53  ;;  %v15018_v53 = vld [vmem:[#allocation4 + $0x48] ss:$16 sps:$4 sm:$0xff]   ;;  %v15022_v48 = vld [vmem:[#allocation4 + $0x64] ss:$16 sps:$4 sm:$0xff]  }
 0x145   :  { %17469 = vst [vmem:[#allocation24_spill] sm:$0xff] %v14712_v52  ;;  %17471 = vst [vmem:[#allocation26_spill] sm:$0xff] %v14718_v55  ;;  %v15010_v55 = vld [vmem:[#allocation4 + $0x4c] ss:$16 sps:$4 sm:$0xff]   ;;  %v15016_v52 = vld [vmem:[#allocation4 + $0x40] ss:$16 sps:$4 sm:$0xff]  }
 0x146   :  { %17517 = vst [vmem:[#allocation71_spill] sm:$0xff] %v15010_v55  ;;  %17518 = vst [vmem:[#allocation72_spill] sm:$0xff] %v15016_v52  ;;  %v15046_v41 = vld [vmem:[#allocation4 + $0xa4] ss:$16 sps:$4 sm:$0xff]  }
 0x147   :  { %v322_v56 = vpop.f32.mrb[8].mxu0  ;;  %v395_v59 = vpop.f32.mrb[8].mxu1  ;;  %17519 = vst [vmem:[#allocation73_spill] sm:$0xff] %v15018_v53  ;;  %17520 = vst [vmem:[#allocation74_spill] sm:$0xff] %v15022_v48 }
 0x148   :  { %v14721_v57 = vadd.f32 %v322_v56, %v14667_v26  ;;  %v324_v58 = vpop.f32.mrb[9].mxu0  ;;  %v14727_v62 = vadd.f32 %v395_v59, %v14663_v25  ;;  %v397_v63 = vpop.f32.mrb[9].mxu1  ;;  %v14776_v56 = vrot.slane %v14647_v19, %v152_v31  ;;  %v14782_v59 = vrot.slane %v14647_v19, %v160_v43  ;;  %17525 = vst [vmem:[#allocation79_spill] sm:$0xff] %v15036_v50 }
 0x149   :  { %v14724_v60 = vadd.f32 %v324_v58, %v14680_v30  ;;  %v326_v61 = vpop.f32.mrb[10].mxu0  ;;  %v14733_v3 = vadd.f32 %v397_v63, %v14675_v29  ;;  %v399_v4 = vpop.f32.mrb[10].mxu1  ;;  %v14779_v58 = vrot.slane %v14647_v19, %v156_v34  ;;  %17526 = vst [vmem:[#allocation80_spill] sm:$0xff] %v15040_v44  ;;  %17527 = vst [vmem:[#allocation81_spill] sm:$0xff] %v15042_v46 }
 0x14a   :  { %17472 = vst [vmem:[#allocation27_spill] sm:$0xff] %v14721_v57  ;;  %17474 = vst [vmem:[#allocation29_spill] sm:$0xff] %v14727_v62  ;;  %v14730_v1 = vadd.f32 %v326_v61, %v14667_v26  ;;  %v328_v2 = vpop.f32.mrb[11].mxu0  ;;  %v14739_v6 = vadd.f32 %v399_v4, %v14663_v25  ;;  %v401_v7 = vpop.f32.mrb[11].mxu1 }
 0x14b   :  { %17473 = vst [vmem:[#allocation28_spill] sm:$0xff] %v14724_v60  ;;  %17476 = vst [vmem:[#allocation31_spill] sm:$0xff] %v14733_v3  ;;  %v14736_v5 = vadd.f32 %v328_v2, %v14680_v30  ;;  %v14742_v8 = vadd.f32 %v401_v7, %v14675_v29  ;;  %v14982_v60 = vld [vmem:[#allocation4 + $0xc] ss:$16 sps:$4 sm:$0xff]  }
 0x14c   :  { %17475 = vst [vmem:[#allocation30_spill] sm:$0xff] %v14730_v1  ;;  %17478 = vst [vmem:[#allocation33_spill] sm:$0xff] %v14739_v6 }
 0x14d   :  { %17477 = vst [vmem:[#allocation32_spill] sm:$0xff] %v14736_v5  ;;  %17479 = vst [vmem:[#allocation34_spill] sm:$0xff] %v14742_v8 }
 0x14e   :  { %17528 = vst [vmem:[#allocation82_spill] sm:$0xff] %v15046_v41 }
 0x14f   :  { %v332_v9 = vpop.f32.mrb[12].mxu0  ;;  %v405_v12 = vpop.f32.mrb[12].mxu1 }
 0x150   :  { %v14745_v10 = vadd.f32 %v332_v9, %v14667_v26  ;;  %v334_v11 = vpop.f32.mrb[13].mxu0  ;;  %v14752_v16 = vadd.f32 %v405_v12, %v14663_v25  ;;  %v407_v17 = vpop.f32.mrb[13].mxu1 }
 0x151   :  { %v14749_v14 = vadd.f32 %v334_v11, %v14680_v30  ;;  %v336_v15 = vpop.f32.mrb[14].mxu0  ;;  %v14760_v40 = vadd.f32 %v407_v17, %v14675_v29  ;;  %v409_v42 = vpop.f32.mrb[14].mxu1 }
 0x152   :  { %17480 = vst [vmem:[#allocation35_spill] sm:$0xff] %v14745_v10  ;;  %17482 = vst [vmem:[#allocation37_spill] sm:$0xff] %v14752_v16  ;;  %v14757_v35 = vadd.f32 %v336_v15, %v14667_v26  ;;  %v338_v38 = vpop.f32.mrb[15].mxu0  ;;  %v14767_v47 = vadd.f32 %v409_v42, %v14663_v25  ;;  %v411_v49 = vpop.f32.mrb[15].mxu1 }
 0x153   :  { %17481 = vst [vmem:[#allocation36_spill] sm:$0xff] %v14749_v14  ;;  %17484 = vst [vmem:[#allocation39_spill] sm:$0xff] %v14760_v40  ;;  %v14764_v45 = vadd.f32 %v338_v38, %v14680_v30  ;;  %v14770_v51 = vadd.f32 %v411_v49, %v14675_v29  ;;  %v305_v40 = vadd.f32 %v14669_v27, %v14680_v30 }
 0x154   :  { %17483 = vst [vmem:[#allocation38_spill] sm:$0xff] %v14757_v35  ;;  %17486 = vst [vmem:[#allocation41_spill] sm:$0xff] %v14767_v47 }
 0x155   :  { %17485 = vst [vmem:[#allocation40_spill] sm:$0xff] %v14764_v45  ;;  %17487 = vst [vmem:[#allocation42_spill] sm:$0xff] %v14770_v51 }
 0x157   :  { %v448_v61 = vpop.f32.mrb[16].mxu0  ;;  %v521_v4 = vpop.f32.mrb[16].mxu1 }
 0x158   :  { %v14785_v63 = vadd.f32 %v448_v61, %v14773_v54  ;;  %v450_v2 = vpop.f32.mrb[17].mxu0  ;;  %v14791_v11 = vadd.f32 %v521_v4, %v14779_v58  ;;  %v523_v12 = vpop.f32.mrb[17].mxu1 }
 0x159   :  { %v14788_v7 = vadd.f32 %v450_v2, %v14776_v56  ;;  %v452_v9 = vpop.f32.mrb[18].mxu0  ;;  %v14797_v19 = vadd.f32 %v523_v12, %v14782_v59  ;;  %v525_v17 = vpop.f32.mrb[18].mxu1 }
 0x15a   :  { %17488 = vst [vmem:[#allocation43_spill] sm:$0xff] %v14785_v63  ;;  %17490 = vst [vmem:[#allocation45_spill] sm:$0xff] %v14791_v11  ;;  %v14794_v13 = vadd.f32 %v452_v9, %v14773_v54  ;;  %v454_v15 = vpop.f32.mrb[19].mxu0  ;;  %v14803_v34 = vadd.f32 %v525_v17, %v14779_v58  ;;  %v527_v38 = vpop.f32.mrb[19].mxu1 }
 0x15b   :  { %17489 = vst [vmem:[#allocation44_spill] sm:$0xff] %v14788_v7  ;;  %17492 = vst [vmem:[#allocation47_spill] sm:$0xff] %v14797_v19  ;;  %v14800_v31 = vadd.f32 %v454_v15, %v14776_v56  ;;  %v14806_v42 = vadd.f32 %v527_v38, %v14782_v59 }
 0x15c   :  { %17491 = vst [vmem:[#allocation46_spill] sm:$0xff] %v14794_v13  ;;  %17494 = vst [vmem:[#allocation49_spill] sm:$0xff] %v14803_v34 }
 0x15d   :  { %17493 = vst [vmem:[#allocation48_spill] sm:$0xff] %v14800_v31  ;;  %17495 = vst [vmem:[#allocation50_spill] sm:$0xff] %v14806_v42 }
 0x15f   :  { %v458_v43 = vpop.f32.mrb[20].mxu0  ;;  %v531_v2 = vpop.f32.mrb[20].mxu1 }
 0x160   :  { %v14809_v49 = vadd.f32 %v458_v43, %v14773_v54  ;;  %v460_v61 = vpop.f32.mrb[21].mxu0  ;;  %v14815_v12 = vadd.f32 %v531_v2, %v14779_v58  ;;  %v533_v15 = vpop.f32.mrb[21].mxu1 }
 0x161   :  { %v14812_v4 = vadd.f32 %v460_v61, %v14776_v56  ;;  %v462_v9 = vpop.f32.mrb[22].mxu0  ;;  %v14821_v38 = vadd.f32 %v533_v15, %v14782_v59  ;;  %v535_v0 = vpop.f32.mrb[22].mxu1 }
 0x162   :  { %17496 = vst [vmem:[#allocation51_spill] sm:$0xff] %v14809_v49  ;;  %17498 = vst [vmem:[#allocation53_spill] sm:$0xff] %v14815_v12  ;;  %v14818_v17 = vadd.f32 %v462_v9, %v14773_v54  ;;  %v464_v23 = vpop.f32.mrb[23].mxu0  ;;  %v14827_v22 = vadd.f32 %v535_v0, %v14779_v58  ;;  %v537_v61 = vpop.f32.mrb[23].mxu1 }
 0x163   :  { %17497 = vst [vmem:[#allocation52_spill] sm:$0xff] %v14812_v4  ;;  %17500 = vst [vmem:[#allocation55_spill] sm:$0xff] %v14821_v38  ;;  %v14824_v43 = vadd.f32 %v464_v23, %v14776_v56  ;;  %v14830_v20 = vadd.f32 %v537_v61, %v14782_v59 }
 0x164   :  { %17499 = vst [vmem:[#allocation54_spill] sm:$0xff] %v14818_v17  ;;  %17502 = vst [vmem:[#allocation57_spill] sm:$0xff] %v14827_v22  ;;  %v14974_v22 = vld [vmem:[#allocation8 + $0x1e0] ss:$16 sps:$4 sm:$0xff]   ;;  %v14976_v17 = vld [vmem:[#allocation8 + $0x1e8] ss:$16 sps:$4 sm:$0xff]  }
 0x165   :  { %17501 = vst [vmem:[#allocation56_spill] sm:$0xff] %v14824_v43  ;;  %17503 = vst [vmem:[#allocation58_spill] sm:$0xff] %v14830_v20  ;;  %v14968_v20 = vld [vmem:[#allocation8 + $0x1e4] ss:$16 sps:$4 sm:$0xff]   ;;  %v14970_v43 = vld [vmem:[#allocation8 + $0x1ec] ss:$16 sps:$4 sm:$0xff]  }
 0x167   :  { %v468_v2 = vpop.f32.mrb[24].mxu0  ;;  %v541_v21 = vpop.f32.mrb[24].mxu1 }
 0x168   :  { %v14833_v18 = vadd.f32 %v468_v2, %v14773_v54  ;;  %v470_v9 = vpop.f32.mrb[25].mxu0  ;;  %v14839_v23 = vadd.f32 %v541_v21, %v14779_v58  ;;  %v543_v7 = vpop.f32.mrb[25].mxu1 }
 0x169   :  { %v14836_v15 = vadd.f32 %v470_v9, %v14776_v56  ;;  %v472_v19 = vpop.f32.mrb[26].mxu0  ;;  %v14845_v61 = vadd.f32 %v543_v7, %v14782_v59  ;;  %v545_v63 = vpop.f32.mrb[26].mxu1 }
 0x16a   :  { %17504 = vst [vmem:[#allocation59_spill] sm:$0xff] %v14833_v18  ;;  %17506 = vst [vmem:[#allocation61_spill] sm:$0xff] %v14839_v23  ;;  %v14842_v0 = vadd.f32 %v472_v19, %v14773_v54  ;;  %v474_v11 = vpop.f32.mrb[27].mxu0  ;;  %v14851_v51 = vadd.f32 %v545_v63, %v14779_v58  ;;  %v547_v9 = vpop.f32.mrb[27].mxu1  ;;  %v14996_v18 = vld [vmem:[#allocation4 + $0x2c] ss:$16 sps:$4 sm:$0xff]  }
 0x16b   :  { %17505 = vst [vmem:[#allocation60_spill] sm:$0xff] %v14836_v15  ;;  %17508 = vst [vmem:[#allocation63_spill] sm:$0xff] %v14845_v61  ;;  %v14848_v2 = vadd.f32 %v474_v11, %v14776_v56  ;;  %v14854_v45 = vadd.f32 %v547_v9, %v14782_v59  ;;  %v14986_v61 = vld [vmem:[#allocation4] ss:$16 sps:$4 sm:$0xff]   ;;  %v14988_v15 = vld [vmem:[#allocation4 + $0x8] ss:$16 sps:$4 sm:$0xff]  }
 0x16c   :  { %17507 = vst [vmem:[#allocation62_spill] sm:$0xff] %v14842_v0  ;;  %17510 = vst [vmem:[#allocation65_spill] sm:$0xff] %v14851_v51  ;;  %v15030_v51 = vld [vmem:[#allocation4 + $0x68] ss:$16 sps:$4 sm:$0xff]   ;;  %v15034_v0 = vld [vmem:[#allocation4 + $0x84] ss:$16 sps:$4 sm:$0xff]  }
 0x16d   :  { %17509 = vst [vmem:[#allocation64_spill] sm:$0xff] %v14848_v2  ;;  %17511 = vst [vmem:[#allocation66_spill] sm:$0xff] %v14854_v45  ;;  %v15024_v45 = vld [vmem:[#allocation4 + $0x6c] ss:$16 sps:$4 sm:$0xff]   ;;  %v15028_v2 = vld [vmem:[#allocation4 + $0x60] ss:$16 sps:$4 sm:$0xff]  }
 0x16e   :  { %17521 = vst [vmem:[#allocation75_spill] sm:$0xff] %v15024_v45  ;;  %17522 = vst [vmem:[#allocation76_spill] sm:$0xff] %v15028_v2 }
 0x16f   :  { %v478_v21 = vpop.f32.mrb[28].mxu0  ;;  %v551_v35 = vpop.f32.mrb[28].mxu1  ;;  %17523 = vst [vmem:[#allocation77_spill] sm:$0xff] %v15030_v51  ;;  %17524 = vst [vmem:[#allocation78_spill] sm:$0xff] %v15034_v0 }
 0x170   :  { %v14857_v47 = vadd.f32 %v478_v21, %v14773_v54  ;;  %v480_v19 = vpop.f32.mrb[29].mxu0  ;;  %v14863_v11 = vadd.f32 %v551_v35, %v14779_v58  ;;  %v553_v31 = vpop.f32.mrb[29].mxu1  ;;  %v303_v21 = vadd.f32 %v14659_v24, %v14667_v26  ;;  %v378_v35 = vadd.f32 %v14682_v32, %v14675_v29 }
 0x171   :  { %v14860_v7 = vadd.f32 %v480_v19, %v14776_v56  ;;  %v482_v42 = vpop.f32.mrb[30].mxu0  ;;  %v14866_v34 = vadd.f32 %v553_v31, %v14782_v59  ;;  %v555_v9 = vpop.f32.mrb[30].mxu1  ;;  %v376_v19 = vadd.f32 %v14671_v28, %v14663_v25 }
 0x172   :  { %v484_v63 = vpop.f32.mrb[31].mxu0  ;;  %v557_v13 = vpop.f32.mrb[31].mxu1 }
 0x177   :  { %v908_v14 = vpop.f32.mrb[32].mxu0  ;;  %v949_v10 = vpop.f32.mrb[32].mxu1 }
 0x178   :  { %v956_v16 = vadd.f32 %v908_v14, %v303_v21  ;;  %v910_v38 = vpop.f32.mrb[33].mxu0  ;;  %v958_v31 = vadd.f32 %v949_v10, %v376_v19  ;;  %v951_v12 = vpop.f32.mrb[33].mxu1  ;;  %v558_v19 = vadd.f32 %v557_v13, %v14782_v59  ;;  %v14885_v59 = vld [vmem:[#allocation8 + $0x108] ss:$16 sps:$4 sm:$0xff]  }
 0x179   :  { %v957_v4 = vadd.f32 %v910_v38, %v305_v40  ;;  %v912_v49 = vpop.f32.mrb[34].mxu0  ;;  %v959_v5 = vadd.f32 %v951_v12, %v378_v35  ;;  %v953_v26 = vpop.f32.mrb[34].mxu1 }
 0x17a   :  { %v1242_v8 = vmul.f32 0.5, %v956_v16  ;;  %v913_v24 = vpop.f32.mrb[35].mxu0  ;;  %v954_v27 = vpop.f32.mrb[35].mxu1 }
 0x17b   :  { %v1246_v6 = vmul.f32 0.5, %v957_v4  ;;  %v1251_v25 = vmul.f32 0.5, %v959_v5  ;;  %v485_v5 = vadd.f32 %v484_v63, %v14776_v56 }
 0x17c   :  { %13976 = vtanh.f32 %v1242_v8  ;;  %v556_v8 = vadd.f32 %v555_v9, %v14779_v58  ;;  %v14883_v58 = vld [vmem:[#allocation8 + $0x100] ss:$16 sps:$4 sm:$0xff]   ;;  %v14889_v9 = vld [vmem:[#allocation8 + $0x124] ss:$16 sps:$4 sm:$0xff]  }
 0x17d   :  { %13978 = vtanh.f32 %v1246_v6  ;;  %v483_v6 = vadd.f32 %v482_v42, %v14773_v54 }
 0x17e   :  { %13980 = vtanh.f32 %v958_v31 }
 0x17f   :  { %13982 = vtanh.f32 %v1251_v25 }
 0x186   :  { %v13977_v28 = vpop.eup %13976 }
 0x187   :  { %v13979_v30 = vpop.eup %13978  ;;  %v1244_v29 = vadd.f32 1.0, %v13977_v28 }
 0x188   :  { %v1248_v32 = vadd.f32 1.0, %v13979_v30  ;;  %v13981_v10 = vpop.eup %13980 }
 0x189   :  { %v1245_v14 = vmul.f32 0.5, %v1244_v29  ;;  %v13983_v4 = vpop.eup %13982 }
 0x18a   :  { %v1249_v40 = vmul.f32 0.5, %v1248_v32  ;;  %v1253_v12 = vadd.f32 1.0, %v13983_v4  ;;  %v14903_v4 = vld [vmem:[#allocation8 + $0x144] ss:$16 sps:$4 sm:$0xff]  }
 0x18b   :  { %v1256_v38 = vmul.f32 %v13981_v10, %v1245_v14 }
 0x18c   :  { %v1255_v49 = vmul.f32 0.0, %v1249_v40  ;;  %v1254_v26 = vmul.f32 0.5, %v1253_v12  ;;  %v14891_v40 = vld [vmem:[#allocation8 + $0x12c] ss:$16 sps:$4 sm:$0xff]  }
 0x18d   :  { %v14905_v12 = vld [vmem:[#allocation8 + $0x14c] ss:$16 sps:$4 sm:$0xff]  }
 0x18e   :  { %v14876_v16 = vadd.f32 %v1256_v38, %v1255_v49  ;;  %v14897_v38 = vld [vmem:[#allocation8 + $0x120] ss:$16 sps:$4 sm:$0xff]   ;;  %v14899_v49 = vld [vmem:[#allocation8 + $0x128] ss:$16 sps:$4 sm:$0xff]  }
 0x190   :  { %13984 = vtanh.f32 %v14876_v16 }
 0x197   :  { %v1190_v21 = vpop.f32.mrb[36].mxu0  ;;  %v1231_v31 = vpop.f32.mrb[36].mxu1 }
 0x198   :  { %v1238_v35 = vadd.f32 %v1190_v21, %v483_v6  ;;  %v1192_v24 = vpop.f32.mrb[37].mxu0  ;;  %v1240_v27 = vadd.f32 %v1231_v31, %v556_v8  ;;  %v1233_v28 = vpop.f32.mrb[37].mxu1  ;;  %v17512_v6 = vmov 0   ;;  %v14911_v8 = vld [vmem:[#allocation8 + $0x140] ss:$16 sps:$4 sm:$0xff]  }
 0x199   :  { %v1239_v25 = vadd.f32 %v1192_v24, %v485_v5  ;;  %v1194_v30 = vpop.f32.mrb[38].mxu0  ;;  %v1241_v14 = vadd.f32 %v1233_v28, %v558_v19  ;;  %v1235_v54 = vpop.f32.mrb[38].mxu1  ;;  %v14913_v21 = vld [vmem:[#allocation8 + $0x148] ss:$16 sps:$4 sm:$0xff]   ;;  %v14917_v19 = vld [vmem:[#allocation8 + $0x164] ss:$16 sps:$4 sm:$0xff]  }
 0x19a   :  { %v13985_v29 = vpop.eup %13984  ;;  %v1260_v32 = vmul.f32 0.5, %v1238_v35  ;;  %v1195_v10 = vpop.f32.mrb[39].mxu0  ;;  %v14919_v35 = vld [vmem:[#allocation8 + $0x16c] ss:$16 sps:$4 sm:$0xff]   ;;  %v14925_v28 = vld [vmem:[#allocation8 + $0x168] ss:$16 sps:$4 sm:$0xff]  }
 0x19b   :  { %v1259_v42 = vmul.f32 %v13985_v29, %v1254_v26  ;;  %v1264_v56 = vmul.f32 0.5, %v1239_v25  ;;  %v1236_v63 = vpop.f32.mrb[39].mxu1  ;;  %v1269_v5 = vmul.f32 0.5, %v1241_v14  ;;  %v14923_v25 = vld [vmem:[#allocation8 + $0x160] ss:$16 sps:$4 sm:$0xff]  }
 0x19c   :  { %13986 = vtanh.f32 %v1260_v32  ;;  %v14929_v29 = vld [vmem:[#allocation8 + $0x184] ss:$16 sps:$4 sm:$0xff]   ;;  %v14931_v32 = vld [vmem:[#allocation8 + $0x18c] ss:$16 sps:$4 sm:$0xff]   ;;  %v14937_v63 = vld [vmem:[#allocation8 + $0x188] ss:$16 sps:$4 sm:$0xff]  }
 0x19d   :  { %v14887_v13 = vpack.c.bf16 %v1259_v42, %v1259_v42  ;;  %13988 = vtanh.f32 %v1264_v56  ;;  %v14935_v56 = vld [vmem:[#allocation8 + $0x180] ss:$16 sps:$4 sm:$0xff]  }
 0x19e   :  { %13990 = vtanh.f32 %v1240_v27 }
 0x19f   :  { %1509 = vmatmul.mubr.bf16.vlgmr.msra.gmra.mrb[40].mxu0 %v14887_v13  ;;  %1550 = vmatmul.mubr.bf16.vlgmr.msra.gmra.mrb[40].mxu1 %v14887_v13  ;;  %13992 = vtanh.f32 %v1269_v5  ;;  %v14941_v5 = vld [vmem:[#allocation8 + $0x1a4] ss:$16 sps:$4 sm:$0xff]  }
 0x1a0   :  { %1763 = vmatpush1.bf16.msra.mxu0 %v14883_v58  ;;  %1804 = vmatpush1.bf16.msra.mxu1 %v14885_v59 }
 0x1a1   :  { %1764 = vmatprep.subr.bf16.mxu0 %v14889_v9  ;;  %1805 = vmatprep.subr.bf16.mxu1 %v14891_v40 }
 0x1a2   :  { %1794 = vmatprep.mubr.bf16.mxu0 %v17512_v6  ;;  %1835 = vmatprep.mubr.bf16.mxu1 %v17512_v6 }
 0x1a4   :  { %1765 = vmatpush1.bf16.msra.mxu0 %v14897_v38  ;;  %1806 = vmatpush1.bf16.msra.mxu1 %v14899_v49 }
 0x1a5   :  { %1766 = vmatprep.subr.bf16.mxu0 %v14903_v4  ;;  %1807 = vmatprep.subr.bf16.mxu1 %v14905_v12 }
 0x1a6   :  { %v13987_v31 = vpop.eup %13986 }
 0x1a7   :  { %v13989_v24 = vpop.eup %13988  ;;  %v1262_v26 = vadd.f32 1.0, %v13987_v31  ;;  %v14943_v31 = vld [vmem:[#allocation8 + $0x1ac] ss:$16 sps:$4 sm:$0xff]  }
 0x1a8   :  { %v1266_v27 = vadd.f32 1.0, %v13989_v24  ;;  %1767 = vmatpush1.bf16.msra.mxu0 %v14911_v8  ;;  %1808 = vmatpush1.bf16.msra.mxu1 %v14913_v21  ;;  %v13991_v14 = vpop.eup %13990 }
 0x1a9   :  { %v1263_v30 = vmul.f32 0.5, %v1262_v26  ;;  %1768 = vmatprep.subr.bf16.mxu0 %v14917_v19  ;;  %1809 = vmatprep.subr.bf16.mxu1 %v14919_v35  ;;  %v14950_v26 = vld [vmem:[#allocation8 + $0x1a0] ss:$16 sps:$4 sm:$0xff]  }
 0x1aa   :  { %v1267_v10 = vmul.f32 0.5, %v1266_v27  ;;  %v14952_v27 = vld [vmem:[#allocation8 + $0x1a8] ss:$16 sps:$4 sm:$0xff]  }
 0x1ab   :  { %v1274_v54 = vmul.f32 %v13991_v14, %v1263_v30  ;;  %v14956_v30 = vld [vmem:[#allocation8 + $0x1c4] ss:$16 sps:$4 sm:$0xff]   ;;  %v14958_v14 = vld [vmem:[#allocation8 + $0x1cc] ss:$16 sps:$4 sm:$0xff]  }
 0x1ac   :  { %v1273_v42 = vmul.f32 0.0, %v1267_v10  ;;  %1769 = vmatpush1.bf16.msra.mxu0 %v14923_v25  ;;  %1810 = vmatpush1.bf16.msra.mxu1 %v14925_v28  ;;  %v13993_v10 = vpop.eup %13992 }
 0x1ad   :  { %1770 = vmatprep.subr.bf16.mxu0 %v14929_v29  ;;  %1811 = vmatprep.subr.bf16.mxu1 %v14931_v32  ;;  %v1271_v1 = vadd.f32 1.0, %v13993_v10  ;;  %v14980_v10 = vld [vmem:[#allocation4 + $0x4] ss:$16 sps:$4 sm:$0xff]  }
 0x1ae   :  { %v14945_v24 = vadd.f32 %v1274_v54, %v1273_v42  ;;  %v14962_v54 = vld [vmem:[#allocation8 + $0x1c0] ss:$16 sps:$4 sm:$0xff]   ;;  %v14964_v42 = vld [vmem:[#allocation8 + $0x1c8] ss:$16 sps:$4 sm:$0xff]  }
 0x1af   :  { %v1272_v3 = vmul.f32 0.5, %v1271_v1  ;;  %v14994_v1 = vld [vmem:[#allocation4 + $0x24] ss:$16 sps:$4 sm:$0xff]  }
 0x1b0   :  { %13994 = vtanh.f32 %v14945_v24  ;;  %1771 = vmatpush1.bf16.msra.mxu0 %v14935_v56  ;;  %1812 = vmatpush1.bf16.msra.mxu1 %v14937_v63 }
 0x1b1   :  { %1772 = vmatprep.subr.bf16.mxu0 %v14941_v5  ;;  %1813 = vmatprep.subr.bf16.mxu1 %v14943_v31 }
 0x1b4   :  { %1773 = vmatpush1.bf16.msra.mxu0 %v14950_v26  ;;  %1814 = vmatpush1.bf16.msra.mxu1 %v14952_v27 }
 0x1b5   :  { %1774 = vmatprep.subr.bf16.mxu0 %v14956_v30  ;;  %1815 = vmatprep.subr.bf16.mxu1 %v14958_v14 }
 0x1b8   :  { %1775 = vmatpush1.bf16.msra.mxu0 %v14962_v54  ;;  %1816 = vmatpush1.bf16.msra.mxu1 %v14964_v42 }
 0x1b9   :  { %1776 = vmatprep.subr.bf16.mxu0 %v14968_v20  ;;  %1817 = vmatprep.subr.bf16.mxu1 %v14970_v43 }
 0x1ba   :  { %v13995_v62 = vpop.eup %13994 }
 0x1bb   :  { %v1277_v57 = vmul.f32 %v13995_v62, %v1272_v3  ;;  %v15002_v62 = vld [vmem:[#allocation4 + $0x20] ss:$16 sps:$4 sm:$0xff]   ;;  %v15008_v3 = vld [vmem:[#allocation4 + $0x44] ss:$16 sps:$4 sm:$0xff]  }
 0x1bc   :  { %1777 = vmatpush1.bf16.msra.mxu0 %v14974_v22  ;;  %1818 = vmatpush1.bf16.msra.mxu1 %v14976_v17  ;;  %17514 = vst [vmem:[#allocation68_spill] sm:$0xff] %v15002_v62  ;;  %17516 = vst [vmem:[#allocation70_spill] sm:$0xff] %v15008_v3 }
 0x1bd   :  { %v14990_v23 = vpack.c.bf16 %v1277_v57, %v1277_v57  ;;  %2048 = vmatprep.subr.bf16.mxu0 %v14980_v10  ;;  %2089 = vmatprep.subr.bf16.mxu1 %v14982_v60  ;;  %v15004_v57 = vld [vmem:[#allocation4 + $0x28] ss:$16 sps:$4 sm:$0xff]  }
 0x1be   :  { %17515 = vst [vmem:[#allocation69_spill] sm:$0xff] %v15004_v57 }
 0x1bf   :  { %17513 = vst [vmem:[#allocation67_spill] sm:$0xff] %v14990_v23  ;;  %1795 = vmatmul.mubr.bf16.vlgmr.msra.gmra.mrb[44].mxu0 %v14990_v23  ;;  %1836 = vmatmul.mubr.bf16.vlgmr.msra.gmra.mrb[44].mxu1 %v14990_v23 }
 0x1c0   :  { %2049 = vmatpush1.bf16.msra.mxu0 %v14986_v61  ;;  %2090 = vmatpush1.bf16.msra.mxu1 %v14988_v15 }
 0x1c1   :  { %2050 = vmatprep.subr.bf16.mxu0 %v14994_v1  ;;  %2091 = vmatprep.subr.bf16.mxu1 %v14996_v18 }
 0x1c2   :  { %2080 = vmatprep.mubr.bf16.mxu0 %v17512_v6  ;;  %2121 = vmatprep.mubr.bf16.mxu1 %v17512_v6 }
 0x1c4   :  { %2051 = vmatpush1.bf16.msra.mxu0 %v15002_v62  ;;  %2092 = vmatpush1.bf16.msra.mxu1 %v15004_v57 }
 0x1c5   :  { %2052 = vmatprep.subr.bf16.mxu0 %v15008_v3  ;;  %2093 = vmatprep.subr.bf16.mxu1 %v15010_v55 }
 0x1c8   :  { %2053 = vmatpush1.bf16.msra.mxu0 %v15016_v52  ;;  %2094 = vmatpush1.bf16.msra.mxu1 %v15018_v53 }
 0x1c9   :  { %2054 = vmatprep.subr.bf16.mxu0 %v15022_v48  ;;  %2095 = vmatprep.subr.bf16.mxu1 %v15024_v45  ;;  %v15048_v48 = vld [vmem:[#allocation4 + $0xac] ss:$16 sps:$4 sm:$0xff]   ;;  %v15052_v45 = vld [vmem:[#allocation4 + $0xa0] ss:$16 sps:$4 sm:$0xff]  }
 0x1ca   :  { %17529 = vst [vmem:[#allocation83_spill] sm:$0xff] %v15048_v48  ;;  %17530 = vst [vmem:[#allocation84_spill] sm:$0xff] %v15052_v45 }
 0x1cc   :  { %2055 = vmatpush1.bf16.msra.mxu0 %v15028_v2  ;;  %2096 = vmatpush1.bf16.msra.mxu1 %v15030_v51  ;;  %v15054_v2 = vld [vmem:[#allocation4 + $0xa8] ss:$16 sps:$4 sm:$0xff]   ;;  %v15058_v51 = vld [vmem:[#allocation4 + $0xc4] ss:$16 sps:$4 sm:$0xff]  }
 0x1cd   :  { %2056 = vmatprep.subr.bf16.mxu0 %v15034_v0  ;;  %2097 = vmatprep.subr.bf16.mxu1 %v15036_v50  ;;  %17531 = vst [vmem:[#allocation85_spill] sm:$0xff] %v15054_v2  ;;  %17532 = vst [vmem:[#allocation86_spill] sm:$0xff] %v15058_v51  ;;  %v15060_v0 = vld [vmem:[#allocation4 + $0xcc] ss:$16 sps:$4 sm:$0xff]   ;;  %v15064_v50 = vld [vmem:[#allocation4 + $0xc0] ss:$16 sps:$4 sm:$0xff]  }
 0x1ce   :  { %17533 = vst [vmem:[#allocation87_spill] sm:$0xff] %v15060_v0  ;;  %17534 = vst [vmem:[#allocation88_spill] sm:$0xff] %v15064_v50 }
 0x1d0   :  { %2057 = vmatpush1.bf16.msra.mxu0 %v15040_v44  ;;  %2098 = vmatpush1.bf16.msra.mxu1 %v15042_v46  ;;  %v15066_v44 = vld [vmem:[#allocation4 + $0xc8] ss:$16 sps:$4 sm:$0xff]   ;;  %v15070_v46 = vld [vmem:[#allocation4 + $0xe4] ss:$16 sps:$4 sm:$0xff]  }
 0x1d1   :  { %2058 = vmatprep.subr.bf16.mxu0 %v15046_v41  ;;  %2099 = vmatprep.subr.bf16.mxu1 %v15048_v48  ;;  %17535 = vst [vmem:[#allocation89_spill] sm:$0xff] %v15066_v44  ;;  %17536 = vst [vmem:[#allocation90_spill] sm:$0xff] %v15070_v46  ;;  %v15072_v41 = vld [vmem:[#allocation4 + $0xec] ss:$16 sps:$4 sm:$0xff]   ;;  %v15076_v48 = vld [vmem:[#allocation4 + $0xe0] ss:$16 sps:$4 sm:$0xff]  }
 0x1d2   :  { %17537 = vst [vmem:[#allocation91_spill] sm:$0xff] %v15072_v41  ;;  %17538 = vst [vmem:[#allocation92_spill] sm:$0xff] %v15076_v48 }
 0x1d4   :  { %2059 = vmatpush1.bf16.msra.mxu0 %v15052_v45  ;;  %2100 = vmatpush1.bf16.msra.mxu1 %v15054_v2  ;;  %v15078_v45 = vld [vmem:[#allocation4 + $0xe8] ss:$16 sps:$4 sm:$0xff]   ;;  %v15082_v2 = vld [vmem:[#allocation6 + $0x4] ss:$16 sps:$4 sm:$0xff]  }
 0x1d5   :  { %2060 = vmatprep.subr.bf16.mxu0 %v15058_v51  ;;  %2101 = vmatprep.subr.bf16.mxu1 %v15060_v0  ;;  %17539 = vst [vmem:[#allocation93_spill] sm:$0xff] %v15078_v45  ;;  %17540 = vst [vmem:[#allocation94_spill] sm:$0xff] %v15082_v2  ;;  %v15084_v51 = vld [vmem:[#allocation6 + $0xc] ss:$16 sps:$4 sm:$0xff]   ;;  %v15088_v0 = vld [vmem:[#allocation6] ss:$16 sps:$4 sm:$0xff]  }
 0x1d6   :  { %17541 = vst [vmem:[#allocation95_spill] sm:$0xff] %v15084_v51  ;;  %17542 = vst [vmem:[#allocation96_spill] sm:$0xff] %v15088_v0 }
 0x1d8   :  { %2061 = vmatpush1.bf16.msra.mxu0 %v15064_v50  ;;  %2102 = vmatpush1.bf16.msra.mxu1 %v15066_v44  ;;  %v15090_v50 = vld [vmem:[#allocation6 + $0x8] ss:$16 sps:$4 sm:$0xff]   ;;  %v15094_v44 = vld [vmem:[#allocation6 + $0x24] ss:$16 sps:$4 sm:$0xff]  }
 0x1d9   :  { %2062 = vmatprep.subr.bf16.mxu0 %v15070_v46  ;;  %2103 = vmatprep.subr.bf16.mxu1 %v15072_v41  ;;  %17543 = vst [vmem:[#allocation97_spill] sm:$0xff] %v15090_v50  ;;  %17544 = vst [vmem:[#allocation98_spill] sm:$0xff] %v15094_v44  ;;  %v15096_v46 = vld [vmem:[#allocation6 + $0x2c] ss:$16 sps:$4 sm:$0xff]   ;;  %v14240_v41 = vld [vmem:[#allocation8 + $0x84] ss:$16 sps:$4 sm:$0xff]  }
 0x1da   :  { %17545 = vst [vmem:[#allocation99_spill] sm:$0xff] %v15096_v46 }
 0x1dc   :  { %2063 = vmatpush1.bf16.msra.mxu0 %v15076_v48  ;;  %2104 = vmatpush1.bf16.msra.mxu1 %v15078_v45  ;;  %v15102_v45 = vld [vmem:[#allocation6 + $0x20] ss:$16 sps:$4 sm:$0xff]   ;;  %v15104_v48 = vld [vmem:[#allocation6 + $0x28] ss:$16 sps:$4 sm:$0xff]  }
 0x1dd   :  { %2330 = vmatprep.subr.bf16.mxu0 %v15082_v2  ;;  %2371 = vmatprep.subr.bf16.mxu1 %v15084_v51  ;;  %17546 = vst [vmem:[#allocation100_spill] sm:$0xff] %v15102_v45  ;;  %17547 = vst [vmem:[#allocation101_spill] sm:$0xff] %v15104_v48  ;;  %v15108_v51 = vld [vmem:[#allocation6 + $0x44] ss:$16 sps:$4 sm:$0xff]   ;;  %v15110_v2 = vld [vmem:[#allocation6 + $0x4c] ss:$16 sps:$4 sm:$0xff]  }
 0x1de   :  { %17548 = vst [vmem:[#allocation102_spill] sm:$0xff] %v15108_v51  ;;  %17549 = vst [vmem:[#allocation103_spill] sm:$0xff] %v15110_v2 }
 0x1df   :  { %2081 = vmatmul.mubr.bf16.vlgmr.msra.gmra.mrb[48].mxu0 %v14887_v13  ;;  %2122 = vmatmul.mubr.bf16.vlgmr.msra.gmra.mrb[48].mxu1 %v14887_v13  ;;  %v15116_v13 = vld [vmem:[#allocation6 + $0x40] ss:$16 sps:$4 sm:$0xff]  }
 0x1e0   :  { %2331 = vmatpush1.bf16.msra.mxu0 %v15088_v0  ;;  %2372 = vmatpush1.bf16.msra.mxu1 %v15090_v50  ;;  %17550 = vst [vmem:[#allocation104_spill] sm:$0xff] %v15116_v13  ;;  %v15118_v50 = vld [vmem:[#allocation6 + $0x48] ss:$16 sps:$4 sm:$0xff]   ;;  %v15128_v0 = vld [vmem:[#allocation6 + $0x60] ss:$16 sps:$4 sm:$0xff]  }
 0x1e1   :  { %2332 = vmatprep.subr.bf16.mxu0 %v15094_v44  ;;  %2373 = vmatprep.subr.bf16.mxu1 %v15096_v46  ;;  %17551 = vst [vmem:[#allocation105_spill] sm:$0xff] %v15118_v50  ;;  %v15122_v46 = vld [vmem:[#allocation6 + $0x64] ss:$16 sps:$4 sm:$0xff]   ;;  %v15124_v44 = vld [vmem:[#allocation6 + $0x6c] ss:$16 sps:$4 sm:$0xff]   ;;  %17554 = vst [vmem:[#allocation108_spill] sm:$0xff] %v15128_v0 }
 0x1e2   :  { %2362 = vmatprep.mubr.bf16.mxu0 %v17512_v6  ;;  %2403 = vmatprep.mubr.bf16.mxu1 %v17512_v6  ;;  %17552 = vst [vmem:[#allocation106_spill] sm:$0xff] %v15122_v46  ;;  %17553 = vst [vmem:[#allocation107_spill] sm:$0xff] %v15124_v44 }
 0x1e4   :  { %2333 = vmatpush1.bf16.msra.mxu0 %v15102_v45  ;;  %2374 = vmatpush1.bf16.msra.mxu1 %v15104_v48  ;;  %v15130_v45 = vld [vmem:[#allocation6 + $0x68] ss:$16 sps:$4 sm:$0xff]   ;;  %v15134_v48 = vld [vmem:[#allocation6 + $0x84] ss:$16 sps:$4 sm:$0xff]  }
 0x1e5   :  { %2334 = vmatprep.subr.bf16.mxu0 %v15108_v51  ;;  %2375 = vmatprep.subr.bf16.mxu1 %v15110_v2  ;;  %17555 = vst [vmem:[#allocation109_spill] sm:$0xff] %v15130_v45  ;;  %17556 = vst [vmem:[#allocation110_spill] sm:$0xff] %v15134_v48  ;;  %v15136_v51 = vld [vmem:[#allocation6 + $0x8c] ss:$16 sps:$4 sm:$0xff]   ;;  %v15140_v2 = vld [vmem:[#allocation6 + $0x80] ss:$16 sps:$4 sm:$0xff]  }
 0x1e6   :  { %17557 = vst [vmem:[#allocation111_spill] sm:$0xff] %v15136_v51  ;;  %17558 = vst [vmem:[#allocation112_spill] sm:$0xff] %v15140_v2 }
 0x1e8   :  { %2335 = vmatpush1.bf16.msra.mxu0 %v15116_v13  ;;  %2376 = vmatpush1.bf16.msra.mxu1 %v15118_v50  ;;  %v15142_v13 = vld [vmem:[#allocation6 + $0x88] ss:$16 sps:$4 sm:$0xff]   ;;  %v15146_v50 = vld [vmem:[#allocation6 + $0xa4] ss:$16 sps:$4 sm:$0xff]  }
 0x1e9   :  { %2336 = vmatprep.subr.bf16.mxu0 %v15122_v46  ;;  %2377 = vmatprep.subr.bf16.mxu1 %v15124_v44  ;;  %17559 = vst [vmem:[#allocation113_spill] sm:$0xff] %v15142_v13  ;;  %17560 = vst [vmem:[#allocation114_spill] sm:$0xff] %v15146_v50  ;;  %v15148_v46 = vld [vmem:[#allocation6 + $0xac] ss:$16 sps:$4 sm:$0xff]   ;;  %v15152_v44 = vld [vmem:[#allocation6 + $0xa0] ss:$16 sps:$4 sm:$0xff]  }
 0x1ea   :  { %17561 = vst [vmem:[#allocation115_spill] sm:$0xff] %v15148_v46  ;;  %17562 = vst [vmem:[#allocation116_spill] sm:$0xff] %v15152_v44 }
 0x1ec   :  { %2337 = vmatpush1.bf16.msra.mxu0 %v15128_v0  ;;  %2378 = vmatpush1.bf16.msra.mxu1 %v15130_v45  ;;  %v15154_v0 = vld [vmem:[#allocation6 + $0xa8] ss:$16 sps:$4 sm:$0xff]   ;;  %v15158_v45 = vld [vmem:[#allocation6 + $0xc4] ss:$16 sps:$4 sm:$0xff]  }
 0x1ed   :  { %2338 = vmatprep.subr.bf16.mxu0 %v15134_v48  ;;  %2379 = vmatprep.subr.bf16.mxu1 %v15136_v51  ;;  %17563 = vst [vmem:[#allocation117_spill] sm:$0xff] %v15154_v0  ;;  %17564 = vst [vmem:[#allocation118_spill] sm:$0xff] %v15158_v45  ;;  %v15160_v48 = vld [vmem:[#allocation6 + $0xcc] ss:$16 sps:$4 sm:$0xff]   ;;  %v15164_v51 = vld [vmem:[#allocation6 + $0xc0] ss:$16 sps:$4 sm:$0xff]  }
 0x1ee   :  { %17565 = vst [vmem:[#allocation119_spill] sm:$0xff] %v15160_v48  ;;  %17566 = vst [vmem:[#allocation120_spill] sm:$0xff] %v15164_v51 }
 0x1f0   :  { %2339 = vmatpush1.bf16.msra.mxu0 %v15140_v2  ;;  %2380 = vmatpush1.bf16.msra.mxu1 %v15142_v13  ;;  %v15166_v2 = vld [vmem:[#allocation6 + $0xc8] ss:$16 sps:$4 sm:$0xff]   ;;  %v15170_v13 = vld [vmem:[#allocation6 + $0xe4] ss:$16 sps:$4 sm:$0xff]  }
 0x1f1   :  { %2340 = vmatprep.subr.bf16.mxu0 %v15146_v50  ;;  %2381 = vmatprep.subr.bf16.mxu1 %v15148_v46  ;;  %17567 = vst [vmem:[#allocation121_spill] sm:$0xff] %v15166_v2  ;;  %17568 = vst [vmem:[#allocation122_spill] sm:$0xff] %v15170_v13  ;;  %v15172_v50 = vld [vmem:[#allocation6 + $0xec] ss:$16 sps:$4 sm:$0xff]   ;;  %v15176_v46 = vld [vmem:[#allocation6 + $0xe0] ss:$16 sps:$4 sm:$0xff]  }
 0x1f2   :  { %17569 = vst [vmem:[#allocation123_spill] sm:$0xff] %v15172_v50  ;;  %17570 = vst [vmem:[#allocation124_spill] sm:$0xff] %v15176_v46 }
 0x1f4   :  { %2341 = vmatpush1.bf16.msra.mxu0 %v15152_v44  ;;  %2382 = vmatpush1.bf16.msra.mxu1 %v15154_v0  ;;  %v15178_v44 = vld [vmem:[#allocation6 + $0xe8] ss:$16 sps:$4 sm:$0xff]   ;;  %v14228_v0 = vld [vmem:[#allocation8 + $0x24] ss:$16 sps:$4 sm:$0xff]  }
 0x1f5   :  { %2342 = vmatprep.subr.bf16.mxu0 %v15158_v45  ;;  %2383 = vmatprep.subr.bf16.mxu1 %v15160_v48  ;;  %17571 = vst [vmem:[#allocation125_spill] sm:$0xff] %v15178_v44  ;;  %v14224_v48 = vld [vmem:[#allocation8 + $0x4] ss:$16 sps:$4 sm:$0xff]   ;;  %v14225_v45 = vld [vmem:[#allocation8 + $0xc] ss:$16 sps:$4 sm:$0xff]  }
 0x1f8   :  { %2343 = vmatpush1.bf16.msra.mxu0 %v15164_v51  ;;  %2384 = vmatpush1.bf16.msra.mxu1 %v15166_v2  ;;  %v14226_v2 = vld [vmem:[#allocation8] ss:$16 sps:$4 sm:$0xff]   ;;  %v14227_v51 = vld [vmem:[#allocation8 + $0x8] ss:$16 sps:$4 sm:$0xff]  }
 0x1f9   :  { %2344 = vmatprep.subr.bf16.mxu0 %v15170_v13  ;;  %2385 = vmatprep.subr.bf16.mxu1 %v15172_v50  ;;  %v14229_v13 = vld [vmem:[#allocation8 + $0x2c] ss:$16 sps:$4 sm:$0xff]   ;;  %v14239_v50 = vld [vmem:[#allocation8 + $0x68] ss:$16 sps:$4 sm:$0xff]  }
 0x1fc   :  { %2345 = vmatpush1.bf16.msra.mxu0 %v15176_v46  ;;  %2386 = vmatpush1.bf16.msra.mxu1 %v15178_v44  ;;  %v14230_v44 = vld [vmem:[#allocation8 + $0x20] ss:$16 sps:$4 sm:$0xff]   ;;  %v14233_v46 = vld [vmem:[#allocation8 + $0x4c] ss:$16 sps:$4 sm:$0xff]  }
 0x1fd   :  { %2650 = vmatprep.subr.bf16.mxu0 %v14224_v48  ;;  %2691 = vmatprep.subr.bf16.mxu1 %v14225_v45  ;;  %v14231_v48 = vld [vmem:[#allocation8 + $0x28] ss:$16 sps:$4 sm:$0xff]   ;;  %v14232_v45 = vld [vmem:[#allocation8 + $0x44] ss:$16 sps:$4 sm:$0xff]  }
 0x1ff   :  { %2363 = vmatmul.mubr.bf16.vlgmr.msra.gmra.mrb[52].mxu0 %v14990_v23  ;;  %2404 = vmatmul.mubr.bf16.vlgmr.msra.gmra.mrb[52].mxu1 %v14990_v23  ;;  %v14234_v23 = vld [vmem:[#allocation8 + $0x40] ss:$16 sps:$4 sm:$0xff]  }
 0x200   :  { %2651 = vmatpush1.bf16.msra.mxu0 %v14226_v2  ;;  %2692 = vmatpush1.bf16.msra.mxu1 %v14227_v51  ;;  %v14235_v2 = vld [vmem:[#allocation8 + $0x48] ss:$16 sps:$4 sm:$0xff]   ;;  %v14236_v51 = vld [vmem:[#allocation8 + $0x64] ss:$16 sps:$4 sm:$0xff]  }
 0x201   :  { %2652 = vmatprep.subr.bf16.mxu0 %v14228_v0  ;;  %2693 = vmatprep.subr.bf16.mxu1 %v14229_v13  ;;  %v14237_v0 = vld [vmem:[#allocation8 + $0x6c] ss:$16 sps:$4 sm:$0xff]   ;;  %v14238_v13 = vld [vmem:[#allocation8 + $0x60] ss:$16 sps:$4 sm:$0xff]  }
 0x202   :  { %2682 = vmatprep.mubr.bf16.mxu0 %v17512_v6  ;;  %2723 = vmatprep.mubr.bf16.mxu1 %v17512_v6 }
 0x204   :  { %2653 = vmatpush1.bf16.msra.mxu0 %v14230_v44  ;;  %2694 = vmatpush1.bf16.msra.mxu1 %v14231_v48  ;;  %v14241_v44 = vld [vmem:[#allocation8 + $0x8c] ss:$16 sps:$4 sm:$0xff]   ;;  %v14242_v48 = vld [vmem:[#allocation8 + $0x80] ss:$16 sps:$4 sm:$0xff]  }
 0x205   :  { %2654 = vmatprep.subr.bf16.mxu0 %v14232_v45  ;;  %2695 = vmatprep.subr.bf16.mxu1 %v14233_v46  ;;  %v14243_v45 = vld [vmem:[#allocation8 + $0x88] ss:$16 sps:$4 sm:$0xff]   ;;  %v14244_v46 = vld [vmem:[#allocation8 + $0xa4] ss:$16 sps:$4 sm:$0xff]  }
 0x208   :  { %2655 = vmatpush1.bf16.msra.mxu0 %v14234_v23  ;;  %2696 = vmatpush1.bf16.msra.mxu1 %v14235_v2  ;;  %v14245_v23 = vld [vmem:[#allocation8 + $0xac] ss:$16 sps:$4 sm:$0xff]   ;;  %v14246_v2 = vld [vmem:[#allocation8 + $0xa0] ss:$16 sps:$4 sm:$0xff]  }
 0x209   :  { %2656 = vmatprep.subr.bf16.mxu0 %v14236_v51  ;;  %2697 = vmatprep.subr.bf16.mxu1 %v14237_v0  ;;  %v14247_v51 = vld [vmem:[#allocation8 + $0xa8] ss:$16 sps:$4 sm:$0xff]   ;;  %v14248_v0 = vld [vmem:[#allocation8 + $0xc4] ss:$16 sps:$4 sm:$0xff]  }
 0x20c   :  { %2657 = vmatpush1.bf16.msra.mxu0 %v14238_v13  ;;  %2698 = vmatpush1.bf16.msra.mxu1 %v14239_v50  ;;  %v14249_v13 = vld [vmem:[#allocation8 + $0xcc] ss:$16 sps:$4 sm:$0xff]   ;;  %v14250_v50 = vld [vmem:[#allocation8 + $0xc0] ss:$16 sps:$4 sm:$0xff]  }
 0x20d   :  { %2658 = vmatprep.subr.bf16.mxu0 %v14240_v41  ;;  %2699 = vmatprep.subr.bf16.mxu1 %v14241_v44  ;;  %v14251_v41 = vld [vmem:[#allocation8 + $0xc8] ss:$16 sps:$4 sm:$0xff]   ;;  %v14252_v44 = vld [vmem:[#allocation8 + $0xe4] ss:$16 sps:$4 sm:$0xff]  }
 0x210   :  { %2659 = vmatpush1.bf16.msra.mxu0 %v14242_v48  ;;  %2700 = vmatpush1.bf16.msra.mxu1 %v14243_v45  ;;  %v14253_v48 = vld [vmem:[#allocation8 + $0xec] ss:$16 sps:$4 sm:$0xff]   ;;  %v14254_v45 = vld [vmem:[#allocation8 + $0xe0] ss:$16 sps:$4 sm:$0xff]  }
 0x211   :  { %2660 = vmatprep.subr.bf16.mxu0 %v14244_v46  ;;  %2701 = vmatprep.subr.bf16.mxu1 %v14245_v23  ;;  %v14255_v46 = vld [vmem:[#allocation8 + $0xe8] ss:$16 sps:$4 sm:$0xff]   ;;  %v14256_v23 = vld [vmem:[#allocation8 + $0x104] ss:$16 sps:$4 sm:$0xff]  }
 0x214   :  { %2661 = vmatpush1.bf16.msra.mxu0 %v14246_v2  ;;  %2702 = vmatpush1.bf16.msra.mxu1 %v14247_v51  ;;  %v14257_v2 = vld [vmem:[#allocation8 + $0x10c] ss:$16 sps:$4 sm:$0xff]  }
 0x215   :  { %2662 = vmatprep.subr.bf16.mxu0 %v14248_v0  ;;  %2703 = vmatprep.subr.bf16.mxu1 %v14249_v13 }
 0x218   :  { %2663 = vmatpush1.bf16.msra.mxu0 %v14250_v50  ;;  %2704 = vmatpush1.bf16.msra.mxu1 %v14251_v41 }
 0x219   :  { %2664 = vmatprep.subr.bf16.mxu0 %v14252_v44  ;;  %2705 = vmatprep.subr.bf16.mxu1 %v14253_v48 }
 0x21c   :  { %2665 = vmatpush1.bf16.msra.mxu0 %v14254_v45  ;;  %2706 = vmatpush1.bf16.msra.mxu1 %v14255_v46 }
 0x21d   :  { %2936 = vmatprep.subr.bf16.mxu0 %v14256_v23  ;;  %2977 = vmatprep.subr.bf16.mxu1 %v14257_v2 }
 0x2b2   :  { %v2082_v51 = vpop.f32.mrb[48].mxu0  ;;  %v2123_v0 = vpop.f32.mrb[48].mxu1 }
 0x2b3   :  { %v2130_v13 = vadd.f32 %v2082_v51, %v14685_v33  ;;  %v2132_v50 = vadd.f32 %v2123_v0, %v14691_v37  ;;  %v2084_v53 = vpop.f32.mrb[49].mxu0  ;;  %v2125_v41 = vpop.f32.mrb[49].mxu1 }
 0x2b4   :  { %v2131_v44 = vadd.f32 %v2084_v53, %v14688_v36  ;;  %v2133_v48 = vadd.f32 %v2125_v41, %v14694_v39  ;;  %v2086_v52 = vpop.f32.mrb[50].mxu0  ;;  %v2127_v45 = vpop.f32.mrb[50].mxu1 }
 0x2b5   :  { %v2416_v55 = vmul.f32 0.5, %v2130_v13  ;;  %v2087_v46 = vpop.f32.mrb[51].mxu0  ;;  %v2128_v3 = vpop.f32.mrb[51].mxu1 }
 0x2b6   :  { %v2420_v23 = vmul.f32 0.5, %v2131_v44  ;;  %v2425_v2 = vmul.f32 0.5, %v2133_v48 }
 0x2b7   :  { %13996 = vtanh.f32 %v2416_v55 }
 0x2b8   :  { %13998 = vtanh.f32 %v2420_v23 }
 0x2b9   :  { %14000 = vtanh.f32 %v2132_v50 }
 0x2ba   :  { %14002 = vtanh.f32 %v2425_v2 }
 0x2c1   :  { %v13997_v57 = vpop.eup %13996 }
 0x2c2   :  { %v13999_v33 = vpop.eup %13998  ;;  %v2418_v51 = vadd.f32 1.0, %v13997_v57 }
 0x2c3   :  { %v2422_v37 = vadd.f32 1.0, %v13999_v33  ;;  %v14001_v62 = vpop.eup %14000 }
 0x2c4   :  { %v2419_v0 = vmul.f32 0.5, %v2418_v51  ;;  %v14003_v3 = vpop.eup %14002 }
 0x2c5   :  { %v2423_v36 = vmul.f32 0.5, %v2422_v37  ;;  %v2427_v55 = vadd.f32 1.0, %v14003_v3  ;;  %v17597_v3 = vld [vmem:[#allocation93_spill] sm:$0xff] }
 0x2c6   :  { %v2430_v53 = vmul.f32 %v14001_v62, %v2419_v0 }
 0x2c7   :  { %v2429_v39 = vmul.f32 %v2423_v36, %v14876_v16  ;;  %v2428_v45 = vmul.f32 0.5, %v2427_v55  ;;  %v17598_v55 = vld [vmem:[#allocation94_spill] sm:$0xff] }
 0x2c9   :  { %v15193_v52 = vadd.f32 %v2430_v53, %v2429_v39  ;;  %v17596_v39 = vld [vmem:[#allocation92_spill] sm:$0xff] }
 0x2cb   :  { %14004 = vtanh.f32 %v15193_v52 }
 0x2d2   :  { %v2364_v13 = vpop.f32.mrb[52].mxu0  ;;  %v2405_v50 = vpop.f32.mrb[52].mxu1 }
 0x2d3   :  { %v2412_v41 = vadd.f32 %v2364_v13, %v14857_v47  ;;  %v2414_v57 = vadd.f32 %v2405_v50, %v14863_v11  ;;  %v2366_v44 = vpop.f32.mrb[53].mxu0  ;;  %v2407_v48 = vpop.f32.mrb[53].mxu1  ;;  %v17599_v13 = vld [vmem:[#allocation95_spill] sm:$0xff]  ;;  %v17600_v50 = vld [vmem:[#allocation96_spill] sm:$0xff] }
 0x2d4   :  { %v2413_v46 = vadd.f32 %v2366_v44, %v14860_v7  ;;  %v2415_v62 = vadd.f32 %v2407_v48, %v14866_v34  ;;  %v2368_v16 = vpop.f32.mrb[54].mxu0  ;;  %v2409_v23 = vpop.f32.mrb[54].mxu1  ;;  %v17603_v44 = vld [vmem:[#allocation99_spill] sm:$0xff]  ;;  %v17604_v48 = vld [vmem:[#allocation100_spill] sm:$0xff] }
 0x2d5   :  { %v14005_v2 = vpop.eup %14004  ;;  %v2434_v33 = vmul.f32 0.5, %v2412_v41  ;;  %v2369_v51 = vpop.f32.mrb[55].mxu0  ;;  %v17601_v41 = vld [vmem:[#allocation97_spill] sm:$0xff]  ;;  %v17608_v16 = vld [vmem:[#allocation104_spill] sm:$0xff] }
 0x2d6   :  { %v2410_v37 = vpop.f32.mrb[55].mxu1  ;;  %v2433_v0 = vmul.f32 %v14005_v2, %v2428_v45  ;;  %v2438_v36 = vmul.f32 0.5, %v2413_v46  ;;  %v2443_v47 = vmul.f32 0.5, %v2415_v62  ;;  %v17605_v45 = vld [vmem:[#allocation101_spill] sm:$0xff]  ;;  %v17606_v46 = vld [vmem:[#allocation102_spill] sm:$0xff]  ;;  %v17607_v62 = vld [vmem:[#allocation103_spill] sm:$0xff] }
 0x2d7   :  { %14006 = vtanh.f32 %v2434_v33  ;;  %v17609_v23 = vld [vmem:[#allocation105_spill] sm:$0xff]  ;;  %v17610_v2 = vld [vmem:[#allocation106_spill] sm:$0xff]  ;;  %v17611_v33 = vld [vmem:[#allocation107_spill] sm:$0xff] }
 0x2d8   :  { %v15200_v53 = vpack.c.bf16 %v2433_v0, %v2433_v0  ;;  %14008 = vtanh.f32 %v2438_v36  ;;  %v17612_v51 = vld [vmem:[#allocation108_spill] sm:$0xff]  ;;  %v17613_v37 = vld [vmem:[#allocation109_spill] sm:$0xff]  ;;  %v17614_v0 = vld [vmem:[#allocation110_spill] sm:$0xff] }
 0x2d9   :  { %14010 = vtanh.f32 %v2414_v57  ;;  %v17602_v57 = vld [vmem:[#allocation98_spill] sm:$0xff]  ;;  %v17615_v36 = vld [vmem:[#allocation111_spill] sm:$0xff] }
 0x2da   :  { %2683 = vmatmul.mubr.bf16.vlgmr.msra.gmra.mrb[56].mxu0 %v15200_v53  ;;  %2724 = vmatmul.mubr.bf16.vlgmr.msra.gmra.mrb[56].mxu1 %v15200_v53  ;;  %14012 = vtanh.f32 %v2443_v47  ;;  %v17617_v47 = vld [vmem:[#allocation113_spill] sm:$0xff] }
 0x2db   :  { %2937 = vmatpush1.bf16.msra.mxu0 %v14883_v58  ;;  %2978 = vmatpush1.bf16.msra.mxu1 %v14885_v59 }
 0x2dc   :  { %2938 = vmatprep.subr.bf16.mxu0 %v14889_v9  ;;  %2979 = vmatprep.subr.bf16.mxu1 %v14891_v40 }
 0x2dd   :  { %2968 = vmatprep.mubr.bf16.mxu0 %v17512_v6  ;;  %3009 = vmatprep.mubr.bf16.mxu1 %v17512_v6 }
 0x2df   :  { %2939 = vmatpush1.bf16.msra.mxu0 %v14897_v38  ;;  %2980 = vmatpush1.bf16.msra.mxu1 %v14899_v49 }
 0x2e0   :  { %2940 = vmatprep.subr.bf16.mxu0 %v14903_v4  ;;  %2981 = vmatprep.subr.bf16.mxu1 %v14905_v12 }
 0x2e1   :  { %v14007_v34 = vpop.eup %14006 }
 0x2e2   :  { %v14009_v7 = vpop.eup %14008  ;;  %v2436_v11 = vadd.f32 1.0, %v14007_v34  ;;  %v17618_v34 = vld [vmem:[#allocation114_spill] sm:$0xff] }
 0x2e3   :  { %v2440_v58 = vadd.f32 1.0, %v14009_v7  ;;  %2941 = vmatpush1.bf16.msra.mxu0 %v14911_v8  ;;  %2982 = vmatpush1.bf16.msra.mxu1 %v14913_v21  ;;  %v14011_v9 = vpop.eup %14010  ;;  %v17619_v7 = vld [vmem:[#allocation115_spill] sm:$0xff] }
 0x2e4   :  { %v2437_v59 = vmul.f32 0.5, %v2436_v11  ;;  %2942 = vmatprep.subr.bf16.mxu0 %v14917_v19  ;;  %2983 = vmatprep.subr.bf16.mxu1 %v14919_v35  ;;  %v14013_v12 = vpop.eup %14012  ;;  %v17620_v11 = vld [vmem:[#allocation116_spill] sm:$0xff] }
 0x2e5   :  { %v2441_v40 = vmul.f32 0.5, %v2440_v58  ;;  %v2445_v8 = vadd.f32 1.0, %v14013_v12  ;;  %v17621_v58 = vld [vmem:[#allocation117_spill] sm:$0xff]  ;;  %v17627_v12 = vld [vmem:[#allocation123_spill] sm:$0xff] }
 0x2e6   :  { %v2448_v38 = vmul.f32 %v14011_v9, %v2437_v59  ;;  %v17622_v59 = vld [vmem:[#allocation118_spill] sm:$0xff]  ;;  %v17623_v9 = vld [vmem:[#allocation119_spill] sm:$0xff] }
 0x2e7   :  { %v2447_v49 = vmul.f32 %v2441_v40, %v14945_v24  ;;  %2943 = vmatpush1.bf16.msra.mxu0 %v14923_v25  ;;  %2984 = vmatpush1.bf16.msra.mxu1 %v14925_v28  ;;  %v2446_v21 = vmul.f32 0.5, %v2445_v8  ;;  %v17579_v28 = vld [vmem:[#allocation75_spill] sm:$0xff]  ;;  %v17624_v40 = vld [vmem:[#allocation120_spill] sm:$0xff] }
 0x2e8   :  { %2944 = vmatprep.subr.bf16.mxu0 %v14929_v29  ;;  %2985 = vmatprep.subr.bf16.mxu1 %v14931_v32  ;;  %v17581_v29 = vld [vmem:[#allocation77_spill] sm:$0xff]  ;;  %v17582_v32 = vld [vmem:[#allocation78_spill] sm:$0xff]  ;;  %v17587_v24 = vld [vmem:[#allocation83_spill] sm:$0xff] }
 0x2e9   :  { %v15223_v4 = vadd.f32 %v2448_v38, %v2447_v49  ;;  %v17625_v38 = vld [vmem:[#allocation121_spill] sm:$0xff]  ;;  %v17626_v49 = vld [vmem:[#allocation122_spill] sm:$0xff]  ;;  %v17628_v8 = vld [vmem:[#allocation124_spill] sm:$0xff] }
 0x2eb   :  { %14014 = vtanh.f32 %v15223_v4  ;;  %2945 = vmatpush1.bf16.msra.mxu0 %v14935_v56  ;;  %2986 = vmatpush1.bf16.msra.mxu1 %v14937_v63  ;;  %v17583_v56 = vld [vmem:[#allocation79_spill] sm:$0xff]  ;;  %v17584_v63 = vld [vmem:[#allocation80_spill] sm:$0xff] }
 0x2ec   :  { %2946 = vmatprep.subr.bf16.mxu0 %v14941_v5  ;;  %2987 = vmatprep.subr.bf16.mxu1 %v14943_v31  ;;  %v17585_v5 = vld [vmem:[#allocation81_spill] sm:$0xff]  ;;  %v17586_v31 = vld [vmem:[#allocation82_spill] sm:$0xff] }
 0x2ef   :  { %2947 = vmatpush1.bf16.msra.mxu0 %v14950_v26  ;;  %2988 = vmatpush1.bf16.msra.mxu1 %v14952_v27  ;;  %v17588_v26 = vld [vmem:[#allocation84_spill] sm:$0xff]  ;;  %v17589_v27 = vld [vmem:[#allocation85_spill] sm:$0xff] }
 0x2f0   :  { %2948 = vmatprep.subr.bf16.mxu0 %v14956_v30  ;;  %2989 = vmatprep.subr.bf16.mxu1 %v14958_v14  ;;  %v17590_v30 = vld [vmem:[#allocation86_spill] sm:$0xff]  ;;  %v17591_v14 = vld [vmem:[#allocation87_spill] sm:$0xff] }
 0x2f3   :  { %2949 = vmatpush1.bf16.msra.mxu0 %v14962_v54  ;;  %2990 = vmatpush1.bf16.msra.mxu1 %v14964_v42  ;;  %v17592_v54 = vld [vmem:[#allocation88_spill] sm:$0xff]  ;;  %v17593_v42 = vld [vmem:[#allocation89_spill] sm:$0xff] }
 0x2f4   :  { %2950 = vmatprep.subr.bf16.mxu0 %v14968_v20  ;;  %2991 = vmatprep.subr.bf16.mxu1 %v14970_v43  ;;  %v17572_v20 = vld [vmem:[#allocation68_spill] sm:$0xff] }
 0x2f5   :  { %v14015_v19 = vpop.eup %14014  ;;  %v17576_v43 = vld [vmem:[#allocation72_spill] sm:$0xff] }
 0x2f6   :  { %v2451_v35 = vmul.f32 %v14015_v19, %v2446_v21  ;;  %v17629_v21 = vld [vmem:[#allocation125_spill] sm:$0xff] }
 0x2f7   :  { %2951 = vmatpush1.bf16.msra.mxu0 %v14974_v22  ;;  %2992 = vmatpush1.bf16.msra.mxu1 %v14976_v17  ;;  %v17573_v22 = vld [vmem:[#allocation69_spill] sm:$0xff]  ;;  %v17575_v17 = vld [vmem:[#allocation71_spill] sm:$0xff] }
 0x2f8   :  { %v15240_v25 = vpack.c.bf16 %v2451_v35, %v2451_v35  ;;  %3222 = vmatprep.subr.bf16.mxu0 %v14980_v10  ;;  %3263 = vmatprep.subr.bf16.mxu1 %v14982_v60  ;;  %v17574_v60 = vld [vmem:[#allocation70_spill] sm:$0xff]  ;;  %v15318_v19 = vld [vmem:[#allocation8 + $0x4] ss:$16 sps:$4 sm:$0xff]  }
 0x2f9   :  { %v17594_v10 = vld [vmem:[#allocation90_spill] sm:$0xff] }
 0x2fa   :  { %2969 = vmatmul.mubr.bf16.vlgmr.msra.gmra.mrb[60].mxu0 %v15240_v25  ;;  %3010 = vmatmul.mubr.bf16.vlgmr.msra.gmra.mrb[60].mxu1 %v15240_v25  ;;  %v15320_v35 = vld [vmem:[#allocation8 + $0xc] ss:$16 sps:$4 sm:$0xff]  }
 0x2fb   :  { %3223 = vmatpush1.bf16.msra.mxu0 %v14986_v61  ;;  %3264 = vmatpush1.bf16.msra.mxu1 %v14988_v15  ;;  %v17577_v61 = vld [vmem:[#allocation73_spill] sm:$0xff]  ;;  %v17578_v15 = vld [vmem:[#allocation74_spill] sm:$0xff] }
 0x2fc   :  { %3224 = vmatprep.subr.bf16.mxu0 %v14994_v1  ;;  %3265 = vmatprep.subr.bf16.mxu1 %v14996_v18  ;;  %v17580_v18 = vld [vmem:[#allocation76_spill] sm:$0xff]  ;;  %v17595_v1 = vld [vmem:[#allocation91_spill] sm:$0xff] }
 0x2fd   :  { %3254 = vmatprep.mubr.bf16.mxu0 %v17512_v6  ;;  %3295 = vmatprep.mubr.bf16.mxu1 %v17512_v6 }
 0x2ff   :  { %3225 = vmatpush1.bf16.msra.mxu0 %v17572_v20  ;;  %3266 = vmatpush1.bf16.msra.mxu1 %v17573_v22  ;;  %v15322_v20 = vld [vmem:[#allocation8] ss:$16 sps:$4 sm:$0xff]   ;;  %v15324_v22 = vld [vmem:[#allocation8 + $0x8] ss:$16 sps:$4 sm:$0xff]  }
 0x300   :  { %3226 = vmatprep.subr.bf16.mxu0 %v17574_v60  ;;  %3267 = vmatprep.subr.bf16.mxu1 %v17575_v17  ;;  %v15332_v60 = vld [vmem:[#allocation8 + $0x2c] ss:$16 sps:$4 sm:$0xff]   ;;  %v15334_v17 = vld [vmem:[#allocation8 + $0x20] ss:$16 sps:$4 sm:$0xff]  }
 0x303   :  { %3227 = vmatpush1.bf16.msra.mxu0 %v17576_v43  ;;  %3268 = vmatpush1.bf16.msra.mxu1 %v17577_v61  ;;  %v15336_v43 = vld [vmem:[#allocation8 + $0x28] ss:$16 sps:$4 sm:$0xff]   ;;  %v15342_v61 = vld [vmem:[#allocation8 + $0x44] ss:$16 sps:$4 sm:$0xff]  }
 0x304   :  { %3228 = vmatprep.subr.bf16.mxu0 %v17578_v15  ;;  %3269 = vmatprep.subr.bf16.mxu1 %v17579_v28  ;;  %v15344_v15 = vld [vmem:[#allocation8 + $0x4c] ss:$16 sps:$4 sm:$0xff]   ;;  %v15346_v28 = vld [vmem:[#allocation8 + $0x40] ss:$16 sps:$4 sm:$0xff]  }
 0x307   :  { %3229 = vmatpush1.bf16.msra.mxu0 %v17580_v18  ;;  %3270 = vmatpush1.bf16.msra.mxu1 %v17581_v29  ;;  %v15348_v18 = vld [vmem:[#allocation8 + $0x48] ss:$16 sps:$4 sm:$0xff]   ;;  %v15354_v29 = vld [vmem:[#allocation8 + $0x64] ss:$16 sps:$4 sm:$0xff]  }
 0x308   :  { %3230 = vmatprep.subr.bf16.mxu0 %v17582_v32  ;;  %3271 = vmatprep.subr.bf16.mxu1 %v17583_v56  ;;  %v15356_v32 = vld [vmem:[#allocation8 + $0x6c] ss:$16 sps:$4 sm:$0xff]   ;;  %v15358_v56 = vld [vmem:[#allocation8 + $0x60] ss:$16 sps:$4 sm:$0xff]  }
 0x30b   :  { %3231 = vmatpush1.bf16.msra.mxu0 %v17584_v63  ;;  %3272 = vmatpush1.bf16.msra.mxu1 %v17585_v5  ;;  %v15360_v63 = vld [vmem:[#allocation8 + $0x68] ss:$16 sps:$4 sm:$0xff]   ;;  %v15366_v5 = vld [vmem:[#allocation8 + $0x84] ss:$16 sps:$4 sm:$0xff]  }
 0x30c   :  { %3232 = vmatprep.subr.bf16.mxu0 %v17586_v31  ;;  %3273 = vmatprep.subr.bf16.mxu1 %v17587_v24  ;;  %v15368_v31 = vld [vmem:[#allocation8 + $0x8c] ss:$16 sps:$4 sm:$0xff]   ;;  %v15370_v24 = vld [vmem:[#allocation8 + $0x80] ss:$16 sps:$4 sm:$0xff]  }
 0x30f   :  { %3233 = vmatpush1.bf16.msra.mxu0 %v17588_v26  ;;  %3274 = vmatpush1.bf16.msra.mxu1 %v17589_v27  ;;  %v15372_v26 = vld [vmem:[#allocation8 + $0x88] ss:$16 sps:$4 sm:$0xff]   ;;  %v15378_v27 = vld [vmem:[#allocation8 + $0xa4] ss:$16 sps:$4 sm:$0xff]  }
 0x310   :  { %3234 = vmatprep.subr.bf16.mxu0 %v17590_v30  ;;  %3275 = vmatprep.subr.bf16.mxu1 %v17591_v14  ;;  %v15380_v30 = vld [vmem:[#allocation8 + $0xac] ss:$16 sps:$4 sm:$0xff]   ;;  %v15382_v14 = vld [vmem:[#allocation8 + $0xa0] ss:$16 sps:$4 sm:$0xff]  }
 0x313   :  { %3235 = vmatpush1.bf16.msra.mxu0 %v17592_v54  ;;  %3276 = vmatpush1.bf16.msra.mxu1 %v17593_v42  ;;  %v15384_v54 = vld [vmem:[#allocation8 + $0xa8] ss:$16 sps:$4 sm:$0xff]   ;;  %v15390_v42 = vld [vmem:[#allocation8 + $0xc4] ss:$16 sps:$4 sm:$0xff]  }
 0x314   :  { %3236 = vmatprep.subr.bf16.mxu0 %v17594_v10  ;;  %3277 = vmatprep.subr.bf16.mxu1 %v17595_v1  ;;  %v15392_v10 = vld [vmem:[#allocation8 + $0xcc] ss:$16 sps:$4 sm:$0xff]   ;;  %v15394_v1 = vld [vmem:[#allocation8 + $0xc0] ss:$16 sps:$4 sm:$0xff]  }
 0x317   :  { %3237 = vmatpush1.bf16.msra.mxu0 %v17596_v39  ;;  %3278 = vmatpush1.bf16.msra.mxu1 %v17597_v3  ;;  %v15396_v39 = vld [vmem:[#allocation8 + $0xc8] ss:$16 sps:$4 sm:$0xff]   ;;  %v15402_v3 = vld [vmem:[#allocation8 + $0xe4] ss:$16 sps:$4 sm:$0xff]  }
 0x318   :  { %3504 = vmatprep.subr.bf16.mxu0 %v17598_v55  ;;  %3545 = vmatprep.subr.bf16.mxu1 %v17599_v13  ;;  %v15404_v55 = vld [vmem:[#allocation8 + $0xec] ss:$16 sps:$4 sm:$0xff]   ;;  %v15406_v13 = vld [vmem:[#allocation8 + $0xe0] ss:$16 sps:$4 sm:$0xff]  }
 0x31a   :  { %3255 = vmatmul.mubr.bf16.vlgmr.msra.gmra.mrb[64].mxu0 %v15200_v53  ;;  %3296 = vmatmul.mubr.bf16.vlgmr.msra.gmra.mrb[64].mxu1 %v15200_v53  ;;  %v17616_v53 = vld [vmem:[#allocation112_spill] sm:$0xff] }
 0x31b   :  { %3505 = vmatpush1.bf16.msra.mxu0 %v17600_v50  ;;  %3546 = vmatpush1.bf16.msra.mxu1 %v17601_v41  ;;  %v15408_v50 = vld [vmem:[#allocation8 + $0xe8] ss:$16 sps:$4 sm:$0xff]   ;;  %v15414_v41 = vld [vmem:[#allocation8 + $0x104] ss:$16 sps:$4 sm:$0xff]  }
 0x31c   :  { %3506 = vmatprep.subr.bf16.mxu0 %v17602_v57  ;;  %3547 = vmatprep.subr.bf16.mxu1 %v17603_v44  ;;  %v15416_v57 = vld [vmem:[#allocation8 + $0x10c] ss:$16 sps:$4 sm:$0xff]  }
 0x31d   :  { %3536 = vmatprep.mubr.bf16.mxu0 %v17512_v6  ;;  %3577 = vmatprep.mubr.bf16.mxu1 %v17512_v6 }
 0x31f   :  { %3507 = vmatpush1.bf16.msra.mxu0 %v17604_v48  ;;  %3548 = vmatpush1.bf16.msra.mxu1 %v17605_v45  ;;  %v17630_v45 = vld [vmem:[#allocation19_spill] sm:$0xff] }
 0x320   :  { %3508 = vmatprep.subr.bf16.mxu0 %v17606_v46  ;;  %3549 = vmatprep.subr.bf16.mxu1 %v17607_v62  ;;  %v17631_v62 = vld [vmem:[#allocation21_spill] sm:$0xff] }
 0x323   :  { %3509 = vmatpush1.bf16.msra.mxu0 %v17608_v16  ;;  %3550 = vmatpush1.bf16.msra.mxu1 %v17609_v23 }
 0x324   :  { %3510 = vmatprep.subr.bf16.mxu0 %v17610_v2  ;;  %3551 = vmatprep.subr.bf16.mxu1 %v17611_v33  ;;  %v17632_v33 = vld [vmem:[#allocation20_spill] sm:$0xff] }
 0x327   :  { %3511 = vmatpush1.bf16.msra.mxu0 %v17612_v51  ;;  %3552 = vmatpush1.bf16.msra.mxu1 %v17613_v37  ;;  %v17633_v37 = vld [vmem:[#allocation23_spill] sm:$0xff] }
 0x328   :  { %3512 = vmatprep.subr.bf16.mxu0 %v17614_v0  ;;  %3553 = vmatprep.subr.bf16.mxu1 %v17615_v36 }
 0x32b   :  { %3513 = vmatpush1.bf16.msra.mxu0 %v17616_v53  ;;  %3554 = vmatpush1.bf16.msra.mxu1 %v17617_v47 }
 0x32c   :  { %3514 = vmatprep.subr.bf16.mxu0 %v17618_v34  ;;  %3555 = vmatprep.subr.bf16.mxu1 %v17619_v7 }
 0x32f   :  { %3515 = vmatpush1.bf16.msra.mxu0 %v17620_v11  ;;  %3556 = vmatpush1.bf16.msra.mxu1 %v17621_v58 }
 0x330   :  { %3516 = vmatprep.subr.bf16.mxu0 %v17622_v59  ;;  %3557 = vmatprep.subr.bf16.mxu1 %v17623_v9 }
 0x333   :  { %3517 = vmatpush1.bf16.msra.mxu0 %v17624_v40  ;;  %3558 = vmatpush1.bf16.msra.mxu1 %v17625_v38 }
 0x334   :  { %3518 = vmatprep.subr.bf16.mxu0 %v17626_v49  ;;  %3559 = vmatprep.subr.bf16.mxu1 %v17627_v12 }
 0x337   :  { %3519 = vmatpush1.bf16.msra.mxu0 %v17628_v8  ;;  %3560 = vmatpush1.bf16.msra.mxu1 %v17629_v21 }
 0x338   :  { %3824 = vmatprep.subr.bf16.mxu0 %v15318_v19  ;;  %3865 = vmatprep.subr.bf16.mxu1 %v15320_v35 }
 0x33a   :  { %3537 = vmatmul.mubr.bf16.vlgmr.msra.gmra.mrb[68].mxu0 %v15240_v25  ;;  %3578 = vmatmul.mubr.bf16.vlgmr.msra.gmra.mrb[68].mxu1 %v15240_v25  ;;  %v15330_v25 = vld [vmem:[#allocation8 + $0x24] ss:$16 sps:$4 sm:$0xff]  }
 0x33b   :  { %3856 = vmatprep.mubr.bf16.mxu0 %v17512_v6  ;;  %3897 = vmatprep.mubr.bf16.mxu1 %v17512_v6 }
 0x33c   :  { %3825 = vmatpush1.bf16.msra.mxu0 %v15322_v20  ;;  %3866 = vmatpush1.bf16.msra.mxu1 %v15324_v22 }
 0x33d   :  { %3826 = vmatprep.subr.bf16.mxu0 %v15330_v25  ;;  %3867 = vmatprep.subr.bf16.mxu1 %v15332_v60 }
 0x340   :  { %3827 = vmatpush1.bf16.msra.mxu0 %v15334_v17  ;;  %3868 = vmatpush1.bf16.msra.mxu1 %v15336_v43 }
 0x341   :  { %3828 = vmatprep.subr.bf16.mxu0 %v15342_v61  ;;  %3869 = vmatprep.subr.bf16.mxu1 %v15344_v15 }
 0x344   :  { %3829 = vmatpush1.bf16.msra.mxu0 %v15346_v28  ;;  %3870 = vmatpush1.bf16.msra.mxu1 %v15348_v18 }
 0x345   :  { %3830 = vmatprep.subr.bf16.mxu0 %v15354_v29  ;;  %3871 = vmatprep.subr.bf16.mxu1 %v15356_v32 }
 0x348   :  { %3831 = vmatpush1.bf16.msra.mxu0 %v15358_v56  ;;  %3872 = vmatpush1.bf16.msra.mxu1 %v15360_v63 }
 0x349   :  { %3832 = vmatprep.subr.bf16.mxu0 %v15366_v5  ;;  %3873 = vmatprep.subr.bf16.mxu1 %v15368_v31 }
 0x34c   :  { %3833 = vmatpush1.bf16.msra.mxu0 %v15370_v24  ;;  %3874 = vmatpush1.bf16.msra.mxu1 %v15372_v26 }
 0x34d   :  { %3834 = vmatprep.subr.bf16.mxu0 %v15378_v27  ;;  %3875 = vmatprep.subr.bf16.mxu1 %v15380_v30 }
 0x350   :  { %3835 = vmatpush1.bf16.msra.mxu0 %v15382_v14  ;;  %3876 = vmatpush1.bf16.msra.mxu1 %v15384_v54 }
 0x351   :  { %3836 = vmatprep.subr.bf16.mxu0 %v15390_v42  ;;  %3877 = vmatprep.subr.bf16.mxu1 %v15392_v10 }
 0x354   :  { %3837 = vmatpush1.bf16.msra.mxu0 %v15394_v1  ;;  %3878 = vmatpush1.bf16.msra.mxu1 %v15396_v39 }
 0x355   :  { %3838 = vmatprep.subr.bf16.mxu0 %v15402_v3  ;;  %3879 = vmatprep.subr.bf16.mxu1 %v15404_v55 }
 0x358   :  { %3839 = vmatpush1.bf16.msra.mxu0 %v15406_v13  ;;  %3880 = vmatpush1.bf16.msra.mxu1 %v15408_v50 }
 0x359   :  { %4110 = vmatprep.subr.bf16.mxu0 %v15414_v41  ;;  %4151 = vmatprep.subr.bf16.mxu1 %v15416_v57 }
 0x3ed   :  { %v3256_v44 = vpop.f32.mrb[64].mxu0  ;;  %v3297_v48 = vpop.f32.mrb[64].mxu1 }
 0x3ee   :  { %v3304_v46 = vadd.f32 %v3256_v44, %v17630_v45  ;;  %v3306_v16 = vadd.f32 %v3297_v48, %v17631_v62  ;;  %v3258_v23 = vpop.f32.mrb[65].mxu0  ;;  %v3299_v2 = vpop.f32.mrb[65].mxu1 }
 0x3ef   :  { %v3305_v51 = vadd.f32 %v3258_v23, %v17632_v33  ;;  %v3307_v0 = vadd.f32 %v3299_v2, %v17633_v37  ;;  %v3260_v36 = vpop.f32.mrb[66].mxu0  ;;  %v3301_v53 = vpop.f32.mrb[66].mxu1  ;;  %v17634_v23 = vld [vmem:[#allocation62_spill] sm:$0xff]  ;;  %v17635_v33 = vld [vmem:[#allocation65_spill] sm:$0xff] }
 0x3f0   :  { %v3590_v47 = vmul.f32 0.5, %v3304_v46  ;;  %v3261_v34 = vpop.f32.mrb[67].mxu0  ;;  %v3302_v7 = vpop.f32.mrb[67].mxu1  ;;  %v17636_v53 = vld [vmem:[#allocation64_spill] sm:$0xff] }
 0x3f1   :  { %v3594_v11 = vmul.f32 0.5, %v3305_v51  ;;  %v3599_v58 = vmul.f32 0.5, %v3307_v0  ;;  %v17637_v34 = vld [vmem:[#allocation66_spill] sm:$0xff] }
 0x3f2   :  { %14016 = vtanh.f32 %v3590_v47 }
 0x3f3   :  { %14018 = vtanh.f32 %v3594_v11 }
 0x3f4   :  { %14020 = vtanh.f32 %v3306_v16 }
 0x3f5   :  { %14022 = vtanh.f32 %v3599_v58 }
 0x3fc   :  { %v14017_v59 = vpop.eup %14016 }
 0x3fd   :  { %v14019_v9 = vpop.eup %14018  ;;  %v3592_v40 = vadd.f32 1.0, %v14017_v59 }
 0x3fe   :  { %v3596_v38 = vadd.f32 1.0, %v14019_v9  ;;  %v14021_v12 = vpop.eup %14020 }
 0x3ff   :  { %v3593_v49 = vmul.f32 0.5, %v3592_v40  ;;  %v14023_v45 = vpop.eup %14022 }
 0x400   :  { %v3597_v8 = vmul.f32 0.5, %v3596_v38  ;;  %v3601_v46 = vadd.f32 1.0, %v14023_v45  ;;  %v15440_v45 = vld [vmem:[#allocation8 + $0x12c] ss:$16 sps:$4 sm:$0xff]  }
 0x401   :  { %v3604_v21 = vmul.f32 %v14021_v12, %v3593_v49  ;;  %v15432_v12 = vld [vmem:[#allocation8 + $0x100] ss:$16 sps:$4 sm:$0xff]  }
 0x402   :  { %v3603_v44 = vmul.f32 %v3597_v8, %v15193_v52  ;;  %v3602_v36 = vmul.f32 0.5, %v3601_v46  ;;  %v15434_v8 = vld [vmem:[#allocation8 + $0x108] ss:$16 sps:$4 sm:$0xff]   ;;  %v15446_v46 = vld [vmem:[#allocation8 + $0x120] ss:$16 sps:$4 sm:$0xff]  }
 0x404   :  { %v15425_v48 = vadd.f32 %v3604_v21, %v3603_v44  ;;  %v15438_v44 = vld [vmem:[#allocation8 + $0x124] ss:$16 sps:$4 sm:$0xff]  }
 0x406   :  { %14024 = vtanh.f32 %v15425_v48 }
 0x40d   :  { %v3538_v62 = vpop.f32.mrb[68].mxu0  ;;  %v3579_v16 = vpop.f32.mrb[68].mxu1 }
 0x40e   :  { %v3586_v2 = vadd.f32 %v3538_v62, %v17634_v23  ;;  %v3588_v51 = vadd.f32 %v3579_v16, %v17635_v33  ;;  %v3540_v37 = vpop.f32.mrb[69].mxu0  ;;  %v3581_v0 = vpop.f32.mrb[69].mxu1  ;;  %v15448_v62 = vld [vmem:[#allocation8 + $0x128] ss:$16 sps:$4 sm:$0xff]   ;;  %v15452_v16 = vld [vmem:[#allocation8 + $0x144] ss:$16 sps:$4 sm:$0xff]  }
 0x40f   :  { %v3587_v47 = vadd.f32 %v3540_v37, %v17636_v53  ;;  %v3589_v7 = vadd.f32 %v3581_v0, %v17637_v34  ;;  %v3542_v52 = vpop.f32.mrb[70].mxu0  ;;  %v3583_v11 = vpop.f32.mrb[70].mxu1  ;;  %v15454_v23 = vld [vmem:[#allocation8 + $0x14c] ss:$16 sps:$4 sm:$0xff]   ;;  %v15460_v33 = vld [vmem:[#allocation8 + $0x140] ss:$16 sps:$4 sm:$0xff]  }
 0x410   :  { %v14025_v58 = vpop.eup %14024  ;;  %v3608_v59 = vmul.f32 0.5, %v3586_v2  ;;  %v3543_v9 = vpop.f32.mrb[71].mxu0  ;;  %v15466_v37 = vld [vmem:[#allocation8 + $0x164] ss:$16 sps:$4 sm:$0xff]   ;;  %v15468_v0 = vld [vmem:[#allocation8 + $0x16c] ss:$16 sps:$4 sm:$0xff]  }
 0x411   :  { %v3584_v40 = vpop.f32.mrb[71].mxu1  ;;  %v3607_v38 = vmul.f32 %v14025_v58, %v3602_v36  ;;  %v3612_v49 = vmul.f32 0.5, %v3587_v47  ;;  %v3617_v2 = vmul.f32 0.5, %v3589_v7  ;;  %v15472_v7 = vld [vmem:[#allocation8 + $0x160] ss:$16 sps:$4 sm:$0xff]  }
 0x412   :  { %14026 = vtanh.f32 %v3608_v59  ;;  %v15474_v52 = vld [vmem:[#allocation8 + $0x168] ss:$16 sps:$4 sm:$0xff]   ;;  %v15478_v58 = vld [vmem:[#allocation8 + $0x184] ss:$16 sps:$4 sm:$0xff]   ;;  %v15480_v59 = vld [vmem:[#allocation8 + $0x18c] ss:$16 sps:$4 sm:$0xff]  }
 0x413   :  { %v15436_v21 = vpack.c.bf16 %v3607_v38, %v3607_v38  ;;  %14028 = vtanh.f32 %v3612_v49  ;;  %17638 = vst [vmem:[#allocation68_spill] sm:$0xff] %v15474_v52  ;;  %17639 = vst [vmem:[#allocation69_spill] sm:$0xff] %v15478_v58 }
 0x414   :  { %14030 = vtanh.f32 %v3588_v51  ;;  %v15462_v51 = vld [vmem:[#allocation8 + $0x148] ss:$16 sps:$4 sm:$0xff]   ;;  %17640 = vst [vmem:[#allocation70_spill] sm:$0xff] %v15480_v59 }
 0x415   :  { %3857 = vmatmul.mubr.bf16.vlgmr.msra.gmra.mrb[72].mxu0 %v15436_v21  ;;  %3898 = vmatmul.mubr.bf16.vlgmr.msra.gmra.mrb[72].mxu1 %v15436_v21  ;;  %14032 = vtanh.f32 %v3617_v2  ;;  %v15485_v2 = vld [vmem:[#allocation8 + $0x180] ss:$16 sps:$4 sm:$0xff]  }
 0x416   :  { %4111 = vmatpush1.bf16.msra.mxu0 %v15432_v12  ;;  %4152 = vmatpush1.bf16.msra.mxu1 %v15434_v8  ;;  %17641 = vst [vmem:[#allocation71_spill] sm:$0xff] %v15485_v2 }
 0x417   :  { %4112 = vmatprep.subr.bf16.mxu0 %v15438_v44  ;;  %4153 = vmatprep.subr.bf16.mxu1 %v15440_v45 }
 0x418   :  { %4142 = vmatprep.mubr.bf16.mxu0 %v17512_v6  ;;  %4183 = vmatprep.mubr.bf16.mxu1 %v17512_v6 }
 0x41a   :  { %4113 = vmatpush1.bf16.msra.mxu0 %v15446_v46  ;;  %4154 = vmatpush1.bf16.msra.mxu1 %v15448_v62 }
 0x41b   :  { %4114 = vmatprep.subr.bf16.mxu0 %v15452_v16  ;;  %4155 = vmatprep.subr.bf16.mxu1 %v15454_v23 }
 0x41c   :  { %v14027_v36 = vpop.eup %14026 }
 0x41d   :  { %v14029_v53 = vpop.eup %14028  ;;  %v3610_v47 = vadd.f32 1.0, %v14027_v36  ;;  %v15487_v36 = vld [vmem:[#allocation8 + $0x188] ss:$16 sps:$4 sm:$0xff]  }
 0x41e   :  { %v3614_v34 = vadd.f32 1.0, %v14029_v53  ;;  %4115 = vmatpush1.bf16.msra.mxu0 %v15460_v33  ;;  %4156 = vmatpush1.bf16.msra.mxu1 %v15462_v51  ;;  %v14031_v9 = vpop.eup %14030  ;;  %17642 = vst [vmem:[#allocation72_spill] sm:$0xff] %v15487_v36  ;;  %v15491_v53 = vld [vmem:[#allocation8 + $0x1a4] ss:$16 sps:$4 sm:$0xff]  }
 0x41f   :  { %v3611_v11 = vmul.f32 0.5, %v3610_v47  ;;  %4116 = vmatprep.subr.bf16.mxu0 %v15466_v37  ;;  %4157 = vmatprep.subr.bf16.mxu1 %v15468_v0  ;;  %17643 = vst [vmem:[#allocation73_spill] sm:$0xff] %v15491_v53  ;;  %v15493_v47 = vld [vmem:[#allocation8 + $0x1ac] ss:$16 sps:$4 sm:$0xff]  }
 0x420   :  { %v3615_v40 = vmul.f32 0.5, %v3614_v34  ;;  %17644 = vst [vmem:[#allocation74_spill] sm:$0xff] %v15493_v47 }
 0x421   :  { %v3622_v38 = vmul.f32 %v14031_v9, %v3611_v11  ;;  %v15502_v11 = vld [vmem:[#allocation8 + $0x1a8] ss:$16 sps:$4 sm:$0xff]   ;;  %v15506_v9 = vld [vmem:[#allocation8 + $0x1c4] ss:$16 sps:$4 sm:$0xff]  }
 0x422   :  { %v3621_v49 = vmul.f32 %v3615_v40, %v15223_v4  ;;  %4117 = vmatpush1.bf16.msra.mxu0 %v15472_v7  ;;  %4158 = vmatpush1.bf16.msra.mxu1 %v15474_v52  ;;  %v15500_v4 = vld [vmem:[#allocation8 + $0x1a0] ss:$16 sps:$4 sm:$0xff]   ;;  %17646 = vst [vmem:[#allocation76_spill] sm:$0xff] %v15502_v11  ;;  %17647 = vst [vmem:[#allocation77_spill] sm:$0xff] %v15506_v9  ;;  %v15508_v40 = vld [vmem:[#allocation8 + $0x1cc] ss:$16 sps:$4 sm:$0xff]  }
 0x423   :  { %4118 = vmatprep.subr.bf16.mxu0 %v15478_v58  ;;  %4159 = vmatprep.subr.bf16.mxu1 %v15480_v59  ;;  %17645 = vst [vmem:[#allocation75_spill] sm:$0xff] %v15500_v4  ;;  %17648 = vst [vmem:[#allocation78_spill] sm:$0xff] %v15508_v40 }
 0x424   :  { %v15495_v34 = vadd.f32 %v3622_v38, %v3621_v49  ;;  %v14033_v38 = vpop.eup %14032  ;;  %v15512_v49 = vld [vmem:[#allocation8 + $0x1c0] ss:$16 sps:$4 sm:$0xff]  }
 0x425   :  { %17649 = vst [vmem:[#allocation79_spill] sm:$0xff] %v15512_v49 }
 0x426   :  { %14034 = vtanh.f32 %v15495_v34  ;;  %4119 = vmatpush1.bf16.msra.mxu0 %v15485_v2  ;;  %4160 = vmatpush1.bf16.msra.mxu1 %v15487_v36  ;;  %v15514_v36 = vld [vmem:[#allocation8 + $0x1c8] ss:$16 sps:$4 sm:$0xff]   ;;  %v3619_v2 = vadd.f32 1.0, %v14033_v38  ;;  %v15530_v38 = vld [vmem:[#allocation4 + $0x4] ss:$16 sps:$4 sm:$0xff]  }
 0x427   :  { %4120 = vmatprep.subr.bf16.mxu0 %v15491_v53  ;;  %4161 = vmatprep.subr.bf16.mxu1 %v15493_v47  ;;  %17650 = vst [vmem:[#allocation80_spill] sm:$0xff] %v15514_v36  ;;  %v15518_v53 = vld [vmem:[#allocation8 + $0x1e4] ss:$16 sps:$4 sm:$0xff]   ;;  %v15520_v47 = vld [vmem:[#allocation8 + $0x1ec] ss:$16 sps:$4 sm:$0xff]   ;;  %17652 = vst [vmem:[#allocation82_spill] sm:$0xff] %v15530_v38 }
 0x428   :  { %17651 = vst [vmem:[#allocation81_spill] sm:$0xff] %v15520_v47  ;;  %v3620_v59 = vmul.f32 0.5, %v3619_v2  ;;  %v15544_v2 = vld [vmem:[#allocation4 + $0x24] ss:$16 sps:$4 sm:$0xff]  }
 0x429   :  { %17656 = vst [vmem:[#allocation86_spill] sm:$0xff] %v15544_v2 }
 0x42a   :  { %4121 = vmatpush1.bf16.msra.mxu0 %v15500_v4  ;;  %4162 = vmatpush1.bf16.msra.mxu1 %v15502_v11  ;;  %v15524_v4 = vld [vmem:[#allocation8 + $0x1e0] ss:$16 sps:$4 sm:$0xff]   ;;  %v15526_v11 = vld [vmem:[#allocation8 + $0x1e8] ss:$16 sps:$4 sm:$0xff]  }
 0x42b   :  { %4122 = vmatprep.subr.bf16.mxu0 %v15506_v9  ;;  %4163 = vmatprep.subr.bf16.mxu1 %v15508_v40  ;;  %v15532_v40 = vld [vmem:[#allocation4 + $0xc] ss:$16 sps:$4 sm:$0xff]  }
 0x42c   :  { %17653 = vst [vmem:[#allocation83_spill] sm:$0xff] %v15532_v40 }
 0x42e   :  { %4123 = vmatpush1.bf16.msra.mxu0 %v15512_v49  ;;  %4164 = vmatpush1.bf16.msra.mxu1 %v15514_v36  ;;  %v15536_v36 = vld [vmem:[#allocation4] ss:$16 sps:$4 sm:$0xff]   ;;  %v15538_v49 = vld [vmem:[#allocation4 + $0x8] ss:$16 sps:$4 sm:$0xff]  }
 0x42f   :  { %4124 = vmatprep.subr.bf16.mxu0 %v15518_v53  ;;  %4165 = vmatprep.subr.bf16.mxu1 %v15520_v47  ;;  %17654 = vst [vmem:[#allocation84_spill] sm:$0xff] %v15536_v36  ;;  %17655 = vst [vmem:[#allocation85_spill] sm:$0xff] %v15538_v49  ;;  %v15546_v47 = vld [vmem:[#allocation4 + $0x2c] ss:$16 sps:$4 sm:$0xff]  }
 0x430   :  { %v14035_v9 = vpop.eup %14034  ;;  %17657 = vst [vmem:[#allocation87_spill] sm:$0xff] %v15546_v47 }
 0x431   :  { %v3625_v58 = vmul.f32 %v14035_v9, %v3620_v59  ;;  %v15552_v59 = vld [vmem:[#allocation4 + $0x20] ss:$16 sps:$4 sm:$0xff]   ;;  %v15558_v9 = vld [vmem:[#allocation4 + $0x44] ss:$16 sps:$4 sm:$0xff]  }
 0x432   :  { %4125 = vmatpush1.bf16.msra.mxu0 %v15524_v4  ;;  %4166 = vmatpush1.bf16.msra.mxu1 %v15526_v11  ;;  %17658 = vst [vmem:[#allocation88_spill] sm:$0xff] %v15552_v59  ;;  %17660 = vst [vmem:[#allocation90_spill] sm:$0xff] %v15558_v9 }
 0x433   :  { %v15540_v52 = vpack.c.bf16 %v3625_v58, %v3625_v58  ;;  %4396 = vmatprep.subr.bf16.mxu0 %v15530_v38  ;;  %4437 = vmatprep.subr.bf16.mxu1 %v15532_v40  ;;  %v15554_v58 = vld [vmem:[#allocation4 + $0x28] ss:$16 sps:$4 sm:$0xff]   ;;  %v15560_v40 = vld [vmem:[#allocation4 + $0x4c] ss:$16 sps:$4 sm:$0xff]   ;;  %v15578_v38 = vld [vmem:[#allocation4 + $0x60] ss:$16 sps:$4 sm:$0xff]  }
 0x434   :  { %17659 = vst [vmem:[#allocation89_spill] sm:$0xff] %v15554_v58  ;;  %17661 = vst [vmem:[#allocation91_spill] sm:$0xff] %v15560_v40 }
 0x435   :  { %4143 = vmatmul.mubr.bf16.vlgmr.msra.gmra.mrb[76].mxu0 %v15540_v52  ;;  %4184 = vmatmul.mubr.bf16.vlgmr.msra.gmra.mrb[76].mxu1 %v15540_v52  ;;  %17666 = vst [vmem:[#allocation96_spill] sm:$0xff] %v15578_v38 }
 0x436   :  { %4397 = vmatpush1.bf16.msra.mxu0 %v15536_v36  ;;  %4438 = vmatpush1.bf16.msra.mxu1 %v15538_v49  ;;  %v15566_v49 = vld [vmem:[#allocation4 + $0x40] ss:$16 sps:$4 sm:$0xff]   ;;  %v15568_v36 = vld [vmem:[#allocation4 + $0x48] ss:$16 sps:$4 sm:$0xff]  }
 0x437   :  { %4398 = vmatprep.subr.bf16.mxu0 %v15544_v2  ;;  %4439 = vmatprep.subr.bf16.mxu1 %v15546_v47  ;;  %17662 = vst [vmem:[#allocation92_spill] sm:$0xff] %v15566_v49  ;;  %17663 = vst [vmem:[#allocation93_spill] sm:$0xff] %v15568_v36  ;;  %v15572_v47 = vld [vmem:[#allocation4 + $0x64] ss:$16 sps:$4 sm:$0xff]   ;;  %v15574_v2 = vld [vmem:[#allocation4 + $0x6c] ss:$16 sps:$4 sm:$0xff]  }
 0x438   :  { %4428 = vmatprep.mubr.bf16.mxu0 %v17512_v6  ;;  %4469 = vmatprep.mubr.bf16.mxu1 %v17512_v6  ;;  %17664 = vst [vmem:[#allocation94_spill] sm:$0xff] %v15572_v47  ;;  %17665 = vst [vmem:[#allocation95_spill] sm:$0xff] %v15574_v2 }
 0x43a   :  { %4399 = vmatpush1.bf16.msra.mxu0 %v15552_v59  ;;  %4440 = vmatpush1.bf16.msra.mxu1 %v15554_v58  ;;  %v15580_v59 = vld [vmem:[#allocation4 + $0x68] ss:$16 sps:$4 sm:$0xff]   ;;  %v15584_v58 = vld [vmem:[#allocation4 + $0x84] ss:$16 sps:$4 sm:$0xff]  }
 0x43b   :  { %4400 = vmatprep.subr.bf16.mxu0 %v15558_v9  ;;  %4441 = vmatprep.subr.bf16.mxu1 %v15560_v40  ;;  %17667 = vst [vmem:[#allocation97_spill] sm:$0xff] %v15580_v59  ;;  %17668 = vst [vmem:[#allocation98_spill] sm:$0xff] %v15584_v58  ;;  %v15586_v9 = vld [vmem:[#allocation4 + $0x8c] ss:$16 sps:$4 sm:$0xff]   ;;  %v15590_v40 = vld [vmem:[#allocation4 + $0x80] ss:$16 sps:$4 sm:$0xff]  }
 0x43c   :  { %17669 = vst [vmem:[#allocation99_spill] sm:$0xff] %v15586_v9  ;;  %17670 = vst [vmem:[#allocation100_spill] sm:$0xff] %v15590_v40 }
 0x43e   :  { %4401 = vmatpush1.bf16.msra.mxu0 %v15566_v49  ;;  %4442 = vmatpush1.bf16.msra.mxu1 %v15568_v36  ;;  %v15592_v49 = vld [vmem:[#allocation4 + $0x88] ss:$16 sps:$4 sm:$0xff]   ;;  %v15596_v36 = vld [vmem:[#allocation4 + $0xa4] ss:$16 sps:$4 sm:$0xff]  }
 0x43f   :  { %4402 = vmatprep.subr.bf16.mxu0 %v15572_v47  ;;  %4443 = vmatprep.subr.bf16.mxu1 %v15574_v2  ;;  %17671 = vst [vmem:[#allocation101_spill] sm:$0xff] %v15592_v49  ;;  %17672 = vst [vmem:[#allocation102_spill] sm:$0xff] %v15596_v36  ;;  %v15598_v47 = vld [vmem:[#allocation4 + $0xac] ss:$16 sps:$4 sm:$0xff]   ;;  %v15602_v2 = vld [vmem:[#allocation4 + $0xa0] ss:$16 sps:$4 sm:$0xff]  }
 0x440   :  { %17673 = vst [vmem:[#allocation103_spill] sm:$0xff] %v15598_v47  ;;  %17674 = vst [vmem:[#allocation104_spill] sm:$0xff] %v15602_v2 }
 0x442   :  { %4403 = vmatpush1.bf16.msra.mxu0 %v15578_v38  ;;  %4444 = vmatpush1.bf16.msra.mxu1 %v15580_v59  ;;  %v15604_v38 = vld [vmem:[#allocation4 + $0xa8] ss:$16 sps:$4 sm:$0xff]   ;;  %v15608_v59 = vld [vmem:[#allocation4 + $0xc4] ss:$16 sps:$4 sm:$0xff]  }
 0x443   :  { %4404 = vmatprep.subr.bf16.mxu0 %v15584_v58  ;;  %4445 = vmatprep.subr.bf16.mxu1 %v15586_v9  ;;  %17675 = vst [vmem:[#allocation105_spill] sm:$0xff] %v15604_v38  ;;  %17676 = vst [vmem:[#allocation106_spill] sm:$0xff] %v15608_v59  ;;  %v15610_v58 = vld [vmem:[#allocation4 + $0xcc] ss:$16 sps:$4 sm:$0xff]   ;;  %v15614_v9 = vld [vmem:[#allocation4 + $0xc0] ss:$16 sps:$4 sm:$0xff]  }
 0x444   :  { %17677 = vst [vmem:[#allocation107_spill] sm:$0xff] %v15610_v58  ;;  %17678 = vst [vmem:[#allocation108_spill] sm:$0xff] %v15614_v9 }
 0x446   :  { %4405 = vmatpush1.bf16.msra.mxu0 %v15590_v40  ;;  %4446 = vmatpush1.bf16.msra.mxu1 %v15592_v49  ;;  %v15616_v40 = vld [vmem:[#allocation4 + $0xc8] ss:$16 sps:$4 sm:$0xff]   ;;  %v15620_v49 = vld [vmem:[#allocation4 + $0xe4] ss:$16 sps:$4 sm:$0xff]  }
 0x447   :  { %4406 = vmatprep.subr.bf16.mxu0 %v15596_v36  ;;  %4447 = vmatprep.subr.bf16.mxu1 %v15598_v47  ;;  %17679 = vst [vmem:[#allocation109_spill] sm:$0xff] %v15616_v40  ;;  %17680 = vst [vmem:[#allocation110_spill] sm:$0xff] %v15620_v49  ;;  %v15622_v36 = vld [vmem:[#allocation4 + $0xec] ss:$16 sps:$4 sm:$0xff]   ;;  %v15626_v47 = vld [vmem:[#allocation4 + $0xe0] ss:$16 sps:$4 sm:$0xff]  }
 0x448   :  { %17681 = vst [vmem:[#allocation111_spill] sm:$0xff] %v15626_v47 }
 0x44a   :  { %4407 = vmatpush1.bf16.msra.mxu0 %v15602_v2  ;;  %4448 = vmatpush1.bf16.msra.mxu1 %v15604_v38  ;;  %v15628_v2 = vld [vmem:[#allocation4 + $0xe8] ss:$16 sps:$4 sm:$0xff]   ;;  %v15632_v38 = vld [vmem:[#allocation6 + $0x4] ss:$16 sps:$4 sm:$0xff]  }
 0x44b   :  { %4408 = vmatprep.subr.bf16.mxu0 %v15608_v59  ;;  %4449 = vmatprep.subr.bf16.mxu1 %v15610_v58  ;;  %17682 = vst [vmem:[#allocation112_spill] sm:$0xff] %v15628_v2  ;;  %17683 = vst [vmem:[#allocation113_spill] sm:$0xff] %v15632_v38  ;;  %v15634_v59 = vld [vmem:[#allocation6 + $0xc] ss:$16 sps:$4 sm:$0xff]   ;;  %v15638_v58 = vld [vmem:[#allocation6] ss:$16 sps:$4 sm:$0xff]  }
 0x44c   :  { %17684 = vst [vmem:[#allocation114_spill] sm:$0xff] %v15634_v59  ;;  %17685 = vst [vmem:[#allocation115_spill] sm:$0xff] %v15638_v58 }
 0x44e   :  { %4409 = vmatpush1.bf16.msra.mxu0 %v15614_v9  ;;  %4450 = vmatpush1.bf16.msra.mxu1 %v15616_v40  ;;  %v15640_v9 = vld [vmem:[#allocation6 + $0x8] ss:$16 sps:$4 sm:$0xff]   ;;  %v15644_v40 = vld [vmem:[#allocation6 + $0x24] ss:$16 sps:$4 sm:$0xff]  }
 0x44f   :  { %4410 = vmatprep.subr.bf16.mxu0 %v15620_v49  ;;  %4451 = vmatprep.subr.bf16.mxu1 %v15622_v36  ;;  %17686 = vst [vmem:[#allocation116_spill] sm:$0xff] %v15640_v9  ;;  %17687 = vst [vmem:[#allocation117_spill] sm:$0xff] %v15644_v40  ;;  %v15646_v49 = vld [vmem:[#allocation6 + $0x2c] ss:$16 sps:$4 sm:$0xff]  }
 0x450   :  { %17688 = vst [vmem:[#allocation118_spill] sm:$0xff] %v15646_v49 }
 0x452   :  { %4411 = vmatpush1.bf16.msra.mxu0 %v15626_v47  ;;  %4452 = vmatpush1.bf16.msra.mxu1 %v15628_v2  ;;  %v15652_v2 = vld [vmem:[#allocation6 + $0x20] ss:$16 sps:$4 sm:$0xff]   ;;  %v15654_v47 = vld [vmem:[#allocation6 + $0x28] ss:$16 sps:$4 sm:$0xff]  }
 0x453   :  { %4678 = vmatprep.subr.bf16.mxu0 %v15632_v38  ;;  %4719 = vmatprep.subr.bf16.mxu1 %v15634_v59  ;;  %17689 = vst [vmem:[#allocation119_spill] sm:$0xff] %v15652_v2  ;;  %17690 = vst [vmem:[#allocation120_spill] sm:$0xff] %v15654_v47  ;;  %v15658_v59 = vld [vmem:[#allocation6 + $0x44] ss:$16 sps:$4 sm:$0xff]   ;;  %v15660_v38 = vld [vmem:[#allocation6 + $0x4c] ss:$16 sps:$4 sm:$0xff]  }
 0x454   :  { %17691 = vst [vmem:[#allocation121_spill] sm:$0xff] %v15658_v59  ;;  %17692 = vst [vmem:[#allocation122_spill] sm:$0xff] %v15660_v38 }
 0x455   :  { %4429 = vmatmul.mubr.bf16.vlgmr.msra.gmra.mrb[80].mxu0 %v15436_v21  ;;  %4470 = vmatmul.mubr.bf16.vlgmr.msra.gmra.mrb[80].mxu1 %v15436_v21  ;;  %v15666_v21 = vld [vmem:[#allocation6 + $0x40] ss:$16 sps:$4 sm:$0xff]  }
 0x456   :  { %4679 = vmatpush1.bf16.msra.mxu0 %v15638_v58  ;;  %4720 = vmatpush1.bf16.msra.mxu1 %v15640_v9  ;;  %17693 = vst [vmem:[#allocation123_spill] sm:$0xff] %v15666_v21  ;;  %v15668_v9 = vld [vmem:[#allocation6 + $0x48] ss:$16 sps:$4 sm:$0xff]   ;;  %v15678_v58 = vld [vmem:[#allocation6 + $0x60] ss:$16 sps:$4 sm:$0xff]  }
 0x457   :  { %4680 = vmatprep.subr.bf16.mxu0 %v15644_v40  ;;  %4721 = vmatprep.subr.bf16.mxu1 %v15646_v49  ;;  %17694 = vst [vmem:[#allocation124_spill] sm:$0xff] %v15668_v9  ;;  %v15672_v49 = vld [vmem:[#allocation6 + $0x64] ss:$16 sps:$4 sm:$0xff]   ;;  %v15674_v40 = vld [vmem:[#allocation6 + $0x6c] ss:$16 sps:$4 sm:$0xff]   ;;  %17697 = vst [vmem:[#allocation21_spill] sm:$0xff] %v15678_v58 }
 0x458   :  { %4710 = vmatprep.mubr.bf16.mxu0 %v17512_v6  ;;  %4751 = vmatprep.mubr.bf16.mxu1 %v17512_v6  ;;  %17695 = vst [vmem:[#allocation125_spill] sm:$0xff] %v15672_v49  ;;  %17696 = vst [vmem:[#allocation19_spill] sm:$0xff] %v15674_v40 }
 0x45a   :  { %4681 = vmatpush1.bf16.msra.mxu0 %v15652_v2  ;;  %4722 = vmatpush1.bf16.msra.mxu1 %v15654_v47  ;;  %v15680_v2 = vld [vmem:[#allocation6 + $0x68] ss:$16 sps:$4 sm:$0xff]   ;;  %v15684_v47 = vld [vmem:[#allocation6 + $0x84] ss:$16 sps:$4 sm:$0xff]  }
 0x45b   :  { %4682 = vmatprep.subr.bf16.mxu0 %v15658_v59  ;;  %4723 = vmatprep.subr.bf16.mxu1 %v15660_v38  ;;  %17698 = vst [vmem:[#allocation20_spill] sm:$0xff] %v15680_v2  ;;  %17699 = vst [vmem:[#allocation23_spill] sm:$0xff] %v15684_v47  ;;  %v15686_v59 = vld [vmem:[#allocation6 + $0x8c] ss:$16 sps:$4 sm:$0xff]   ;;  %v15690_v38 = vld [vmem:[#allocation6 + $0x80] ss:$16 sps:$4 sm:$0xff]  }
 0x45c   :  { %17700 = vst [vmem:[#allocation62_spill] sm:$0xff] %v15686_v59  ;;  %17701 = vst [vmem:[#allocation65_spill] sm:$0xff] %v15690_v38 }
 0x45e   :  { %4683 = vmatpush1.bf16.msra.mxu0 %v15666_v21  ;;  %4724 = vmatpush1.bf16.msra.mxu1 %v15668_v9  ;;  %v15692_v21 = vld [vmem:[#allocation6 + $0x88] ss:$16 sps:$4 sm:$0xff]   ;;  %v15696_v9 = vld [vmem:[#allocation6 + $0xa4] ss:$16 sps:$4 sm:$0xff]  }
 0x45f   :  { %4684 = vmatprep.subr.bf16.mxu0 %v15672_v49  ;;  %4725 = vmatprep.subr.bf16.mxu1 %v15674_v40  ;;  %17702 = vst [vmem:[#allocation64_spill] sm:$0xff] %v15692_v21  ;;  %17703 = vst [vmem:[#allocation66_spill] sm:$0xff] %v15696_v9  ;;  %v15698_v49 = vld [vmem:[#allocation6 + $0xac] ss:$16 sps:$4 sm:$0xff]   ;;  %v15702_v40 = vld [vmem:[#allocation6 + $0xa0] ss:$16 sps:$4 sm:$0xff]  }
 0x460   :  { %17704 = vst [vmem:[#allocation126_spill] sm:$0xff] %v15698_v49  ;;  %17705 = vst [vmem:[#allocation127_spill] sm:$0xff] %v15702_v40 }
 0x462   :  { %4685 = vmatpush1.bf16.msra.mxu0 %v15678_v58  ;;  %4726 = vmatpush1.bf16.msra.mxu1 %v15680_v2  ;;  %v15704_v58 = vld [vmem:[#allocation6 + $0xa8] ss:$16 sps:$4 sm:$0xff]   ;;  %v15708_v2 = vld [vmem:[#allocation6 + $0xc4] ss:$16 sps:$4 sm:$0xff]  }
 0x463   :  { %4686 = vmatprep.subr.bf16.mxu0 %v15684_v47  ;;  %4727 = vmatprep.subr.bf16.mxu1 %v15686_v59  ;;  %v15710_v47 = vld [vmem:[#allocation6 + $0xcc] ss:$16 sps:$4 sm:$0xff]   ;;  %v15714_v59 = vld [vmem:[#allocation6 + $0xc0] ss:$16 sps:$4 sm:$0xff]  }
 0x466   :  { %4687 = vmatpush1.bf16.msra.mxu0 %v15690_v38  ;;  %4728 = vmatpush1.bf16.msra.mxu1 %v15692_v21  ;;  %v15716_v38 = vld [vmem:[#allocation6 + $0xc8] ss:$16 sps:$4 sm:$0xff]   ;;  %v15720_v21 = vld [vmem:[#allocation6 + $0xe4] ss:$16 sps:$4 sm:$0xff]  }
 0x467   :  { %4688 = vmatprep.subr.bf16.mxu0 %v15696_v9  ;;  %4729 = vmatprep.subr.bf16.mxu1 %v15698_v49  ;;  %v15722_v9 = vld [vmem:[#allocation6 + $0xec] ss:$16 sps:$4 sm:$0xff]   ;;  %v15726_v49 = vld [vmem:[#allocation6 + $0xe0] ss:$16 sps:$4 sm:$0xff]  }
 0x46a   :  { %4689 = vmatpush1.bf16.msra.mxu0 %v15702_v40  ;;  %4730 = vmatpush1.bf16.msra.mxu1 %v15704_v58  ;;  %v15728_v40 = vld [vmem:[#allocation6 + $0xe8] ss:$16 sps:$4 sm:$0xff]  }
 0x46b   :  { %4690 = vmatprep.subr.bf16.mxu0 %v15708_v2  ;;  %4731 = vmatprep.subr.bf16.mxu1 %v15710_v47 }
 0x46e   :  { %4691 = vmatpush1.bf16.msra.mxu0 %v15714_v59  ;;  %4732 = vmatpush1.bf16.msra.mxu1 %v15716_v38 }
 0x46f   :  { %4692 = vmatprep.subr.bf16.mxu0 %v15720_v21  ;;  %4733 = vmatprep.subr.bf16.mxu1 %v15722_v9 }
 0x472   :  { %4693 = vmatpush1.bf16.msra.mxu0 %v15726_v49  ;;  %4734 = vmatpush1.bf16.msra.mxu1 %v15728_v40 }
 0x473   :  { %4998 = vmatprep.subr.bf16.mxu0 %v15318_v19  ;;  %5039 = vmatprep.subr.bf16.mxu1 %v15320_v35 }
 0x475   :  { %4711 = vmatmul.mubr.bf16.vlgmr.msra.gmra.mrb[84].mxu0 %v15540_v52  ;;  %4752 = vmatmul.mubr.bf16.vlgmr.msra.gmra.mrb[84].mxu1 %v15540_v52 }
 0x476   :  { %4999 = vmatpush1.bf16.msra.mxu0 %v15322_v20  ;;  %5040 = vmatpush1.bf16.msra.mxu1 %v15324_v22  ;;  %v17706_v20 = vld [vmem:[#allocation22_spill] sm:$0xff] }
 0x477   :  { %5000 = vmatprep.subr.bf16.mxu0 %v15330_v25  ;;  %5041 = vmatprep.subr.bf16.mxu1 %v15332_v60  ;;  %v17707_v25 = vld [vmem:[#allocation25_spill] sm:$0xff] }
 0x478   :  { %5030 = vmatprep.mubr.bf16.mxu0 %v17512_v6  ;;  %5071 = vmatprep.mubr.bf16.mxu1 %v17512_v6 }
 0x47a   :  { %5001 = vmatpush1.bf16.msra.mxu0 %v15334_v17  ;;  %5042 = vmatpush1.bf16.msra.mxu1 %v15336_v43 }
 0x47b   :  { %5002 = vmatprep.subr.bf16.mxu0 %v15342_v61  ;;  %5043 = vmatprep.subr.bf16.mxu1 %v15344_v15  ;;  %v17708_v61 = vld [vmem:[#allocation24_spill] sm:$0xff] }
 0x47e   :  { %5003 = vmatpush1.bf16.msra.mxu0 %v15346_v28  ;;  %5044 = vmatpush1.bf16.msra.mxu1 %v15348_v18  ;;  %v17709_v28 = vld [vmem:[#allocation26_spill] sm:$0xff] }
 0x47f   :  { %5004 = vmatprep.subr.bf16.mxu0 %v15354_v29  ;;  %5045 = vmatprep.subr.bf16.mxu1 %v15356_v32 }
 0x482   :  { %5005 = vmatpush1.bf16.msra.mxu0 %v15358_v56  ;;  %5046 = vmatpush1.bf16.msra.mxu1 %v15360_v63 }
 0x483   :  { %5006 = vmatprep.subr.bf16.mxu0 %v15366_v5  ;;  %5047 = vmatprep.subr.bf16.mxu1 %v15368_v31 }
 0x486   :  { %5007 = vmatpush1.bf16.msra.mxu0 %v15370_v24  ;;  %5048 = vmatpush1.bf16.msra.mxu1 %v15372_v26 }
 0x487   :  { %5008 = vmatprep.subr.bf16.mxu0 %v15378_v27  ;;  %5049 = vmatprep.subr.bf16.mxu1 %v15380_v30 }
 0x48a   :  { %5009 = vmatpush1.bf16.msra.mxu0 %v15382_v14  ;;  %5050 = vmatpush1.bf16.msra.mxu1 %v15384_v54 }
 0x48b   :  { %5010 = vmatprep.subr.bf16.mxu0 %v15390_v42  ;;  %5051 = vmatprep.subr.bf16.mxu1 %v15392_v10 }
 0x48e   :  { %5011 = vmatpush1.bf16.msra.mxu0 %v15394_v1  ;;  %5052 = vmatpush1.bf16.msra.mxu1 %v15396_v39 }
 0x48f   :  { %5012 = vmatprep.subr.bf16.mxu0 %v15402_v3  ;;  %5053 = vmatprep.subr.bf16.mxu1 %v15404_v55 }
 0x492   :  { %5013 = vmatpush1.bf16.msra.mxu0 %v15406_v13  ;;  %5054 = vmatpush1.bf16.msra.mxu1 %v15408_v50 }
 0x493   :  { %5284 = vmatprep.subr.bf16.mxu0 %v15414_v41  ;;  %5325 = vmatprep.subr.bf16.mxu1 %v15416_v57  ;;  %v17710_v57 = vld [vmem:[#allocation59_spill] sm:$0xff] }
 0x528   :  { %v4430_v19 = vpop.f32.mrb[80].mxu0  ;;  %v4471_v35 = vpop.f32.mrb[80].mxu1 }
 0x529   :  { %v4478_v22 = vadd.f32 %v4430_v19, %v17706_v20  ;;  %v4480_v60 = vadd.f32 %v4471_v35, %v17707_v25  ;;  %v4432_v17 = vpop.f32.mrb[81].mxu0  ;;  %v4473_v43 = vpop.f32.mrb[81].mxu1  ;;  %v17711_v19 = vld [vmem:[#allocation61_spill] sm:$0xff] }
 0x52a   :  { %v4479_v15 = vadd.f32 %v4432_v17, %v17708_v61  ;;  %v4481_v18 = vadd.f32 %v4473_v43, %v17709_v28  ;;  %v4434_v29 = vpop.f32.mrb[82].mxu0  ;;  %v4475_v32 = vpop.f32.mrb[82].mxu1  ;;  %v17713_v43 = vld [vmem:[#allocation63_spill] sm:$0xff] }
 0x52b   :  { %v4764_v56 = vmul.f32 0.5, %v4478_v22  ;;  %v4435_v63 = vpop.f32.mrb[83].mxu0  ;;  %v4476_v5 = vpop.f32.mrb[83].mxu1 }
 0x52c   :  { %v4768_v31 = vmul.f32 0.5, %v4479_v15  ;;  %v4773_v24 = vmul.f32 0.5, %v4481_v18 }
 0x52d   :  { %14036 = vtanh.f32 %v4764_v56 }
 0x52e   :  { %14038 = vtanh.f32 %v4768_v31 }
 0x52f   :  { %14040 = vtanh.f32 %v4480_v60  ;;  %v17712_v60 = vld [vmem:[#allocation60_spill] sm:$0xff] }
 0x530   :  { %14042 = vtanh.f32 %v4773_v24 }
 0x537   :  { %v14037_v26 = vpop.eup %14036 }
 0x538   :  { %v14039_v27 = vpop.eup %14038  ;;  %v4766_v30 = vadd.f32 1.0, %v14037_v26 }
 0x539   :  { %v4770_v14 = vadd.f32 1.0, %v14039_v27  ;;  %v14041_v42 = vpop.eup %14040  ;;  %v17715_v27 = vld [vmem:[#allocation69_spill] sm:$0xff] }
 0x53a   :  { %v4767_v54 = vmul.f32 0.5, %v4766_v30  ;;  %v14043_v55 = vpop.eup %14042  ;;  %v17716_v30 = vld [vmem:[#allocation70_spill] sm:$0xff] }
 0x53b   :  { %v4771_v10 = vmul.f32 0.5, %v4770_v14  ;;  %v4775_v13 = vadd.f32 1.0, %v14043_v55  ;;  %v17720_v14 = vld [vmem:[#allocation74_spill] sm:$0xff]  ;;  %v17726_v55 = vld [vmem:[#allocation80_spill] sm:$0xff] }
 0x53c   :  { %v4778_v1 = vmul.f32 %v14041_v42, %v4767_v54  ;;  %v17722_v54 = vld [vmem:[#allocation76_spill] sm:$0xff] }
 0x53d   :  { %v4777_v39 = vmul.f32 %v4771_v10, %v15425_v48  ;;  %v4776_v25 = vmul.f32 0.5, %v4775_v13  ;;  %v17723_v10 = vld [vmem:[#allocation77_spill] sm:$0xff] }
 0x53f   :  { %v15777_v3 = vadd.f32 %v4778_v1, %v4777_v39  ;;  %v17724_v1 = vld [vmem:[#allocation78_spill] sm:$0xff]  ;;  %v17725_v39 = vld [vmem:[#allocation79_spill] sm:$0xff] }
 0x541   :  { %14044 = vtanh.f32 %v15777_v3 }
 0x548   :  { %v4712_v50 = vpop.f32.mrb[84].mxu0  ;;  %v4753_v41 = vpop.f32.mrb[84].mxu1 }
 0x549   :  { %v4760_v52 = vadd.f32 %v4712_v50, %v17710_v57  ;;  %v4762_v35 = vadd.f32 %v4753_v41, %v17711_v19  ;;  %v4714_v20 = vpop.f32.mrb[85].mxu0  ;;  %v4755_v22 = vpop.f32.mrb[85].mxu1  ;;  %v17727_v50 = vld [vmem:[#allocation81_spill] sm:$0xff]  ;;  %v17728_v19 = vld [vmem:[#allocation82_spill] sm:$0xff] }
 0x54a   :  { %v4761_v17 = vadd.f32 %v4714_v20, %v17712_v60  ;;  %v4763_v61 = vadd.f32 %v4755_v22, %v17713_v43  ;;  %v4716_v48 = vpop.f32.mrb[86].mxu0  ;;  %v4757_v15 = vpop.f32.mrb[86].mxu1  ;;  %v17730_v20 = vld [vmem:[#allocation84_spill] sm:$0xff]  ;;  %v17732_v22 = vld [vmem:[#allocation86_spill] sm:$0xff] }
 0x54b   :  { %v14045_v28 = vpop.eup %14044  ;;  %v4782_v18 = vmul.f32 0.5, %v4760_v52  ;;  %v4717_v29 = vpop.f32.mrb[87].mxu0  ;;  %v17736_v60 = vld [vmem:[#allocation90_spill] sm:$0xff]  ;;  %v17738_v43 = vld [vmem:[#allocation92_spill] sm:$0xff]  ;;  %v17741_v15 = vld [vmem:[#allocation95_spill] sm:$0xff] }
 0x54c   :  { %v4758_v32 = vpop.f32.mrb[87].mxu1  ;;  %v4781_v56 = vmul.f32 %v14045_v28, %v4776_v25  ;;  %v4786_v63 = vmul.f32 0.5, %v4761_v17  ;;  %v4791_v31 = vmul.f32 0.5, %v4763_v61  ;;  %v17733_v25 = vld [vmem:[#allocation87_spill] sm:$0xff]  ;;  %v17739_v61 = vld [vmem:[#allocation93_spill] sm:$0xff]  ;;  %v17740_v48 = vld [vmem:[#allocation94_spill] sm:$0xff] }
 0x54d   :  { %14046 = vtanh.f32 %v4782_v18  ;;  %v17737_v17 = vld [vmem:[#allocation91_spill] sm:$0xff]  ;;  %v17742_v28 = vld [vmem:[#allocation96_spill] sm:$0xff]  ;;  %v17743_v18 = vld [vmem:[#allocation97_spill] sm:$0xff] }
 0x54e   :  { %v15784_v5 = vpack.c.bf16 %v4781_v56, %v4781_v56  ;;  %14048 = vtanh.f32 %v4786_v63  ;;  %v17744_v29 = vld [vmem:[#allocation98_spill] sm:$0xff]  ;;  %v17745_v32 = vld [vmem:[#allocation99_spill] sm:$0xff]  ;;  %v17746_v56 = vld [vmem:[#allocation100_spill] sm:$0xff] }
 0x54f   :  { %14050 = vtanh.f32 %v4762_v35  ;;  %v17729_v35 = vld [vmem:[#allocation83_spill] sm:$0xff]  ;;  %v17747_v63 = vld [vmem:[#allocation101_spill] sm:$0xff] }
 0x550   :  { %5031 = vmatmul.mubr.bf16.vlgmr.msra.gmra.mrb[88].mxu0 %v15784_v5  ;;  %5072 = vmatmul.mubr.bf16.vlgmr.msra.gmra.mrb[88].mxu1 %v15784_v5  ;;  %14052 = vtanh.f32 %v4791_v31  ;;  %v17748_v31 = vld [vmem:[#allocation102_spill] sm:$0xff] }
 0x551   :  { %5285 = vmatpush1.bf16.msra.mxu0 %v15432_v12  ;;  %5326 = vmatpush1.bf16.msra.mxu1 %v15434_v8 }
 0x552   :  { %5286 = vmatprep.subr.bf16.mxu0 %v15438_v44  ;;  %5327 = vmatprep.subr.bf16.mxu1 %v15440_v45 }
 0x553   :  { %5316 = vmatprep.mubr.bf16.mxu0 %v17512_v6  ;;  %5357 = vmatprep.mubr.bf16.mxu1 %v17512_v6 }
 0x555   :  { %5287 = vmatpush1.bf16.msra.mxu0 %v15446_v46  ;;  %5328 = vmatpush1.bf16.msra.mxu1 %v15448_v62 }
 0x556   :  { %5288 = vmatprep.subr.bf16.mxu0 %v15452_v16  ;;  %5329 = vmatprep.subr.bf16.mxu1 %v15454_v23  ;;  %v17714_v23 = vld [vmem:[#allocation68_spill] sm:$0xff] }
 0x557   :  { %v14047_v12 = vpop.eup %14046 }
 0x558   :  { %v14049_v24 = vpop.eup %14048  ;;  %v4784_v8 = vadd.f32 1.0, %v14047_v12  ;;  %v17749_v12 = vld [vmem:[#allocation103_spill] sm:$0xff] }
 0x559   :  { %v4788_v26 = vadd.f32 1.0, %v14049_v24  ;;  %5289 = vmatpush1.bf16.msra.mxu0 %v15460_v33  ;;  %5330 = vmatpush1.bf16.msra.mxu1 %v15462_v51  ;;  %v14051_v45 = vpop.eup %14050  ;;  %v17717_v51 = vld [vmem:[#allocation71_spill] sm:$0xff]  ;;  %v17750_v24 = vld [vmem:[#allocation104_spill] sm:$0xff] }
 0x55a   :  { %v4785_v44 = vmul.f32 0.5, %v4784_v8  ;;  %5290 = vmatprep.subr.bf16.mxu0 %v15466_v37  ;;  %5331 = vmatprep.subr.bf16.mxu1 %v15468_v0  ;;  %v17718_v37 = vld [vmem:[#allocation72_spill] sm:$0xff]  ;;  %v17719_v0 = vld [vmem:[#allocation73_spill] sm:$0xff] }
 0x55b   :  { %v4789_v46 = vmul.f32 0.5, %v4788_v26  ;;  %v17751_v8 = vld [vmem:[#allocation105_spill] sm:$0xff]  ;;  %v17752_v26 = vld [vmem:[#allocation106_spill] sm:$0xff] }
 0x55c   :  { %v4796_v62 = vmul.f32 %v14051_v45, %v4785_v44  ;;  %v17753_v44 = vld [vmem:[#allocation107_spill] sm:$0xff]  ;;  %v17754_v45 = vld [vmem:[#allocation108_spill] sm:$0xff] }
 0x55d   :  { %v4795_v16 = vmul.f32 %v4789_v46, %v15495_v34  ;;  %5291 = vmatpush1.bf16.msra.mxu0 %v15472_v7  ;;  %5332 = vmatpush1.bf16.msra.mxu1 %v17714_v23  ;;  %v14053_v34 = vpop.eup %14052  ;;  %v17721_v7 = vld [vmem:[#allocation75_spill] sm:$0xff]  ;;  %v17755_v46 = vld [vmem:[#allocation109_spill] sm:$0xff]  ;;  %v17758_v23 = vld [vmem:[#allocation112_spill] sm:$0xff] }
 0x55e   :  { %5292 = vmatprep.subr.bf16.mxu0 %v17715_v27  ;;  %5333 = vmatprep.subr.bf16.mxu1 %v17716_v30  ;;  %v4793_v42 = vadd.f32 1.0, %v14053_v34  ;;  %v17759_v27 = vld [vmem:[#allocation113_spill] sm:$0xff]  ;;  %v17760_v30 = vld [vmem:[#allocation114_spill] sm:$0xff]  ;;  %v17766_v34 = vld [vmem:[#allocation120_spill] sm:$0xff] }
 0x55f   :  { %v15807_v33 = vadd.f32 %v4796_v62, %v4795_v16  ;;  %v17756_v62 = vld [vmem:[#allocation110_spill] sm:$0xff]  ;;  %v17757_v16 = vld [vmem:[#allocation111_spill] sm:$0xff] }
 0x560   :  { %v4794_v13 = vmul.f32 0.5, %v4793_v42  ;;  %v17770_v42 = vld [vmem:[#allocation124_spill] sm:$0xff] }
 0x561   :  { %14054 = vtanh.f32 %v15807_v33  ;;  %5293 = vmatpush1.bf16.msra.mxu0 %v17717_v51  ;;  %5334 = vmatpush1.bf16.msra.mxu1 %v17718_v37  ;;  %v17761_v51 = vld [vmem:[#allocation115_spill] sm:$0xff]  ;;  %v17762_v37 = vld [vmem:[#allocation116_spill] sm:$0xff] }
 0x562   :  { %5294 = vmatprep.subr.bf16.mxu0 %v17719_v0  ;;  %5335 = vmatprep.subr.bf16.mxu1 %v17720_v14  ;;  %v17763_v0 = vld [vmem:[#allocation117_spill] sm:$0xff]  ;;  %v17764_v14 = vld [vmem:[#allocation118_spill] sm:$0xff] }
 0x565   :  { %5295 = vmatpush1.bf16.msra.mxu0 %v17721_v7  ;;  %5336 = vmatpush1.bf16.msra.mxu1 %v17722_v54  ;;  %v17767_v7 = vld [vmem:[#allocation121_spill] sm:$0xff]  ;;  %v17768_v54 = vld [vmem:[#allocation122_spill] sm:$0xff] }
 0x566   :  { %5296 = vmatprep.subr.bf16.mxu0 %v17723_v10  ;;  %5337 = vmatprep.subr.bf16.mxu1 %v17724_v1  ;;  %v17771_v10 = vld [vmem:[#allocation125_spill] sm:$0xff]  ;;  %v17772_v1 = vld [vmem:[#allocation19_spill] sm:$0xff] }
 0x569   :  { %5297 = vmatpush1.bf16.msra.mxu0 %v17725_v39  ;;  %5338 = vmatpush1.bf16.msra.mxu1 %v17726_v55  ;;  %v17773_v39 = vld [vmem:[#allocation21_spill] sm:$0xff]  ;;  %v17774_v55 = vld [vmem:[#allocation20_spill] sm:$0xff] }
 0x56a   :  { %5298 = vmatprep.subr.bf16.mxu0 %v15518_v53  ;;  %5339 = vmatprep.subr.bf16.mxu1 %v17727_v50  ;;  %v17731_v53 = vld [vmem:[#allocation85_spill] sm:$0xff]  ;;  %v17776_v50 = vld [vmem:[#allocation62_spill] sm:$0xff] }
 0x56b   :  { %v14055_v41 = vpop.eup %14054 }
 0x56c   :  { %v4799_v57 = vmul.f32 %v14055_v41, %v4794_v13  ;;  %v17775_v13 = vld [vmem:[#allocation23_spill] sm:$0xff]  ;;  %v17777_v41 = vld [vmem:[#allocation65_spill] sm:$0xff] }
 0x56d   :  { %5299 = vmatpush1.bf16.msra.mxu0 %v15524_v4  ;;  %5340 = vmatpush1.bf16.msra.mxu1 %v15526_v11  ;;  %v17734_v4 = vld [vmem:[#allocation88_spill] sm:$0xff]  ;;  %v17735_v11 = vld [vmem:[#allocation89_spill] sm:$0xff] }
 0x56e   :  { %v15824_v52 = vpack.c.bf16 %v4799_v57, %v4799_v57  ;;  %5570 = vmatprep.subr.bf16.mxu0 %v17728_v19  ;;  %5611 = vmatprep.subr.bf16.mxu1 %v17729_v35  ;;  %v17778_v57 = vld [vmem:[#allocation64_spill] sm:$0xff]  ;;  %v17779_v19 = vld [vmem:[#allocation66_spill] sm:$0xff] }
 0x56f   :  { %v17780_v35 = vld [vmem:[#allocation126_spill] sm:$0xff] }
 0x570   :  { %5317 = vmatmul.mubr.bf16.vlgmr.msra.gmra.mrb[92].mxu0 %v15824_v52  ;;  %5358 = vmatmul.mubr.bf16.vlgmr.msra.gmra.mrb[92].mxu1 %v15824_v52 }
 0x571   :  { %5571 = vmatpush1.bf16.msra.mxu0 %v17730_v20  ;;  %5612 = vmatpush1.bf16.msra.mxu1 %v17731_v53  ;;  %v17781_v20 = vld [vmem:[#allocation127_spill] sm:$0xff] }
 0x572   :  { %5572 = vmatprep.subr.bf16.mxu0 %v17732_v22  ;;  %5613 = vmatprep.subr.bf16.mxu1 %v17733_v25  ;;  %v15930_v53 = vld [vmem:[#allocation8 + $0x40] ss:$16 sps:$4 sm:$0xff]   ;;  %v15932_v22 = vld [vmem:[#allocation8 + $0x48] ss:$16 sps:$4 sm:$0xff]   ;;  %v15938_v25 = vld [vmem:[#allocation8 + $0x64] ss:$16 sps:$4 sm:$0xff]  }
 0x573   :  { %5602 = vmatprep.mubr.bf16.mxu0 %v17512_v6  ;;  %5643 = vmatprep.mubr.bf16.mxu1 %v17512_v6 }
 0x575   :  { %5573 = vmatpush1.bf16.msra.mxu0 %v17734_v4  ;;  %5614 = vmatpush1.bf16.msra.mxu1 %v17735_v11  ;;  %v15940_v4 = vld [vmem:[#allocation8 + $0x6c] ss:$16 sps:$4 sm:$0xff]   ;;  %v15942_v11 = vld [vmem:[#allocation8 + $0x60] ss:$16 sps:$4 sm:$0xff]  }
 0x576   :  { %5574 = vmatprep.subr.bf16.mxu0 %v17736_v60  ;;  %5615 = vmatprep.subr.bf16.mxu1 %v17737_v17  ;;  %v15944_v60 = vld [vmem:[#allocation8 + $0x68] ss:$16 sps:$4 sm:$0xff]   ;;  %v15950_v17 = vld [vmem:[#allocation8 + $0x84] ss:$16 sps:$4 sm:$0xff]  }
 0x579   :  { %5575 = vmatpush1.bf16.msra.mxu0 %v17738_v43  ;;  %5616 = vmatpush1.bf16.msra.mxu1 %v17739_v61  ;;  %v15952_v43 = vld [vmem:[#allocation8 + $0x8c] ss:$16 sps:$4 sm:$0xff]   ;;  %v15954_v61 = vld [vmem:[#allocation8 + $0x80] ss:$16 sps:$4 sm:$0xff]  }
 0x57a   :  { %5576 = vmatprep.subr.bf16.mxu0 %v17740_v48  ;;  %5617 = vmatprep.subr.bf16.mxu1 %v17741_v15  ;;  %v15956_v48 = vld [vmem:[#allocation8 + $0x88] ss:$16 sps:$4 sm:$0xff]   ;;  %v15962_v15 = vld [vmem:[#allocation8 + $0xa4] ss:$16 sps:$4 sm:$0xff]  }
 0x57d   :  { %5577 = vmatpush1.bf16.msra.mxu0 %v17742_v28  ;;  %5618 = vmatpush1.bf16.msra.mxu1 %v17743_v18  ;;  %v15964_v28 = vld [vmem:[#allocation8 + $0xac] ss:$16 sps:$4 sm:$0xff]   ;;  %v15966_v18 = vld [vmem:[#allocation8 + $0xa0] ss:$16 sps:$4 sm:$0xff]  }
 0x57e   :  { %5578 = vmatprep.subr.bf16.mxu0 %v17744_v29  ;;  %5619 = vmatprep.subr.bf16.mxu1 %v17745_v32  ;;  %v15968_v29 = vld [vmem:[#allocation8 + $0xa8] ss:$16 sps:$4 sm:$0xff]   ;;  %v15974_v32 = vld [vmem:[#allocation8 + $0xc4] ss:$16 sps:$4 sm:$0xff]  }
 0x581   :  { %5579 = vmatpush1.bf16.msra.mxu0 %v17746_v56  ;;  %5620 = vmatpush1.bf16.msra.mxu1 %v17747_v63  ;;  %v15976_v56 = vld [vmem:[#allocation8 + $0xcc] ss:$16 sps:$4 sm:$0xff]   ;;  %v15978_v63 = vld [vmem:[#allocation8 + $0xc0] ss:$16 sps:$4 sm:$0xff]  }
 0x582   :  { %5580 = vmatprep.subr.bf16.mxu0 %v17748_v31  ;;  %5621 = vmatprep.subr.bf16.mxu1 %v17749_v12  ;;  %v15980_v31 = vld [vmem:[#allocation8 + $0xc8] ss:$16 sps:$4 sm:$0xff]   ;;  %v15986_v12 = vld [vmem:[#allocation8 + $0xe4] ss:$16 sps:$4 sm:$0xff]  }
 0x585   :  { %5581 = vmatpush1.bf16.msra.mxu0 %v17750_v24  ;;  %5622 = vmatpush1.bf16.msra.mxu1 %v17751_v8  ;;  %v15988_v24 = vld [vmem:[#allocation8 + $0xec] ss:$16 sps:$4 sm:$0xff]   ;;  %v15990_v8 = vld [vmem:[#allocation8 + $0xe0] ss:$16 sps:$4 sm:$0xff]  }
 0x586   :  { %5582 = vmatprep.subr.bf16.mxu0 %v17752_v26  ;;  %5623 = vmatprep.subr.bf16.mxu1 %v17753_v44  ;;  %v15992_v26 = vld [vmem:[#allocation8 + $0xe8] ss:$16 sps:$4 sm:$0xff]   ;;  %v15998_v44 = vld [vmem:[#allocation8 + $0x104] ss:$16 sps:$4 sm:$0xff]  }
 0x589   :  { %5583 = vmatpush1.bf16.msra.mxu0 %v17754_v45  ;;  %5624 = vmatpush1.bf16.msra.mxu1 %v17755_v46  ;;  %v16000_v45 = vld [vmem:[#allocation8 + $0x10c] ss:$16 sps:$4 sm:$0xff]  }
 0x58a   :  { %5584 = vmatprep.subr.bf16.mxu0 %v17756_v62  ;;  %5625 = vmatprep.subr.bf16.mxu1 %v15622_v36  ;;  %v17765_v36 = vld [vmem:[#allocation119_spill] sm:$0xff] }
 0x58d   :  { %5585 = vmatpush1.bf16.msra.mxu0 %v17757_v16  ;;  %5626 = vmatpush1.bf16.msra.mxu1 %v17758_v23  ;;  %v17782_v16 = vld [vmem:[#allocation27_spill] sm:$0xff] }
 0x58e   :  { %5852 = vmatprep.subr.bf16.mxu0 %v17759_v27  ;;  %5893 = vmatprep.subr.bf16.mxu1 %v17760_v30  ;;  %v17783_v27 = vld [vmem:[#allocation29_spill] sm:$0xff] }
 0x590   :  { %5603 = vmatmul.mubr.bf16.vlgmr.msra.gmra.mrb[96].mxu0 %v15784_v5  ;;  %5644 = vmatmul.mubr.bf16.vlgmr.msra.gmra.mrb[96].mxu1 %v15784_v5  ;;  %v17769_v5 = vld [vmem:[#allocation123_spill] sm:$0xff] }
 0x591   :  { %5853 = vmatpush1.bf16.msra.mxu0 %v17761_v51  ;;  %5894 = vmatpush1.bf16.msra.mxu1 %v17762_v37 }
 0x592   :  { %5854 = vmatprep.subr.bf16.mxu0 %v17763_v0  ;;  %5895 = vmatprep.subr.bf16.mxu1 %v17764_v14  ;;  %v17784_v0 = vld [vmem:[#allocation28_spill] sm:$0xff] }
 0x593   :  { %5884 = vmatprep.mubr.bf16.mxu0 %v17512_v6  ;;  %5925 = vmatprep.mubr.bf16.mxu1 %v17512_v6 }
 0x595   :  { %5855 = vmatpush1.bf16.msra.mxu0 %v17765_v36  ;;  %5896 = vmatpush1.bf16.msra.mxu1 %v17766_v34  ;;  %v17785_v36 = vld [vmem:[#allocation31_spill] sm:$0xff] }
 0x596   :  { %5856 = vmatprep.subr.bf16.mxu0 %v17767_v7  ;;  %5897 = vmatprep.subr.bf16.mxu1 %v17768_v54 }
 0x599   :  { %5857 = vmatpush1.bf16.msra.mxu0 %v17769_v5  ;;  %5898 = vmatpush1.bf16.msra.mxu1 %v17770_v42 }
 0x59a   :  { %5858 = vmatprep.subr.bf16.mxu0 %v17771_v10  ;;  %5899 = vmatprep.subr.bf16.mxu1 %v17772_v1 }
 0x59d   :  { %5859 = vmatpush1.bf16.msra.mxu0 %v17773_v39  ;;  %5900 = vmatpush1.bf16.msra.mxu1 %v17774_v55 }
 0x59e   :  { %5860 = vmatprep.subr.bf16.mxu0 %v17775_v13  ;;  %5901 = vmatprep.subr.bf16.mxu1 %v17776_v50 }
 0x5a1   :  { %5861 = vmatpush1.bf16.msra.mxu0 %v17777_v41  ;;  %5902 = vmatpush1.bf16.msra.mxu1 %v17778_v57 }
 0x5a2   :  { %5862 = vmatprep.subr.bf16.mxu0 %v17779_v19  ;;  %5903 = vmatprep.subr.bf16.mxu1 %v17780_v35 }
 0x5a5   :  { %5863 = vmatpush1.bf16.msra.mxu0 %v17781_v20  ;;  %5904 = vmatpush1.bf16.msra.mxu1 %v15704_v58  ;;  %v15918_v58 = vld [vmem:[#allocation8 + $0x20] ss:$16 sps:$4 sm:$0xff]  }
 0x5a6   :  { %5864 = vmatprep.subr.bf16.mxu0 %v15708_v2  ;;  %5905 = vmatprep.subr.bf16.mxu1 %v15710_v47  ;;  %v15902_v47 = vld [vmem:[#allocation8 + $0x4] ss:$16 sps:$4 sm:$0xff]   ;;  %v15904_v2 = vld [vmem:[#allocation8 + $0xc] ss:$16 sps:$4 sm:$0xff]  }
 0x5a9   :  { %5865 = vmatpush1.bf16.msra.mxu0 %v15714_v59  ;;  %5906 = vmatpush1.bf16.msra.mxu1 %v15716_v38  ;;  %v15906_v38 = vld [vmem:[#allocation8] ss:$16 sps:$4 sm:$0xff]   ;;  %v15908_v59 = vld [vmem:[#allocation8 + $0x8] ss:$16 sps:$4 sm:$0xff]  }
 0x5aa   :  { %5866 = vmatprep.subr.bf16.mxu0 %v15720_v21  ;;  %5907 = vmatprep.subr.bf16.mxu1 %v15722_v9  ;;  %v15920_v9 = vld [vmem:[#allocation8 + $0x28] ss:$16 sps:$4 sm:$0xff]   ;;  %v15926_v21 = vld [vmem:[#allocation8 + $0x44] ss:$16 sps:$4 sm:$0xff]  }
 0x5ad   :  { %5867 = vmatpush1.bf16.msra.mxu0 %v15726_v49  ;;  %5908 = vmatpush1.bf16.msra.mxu1 %v15728_v40  ;;  %v15914_v40 = vld [vmem:[#allocation8 + $0x24] ss:$16 sps:$4 sm:$0xff]   ;;  %v15916_v49 = vld [vmem:[#allocation8 + $0x2c] ss:$16 sps:$4 sm:$0xff]  }
 0x5ae   :  { %6172 = vmatprep.subr.bf16.mxu0 %v15902_v47  ;;  %6213 = vmatprep.subr.bf16.mxu1 %v15904_v2 }
 0x5b0   :  { %5885 = vmatmul.mubr.bf16.vlgmr.msra.gmra.mrb[100].mxu0 %v15824_v52  ;;  %5926 = vmatmul.mubr.bf16.vlgmr.msra.gmra.mrb[100].mxu1 %v15824_v52  ;;  %v15928_v52 = vld [vmem:[#allocation8 + $0x4c] ss:$16 sps:$4 sm:$0xff]  }
 0x5b1   :  { %6204 = vmatprep.mubr.bf16.mxu0 %v17512_v6  ;;  %6245 = vmatprep.mubr.bf16.mxu1 %v17512_v6 }
 0x5b2   :  { %6173 = vmatpush1.bf16.msra.mxu0 %v15906_v38  ;;  %6214 = vmatpush1.bf16.msra.mxu1 %v15908_v59 }
 0x5b3   :  { %6174 = vmatprep.subr.bf16.mxu0 %v15914_v40  ;;  %6215 = vmatprep.subr.bf16.mxu1 %v15916_v49 }
 0x5b6   :  { %6175 = vmatpush1.bf16.msra.mxu0 %v15918_v58  ;;  %6216 = vmatpush1.bf16.msra.mxu1 %v15920_v9 }
 0x5b7   :  { %6176 = vmatprep.subr.bf16.mxu0 %v15926_v21  ;;  %6217 = vmatprep.subr.bf16.mxu1 %v15928_v52 }
 0x5ba   :  { %6177 = vmatpush1.bf16.msra.mxu0 %v15930_v53  ;;  %6218 = vmatpush1.bf16.msra.mxu1 %v15932_v22 }
 0x5bb   :  { %6178 = vmatprep.subr.bf16.mxu0 %v15938_v25  ;;  %6219 = vmatprep.subr.bf16.mxu1 %v15940_v4 }
 0x5be   :  { %6179 = vmatpush1.bf16.msra.mxu0 %v15942_v11  ;;  %6220 = vmatpush1.bf16.msra.mxu1 %v15944_v60 }
 0x5bf   :  { %6180 = vmatprep.subr.bf16.mxu0 %v15950_v17  ;;  %6221 = vmatprep.subr.bf16.mxu1 %v15952_v43 }
 0x5c2   :  { %6181 = vmatpush1.bf16.msra.mxu0 %v15954_v61  ;;  %6222 = vmatpush1.bf16.msra.mxu1 %v15956_v48 }
 0x5c3   :  { %6182 = vmatprep.subr.bf16.mxu0 %v15962_v15  ;;  %6223 = vmatprep.subr.bf16.mxu1 %v15964_v28 }
 0x5c6   :  { %6183 = vmatpush1.bf16.msra.mxu0 %v15966_v18  ;;  %6224 = vmatpush1.bf16.msra.mxu1 %v15968_v29 }
 0x5c7   :  { %6184 = vmatprep.subr.bf16.mxu0 %v15974_v32  ;;  %6225 = vmatprep.subr.bf16.mxu1 %v15976_v56 }
 0x5ca   :  { %6185 = vmatpush1.bf16.msra.mxu0 %v15978_v63  ;;  %6226 = vmatpush1.bf16.msra.mxu1 %v15980_v31 }
 0x5cb   :  { %6186 = vmatprep.subr.bf16.mxu0 %v15986_v12  ;;  %6227 = vmatprep.subr.bf16.mxu1 %v15988_v24 }
 0x5ce   :  { %6187 = vmatpush1.bf16.msra.mxu0 %v15990_v8  ;;  %6228 = vmatpush1.bf16.msra.mxu1 %v15992_v26 }
 0x5cf   :  { %6458 = vmatprep.subr.bf16.mxu0 %v15998_v44  ;;  %6499 = vmatprep.subr.bf16.mxu1 %v16000_v45 }
 0x663   :  { %v5604_v46 = vpop.f32.mrb[96].mxu0  ;;  %v5645_v62 = vpop.f32.mrb[96].mxu1 }
 0x664   :  { %v5652_v23 = vadd.f32 %v5604_v46, %v17782_v16  ;;  %v5654_v30 = vadd.f32 %v5645_v62, %v17783_v27  ;;  %v5606_v51 = vpop.f32.mrb[97].mxu0  ;;  %v5647_v37 = vpop.f32.mrb[97].mxu1 }
 0x665   :  { %v5653_v14 = vadd.f32 %v5606_v51, %v17784_v0  ;;  %v5655_v34 = vadd.f32 %v5647_v37, %v17785_v36  ;;  %v5608_v7 = vpop.f32.mrb[98].mxu0  ;;  %v5649_v54 = vpop.f32.mrb[98].mxu1  ;;  %v17786_v51 = vld [vmem:[#allocation54_spill] sm:$0xff]  ;;  %v17787_v0 = vld [vmem:[#allocation57_spill] sm:$0xff] }
 0x666   :  { %v5938_v5 = vmul.f32 0.5, %v5652_v23  ;;  %v5609_v42 = vpop.f32.mrb[99].mxu0  ;;  %v5650_v10 = vpop.f32.mrb[99].mxu1  ;;  %v17788_v54 = vld [vmem:[#allocation56_spill] sm:$0xff] }
 0x667   :  { %v5942_v1 = vmul.f32 0.5, %v5653_v14  ;;  %v5947_v39 = vmul.f32 0.5, %v5655_v34  ;;  %v17789_v42 = vld [vmem:[#allocation58_spill] sm:$0xff] }
 0x668   :  { %14056 = vtanh.f32 %v5938_v5 }
 0x669   :  { %14058 = vtanh.f32 %v5942_v1 }
 0x66a   :  { %14060 = vtanh.f32 %v5654_v30 }
 0x66b   :  { %14062 = vtanh.f32 %v5947_v39 }
 0x672   :  { %v14057_v55 = vpop.eup %14056 }
 0x673   :  { %v14059_v13 = vpop.eup %14058  ;;  %v5940_v50 = vadd.f32 1.0, %v14057_v55 }
 0x674   :  { %v5944_v41 = vadd.f32 1.0, %v14059_v13  ;;  %v14061_v19 = vpop.eup %14060 }
 0x675   :  { %v5941_v57 = vmul.f32 0.5, %v5940_v50  ;;  %v14063_v16 = vpop.eup %14062 }
 0x676   :  { %v5945_v35 = vmul.f32 0.5, %v5944_v41  ;;  %v5949_v23 = vadd.f32 1.0, %v14063_v16  ;;  %v16024_v16 = vld [vmem:[#allocation8 + $0x12c] ss:$16 sps:$4 sm:$0xff]  }
 0x677   :  { %v5952_v20 = vmul.f32 %v14061_v19, %v5941_v57  ;;  %v16016_v19 = vld [vmem:[#allocation8 + $0x100] ss:$16 sps:$4 sm:$0xff]  }
 0x678   :  { %v5951_v46 = vmul.f32 %v5945_v35, %v15777_v3  ;;  %v5950_v7 = vmul.f32 0.5, %v5949_v23  ;;  %v16018_v35 = vld [vmem:[#allocation8 + $0x108] ss:$16 sps:$4 sm:$0xff]   ;;  %v16030_v23 = vld [vmem:[#allocation8 + $0x120] ss:$16 sps:$4 sm:$0xff]  }
 0x67a   :  { %v16009_v62 = vadd.f32 %v5952_v20, %v5951_v46  ;;  %v16022_v46 = vld [vmem:[#allocation8 + $0x124] ss:$16 sps:$4 sm:$0xff]  }
 0x67c   :  { %14064 = vtanh.f32 %v16009_v62 }
 0x683   :  { %v5886_v27 = vpop.f32.mrb[100].mxu0  ;;  %v5927_v30 = vpop.f32.mrb[100].mxu1 }
 0x684   :  { %v5934_v37 = vadd.f32 %v5886_v27, %v17786_v51  ;;  %v5936_v14 = vadd.f32 %v5927_v30, %v17787_v0  ;;  %v5888_v36 = vpop.f32.mrb[101].mxu0  ;;  %v5929_v34 = vpop.f32.mrb[101].mxu1  ;;  %v16032_v27 = vld [vmem:[#allocation8 + $0x128] ss:$16 sps:$4 sm:$0xff]   ;;  %v16036_v30 = vld [vmem:[#allocation8 + $0x144] ss:$16 sps:$4 sm:$0xff]  }
 0x685   :  { %v5935_v5 = vadd.f32 %v5888_v36, %v17788_v54  ;;  %v5937_v10 = vadd.f32 %v5929_v34, %v17789_v42  ;;  %v5890_v3 = vpop.f32.mrb[102].mxu0  ;;  %v5931_v1 = vpop.f32.mrb[102].mxu1  ;;  %v16038_v51 = vld [vmem:[#allocation8 + $0x14c] ss:$16 sps:$4 sm:$0xff]   ;;  %v16044_v0 = vld [vmem:[#allocation8 + $0x140] ss:$16 sps:$4 sm:$0xff]  }
 0x686   :  { %v14065_v39 = vpop.eup %14064  ;;  %v5956_v55 = vmul.f32 0.5, %v5934_v37  ;;  %v5891_v13 = vpop.f32.mrb[103].mxu0  ;;  %v16050_v36 = vld [vmem:[#allocation8 + $0x164] ss:$16 sps:$4 sm:$0xff]   ;;  %v16052_v34 = vld [vmem:[#allocation8 + $0x16c] ss:$16 sps:$4 sm:$0xff]  }
 0x687   :  { %v5932_v50 = vpop.f32.mrb[103].mxu1  ;;  %v5955_v41 = vmul.f32 %v14065_v39, %v5950_v7  ;;  %v5960_v57 = vmul.f32 0.5, %v5935_v5  ;;  %v5965_v37 = vmul.f32 0.5, %v5937_v10  ;;  %v16056_v10 = vld [vmem:[#allocation8 + $0x160] ss:$16 sps:$4 sm:$0xff]  }
 0x688   :  { %14066 = vtanh.f32 %v5956_v55  ;;  %v16058_v3 = vld [vmem:[#allocation8 + $0x168] ss:$16 sps:$4 sm:$0xff]   ;;  %v16062_v39 = vld [vmem:[#allocation8 + $0x184] ss:$16 sps:$4 sm:$0xff]   ;;  %v16064_v55 = vld [vmem:[#allocation8 + $0x18c] ss:$16 sps:$4 sm:$0xff]  }
 0x689   :  { %v16020_v20 = vpack.c.bf16 %v5955_v41, %v5955_v41  ;;  %14068 = vtanh.f32 %v5960_v57  ;;  %17790 = vst [vmem:[#allocation22_spill] sm:$0xff] %v16058_v3  ;;  %17791 = vst [vmem:[#allocation25_spill] sm:$0xff] %v16062_v39 }
 0x68a   :  { %14070 = vtanh.f32 %v5936_v14  ;;  %v16046_v14 = vld [vmem:[#allocation8 + $0x148] ss:$16 sps:$4 sm:$0xff]   ;;  %17792 = vst [vmem:[#allocation24_spill] sm:$0xff] %v16064_v55 }
 0x68b   :  { %6205 = vmatmul.mubr.bf16.vlgmr.msra.gmra.mrb[92].mxu0 %v16020_v20  ;;  %6246 = vmatmul.mubr.bf16.vlgmr.msra.gmra.mrb[92].mxu1 %v16020_v20  ;;  %14072 = vtanh.f32 %v5965_v37  ;;  %v16069_v37 = vld [vmem:[#allocation8 + $0x180] ss:$16 sps:$4 sm:$0xff]  }
 0x68c   :  { %6459 = vmatpush1.bf16.msra.mxu0 %v16016_v19  ;;  %6500 = vmatpush1.bf16.msra.mxu1 %v16018_v35  ;;  %17793 = vst [vmem:[#allocation26_spill] sm:$0xff] %v16069_v37 }
 0x68d   :  { %6460 = vmatprep.subr.bf16.mxu0 %v16022_v46  ;;  %6501 = vmatprep.subr.bf16.mxu1 %v16024_v16 }
 0x68e   :  { %6490 = vmatprep.mubr.bf16.mxu0 %v17512_v6  ;;  %6531 = vmatprep.mubr.bf16.mxu1 %v17512_v6 }
 0x690   :  { %6461 = vmatpush1.bf16.msra.mxu0 %v16030_v23  ;;  %6502 = vmatpush1.bf16.msra.mxu1 %v16032_v27 }
 0x691   :  { %6462 = vmatprep.subr.bf16.mxu0 %v16036_v30  ;;  %6503 = vmatprep.subr.bf16.mxu1 %v16038_v51 }
 0x692   :  { %v14067_v7 = vpop.eup %14066 }
 0x693   :  { %v14069_v54 = vpop.eup %14068  ;;  %v5958_v5 = vadd.f32 1.0, %v14067_v7  ;;  %v16071_v7 = vld [vmem:[#allocation8 + $0x188] ss:$16 sps:$4 sm:$0xff]  }
 0x694   :  { %v5962_v42 = vadd.f32 1.0, %v14069_v54  ;;  %6463 = vmatpush1.bf16.msra.mxu0 %v16044_v0  ;;  %6504 = vmatpush1.bf16.msra.mxu1 %v16046_v14  ;;  %v14071_v13 = vpop.eup %14070  ;;  %17794 = vst [vmem:[#allocation59_spill] sm:$0xff] %v16071_v7  ;;  %v16075_v54 = vld [vmem:[#allocation8 + $0x1a4] ss:$16 sps:$4 sm:$0xff]  }
 0x695   :  { %v5959_v1 = vmul.f32 0.5, %v5958_v5  ;;  %6464 = vmatprep.subr.bf16.mxu0 %v16050_v36  ;;  %6505 = vmatprep.subr.bf16.mxu1 %v16052_v34  ;;  %17795 = vst [vmem:[#allocation61_spill] sm:$0xff] %v16075_v54  ;;  %v16077_v5 = vld [vmem:[#allocation8 + $0x1ac] ss:$16 sps:$4 sm:$0xff]  }
 0x696   :  { %v5963_v50 = vmul.f32 0.5, %v5962_v42  ;;  %17796 = vst [vmem:[#allocation60_spill] sm:$0xff] %v16077_v5 }
 0x697   :  { %v5970_v41 = vmul.f32 %v14071_v13, %v5959_v1  ;;  %v16086_v1 = vld [vmem:[#allocation8 + $0x1a8] ss:$16 sps:$4 sm:$0xff]   ;;  %v16090_v13 = vld [vmem:[#allocation8 + $0x1c4] ss:$16 sps:$4 sm:$0xff]  }
 0x698   :  { %v5969_v57 = vmul.f32 %v5963_v50, %v15807_v33  ;;  %6465 = vmatpush1.bf16.msra.mxu0 %v16056_v10  ;;  %6506 = vmatpush1.bf16.msra.mxu1 %v16058_v3  ;;  %v16084_v33 = vld [vmem:[#allocation8 + $0x1a0] ss:$16 sps:$4 sm:$0xff]   ;;  %17798 = vst [vmem:[#allocation68_spill] sm:$0xff] %v16086_v1  ;;  %17799 = vst [vmem:[#allocation69_spill] sm:$0xff] %v16090_v13  ;;  %v16092_v50 = vld [vmem:[#allocation8 + $0x1cc] ss:$16 sps:$4 sm:$0xff]  }
 0x699   :  { %6466 = vmatprep.subr.bf16.mxu0 %v16062_v39  ;;  %6507 = vmatprep.subr.bf16.mxu1 %v16064_v55  ;;  %17797 = vst [vmem:[#allocation63_spill] sm:$0xff] %v16084_v33  ;;  %17800 = vst [vmem:[#allocation70_spill] sm:$0xff] %v16092_v50 }
 0x69a   :  { %v16079_v42 = vadd.f32 %v5970_v41, %v5969_v57  ;;  %v14073_v41 = vpop.eup %14072  ;;  %v16096_v57 = vld [vmem:[#allocation8 + $0x1c0] ss:$16 sps:$4 sm:$0xff]  }
 0x69b   :  { %17801 = vst [vmem:[#allocation71_spill] sm:$0xff] %v16096_v57 }
 0x69c   :  { %14074 = vtanh.f32 %v16079_v42  ;;  %6467 = vmatpush1.bf16.msra.mxu0 %v16069_v37  ;;  %6508 = vmatpush1.bf16.msra.mxu1 %v16071_v7  ;;  %v16098_v7 = vld [vmem:[#allocation8 + $0x1c8] ss:$16 sps:$4 sm:$0xff]   ;;  %v5967_v37 = vadd.f32 1.0, %v14073_v41  ;;  %v16114_v41 = vld [vmem:[#allocation4 + $0x4] ss:$16 sps:$4 sm:$0xff]  }
 0x69d   :  { %6468 = vmatprep.subr.bf16.mxu0 %v16075_v54  ;;  %6509 = vmatprep.subr.bf16.mxu1 %v16077_v5  ;;  %17802 = vst [vmem:[#allocation72_spill] sm:$0xff] %v16098_v7  ;;  %v16102_v54 = vld [vmem:[#allocation8 + $0x1e4] ss:$16 sps:$4 sm:$0xff]   ;;  %v16104_v5 = vld [vmem:[#allocation8 + $0x1ec] ss:$16 sps:$4 sm:$0xff]   ;;  %17804 = vst [vmem:[#allocation74_spill] sm:$0xff] %v16114_v41 }
 0x69e   :  { %17803 = vst [vmem:[#allocation73_spill] sm:$0xff] %v16104_v5  ;;  %v5968_v55 = vmul.f32 0.5, %v5967_v37  ;;  %v16128_v37 = vld [vmem:[#allocation4 + $0x24] ss:$16 sps:$4 sm:$0xff]  }
 0x69f   :  { %17808 = vst [vmem:[#allocation78_spill] sm:$0xff] %v16128_v37 }
 0x6a0   :  { %6469 = vmatpush1.bf16.msra.mxu0 %v16084_v33  ;;  %6510 = vmatpush1.bf16.msra.mxu1 %v16086_v1  ;;  %v16108_v33 = vld [vmem:[#allocation8 + $0x1e0] ss:$16 sps:$4 sm:$0xff]   ;;  %v16110_v1 = vld [vmem:[#allocation8 + $0x1e8] ss:$16 sps:$4 sm:$0xff]  }
 0x6a1   :  { %6470 = vmatprep.subr.bf16.mxu0 %v16090_v13  ;;  %6511 = vmatprep.subr.bf16.mxu1 %v16092_v50  ;;  %v16116_v50 = vld [vmem:[#allocation4 + $0xc] ss:$16 sps:$4 sm:$0xff]  }
 0x6a2   :  { %17805 = vst [vmem:[#allocation75_spill] sm:$0xff] %v16116_v50 }
 0x6a4   :  { %6471 = vmatpush1.bf16.msra.mxu0 %v16096_v57  ;;  %6512 = vmatpush1.bf16.msra.mxu1 %v16098_v7  ;;  %v16120_v7 = vld [vmem:[#allocation4] ss:$16 sps:$4 sm:$0xff]   ;;  %v16122_v57 = vld [vmem:[#allocation4 + $0x8] ss:$16 sps:$4 sm:$0xff]  }
 0x6a5   :  { %6472 = vmatprep.subr.bf16.mxu0 %v16102_v54  ;;  %6513 = vmatprep.subr.bf16.mxu1 %v16104_v5  ;;  %17806 = vst [vmem:[#allocation76_spill] sm:$0xff] %v16120_v7  ;;  %17807 = vst [vmem:[#allocation77_spill] sm:$0xff] %v16122_v57  ;;  %v16130_v5 = vld [vmem:[#allocation4 + $0x2c] ss:$16 sps:$4 sm:$0xff]  }
 0x6a6   :  { %v14075_v13 = vpop.eup %14074  ;;  %17809 = vst [vmem:[#allocation79_spill] sm:$0xff] %v16130_v5 }
 0x6a7   :  { %v5973_v39 = vmul.f32 %v14075_v13, %v5968_v55  ;;  %v16136_v55 = vld [vmem:[#allocation4 + $0x20] ss:$16 sps:$4 sm:$0xff]   ;;  %v16142_v13 = vld [vmem:[#allocation4 + $0x44] ss:$16 sps:$4 sm:$0xff]  }
 0x6a8   :  { %6473 = vmatpush1.bf16.msra.mxu0 %v16108_v33  ;;  %6514 = vmatpush1.bf16.msra.mxu1 %v16110_v1  ;;  %17810 = vst [vmem:[#allocation80_spill] sm:$0xff] %v16136_v55  ;;  %17812 = vst [vmem:[#allocation82_spill] sm:$0xff] %v16142_v13 }
 0x6a9   :  { %v16124_v3 = vpack.c.bf16 %v5973_v39, %v5973_v39  ;;  %6744 = vmatprep.subr.bf16.mxu0 %v16114_v41  ;;  %6785 = vmatprep.subr.bf16.mxu1 %v16116_v50  ;;  %v16138_v39 = vld [vmem:[#allocation4 + $0x28] ss:$16 sps:$4 sm:$0xff]   ;;  %v16144_v50 = vld [vmem:[#allocation4 + $0x4c] ss:$16 sps:$4 sm:$0xff]   ;;  %v16162_v41 = vld [vmem:[#allocation4 + $0x60] ss:$16 sps:$4 sm:$0xff]  }
 0x6aa   :  { %17811 = vst [vmem:[#allocation81_spill] sm:$0xff] %v16138_v39  ;;  %17813 = vst [vmem:[#allocation83_spill] sm:$0xff] %v16144_v50 }
 0x6ab   :  { %6491 = vmatmul.mubr.bf16.vlgmr.msra.gmra.mrb[88].mxu0 %v16124_v3  ;;  %6532 = vmatmul.mubr.bf16.vlgmr.msra.gmra.mrb[88].mxu1 %v16124_v3  ;;  %17818 = vst [vmem:[#allocation88_spill] sm:$0xff] %v16162_v41 }
 0x6ac   :  { %6745 = vmatpush1.bf16.msra.mxu0 %v16120_v7  ;;  %6786 = vmatpush1.bf16.msra.mxu1 %v16122_v57  ;;  %v16150_v57 = vld [vmem:[#allocation4 + $0x40] ss:$16 sps:$4 sm:$0xff]   ;;  %v16152_v7 = vld [vmem:[#allocation4 + $0x48] ss:$16 sps:$4 sm:$0xff]  }
 0x6ad   :  { %6746 = vmatprep.subr.bf16.mxu0 %v16128_v37  ;;  %6787 = vmatprep.subr.bf16.mxu1 %v16130_v5  ;;  %17814 = vst [vmem:[#allocation84_spill] sm:$0xff] %v16150_v57  ;;  %17815 = vst [vmem:[#allocation85_spill] sm:$0xff] %v16152_v7  ;;  %v16156_v5 = vld [vmem:[#allocation4 + $0x64] ss:$16 sps:$4 sm:$0xff]   ;;  %v16158_v37 = vld [vmem:[#allocation4 + $0x6c] ss:$16 sps:$4 sm:$0xff]  }
 0x6ae   :  { %6776 = vmatprep.mubr.bf16.mxu0 %v17512_v6  ;;  %6817 = vmatprep.mubr.bf16.mxu1 %v17512_v6  ;;  %17816 = vst [vmem:[#allocation86_spill] sm:$0xff] %v16156_v5  ;;  %17817 = vst [vmem:[#allocation87_spill] sm:$0xff] %v16158_v37 }
 0x6b0   :  { %6747 = vmatpush1.bf16.msra.mxu0 %v16136_v55  ;;  %6788 = vmatpush1.bf16.msra.mxu1 %v16138_v39  ;;  %v16164_v55 = vld [vmem:[#allocation4 + $0x68] ss:$16 sps:$4 sm:$0xff]   ;;  %v16168_v39 = vld [vmem:[#allocation4 + $0x84] ss:$16 sps:$4 sm:$0xff]  }
 0x6b1   :  { %6748 = vmatprep.subr.bf16.mxu0 %v16142_v13  ;;  %6789 = vmatprep.subr.bf16.mxu1 %v16144_v50  ;;  %17819 = vst [vmem:[#allocation89_spill] sm:$0xff] %v16164_v55  ;;  %17820 = vst [vmem:[#allocation90_spill] sm:$0xff] %v16168_v39  ;;  %v16170_v13 = vld [vmem:[#allocation4 + $0x8c] ss:$16 sps:$4 sm:$0xff]   ;;  %v16174_v50 = vld [vmem:[#allocation4 + $0x80] ss:$16 sps:$4 sm:$0xff]  }
 0x6b2   :  { %17821 = vst [vmem:[#allocation91_spill] sm:$0xff] %v16170_v13  ;;  %17822 = vst [vmem:[#allocation92_spill] sm:$0xff] %v16174_v50 }
 0x6b4   :  { %6749 = vmatpush1.bf16.msra.mxu0 %v16150_v57  ;;  %6790 = vmatpush1.bf16.msra.mxu1 %v16152_v7  ;;  %v16176_v57 = vld [vmem:[#allocation4 + $0x88] ss:$16 sps:$4 sm:$0xff]   ;;  %v16180_v7 = vld [vmem:[#allocation4 + $0xa4] ss:$16 sps:$4 sm:$0xff]  }
 0x6b5   :  { %6750 = vmatprep.subr.bf16.mxu0 %v16156_v5  ;;  %6791 = vmatprep.subr.bf16.mxu1 %v16158_v37  ;;  %17823 = vst [vmem:[#allocation93_spill] sm:$0xff] %v16176_v57  ;;  %17824 = vst [vmem:[#allocation94_spill] sm:$0xff] %v16180_v7  ;;  %v16182_v5 = vld [vmem:[#allocation4 + $0xac] ss:$16 sps:$4 sm:$0xff]   ;;  %v16186_v37 = vld [vmem:[#allocation4 + $0xa0] ss:$16 sps:$4 sm:$0xff]  }
 0x6b6   :  { %17825 = vst [vmem:[#allocation95_spill] sm:$0xff] %v16182_v5  ;;  %17826 = vst [vmem:[#allocation96_spill] sm:$0xff] %v16186_v37 }
 0x6b8   :  { %6751 = vmatpush1.bf16.msra.mxu0 %v16162_v41  ;;  %6792 = vmatpush1.bf16.msra.mxu1 %v16164_v55  ;;  %v16188_v41 = vld [vmem:[#allocation4 + $0xa8] ss:$16 sps:$4 sm:$0xff]   ;;  %v16192_v55 = vld [vmem:[#allocation4 + $0xc4] ss:$16 sps:$4 sm:$0xff]  }
 0x6b9   :  { %6752 = vmatprep.subr.bf16.mxu0 %v16168_v39  ;;  %6793 = vmatprep.subr.bf16.mxu1 %v16170_v13  ;;  %17827 = vst [vmem:[#allocation97_spill] sm:$0xff] %v16188_v41  ;;  %17828 = vst [vmem:[#allocation98_spill] sm:$0xff] %v16192_v55  ;;  %v16194_v39 = vld [vmem:[#allocation4 + $0xcc] ss:$16 sps:$4 sm:$0xff]   ;;  %v16198_v13 = vld [vmem:[#allocation4 + $0xc0] ss:$16 sps:$4 sm:$0xff]  }
 0x6ba   :  { %17829 = vst [vmem:[#allocation99_spill] sm:$0xff] %v16194_v39  ;;  %17830 = vst [vmem:[#allocation100_spill] sm:$0xff] %v16198_v13 }
 0x6bc   :  { %6753 = vmatpush1.bf16.msra.mxu0 %v16174_v50  ;;  %6794 = vmatpush1.bf16.msra.mxu1 %v16176_v57  ;;  %v16200_v50 = vld [vmem:[#allocation4 + $0xc8] ss:$16 sps:$4 sm:$0xff]   ;;  %v16204_v57 = vld [vmem:[#allocation4 + $0xe4] ss:$16 sps:$4 sm:$0xff]  }
 0x6bd   :  { %6754 = vmatprep.subr.bf16.mxu0 %v16180_v7  ;;  %6795 = vmatprep.subr.bf16.mxu1 %v16182_v5  ;;  %17831 = vst [vmem:[#allocation101_spill] sm:$0xff] %v16200_v50  ;;  %17832 = vst [vmem:[#allocation102_spill] sm:$0xff] %v16204_v57  ;;  %v16206_v7 = vld [vmem:[#allocation4 + $0xec] ss:$16 sps:$4 sm:$0xff]   ;;  %v16210_v5 = vld [vmem:[#allocation4 + $0xe0] ss:$16 sps:$4 sm:$0xff]  }
 0x6be   :  { %17833 = vst [vmem:[#allocation103_spill] sm:$0xff] %v16210_v5 }
 0x6c0   :  { %6755 = vmatpush1.bf16.msra.mxu0 %v16186_v37  ;;  %6796 = vmatpush1.bf16.msra.mxu1 %v16188_v41  ;;  %v16212_v37 = vld [vmem:[#allocation4 + $0xe8] ss:$16 sps:$4 sm:$0xff]   ;;  %v16216_v41 = vld [vmem:[#allocation6 + $0x4] ss:$16 sps:$4 sm:$0xff]  }
 0x6c1   :  { %6756 = vmatprep.subr.bf16.mxu0 %v16192_v55  ;;  %6797 = vmatprep.subr.bf16.mxu1 %v16194_v39  ;;  %17834 = vst [vmem:[#allocation104_spill] sm:$0xff] %v16212_v37  ;;  %17835 = vst [vmem:[#allocation105_spill] sm:$0xff] %v16216_v41  ;;  %v16218_v55 = vld [vmem:[#allocation6 + $0xc] ss:$16 sps:$4 sm:$0xff]   ;;  %v16222_v39 = vld [vmem:[#allocation6] ss:$16 sps:$4 sm:$0xff]  }
 0x6c2   :  { %17836 = vst [vmem:[#allocation106_spill] sm:$0xff] %v16218_v55  ;;  %17837 = vst [vmem:[#allocation107_spill] sm:$0xff] %v16222_v39 }
 0x6c4   :  { %6757 = vmatpush1.bf16.msra.mxu0 %v16198_v13  ;;  %6798 = vmatpush1.bf16.msra.mxu1 %v16200_v50  ;;  %v16224_v13 = vld [vmem:[#allocation6 + $0x8] ss:$16 sps:$4 sm:$0xff]   ;;  %v16228_v50 = vld [vmem:[#allocation6 + $0x24] ss:$16 sps:$4 sm:$0xff]  }
 0x6c5   :  { %6758 = vmatprep.subr.bf16.mxu0 %v16204_v57  ;;  %6799 = vmatprep.subr.bf16.mxu1 %v16206_v7  ;;  %17838 = vst [vmem:[#allocation108_spill] sm:$0xff] %v16224_v13  ;;  %17839 = vst [vmem:[#allocation109_spill] sm:$0xff] %v16228_v50  ;;  %v16230_v57 = vld [vmem:[#allocation6 + $0x2c] ss:$16 sps:$4 sm:$0xff]  }
 0x6c6   :  { %17840 = vst [vmem:[#allocation110_spill] sm:$0xff] %v16230_v57 }
 0x6c8   :  { %6759 = vmatpush1.bf16.msra.mxu0 %v16210_v5  ;;  %6800 = vmatpush1.bf16.msra.mxu1 %v16212_v37  ;;  %v16236_v37 = vld [vmem:[#allocation6 + $0x20] ss:$16 sps:$4 sm:$0xff]   ;;  %v16238_v5 = vld [vmem:[#allocation6 + $0x28] ss:$16 sps:$4 sm:$0xff]  }
 0x6c9   :  { %7026 = vmatprep.subr.bf16.mxu0 %v16216_v41  ;;  %7067 = vmatprep.subr.bf16.mxu1 %v16218_v55  ;;  %17841 = vst [vmem:[#allocation111_spill] sm:$0xff] %v16236_v37  ;;  %17842 = vst [vmem:[#allocation112_spill] sm:$0xff] %v16238_v5  ;;  %v16242_v55 = vld [vmem:[#allocation6 + $0x44] ss:$16 sps:$4 sm:$0xff]   ;;  %v16244_v41 = vld [vmem:[#allocation6 + $0x4c] ss:$16 sps:$4 sm:$0xff]  }
 0x6ca   :  { %17843 = vst [vmem:[#allocation113_spill] sm:$0xff] %v16242_v55  ;;  %17844 = vst [vmem:[#allocation114_spill] sm:$0xff] %v16244_v41 }
 0x6cb   :  { %6777 = vmatmul.mubr.bf16.vlgmr.msra.gmra.mrb[104].mxu0 %v16020_v20  ;;  %6818 = vmatmul.mubr.bf16.vlgmr.msra.gmra.mrb[104].mxu1 %v16020_v20  ;;  %v16250_v20 = vld [vmem:[#allocation6 + $0x40] ss:$16 sps:$4 sm:$0xff]  }
 0x6cc   :  { %7027 = vmatpush1.bf16.msra.mxu0 %v16222_v39  ;;  %7068 = vmatpush1.bf16.msra.mxu1 %v16224_v13  ;;  %17845 = vst [vmem:[#allocation115_spill] sm:$0xff] %v16250_v20  ;;  %v16252_v13 = vld [vmem:[#allocation6 + $0x48] ss:$16 sps:$4 sm:$0xff]   ;;  %v16262_v39 = vld [vmem:[#allocation6 + $0x60] ss:$16 sps:$4 sm:$0xff]  }
 0x6cd   :  { %7028 = vmatprep.subr.bf16.mxu0 %v16228_v50  ;;  %7069 = vmatprep.subr.bf16.mxu1 %v16230_v57  ;;  %17846 = vst [vmem:[#allocation116_spill] sm:$0xff] %v16252_v13  ;;  %v16256_v57 = vld [vmem:[#allocation6 + $0x64] ss:$16 sps:$4 sm:$0xff]   ;;  %v16258_v50 = vld [vmem:[#allocation6 + $0x6c] ss:$16 sps:$4 sm:$0xff]   ;;  %17849 = vst [vmem:[#allocation119_spill] sm:$0xff] %v16262_v39 }
 0x6ce   :  { %7058 = vmatprep.mubr.bf16.mxu0 %v17512_v6  ;;  %7099 = vmatprep.mubr.bf16.mxu1 %v17512_v6  ;;  %17847 = vst [vmem:[#allocation117_spill] sm:$0xff] %v16256_v57  ;;  %17848 = vst [vmem:[#allocation118_spill] sm:$0xff] %v16258_v50 }
 0x6d0   :  { %7029 = vmatpush1.bf16.msra.mxu0 %v16236_v37  ;;  %7070 = vmatpush1.bf16.msra.mxu1 %v16238_v5  ;;  %v16264_v37 = vld [vmem:[#allocation6 + $0x68] ss:$16 sps:$4 sm:$0xff]   ;;  %v16268_v5 = vld [vmem:[#allocation6 + $0x84] ss:$16 sps:$4 sm:$0xff]  }
 0x6d1   :  { %7030 = vmatprep.subr.bf16.mxu0 %v16242_v55  ;;  %7071 = vmatprep.subr.bf16.mxu1 %v16244_v41  ;;  %17850 = vst [vmem:[#allocation120_spill] sm:$0xff] %v16264_v37  ;;  %17851 = vst [vmem:[#allocation121_spill] sm:$0xff] %v16268_v5  ;;  %v16270_v55 = vld [vmem:[#allocation6 + $0x8c] ss:$16 sps:$4 sm:$0xff]   ;;  %v16274_v41 = vld [vmem:[#allocation6 + $0x80] ss:$16 sps:$4 sm:$0xff]  }
 0x6d2   :  { %17852 = vst [vmem:[#allocation122_spill] sm:$0xff] %v16270_v55  ;;  %17853 = vst [vmem:[#allocation123_spill] sm:$0xff] %v16274_v41 }
 0x6d4   :  { %7031 = vmatpush1.bf16.msra.mxu0 %v16250_v20  ;;  %7072 = vmatpush1.bf16.msra.mxu1 %v16252_v13  ;;  %v16276_v20 = vld [vmem:[#allocation6 + $0x88] ss:$16 sps:$4 sm:$0xff]   ;;  %v16280_v13 = vld [vmem:[#allocation6 + $0xa4] ss:$16 sps:$4 sm:$0xff]  }
 0x6d5   :  { %7032 = vmatprep.subr.bf16.mxu0 %v16256_v57  ;;  %7073 = vmatprep.subr.bf16.mxu1 %v16258_v50  ;;  %17854 = vst [vmem:[#allocation124_spill] sm:$0xff] %v16276_v20  ;;  %17855 = vst [vmem:[#allocation125_spill] sm:$0xff] %v16280_v13  ;;  %v16282_v57 = vld [vmem:[#allocation6 + $0xac] ss:$16 sps:$4 sm:$0xff]   ;;  %v16286_v50 = vld [vmem:[#allocation6 + $0xa0] ss:$16 sps:$4 sm:$0xff]  }
 0x6d6   :  { %17856 = vst [vmem:[#allocation19_spill] sm:$0xff] %v16282_v57  ;;  %17857 = vst [vmem:[#allocation21_spill] sm:$0xff] %v16286_v50 }
 0x6d8   :  { %7033 = vmatpush1.bf16.msra.mxu0 %v16262_v39  ;;  %7074 = vmatpush1.bf16.msra.mxu1 %v16264_v37  ;;  %v16288_v39 = vld [vmem:[#allocation6 + $0xa8] ss:$16 sps:$4 sm:$0xff]   ;;  %v16292_v37 = vld [vmem:[#allocation6 + $0xc4] ss:$16 sps:$4 sm:$0xff]  }
 0x6d9   :  { %7034 = vmatprep.subr.bf16.mxu0 %v16268_v5  ;;  %7075 = vmatprep.subr.bf16.mxu1 %v16270_v55  ;;  %v16294_v5 = vld [vmem:[#allocation6 + $0xcc] ss:$16 sps:$4 sm:$0xff]   ;;  %v16298_v55 = vld [vmem:[#allocation6 + $0xc0] ss:$16 sps:$4 sm:$0xff]  }
 0x6dc   :  { %7035 = vmatpush1.bf16.msra.mxu0 %v16274_v41  ;;  %7076 = vmatpush1.bf16.msra.mxu1 %v16276_v20  ;;  %v16300_v41 = vld [vmem:[#allocation6 + $0xc8] ss:$16 sps:$4 sm:$0xff]   ;;  %v16304_v20 = vld [vmem:[#allocation6 + $0xe4] ss:$16 sps:$4 sm:$0xff]  }
 0x6dd   :  { %7036 = vmatprep.subr.bf16.mxu0 %v16280_v13  ;;  %7077 = vmatprep.subr.bf16.mxu1 %v16282_v57  ;;  %v16306_v13 = vld [vmem:[#allocation6 + $0xec] ss:$16 sps:$4 sm:$0xff]   ;;  %v16310_v57 = vld [vmem:[#allocation6 + $0xe0] ss:$16 sps:$4 sm:$0xff]  }
 0x6e0   :  { %7037 = vmatpush1.bf16.msra.mxu0 %v16286_v50  ;;  %7078 = vmatpush1.bf16.msra.mxu1 %v16288_v39  ;;  %v16312_v50 = vld [vmem:[#allocation6 + $0xe8] ss:$16 sps:$4 sm:$0xff]  }
 0x6e1   :  { %7038 = vmatprep.subr.bf16.mxu0 %v16292_v37  ;;  %7079 = vmatprep.subr.bf16.mxu1 %v16294_v5 }
 0x6e4   :  { %7039 = vmatpush1.bf16.msra.mxu0 %v16298_v55  ;;  %7080 = vmatpush1.bf16.msra.mxu1 %v16300_v41 }
 0x6e5   :  { %7040 = vmatprep.subr.bf16.mxu0 %v16304_v20  ;;  %7081 = vmatprep.subr.bf16.mxu1 %v16306_v13 }
 0x6e8   :  { %7041 = vmatpush1.bf16.msra.mxu0 %v16310_v57  ;;  %7082 = vmatpush1.bf16.msra.mxu1 %v16312_v50 }
 0x6e9   :  { %7346 = vmatprep.subr.bf16.mxu0 %v15902_v47  ;;  %7387 = vmatprep.subr.bf16.mxu1 %v15904_v2 }
 0x6eb   :  { %7059 = vmatmul.mubr.bf16.vlgmr.msra.gmra.mrb[108].mxu0 %v16124_v3  ;;  %7100 = vmatmul.mubr.bf16.vlgmr.msra.gmra.mrb[108].mxu1 %v16124_v3 }
 0x6ec   :  { %7347 = vmatpush1.bf16.msra.mxu0 %v15906_v38  ;;  %7388 = vmatpush1.bf16.msra.mxu1 %v15908_v59  ;;  %v17858_v38 = vld [vmem:[#allocation30_spill] sm:$0xff] }
 0x6ed   :  { %7348 = vmatprep.subr.bf16.mxu0 %v15914_v40  ;;  %7389 = vmatprep.subr.bf16.mxu1 %v15916_v49  ;;  %v17859_v40 = vld [vmem:[#allocation33_spill] sm:$0xff] }
 0x6ee   :  { %7378 = vmatprep.mubr.bf16.mxu0 %v17512_v6  ;;  %7419 = vmatprep.mubr.bf16.mxu1 %v17512_v6 }
 0x6f0   :  { %7349 = vmatpush1.bf16.msra.mxu0 %v15918_v58  ;;  %7390 = vmatpush1.bf16.msra.mxu1 %v15920_v9 }
 0x6f1   :  { %7350 = vmatprep.subr.bf16.mxu0 %v15926_v21  ;;  %7391 = vmatprep.subr.bf16.mxu1 %v15928_v52  ;;  %v17860_v21 = vld [vmem:[#allocation32_spill] sm:$0xff] }
 0x6f4   :  { %7351 = vmatpush1.bf16.msra.mxu0 %v15930_v53  ;;  %7392 = vmatpush1.bf16.msra.mxu1 %v15932_v22  ;;  %v17861_v53 = vld [vmem:[#allocation34_spill] sm:$0xff] }
 0x6f5   :  { %7352 = vmatprep.subr.bf16.mxu0 %v15938_v25  ;;  %7393 = vmatprep.subr.bf16.mxu1 %v15940_v4 }
 0x6f8   :  { %7353 = vmatpush1.bf16.msra.mxu0 %v15942_v11  ;;  %7394 = vmatpush1.bf16.msra.mxu1 %v15944_v60 }
 0x6f9   :  { %7354 = vmatprep.subr.bf16.mxu0 %v15950_v17  ;;  %7395 = vmatprep.subr.bf16.mxu1 %v15952_v43 }
 0x6fc   :  { %7355 = vmatpush1.bf16.msra.mxu0 %v15954_v61  ;;  %7396 = vmatpush1.bf16.msra.mxu1 %v15956_v48 }
 0x6fd   :  { %7356 = vmatprep.subr.bf16.mxu0 %v15962_v15  ;;  %7397 = vmatprep.subr.bf16.mxu1 %v15964_v28 }
 0x700   :  { %7357 = vmatpush1.bf16.msra.mxu0 %v15966_v18  ;;  %7398 = vmatpush1.bf16.msra.mxu1 %v15968_v29 }
 0x701   :  { %7358 = vmatprep.subr.bf16.mxu0 %v15974_v32  ;;  %7399 = vmatprep.subr.bf16.mxu1 %v15976_v56 }
 0x704   :  { %7359 = vmatpush1.bf16.msra.mxu0 %v15978_v63  ;;  %7400 = vmatpush1.bf16.msra.mxu1 %v15980_v31 }
 0x705   :  { %7360 = vmatprep.subr.bf16.mxu0 %v15986_v12  ;;  %7401 = vmatprep.subr.bf16.mxu1 %v15988_v24 }
 0x708   :  { %7361 = vmatpush1.bf16.msra.mxu0 %v15990_v8  ;;  %7402 = vmatpush1.bf16.msra.mxu1 %v15992_v26 }
 0x709   :  { %7632 = vmatprep.subr.bf16.mxu0 %v15998_v44  ;;  %7673 = vmatprep.subr.bf16.mxu1 %v16000_v45  ;;  %v17862_v45 = vld [vmem:[#allocation51_spill] sm:$0xff] }
 0x79e   :  { %v6778_v47 = vpop.f32.mrb[104].mxu0  ;;  %v6819_v2 = vpop.f32.mrb[104].mxu1 }
 0x79f   :  { %v6826_v59 = vadd.f32 %v6778_v47, %v17858_v38  ;;  %v6828_v49 = vadd.f32 %v6819_v2, %v17859_v40  ;;  %v6780_v58 = vpop.f32.mrb[105].mxu0  ;;  %v6821_v9 = vpop.f32.mrb[105].mxu1  ;;  %v17863_v47 = vld [vmem:[#allocation53_spill] sm:$0xff] }
 0x7a0   :  { %v6827_v52 = vadd.f32 %v6780_v58, %v17860_v21  ;;  %v6829_v22 = vadd.f32 %v6821_v9, %v17861_v53  ;;  %v6782_v25 = vpop.f32.mrb[106].mxu0  ;;  %v6823_v4 = vpop.f32.mrb[106].mxu1  ;;  %v17865_v9 = vld [vmem:[#allocation55_spill] sm:$0xff] }
 0x7a1   :  { %v7112_v11 = vmul.f32 0.5, %v6826_v59  ;;  %v6783_v60 = vpop.f32.mrb[107].mxu0  ;;  %v6824_v17 = vpop.f32.mrb[107].mxu1 }
 0x7a2   :  { %v7116_v43 = vmul.f32 0.5, %v6827_v52  ;;  %v7121_v61 = vmul.f32 0.5, %v6829_v22 }
 0x7a3   :  { %14076 = vtanh.f32 %v7112_v11 }
 0x7a4   :  { %14078 = vtanh.f32 %v7116_v43 }
 0x7a5   :  { %14080 = vtanh.f32 %v6828_v49  ;;  %v17864_v49 = vld [vmem:[#allocation52_spill] sm:$0xff] }
 0x7a6   :  { %14082 = vtanh.f32 %v7121_v61 }
 0x7ad   :  { %v14077_v48 = vpop.eup %14076 }
 0x7ae   :  { %v14079_v15 = vpop.eup %14078  ;;  %v7114_v28 = vadd.f32 1.0, %v14077_v48 }
 0x7af   :  { %v7118_v18 = vadd.f32 1.0, %v14079_v15  ;;  %v14081_v32 = vpop.eup %14080  ;;  %v17867_v15 = vld [vmem:[#allocation25_spill] sm:$0xff] }
 0x7b0   :  { %v7115_v29 = vmul.f32 0.5, %v7114_v28  ;;  %v14083_v24 = vpop.eup %14082  ;;  %v17868_v28 = vld [vmem:[#allocation24_spill] sm:$0xff] }
 0x7b1   :  { %v7119_v56 = vmul.f32 0.5, %v7118_v18  ;;  %v7123_v8 = vadd.f32 1.0, %v14083_v24  ;;  %v17872_v18 = vld [vmem:[#allocation60_spill] sm:$0xff] }
 0x7b2   :  { %v7126_v63 = vmul.f32 %v14081_v32, %v7115_v29  ;;  %v17874_v29 = vld [vmem:[#allocation68_spill] sm:$0xff] }
 0x7b3   :  { %v7125_v31 = vmul.f32 %v7119_v56, %v16009_v62  ;;  %v7124_v40 = vmul.f32 0.5, %v7123_v8  ;;  %v17875_v56 = vld [vmem:[#allocation69_spill] sm:$0xff]  ;;  %v17878_v24 = vld [vmem:[#allocation72_spill] sm:$0xff] }
 0x7b5   :  { %v16361_v12 = vadd.f32 %v7126_v63, %v7125_v31  ;;  %v17876_v63 = vld [vmem:[#allocation70_spill] sm:$0xff]  ;;  %v17877_v31 = vld [vmem:[#allocation71_spill] sm:$0xff] }
 0x7b7   :  { %14084 = vtanh.f32 %v16361_v12 }
 0x7be   :  { %v7060_v26 = vpop.f32.mrb[108].mxu0  ;;  %v7101_v44 = vpop.f32.mrb[108].mxu1 }
 0x7bf   :  { %v7108_v3 = vadd.f32 %v7060_v26, %v17862_v45  ;;  %v7110_v2 = vadd.f32 %v7101_v44, %v17863_v47  ;;  %v7062_v38 = vpop.f32.mrb[109].mxu0  ;;  %v7103_v59 = vpop.f32.mrb[109].mxu1  ;;  %v17879_v26 = vld [vmem:[#allocation73_spill] sm:$0xff]  ;;  %v17880_v47 = vld [vmem:[#allocation74_spill] sm:$0xff] }
 0x7c0   :  { %v7109_v58 = vadd.f32 %v7062_v38, %v17864_v49  ;;  %v7111_v21 = vadd.f32 %v7103_v59, %v17865_v9  ;;  %v7064_v62 = vpop.f32.mrb[110].mxu0  ;;  %v7105_v52 = vpop.f32.mrb[110].mxu1  ;;  %v17882_v38 = vld [vmem:[#allocation76_spill] sm:$0xff]  ;;  %v17884_v59 = vld [vmem:[#allocation78_spill] sm:$0xff] }
 0x7c1   :  { %v14085_v53 = vpop.eup %14084  ;;  %v7130_v22 = vmul.f32 0.5, %v7108_v3  ;;  %v7065_v25 = vpop.f32.mrb[111].mxu0  ;;  %v17888_v49 = vld [vmem:[#allocation82_spill] sm:$0xff]  ;;  %v17890_v9 = vld [vmem:[#allocation84_spill] sm:$0xff]  ;;  %v17893_v52 = vld [vmem:[#allocation87_spill] sm:$0xff] }
 0x7c2   :  { %v7106_v4 = vpop.f32.mrb[111].mxu1  ;;  %v7129_v11 = vmul.f32 %v14085_v53, %v7124_v40  ;;  %v7134_v60 = vmul.f32 0.5, %v7109_v58  ;;  %v7139_v43 = vmul.f32 0.5, %v7111_v21  ;;  %v17885_v40 = vld [vmem:[#allocation79_spill] sm:$0xff]  ;;  %v17891_v21 = vld [vmem:[#allocation85_spill] sm:$0xff]  ;;  %v17892_v62 = vld [vmem:[#allocation86_spill] sm:$0xff] }
 0x7c3   :  { %14086 = vtanh.f32 %v7130_v22  ;;  %v17889_v58 = vld [vmem:[#allocation83_spill] sm:$0xff]  ;;  %v17894_v53 = vld [vmem:[#allocation88_spill] sm:$0xff]  ;;  %v17895_v22 = vld [vmem:[#allocation89_spill] sm:$0xff] }
 0x7c4   :  { %v16368_v17 = vpack.c.bf16 %v7129_v11, %v7129_v11  ;;  %14088 = vtanh.f32 %v7134_v60  ;;  %v17896_v25 = vld [vmem:[#allocation90_spill] sm:$0xff]  ;;  %v17897_v4 = vld [vmem:[#allocation91_spill] sm:$0xff]  ;;  %v17898_v11 = vld [vmem:[#allocation92_spill] sm:$0xff] }
 0x7c5   :  { %14090 = vtanh.f32 %v7110_v2  ;;  %v17881_v2 = vld [vmem:[#allocation75_spill] sm:$0xff]  ;;  %v17899_v60 = vld [vmem:[#allocation93_spill] sm:$0xff] }
 0x7c6   :  { %7379 = vmatmul.mubr.bf16.vlgmr.msra.gmra.mrb[76].mxu0 %v16368_v17  ;;  %7420 = vmatmul.mubr.bf16.vlgmr.msra.gmra.mrb[76].mxu1 %v16368_v17  ;;  %14092 = vtanh.f32 %v7139_v43  ;;  %v17900_v43 = vld [vmem:[#allocation94_spill] sm:$0xff] }
 0x7c7   :  { %7633 = vmatpush1.bf16.msra.mxu0 %v16016_v19  ;;  %7674 = vmatpush1.bf16.msra.mxu1 %v16018_v35 }
 0x7c8   :  { %7634 = vmatprep.subr.bf16.mxu0 %v16022_v46  ;;  %7675 = vmatprep.subr.bf16.mxu1 %v16024_v16 }
 0x7c9   :  { %7664 = vmatprep.mubr.bf16.mxu0 %v17512_v6  ;;  %7705 = vmatprep.mubr.bf16.mxu1 %v17512_v6 }
 0x7cb   :  { %7635 = vmatpush1.bf16.msra.mxu0 %v16030_v23  ;;  %7676 = vmatpush1.bf16.msra.mxu1 %v16032_v27 }
 0x7cc   :  { %7636 = vmatprep.subr.bf16.mxu0 %v16036_v30  ;;  %7677 = vmatprep.subr.bf16.mxu1 %v16038_v51  ;;  %v17866_v51 = vld [vmem:[#allocation22_spill] sm:$0xff] }
 0x7cd   :  { %v14087_v19 = vpop.eup %14086 }
 0x7ce   :  { %v14089_v61 = vpop.eup %14088  ;;  %v7132_v35 = vadd.f32 1.0, %v14087_v19  ;;  %v17901_v19 = vld [vmem:[#allocation95_spill] sm:$0xff] }
 0x7cf   :  { %v7136_v48 = vadd.f32 1.0, %v14089_v61  ;;  %7637 = vmatpush1.bf16.msra.mxu0 %v16044_v0  ;;  %7678 = vmatpush1.bf16.msra.mxu1 %v16046_v14  ;;  %v14091_v16 = vpop.eup %14090  ;;  %v17869_v14 = vld [vmem:[#allocation26_spill] sm:$0xff]  ;;  %v17902_v61 = vld [vmem:[#allocation96_spill] sm:$0xff] }
 0x7d0   :  { %v7133_v46 = vmul.f32 0.5, %v7132_v35  ;;  %7638 = vmatprep.subr.bf16.mxu0 %v16050_v36  ;;  %7679 = vmatprep.subr.bf16.mxu1 %v16052_v34  ;;  %v17870_v36 = vld [vmem:[#allocation59_spill] sm:$0xff]  ;;  %v17871_v34 = vld [vmem:[#allocation61_spill] sm:$0xff] }
 0x7d1   :  { %v7137_v23 = vmul.f32 0.5, %v7136_v48  ;;  %v17903_v35 = vld [vmem:[#allocation97_spill] sm:$0xff]  ;;  %v17904_v48 = vld [vmem:[#allocation98_spill] sm:$0xff] }
 0x7d2   :  { %v7144_v27 = vmul.f32 %v14091_v16, %v7133_v46  ;;  %v17905_v46 = vld [vmem:[#allocation99_spill] sm:$0xff]  ;;  %v17906_v16 = vld [vmem:[#allocation100_spill] sm:$0xff] }
 0x7d3   :  { %v7143_v30 = vmul.f32 %v7137_v23, %v16079_v42  ;;  %7639 = vmatpush1.bf16.msra.mxu0 %v16056_v10  ;;  %7680 = vmatpush1.bf16.msra.mxu1 %v17866_v51  ;;  %v14093_v42 = vpop.eup %14092  ;;  %v17873_v10 = vld [vmem:[#allocation63_spill] sm:$0xff]  ;;  %v17907_v23 = vld [vmem:[#allocation101_spill] sm:$0xff]  ;;  %v17910_v51 = vld [vmem:[#allocation104_spill] sm:$0xff] }
 0x7d4   :  { %7640 = vmatprep.subr.bf16.mxu0 %v17867_v15  ;;  %7681 = vmatprep.subr.bf16.mxu1 %v17868_v28  ;;  %v7141_v32 = vadd.f32 1.0, %v14093_v42  ;;  %v17911_v15 = vld [vmem:[#allocation105_spill] sm:$0xff]  ;;  %v17912_v28 = vld [vmem:[#allocation106_spill] sm:$0xff]  ;;  %v17918_v42 = vld [vmem:[#allocation112_spill] sm:$0xff] }
 0x7d5   :  { %v16391_v0 = vadd.f32 %v7144_v27, %v7143_v30  ;;  %v17908_v27 = vld [vmem:[#allocation102_spill] sm:$0xff]  ;;  %v17909_v30 = vld [vmem:[#allocation103_spill] sm:$0xff] }
 0x7d6   :  { %v7142_v8 = vmul.f32 0.5, %v7141_v32  ;;  %v17922_v32 = vld [vmem:[#allocation116_spill] sm:$0xff] }
 0x7d7   :  { %14094 = vtanh.f32 %v16391_v0  ;;  %7641 = vmatpush1.bf16.msra.mxu0 %v17869_v14  ;;  %7682 = vmatpush1.bf16.msra.mxu1 %v17870_v36  ;;  %v17913_v14 = vld [vmem:[#allocation107_spill] sm:$0xff]  ;;  %v17914_v36 = vld [vmem:[#allocation108_spill] sm:$0xff] }
 0x7d8   :  { %7642 = vmatprep.subr.bf16.mxu0 %v17871_v34  ;;  %7683 = vmatprep.subr.bf16.mxu1 %v17872_v18  ;;  %v17915_v34 = vld [vmem:[#allocation109_spill] sm:$0xff]  ;;  %v17916_v18 = vld [vmem:[#allocation110_spill] sm:$0xff] }
 0x7db   :  { %7643 = vmatpush1.bf16.msra.mxu0 %v17873_v10  ;;  %7684 = vmatpush1.bf16.msra.mxu1 %v17874_v29  ;;  %v17919_v10 = vld [vmem:[#allocation113_spill] sm:$0xff]  ;;  %v17920_v29 = vld [vmem:[#allocation114_spill] sm:$0xff] }
 0x7dc   :  { %7644 = vmatprep.subr.bf16.mxu0 %v17875_v56  ;;  %7685 = vmatprep.subr.bf16.mxu1 %v17876_v63  ;;  %v17923_v56 = vld [vmem:[#allocation117_spill] sm:$0xff]  ;;  %v17924_v63 = vld [vmem:[#allocation118_spill] sm:$0xff] }
 0x7df   :  { %7645 = vmatpush1.bf16.msra.mxu0 %v17877_v31  ;;  %7686 = vmatpush1.bf16.msra.mxu1 %v17878_v24  ;;  %v17925_v31 = vld [vmem:[#allocation119_spill] sm:$0xff]  ;;  %v17926_v24 = vld [vmem:[#allocation120_spill] sm:$0xff] }
 0x7e0   :  { %7646 = vmatprep.subr.bf16.mxu0 %v16102_v54  ;;  %7687 = vmatprep.subr.bf16.mxu1 %v17879_v26  ;;  %v17883_v54 = vld [vmem:[#allocation77_spill] sm:$0xff]  ;;  %v17928_v26 = vld [vmem:[#allocation122_spill] sm:$0xff] }
 0x7e1   :  { %v14095_v44 = vpop.eup %14094 }
 0x7e2   :  { %v7147_v45 = vmul.f32 %v14095_v44, %v7142_v8  ;;  %v17927_v8 = vld [vmem:[#allocation121_spill] sm:$0xff]  ;;  %v17929_v44 = vld [vmem:[#allocation123_spill] sm:$0xff] }
 0x7e3   :  { %7647 = vmatpush1.bf16.msra.mxu0 %v16108_v33  ;;  %7688 = vmatpush1.bf16.msra.mxu1 %v16110_v1  ;;  %v17886_v33 = vld [vmem:[#allocation80_spill] sm:$0xff]  ;;  %v17887_v1 = vld [vmem:[#allocation81_spill] sm:$0xff] }
 0x7e4   :  { %v16408_v3 = vpack.c.bf16 %v7147_v45, %v7147_v45  ;;  %7918 = vmatprep.subr.bf16.mxu0 %v17880_v47  ;;  %7959 = vmatprep.subr.bf16.mxu1 %v17881_v2  ;;  %v17930_v45 = vld [vmem:[#allocation124_spill] sm:$0xff]  ;;  %v17931_v47 = vld [vmem:[#allocation125_spill] sm:$0xff]  ;;  %v17932_v2 = vld [vmem:[#allocation19_spill] sm:$0xff] }
 0x7e6   :  { %7665 = vmatmul.mubr.bf16.vlgmr.msra.gmra.mrb[72].mxu0 %v16408_v3  ;;  %7706 = vmatmul.mubr.bf16.vlgmr.msra.gmra.mrb[72].mxu1 %v16408_v3 }
 0x7e7   :  { %7919 = vmatpush1.bf16.msra.mxu0 %v17882_v38  ;;  %7960 = vmatpush1.bf16.msra.mxu1 %v17883_v54  ;;  %v17933_v38 = vld [vmem:[#allocation21_spill] sm:$0xff] }
 0x7e8   :  { %7920 = vmatprep.subr.bf16.mxu0 %v17884_v59  ;;  %7961 = vmatprep.subr.bf16.mxu1 %v17885_v40  ;;  %v16514_v54 = vld [vmem:[#allocation8 + $0x40] ss:$16 sps:$4 sm:$0xff]   ;;  %v16516_v59 = vld [vmem:[#allocation8 + $0x48] ss:$16 sps:$4 sm:$0xff]   ;;  %v16522_v40 = vld [vmem:[#allocation8 + $0x64] ss:$16 sps:$4 sm:$0xff]  }
 0x7e9   :  { %7950 = vmatprep.mubr.bf16.mxu0 %v17512_v6  ;;  %7991 = vmatprep.mubr.bf16.mxu1 %v17512_v6 }
 0x7eb   :  { %7921 = vmatpush1.bf16.msra.mxu0 %v17886_v33  ;;  %7962 = vmatpush1.bf16.msra.mxu1 %v17887_v1  ;;  %v16524_v33 = vld [vmem:[#allocation8 + $0x6c] ss:$16 sps:$4 sm:$0xff]   ;;  %v16526_v1 = vld [vmem:[#allocation8 + $0x60] ss:$16 sps:$4 sm:$0xff]  }
 0x7ec   :  { %7922 = vmatprep.subr.bf16.mxu0 %v17888_v49  ;;  %7963 = vmatprep.subr.bf16.mxu1 %v17889_v58  ;;  %v16528_v49 = vld [vmem:[#allocation8 + $0x68] ss:$16 sps:$4 sm:$0xff]   ;;  %v16534_v58 = vld [vmem:[#allocation8 + $0x84] ss:$16 sps:$4 sm:$0xff]  }
 0x7ef   :  { %7923 = vmatpush1.bf16.msra.mxu0 %v17890_v9  ;;  %7964 = vmatpush1.bf16.msra.mxu1 %v17891_v21  ;;  %v16536_v9 = vld [vmem:[#allocation8 + $0x8c] ss:$16 sps:$4 sm:$0xff]   ;;  %v16538_v21 = vld [vmem:[#allocation8 + $0x80] ss:$16 sps:$4 sm:$0xff]  }
 0x7f0   :  { %7924 = vmatprep.subr.bf16.mxu0 %v17892_v62  ;;  %7965 = vmatprep.subr.bf16.mxu1 %v17893_v52  ;;  %v16540_v62 = vld [vmem:[#allocation8 + $0x88] ss:$16 sps:$4 sm:$0xff]   ;;  %v16546_v52 = vld [vmem:[#allocation8 + $0xa4] ss:$16 sps:$4 sm:$0xff]  }
 0x7f3   :  { %7925 = vmatpush1.bf16.msra.mxu0 %v17894_v53  ;;  %7966 = vmatpush1.bf16.msra.mxu1 %v17895_v22  ;;  %v16548_v53 = vld [vmem:[#allocation8 + $0xac] ss:$16 sps:$4 sm:$0xff]   ;;  %v16550_v22 = vld [vmem:[#allocation8 + $0xa0] ss:$16 sps:$4 sm:$0xff]  }
 0x7f4   :  { %7926 = vmatprep.subr.bf16.mxu0 %v17896_v25  ;;  %7967 = vmatprep.subr.bf16.mxu1 %v17897_v4  ;;  %v16552_v25 = vld [vmem:[#allocation8 + $0xa8] ss:$16 sps:$4 sm:$0xff]   ;;  %v16558_v4 = vld [vmem:[#allocation8 + $0xc4] ss:$16 sps:$4 sm:$0xff]  }
 0x7f7   :  { %7927 = vmatpush1.bf16.msra.mxu0 %v17898_v11  ;;  %7968 = vmatpush1.bf16.msra.mxu1 %v17899_v60  ;;  %v16560_v11 = vld [vmem:[#allocation8 + $0xcc] ss:$16 sps:$4 sm:$0xff]   ;;  %v16562_v60 = vld [vmem:[#allocation8 + $0xc0] ss:$16 sps:$4 sm:$0xff]  }
 0x7f8   :  { %7928 = vmatprep.subr.bf16.mxu0 %v17900_v43  ;;  %7969 = vmatprep.subr.bf16.mxu1 %v17901_v19  ;;  %v16564_v43 = vld [vmem:[#allocation8 + $0xc8] ss:$16 sps:$4 sm:$0xff]   ;;  %v16570_v19 = vld [vmem:[#allocation8 + $0xe4] ss:$16 sps:$4 sm:$0xff]  }
 0x7fb   :  { %7929 = vmatpush1.bf16.msra.mxu0 %v17902_v61  ;;  %7970 = vmatpush1.bf16.msra.mxu1 %v17903_v35  ;;  %v16572_v61 = vld [vmem:[#allocation8 + $0xec] ss:$16 sps:$4 sm:$0xff]   ;;  %v16574_v35 = vld [vmem:[#allocation8 + $0xe0] ss:$16 sps:$4 sm:$0xff]  }
 0x7fc   :  { %7930 = vmatprep.subr.bf16.mxu0 %v17904_v48  ;;  %7971 = vmatprep.subr.bf16.mxu1 %v17905_v46  ;;  %v16576_v48 = vld [vmem:[#allocation8 + $0xe8] ss:$16 sps:$4 sm:$0xff]   ;;  %v16582_v46 = vld [vmem:[#allocation8 + $0x104] ss:$16 sps:$4 sm:$0xff]  }
 0x7ff   :  { %7931 = vmatpush1.bf16.msra.mxu0 %v17906_v16  ;;  %7972 = vmatpush1.bf16.msra.mxu1 %v17907_v23  ;;  %v16584_v16 = vld [vmem:[#allocation8 + $0x10c] ss:$16 sps:$4 sm:$0xff]  }
 0x800   :  { %7932 = vmatprep.subr.bf16.mxu0 %v17908_v27  ;;  %7973 = vmatprep.subr.bf16.mxu1 %v16206_v7  ;;  %v17917_v7 = vld [vmem:[#allocation111_spill] sm:$0xff] }
 0x803   :  { %7933 = vmatpush1.bf16.msra.mxu0 %v17909_v30  ;;  %7974 = vmatpush1.bf16.msra.mxu1 %v17910_v51  ;;  %v17934_v30 = vld [vmem:[#allocation35_spill] sm:$0xff] }
 0x804   :  { %8200 = vmatprep.subr.bf16.mxu0 %v17911_v15  ;;  %8241 = vmatprep.subr.bf16.mxu1 %v17912_v28  ;;  %v17935_v15 = vld [vmem:[#allocation37_spill] sm:$0xff] }
 0x806   :  { %7951 = vmatmul.mubr.bf16.vlgmr.msra.gmra.mrb[112].mxu0 %v16368_v17  ;;  %7992 = vmatmul.mubr.bf16.vlgmr.msra.gmra.mrb[112].mxu1 %v16368_v17  ;;  %v17921_v17 = vld [vmem:[#allocation115_spill] sm:$0xff] }
 0x807   :  { %8201 = vmatpush1.bf16.msra.mxu0 %v17913_v14  ;;  %8242 = vmatpush1.bf16.msra.mxu1 %v17914_v36 }
 0x808   :  { %8202 = vmatprep.subr.bf16.mxu0 %v17915_v34  ;;  %8243 = vmatprep.subr.bf16.mxu1 %v17916_v18  ;;  %v17936_v34 = vld [vmem:[#allocation36_spill] sm:$0xff] }
 0x809   :  { %8232 = vmatprep.mubr.bf16.mxu0 %v17512_v6  ;;  %8273 = vmatprep.mubr.bf16.mxu1 %v17512_v6 }
 0x80b   :  { %8203 = vmatpush1.bf16.msra.mxu0 %v17917_v7  ;;  %8244 = vmatpush1.bf16.msra.mxu1 %v17918_v42  ;;  %v17937_v7 = vld [vmem:[#allocation39_spill] sm:$0xff] }
 0x80c   :  { %8204 = vmatprep.subr.bf16.mxu0 %v17919_v10  ;;  %8245 = vmatprep.subr.bf16.mxu1 %v17920_v29 }
 0x80f   :  { %8205 = vmatpush1.bf16.msra.mxu0 %v17921_v17  ;;  %8246 = vmatpush1.bf16.msra.mxu1 %v17922_v32 }
 0x810   :  { %8206 = vmatprep.subr.bf16.mxu0 %v17923_v56  ;;  %8247 = vmatprep.subr.bf16.mxu1 %v17924_v63 }
 0x813   :  { %8207 = vmatpush1.bf16.msra.mxu0 %v17925_v31  ;;  %8248 = vmatpush1.bf16.msra.mxu1 %v17926_v24 }
 0x814   :  { %8208 = vmatprep.subr.bf16.mxu0 %v17927_v8  ;;  %8249 = vmatprep.subr.bf16.mxu1 %v17928_v26 }
 0x817   :  { %8209 = vmatpush1.bf16.msra.mxu0 %v17929_v44  ;;  %8250 = vmatpush1.bf16.msra.mxu1 %v17930_v45 }
 0x818   :  { %8210 = vmatprep.subr.bf16.mxu0 %v17931_v47  ;;  %8251 = vmatprep.subr.bf16.mxu1 %v17932_v2 }
 0x81b   :  { %8211 = vmatpush1.bf16.msra.mxu0 %v17933_v38  ;;  %8252 = vmatpush1.bf16.msra.mxu1 %v16288_v39  ;;  %v16502_v39 = vld [vmem:[#allocation8 + $0x20] ss:$16 sps:$4 sm:$0xff]  }
 0x81c   :  { %8212 = vmatprep.subr.bf16.mxu0 %v16292_v37  ;;  %8253 = vmatprep.subr.bf16.mxu1 %v16294_v5  ;;  %v16486_v5 = vld [vmem:[#allocation8 + $0x4] ss:$16 sps:$4 sm:$0xff]   ;;  %v16488_v37 = vld [vmem:[#allocation8 + $0xc] ss:$16 sps:$4 sm:$0xff]  }
 0x81f   :  { %8213 = vmatpush1.bf16.msra.mxu0 %v16298_v55  ;;  %8254 = vmatpush1.bf16.msra.mxu1 %v16300_v41  ;;  %v16490_v41 = vld [vmem:[#allocation8] ss:$16 sps:$4 sm:$0xff]   ;;  %v16492_v55 = vld [vmem:[#allocation8 + $0x8] ss:$16 sps:$4 sm:$0xff]  }
 0x820   :  { %8214 = vmatprep.subr.bf16.mxu0 %v16304_v20  ;;  %8255 = vmatprep.subr.bf16.mxu1 %v16306_v13  ;;  %v16504_v13 = vld [vmem:[#allocation8 + $0x28] ss:$16 sps:$4 sm:$0xff]   ;;  %v16510_v20 = vld [vmem:[#allocation8 + $0x44] ss:$16 sps:$4 sm:$0xff]  }
 0x823   :  { %8215 = vmatpush1.bf16.msra.mxu0 %v16310_v57  ;;  %8256 = vmatpush1.bf16.msra.mxu1 %v16312_v50  ;;  %v16498_v50 = vld [vmem:[#allocation8 + $0x24] ss:$16 sps:$4 sm:$0xff]   ;;  %v16500_v57 = vld [vmem:[#allocation8 + $0x2c] ss:$16 sps:$4 sm:$0xff]  }
 0x824   :  { %8520 = vmatprep.subr.bf16.mxu0 %v16486_v5  ;;  %8561 = vmatprep.subr.bf16.mxu1 %v16488_v37 }
 0x826   :  { %8233 = vmatmul.mubr.bf16.vlgmr.msra.gmra.mrb[116].mxu0 %v16408_v3  ;;  %8274 = vmatmul.mubr.bf16.vlgmr.msra.gmra.mrb[116].mxu1 %v16408_v3  ;;  %v16512_v3 = vld [vmem:[#allocation8 + $0x4c] ss:$16 sps:$4 sm:$0xff]  }
 0x827   :  { %8552 = vmatprep.mubr.bf16.mxu0 %v17512_v6  ;;  %8593 = vmatprep.mubr.bf16.mxu1 %v17512_v6 }
 0x828   :  { %8521 = vmatpush1.bf16.msra.mxu0 %v16490_v41  ;;  %8562 = vmatpush1.bf16.msra.mxu1 %v16492_v55 }
 0x829   :  { %8522 = vmatprep.subr.bf16.mxu0 %v16498_v50  ;;  %8563 = vmatprep.subr.bf16.mxu1 %v16500_v57 }
 0x82c   :  { %8523 = vmatpush1.bf16.msra.mxu0 %v16502_v39  ;;  %8564 = vmatpush1.bf16.msra.mxu1 %v16504_v13 }
 0x82d   :  { %8524 = vmatprep.subr.bf16.mxu0 %v16510_v20  ;;  %8565 = vmatprep.subr.bf16.mxu1 %v16512_v3 }
 0x830   :  { %8525 = vmatpush1.bf16.msra.mxu0 %v16514_v54  ;;  %8566 = vmatpush1.bf16.msra.mxu1 %v16516_v59 }
 0x831   :  { %8526 = vmatprep.subr.bf16.mxu0 %v16522_v40  ;;  %8567 = vmatprep.subr.bf16.mxu1 %v16524_v33 }
 0x834   :  { %8527 = vmatpush1.bf16.msra.mxu0 %v16526_v1  ;;  %8568 = vmatpush1.bf16.msra.mxu1 %v16528_v49 }
 0x835   :  { %8528 = vmatprep.subr.bf16.mxu0 %v16534_v58  ;;  %8569 = vmatprep.subr.bf16.mxu1 %v16536_v9 }
 0x838   :  { %8529 = vmatpush1.bf16.msra.mxu0 %v16538_v21  ;;  %8570 = vmatpush1.bf16.msra.mxu1 %v16540_v62 }
 0x839   :  { %8530 = vmatprep.subr.bf16.mxu0 %v16546_v52  ;;  %8571 = vmatprep.subr.bf16.mxu1 %v16548_v53 }
 0x83c   :  { %8531 = vmatpush1.bf16.msra.mxu0 %v16550_v22  ;;  %8572 = vmatpush1.bf16.msra.mxu1 %v16552_v25 }
 0x83d   :  { %8532 = vmatprep.subr.bf16.mxu0 %v16558_v4  ;;  %8573 = vmatprep.subr.bf16.mxu1 %v16560_v11 }
 0x840   :  { %8533 = vmatpush1.bf16.msra.mxu0 %v16562_v60  ;;  %8574 = vmatpush1.bf16.msra.mxu1 %v16564_v43 }
 0x841   :  { %8534 = vmatprep.subr.bf16.mxu0 %v16570_v19  ;;  %8575 = vmatprep.subr.bf16.mxu1 %v16572_v61 }
 0x844   :  { %8535 = vmatpush1.bf16.msra.mxu0 %v16574_v35  ;;  %8576 = vmatpush1.bf16.msra.mxu1 %v16576_v48 }
 0x845   :  { %8806 = vmatprep.subr.bf16.mxu0 %v16582_v46  ;;  %8847 = vmatprep.subr.bf16.mxu1 %v16584_v16 }
 0x8d9   :  { %v7952_v23 = vpop.f32.mrb[112].mxu0  ;;  %v7993_v27 = vpop.f32.mrb[112].mxu1 }
 0x8da   :  { %v8000_v51 = vadd.f32 %v7952_v23, %v17934_v30  ;;  %v8002_v28 = vadd.f32 %v7993_v27, %v17935_v15  ;;  %v7954_v14 = vpop.f32.mrb[113].mxu0  ;;  %v7995_v36 = vpop.f32.mrb[113].mxu1 }
 0x8db   :  { %v8001_v18 = vadd.f32 %v7954_v14, %v17936_v34  ;;  %v8003_v42 = vadd.f32 %v7995_v36, %v17937_v7  ;;  %v7956_v10 = vpop.f32.mrb[114].mxu0  ;;  %v7997_v29 = vpop.f32.mrb[114].mxu1  ;;  %v17938_v14 = vld [vmem:[#allocation46_spill] sm:$0xff]  ;;  %v17939_v34 = vld [vmem:[#allocation49_spill] sm:$0xff] }
 0x8dc   :  { %v8286_v17 = vmul.f32 0.5, %v8000_v51  ;;  %v7957_v32 = vpop.f32.mrb[115].mxu0  ;;  %v7998_v56 = vpop.f32.mrb[115].mxu1  ;;  %v17940_v29 = vld [vmem:[#allocation48_spill] sm:$0xff] }
 0x8dd   :  { %v8290_v63 = vmul.f32 0.5, %v8001_v18  ;;  %v8295_v31 = vmul.f32 0.5, %v8003_v42  ;;  %v17941_v32 = vld [vmem:[#allocation50_spill] sm:$0xff] }
 0x8de   :  { %14096 = vtanh.f32 %v8286_v17 }
 0x8df   :  { %14098 = vtanh.f32 %v8290_v63 }
 0x8e0   :  { %14100 = vtanh.f32 %v8002_v28 }
 0x8e1   :  { %14102 = vtanh.f32 %v8295_v31 }
 0x8e8   :  { %v14097_v24 = vpop.eup %14096 }
 0x8e9   :  { %v14099_v8 = vpop.eup %14098  ;;  %v8288_v26 = vadd.f32 1.0, %v14097_v24 }
 0x8ea   :  { %v8292_v44 = vadd.f32 1.0, %v14099_v8  ;;  %v14101_v47 = vpop.eup %14100 }
 0x8eb   :  { %v8289_v45 = vmul.f32 0.5, %v8288_v26  ;;  %v14103_v30 = vpop.eup %14102 }
 0x8ec   :  { %v8293_v2 = vmul.f32 0.5, %v8292_v44  ;;  %v8297_v51 = vadd.f32 1.0, %v14103_v30  ;;  %v16608_v30 = vld [vmem:[#allocation8 + $0x12c] ss:$16 sps:$4 sm:$0xff]  }
 0x8ed   :  { %v8300_v38 = vmul.f32 %v14101_v47, %v8289_v45  ;;  %v16600_v47 = vld [vmem:[#allocation8 + $0x100] ss:$16 sps:$4 sm:$0xff]  }
 0x8ee   :  { %v8299_v23 = vmul.f32 %v8293_v2, %v16361_v12  ;;  %v8298_v10 = vmul.f32 0.5, %v8297_v51  ;;  %v16602_v2 = vld [vmem:[#allocation8 + $0x108] ss:$16 sps:$4 sm:$0xff]   ;;  %v16614_v51 = vld [vmem:[#allocation8 + $0x120] ss:$16 sps:$4 sm:$0xff]  }
 0x8f0   :  { %v16593_v27 = vadd.f32 %v8300_v38, %v8299_v23  ;;  %v16606_v23 = vld [vmem:[#allocation8 + $0x124] ss:$16 sps:$4 sm:$0xff]  }
 0x8f2   :  { %14104 = vtanh.f32 %v16593_v27 }
 0x8f9   :  { %v8234_v15 = vpop.f32.mrb[116].mxu0  ;;  %v8275_v28 = vpop.f32.mrb[116].mxu1 }
 0x8fa   :  { %v8282_v36 = vadd.f32 %v8234_v15, %v17938_v14  ;;  %v8284_v18 = vadd.f32 %v8275_v28, %v17939_v34  ;;  %v8236_v7 = vpop.f32.mrb[117].mxu0  ;;  %v8277_v42 = vpop.f32.mrb[117].mxu1  ;;  %v16616_v15 = vld [vmem:[#allocation8 + $0x128] ss:$16 sps:$4 sm:$0xff]   ;;  %v16620_v28 = vld [vmem:[#allocation8 + $0x144] ss:$16 sps:$4 sm:$0xff]  }
 0x8fb   :  { %v8283_v17 = vadd.f32 %v8236_v7, %v17940_v29  ;;  %v8285_v56 = vadd.f32 %v8277_v42, %v17941_v32  ;;  %v8238_v12 = vpop.f32.mrb[118].mxu0  ;;  %v8279_v63 = vpop.f32.mrb[118].mxu1  ;;  %v16622_v14 = vld [vmem:[#allocation8 + $0x14c] ss:$16 sps:$4 sm:$0xff]   ;;  %v16628_v34 = vld [vmem:[#allocation8 + $0x140] ss:$16 sps:$4 sm:$0xff]  }
 0x8fc   :  { %v14105_v31 = vpop.eup %14104  ;;  %v8304_v24 = vmul.f32 0.5, %v8282_v36  ;;  %v8239_v8 = vpop.f32.mrb[119].mxu0  ;;  %v16634_v7 = vld [vmem:[#allocation8 + $0x164] ss:$16 sps:$4 sm:$0xff]   ;;  %v16636_v42 = vld [vmem:[#allocation8 + $0x16c] ss:$16 sps:$4 sm:$0xff]  }
 0x8fd   :  { %v8280_v26 = vpop.f32.mrb[119].mxu1  ;;  %v8303_v44 = vmul.f32 %v14105_v31, %v8298_v10  ;;  %v8308_v45 = vmul.f32 0.5, %v8283_v17  ;;  %v8313_v36 = vmul.f32 0.5, %v8285_v56  ;;  %v16640_v56 = vld [vmem:[#allocation8 + $0x160] ss:$16 sps:$4 sm:$0xff]  }
 0x8fe   :  { %14106 = vtanh.f32 %v8304_v24  ;;  %17942 = vst [vmem:[#allocation20_spill] sm:$0xff] %v16640_v56  ;;  %v16642_v12 = vld [vmem:[#allocation8 + $0x168] ss:$16 sps:$4 sm:$0xff]   ;;  %v16646_v31 = vld [vmem:[#allocation8 + $0x184] ss:$16 sps:$4 sm:$0xff]  }
 0x8ff   :  { %v16604_v38 = vpack.c.bf16 %v8303_v44, %v8303_v44  ;;  %14108 = vtanh.f32 %v8308_v45  ;;  %17943 = vst [vmem:[#allocation23_spill] sm:$0xff] %v16642_v12  ;;  %17944 = vst [vmem:[#allocation62_spill] sm:$0xff] %v16646_v31  ;;  %v16648_v24 = vld [vmem:[#allocation8 + $0x18c] ss:$16 sps:$4 sm:$0xff]  }
 0x900   :  { %14110 = vtanh.f32 %v8284_v18  ;;  %v16630_v18 = vld [vmem:[#allocation8 + $0x148] ss:$16 sps:$4 sm:$0xff]   ;;  %17945 = vst [vmem:[#allocation65_spill] sm:$0xff] %v16648_v24 }
 0x901   :  { %8553 = vmatmul.mubr.bf16.vlgmr.msra.gmra.mrb[60].mxu0 %v16604_v38  ;;  %8594 = vmatmul.mubr.bf16.vlgmr.msra.gmra.mrb[60].mxu1 %v16604_v38  ;;  %14112 = vtanh.f32 %v8313_v36  ;;  %v16653_v36 = vld [vmem:[#allocation8 + $0x180] ss:$16 sps:$4 sm:$0xff]  }
 0x902   :  { %8807 = vmatpush1.bf16.msra.mxu0 %v16600_v47  ;;  %8848 = vmatpush1.bf16.msra.mxu1 %v16602_v2  ;;  %17946 = vst [vmem:[#allocation64_spill] sm:$0xff] %v16653_v36 }
 0x903   :  { %8808 = vmatprep.subr.bf16.mxu0 %v16606_v23  ;;  %8849 = vmatprep.subr.bf16.mxu1 %v16608_v30 }
 0x904   :  { %8838 = vmatprep.mubr.bf16.mxu0 %v17512_v6  ;;  %8879 = vmatprep.mubr.bf16.mxu1 %v17512_v6 }
 0x906   :  { %8809 = vmatpush1.bf16.msra.mxu0 %v16614_v51  ;;  %8850 = vmatpush1.bf16.msra.mxu1 %v16616_v15 }
 0x907   :  { %8810 = vmatprep.subr.bf16.mxu0 %v16620_v28  ;;  %8851 = vmatprep.subr.bf16.mxu1 %v16622_v14 }
 0x908   :  { %v14107_v10 = vpop.eup %14106 }
 0x909   :  { %v14109_v29 = vpop.eup %14108  ;;  %v8306_v17 = vadd.f32 1.0, %v14107_v10  ;;  %v16655_v10 = vld [vmem:[#allocation8 + $0x188] ss:$16 sps:$4 sm:$0xff]  }
 0x90a   :  { %v8310_v32 = vadd.f32 1.0, %v14109_v29  ;;  %8811 = vmatpush1.bf16.msra.mxu0 %v16628_v34  ;;  %8852 = vmatpush1.bf16.msra.mxu1 %v16630_v18  ;;  %v14111_v8 = vpop.eup %14110  ;;  %17947 = vst [vmem:[#allocation66_spill] sm:$0xff] %v16655_v10  ;;  %v16659_v29 = vld [vmem:[#allocation8 + $0x1a4] ss:$16 sps:$4 sm:$0xff]  }
 0x90b   :  { %v8307_v63 = vmul.f32 0.5, %v8306_v17  ;;  %8812 = vmatprep.subr.bf16.mxu0 %v16634_v7  ;;  %8853 = vmatprep.subr.bf16.mxu1 %v16636_v42  ;;  %17948 = vst [vmem:[#allocation126_spill] sm:$0xff] %v16659_v29  ;;  %v16661_v17 = vld [vmem:[#allocation8 + $0x1ac] ss:$16 sps:$4 sm:$0xff]  }
 0x90c   :  { %v8311_v26 = vmul.f32 0.5, %v8310_v32  ;;  %17949 = vst [vmem:[#allocation127_spill] sm:$0xff] %v16661_v17 }
 0x90d   :  { %v8318_v44 = vmul.f32 %v14111_v8, %v8307_v63  ;;  %v16670_v63 = vld [vmem:[#allocation8 + $0x1a8] ss:$16 sps:$4 sm:$0xff]   ;;  %v16674_v8 = vld [vmem:[#allocation8 + $0x1c4] ss:$16 sps:$4 sm:$0xff]  }
 0x90e   :  { %v8317_v45 = vmul.f32 %v8311_v26, %v16391_v0  ;;  %8813 = vmatpush1.bf16.msra.mxu0 %v16640_v56  ;;  %8854 = vmatpush1.bf16.msra.mxu1 %v16642_v12  ;;  %v16668_v0 = vld [vmem:[#allocation8 + $0x1a0] ss:$16 sps:$4 sm:$0xff]   ;;  %17952 = vst [vmem:[#allocation28_spill] sm:$0xff] %v16670_v63  ;;  %17953 = vst [vmem:[#allocation31_spill] sm:$0xff] %v16674_v8  ;;  %v16676_v26 = vld [vmem:[#allocation8 + $0x1cc] ss:$16 sps:$4 sm:$0xff]  }
 0x90f   :  { %8814 = vmatprep.subr.bf16.mxu0 %v16646_v31  ;;  %8855 = vmatprep.subr.bf16.mxu1 %v16648_v24  ;;  %17951 = vst [vmem:[#allocation29_spill] sm:$0xff] %v16668_v0  ;;  %17954 = vst [vmem:[#allocation54_spill] sm:$0xff] %v16676_v26  ;;  %v13739_v12 = vld [vmem:[#allocation4 + $0x8] ss:$16 sps:$4 sm:$0xff]   ;;  %v13744_v56 = vld [vmem:[#allocation4 + $0x24] ss:$16 sps:$4 sm:$0xff]  }
 0x910   :  { %v16663_v32 = vadd.f32 %v8318_v44, %v8317_v45  ;;  %v14113_v44 = vpop.eup %14112  ;;  %v16680_v45 = vld [vmem:[#allocation8 + $0x1c0] ss:$16 sps:$4 sm:$0xff]  }
 0x911   :  { %17955 = vst [vmem:[#allocation57_spill] sm:$0xff] %v16680_v45 }
 0x912   :  { %17950 = vst [vmem:[#allocation27_spill] sm:$0xff] %v16663_v32  ;;  %14114 = vtanh.f32 %v16663_v32  ;;  %8815 = vmatpush1.bf16.msra.mxu0 %v16653_v36  ;;  %8856 = vmatpush1.bf16.msra.mxu1 %v16655_v10  ;;  %v16682_v10 = vld [vmem:[#allocation8 + $0x1c8] ss:$16 sps:$4 sm:$0xff]   ;;  %v8315_v36 = vadd.f32 1.0, %v14113_v44  ;;  %v13738_v44 = vld [vmem:[#allocation4 + $0x4] ss:$16 sps:$4 sm:$0xff]  }
 0x913   :  { %8816 = vmatprep.subr.bf16.mxu0 %v16659_v29  ;;  %8857 = vmatprep.subr.bf16.mxu1 %v16661_v17  ;;  %17956 = vst [vmem:[#allocation56_spill] sm:$0xff] %v16682_v10  ;;  %v16686_v29 = vld [vmem:[#allocation8 + $0x1e4] ss:$16 sps:$4 sm:$0xff]   ;;  %v16688_v17 = vld [vmem:[#allocation8 + $0x1ec] ss:$16 sps:$4 sm:$0xff]  }
 0x914   :  { %17957 = vst [vmem:[#allocation58_spill] sm:$0xff] %v16686_v29  ;;  %17958 = vst [vmem:[#allocation30_spill] sm:$0xff] %v16688_v17  ;;  %v8316_v24 = vmul.f32 0.5, %v8315_v36  ;;  %v13747_v36 = vld [vmem:[#allocation4 + $0x2c] ss:$16 sps:$4 sm:$0xff]  }
 0x915   :  { %v13763_v32 = vld [vmem:[#allocation4 + $0x88] ss:$16 sps:$4 sm:$0xff]  }
 0x916   :  { %8817 = vmatpush1.bf16.msra.mxu0 %v16668_v0  ;;  %8858 = vmatpush1.bf16.msra.mxu1 %v16670_v63  ;;  %v16692_v0 = vld [vmem:[#allocation8 + $0x1e0] ss:$16 sps:$4 sm:$0xff]   ;;  %v16694_v63 = vld [vmem:[#allocation8 + $0x1e8] ss:$16 sps:$4 sm:$0xff]  }
 0x917   :  { %8818 = vmatprep.subr.bf16.mxu0 %v16674_v8  ;;  %8859 = vmatprep.subr.bf16.mxu1 %v16676_v26  ;;  %17959 = vst [vmem:[#allocation33_spill] sm:$0xff] %v16692_v0  ;;  %17960 = vst [vmem:[#allocation32_spill] sm:$0xff] %v16694_v63  ;;  %v13741_v8 = vld [vmem:[#allocation4 + $0xc] ss:$16 sps:$4 sm:$0xff]  }
 0x91a   :  { %8819 = vmatpush1.bf16.msra.mxu0 %v16680_v45  ;;  %8860 = vmatpush1.bf16.msra.mxu1 %v16682_v10  ;;  %v13736_v45 = vld [vmem:[#allocation4] ss:$16 sps:$4 sm:$0xff]  }
 0x91b   :  { %8820 = vmatprep.subr.bf16.mxu0 %v16686_v29  ;;  %8861 = vmatprep.subr.bf16.mxu1 %v16688_v17  ;;  %v13742_v17 = vld [vmem:[#allocation4 + $0x20] ss:$16 sps:$4 sm:$0xff]  }
 0x91c   :  { %v14115_v26 = vpop.eup %14114  ;;  %v13760_v29 = vld [vmem:[#allocation4 + $0x80] ss:$16 sps:$4 sm:$0xff]  }
 0x91d   :  { %v8321_v31 = vmul.f32 %v14115_v26, %v8316_v24  ;;  %v13745_v24 = vld [vmem:[#allocation4 + $0x28] ss:$16 sps:$4 sm:$0xff]   ;;  %v13750_v26 = vld [vmem:[#allocation4 + $0x44] ss:$16 sps:$4 sm:$0xff]  }
 0x91e   :  { %8821 = vmatpush1.bf16.msra.mxu0 %v16692_v0  ;;  %8862 = vmatpush1.bf16.msra.mxu1 %v16694_v63  ;;  %v13753_v63 = vld [vmem:[#allocation4 + $0x4c] ss:$16 sps:$4 sm:$0xff]  }
 0x91f   :  { %v16700_v10 = vpack.c.bf16 %v8321_v31, %v8321_v31  ;;  %9092 = vmatprep.subr.bf16.mxu0 %v13738_v44  ;;  %9133 = vmatprep.subr.bf16.mxu1 %v13741_v8  ;;  %v13748_v31 = vld [vmem:[#allocation4 + $0x40] ss:$16 sps:$4 sm:$0xff]   ;;  %v13751_v8 = vld [vmem:[#allocation4 + $0x48] ss:$16 sps:$4 sm:$0xff]   ;;  %v13756_v44 = vld [vmem:[#allocation4 + $0x64] ss:$16 sps:$4 sm:$0xff]  }
 0x920   :  { %v13759_v0 = vld [vmem:[#allocation4 + $0x6c] ss:$16 sps:$4 sm:$0xff]  }
 0x921   :  { %8839 = vmatmul.mubr.bf16.vlgmr.msra.gmra.mrb[56].mxu0 %v16700_v10  ;;  %8880 = vmatmul.mubr.bf16.vlgmr.msra.gmra.mrb[56].mxu1 %v16700_v10 }
 0x922   :  { %9093 = vmatpush1.bf16.msra.mxu0 %v13736_v45  ;;  %9134 = vmatpush1.bf16.msra.mxu1 %v13739_v12  ;;  %v13754_v12 = vld [vmem:[#allocation4 + $0x60] ss:$16 sps:$4 sm:$0xff]   ;;  %v13757_v45 = vld [vmem:[#allocation4 + $0x68] ss:$16 sps:$4 sm:$0xff]  }
 0x923   :  { %9094 = vmatprep.subr.bf16.mxu0 %v13744_v56  ;;  %9135 = vmatprep.subr.bf16.mxu1 %v13747_v36  ;;  %v13762_v56 = vld [vmem:[#allocation4 + $0x84] ss:$16 sps:$4 sm:$0xff]   ;;  %v13765_v36 = vld [vmem:[#allocation4 + $0x8c] ss:$16 sps:$4 sm:$0xff]  }
 0x924   :  { %9124 = vmatprep.mubr.bf16.mxu0 %v17512_v6  ;;  %9165 = vmatprep.mubr.bf16.mxu1 %v17512_v6 }
 0x926   :  { %9095 = vmatpush1.bf16.msra.mxu0 %v13742_v17  ;;  %9136 = vmatpush1.bf16.msra.mxu1 %v13745_v24  ;;  %v13768_v17 = vld [vmem:[#allocation4 + $0xa4] ss:$16 sps:$4 sm:$0xff]   ;;  %v13771_v24 = vld [vmem:[#allocation4 + $0xac] ss:$16 sps:$4 sm:$0xff]  }
 0x927   :  { %9096 = vmatprep.subr.bf16.mxu0 %v13750_v26  ;;  %9137 = vmatprep.subr.bf16.mxu1 %v13753_v63  ;;  %v13766_v63 = vld [vmem:[#allocation4 + $0xa0] ss:$16 sps:$4 sm:$0xff]   ;;  %v13769_v26 = vld [vmem:[#allocation4 + $0xa8] ss:$16 sps:$4 sm:$0xff]  }
 0x92a   :  { %9097 = vmatpush1.bf16.msra.mxu0 %v13748_v31  ;;  %9138 = vmatpush1.bf16.msra.mxu1 %v13751_v8  ;;  %v13774_v31 = vld [vmem:[#allocation4 + $0xc4] ss:$16 sps:$4 sm:$0xff]   ;;  %v13777_v8 = vld [vmem:[#allocation4 + $0xcc] ss:$16 sps:$4 sm:$0xff]  }
 0x92b   :  { %9098 = vmatprep.subr.bf16.mxu0 %v13756_v44  ;;  %9139 = vmatprep.subr.bf16.mxu1 %v13759_v0  ;;  %v13772_v0 = vld [vmem:[#allocation4 + $0xc0] ss:$16 sps:$4 sm:$0xff]   ;;  %v13775_v44 = vld [vmem:[#allocation4 + $0xc8] ss:$16 sps:$4 sm:$0xff]  }
 0x92e   :  { %9099 = vmatpush1.bf16.msra.mxu0 %v13754_v12  ;;  %9140 = vmatpush1.bf16.msra.mxu1 %v13757_v45  ;;  %v13780_v12 = vld [vmem:[#allocation4 + $0xe4] ss:$16 sps:$4 sm:$0xff]   ;;  %v13783_v45 = vld [vmem:[#allocation4 + $0xec] ss:$16 sps:$4 sm:$0xff]  }
 0x92f   :  { %9100 = vmatprep.subr.bf16.mxu0 %v13762_v56  ;;  %9141 = vmatprep.subr.bf16.mxu1 %v13765_v36  ;;  %v13778_v56 = vld [vmem:[#allocation4 + $0xe0] ss:$16 sps:$4 sm:$0xff]   ;;  %v13781_v36 = vld [vmem:[#allocation4 + $0xe8] ss:$16 sps:$4 sm:$0xff]  }
 0x932   :  { %9101 = vmatpush1.bf16.msra.mxu0 %v13760_v29  ;;  %9142 = vmatpush1.bf16.msra.mxu1 %v13763_v32  ;;  %v13786_v29 = vld [vmem:[#allocation6 + $0x4] ss:$16 sps:$4 sm:$0xff]   ;;  %v13789_v32 = vld [vmem:[#allocation6 + $0xc] ss:$16 sps:$4 sm:$0xff]  }
 0x933   :  { %9102 = vmatprep.subr.bf16.mxu0 %v13768_v17  ;;  %9143 = vmatprep.subr.bf16.mxu1 %v13771_v24  ;;  %v13784_v17 = vld [vmem:[#allocation6] ss:$16 sps:$4 sm:$0xff]   ;;  %v13787_v24 = vld [vmem:[#allocation6 + $0x8] ss:$16 sps:$4 sm:$0xff]  }
 0x936   :  { %9103 = vmatpush1.bf16.msra.mxu0 %v13766_v63  ;;  %9144 = vmatpush1.bf16.msra.mxu1 %v13769_v26  ;;  %v13792_v63 = vld [vmem:[#allocation6 + $0x24] ss:$16 sps:$4 sm:$0xff]   ;;  %v13795_v26 = vld [vmem:[#allocation6 + $0x2c] ss:$16 sps:$4 sm:$0xff]  }
 0x937   :  { %9104 = vmatprep.subr.bf16.mxu0 %v13774_v31  ;;  %9145 = vmatprep.subr.bf16.mxu1 %v13777_v8  ;;  %v13790_v31 = vld [vmem:[#allocation6 + $0x20] ss:$16 sps:$4 sm:$0xff]   ;;  %v13793_v8 = vld [vmem:[#allocation6 + $0x28] ss:$16 sps:$4 sm:$0xff]  }
 0x93a   :  { %9105 = vmatpush1.bf16.msra.mxu0 %v13772_v0  ;;  %9146 = vmatpush1.bf16.msra.mxu1 %v13775_v44  ;;  %v13798_v0 = vld [vmem:[#allocation6 + $0x44] ss:$16 sps:$4 sm:$0xff]   ;;  %v13801_v44 = vld [vmem:[#allocation6 + $0x4c] ss:$16 sps:$4 sm:$0xff]  }
 0x93b   :  { %9106 = vmatprep.subr.bf16.mxu0 %v13780_v12  ;;  %9147 = vmatprep.subr.bf16.mxu1 %v13783_v45  ;;  %v13796_v12 = vld [vmem:[#allocation6 + $0x40] ss:$16 sps:$4 sm:$0xff]   ;;  %v13799_v45 = vld [vmem:[#allocation6 + $0x48] ss:$16 sps:$4 sm:$0xff]  }
 0x93e   :  { %9107 = vmatpush1.bf16.msra.mxu0 %v13778_v56  ;;  %9148 = vmatpush1.bf16.msra.mxu1 %v13781_v36  ;;  %v13804_v56 = vld [vmem:[#allocation6 + $0x64] ss:$16 sps:$4 sm:$0xff]   ;;  %v13802_v36 = vld [vmem:[#allocation6 + $0x60] ss:$16 sps:$4 sm:$0xff]  }
 0x93f   :  { %9374 = vmatprep.subr.bf16.mxu0 %v13786_v29  ;;  %9415 = vmatprep.subr.bf16.mxu1 %v13789_v32  ;;  %v13805_v29 = vld [vmem:[#allocation6 + $0x68] ss:$16 sps:$4 sm:$0xff]   ;;  %v13810_v32 = vld [vmem:[#allocation6 + $0x84] ss:$16 sps:$4 sm:$0xff]  }
 0x941   :  { %9125 = vmatmul.mubr.bf16.vlgmr.msra.gmra.mrb[120].mxu0 %v16604_v38  ;;  %9166 = vmatmul.mubr.bf16.vlgmr.msra.gmra.mrb[120].mxu1 %v16604_v38  ;;  %v13807_v38 = vld [vmem:[#allocation6 + $0x6c] ss:$16 sps:$4 sm:$0xff]  }
 0x942   :  { %9375 = vmatpush1.bf16.msra.mxu0 %v13784_v17  ;;  %9416 = vmatpush1.bf16.msra.mxu1 %v13787_v24  ;;  %v13813_v17 = vld [vmem:[#allocation6 + $0x8c] ss:$16 sps:$4 sm:$0xff]   ;;  %v13808_v24 = vld [vmem:[#allocation6 + $0x80] ss:$16 sps:$4 sm:$0xff]  }
 0x943   :  { %9376 = vmatprep.subr.bf16.mxu0 %v13792_v63  ;;  %9417 = vmatprep.subr.bf16.mxu1 %v13795_v26  ;;  %v13811_v63 = vld [vmem:[#allocation6 + $0x88] ss:$16 sps:$4 sm:$0xff]   ;;  %v13816_v26 = vld [vmem:[#allocation6 + $0xa4] ss:$16 sps:$4 sm:$0xff]  }
 0x944   :  { %9406 = vmatprep.mubr.bf16.mxu0 %v17512_v6  ;;  %9447 = vmatprep.mubr.bf16.mxu1 %v17512_v6 }
 0x946   :  { %9377 = vmatpush1.bf16.msra.mxu0 %v13790_v31  ;;  %9418 = vmatpush1.bf16.msra.mxu1 %v13793_v8  ;;  %v13819_v31 = vld [vmem:[#allocation6 + $0xac] ss:$16 sps:$4 sm:$0xff]   ;;  %v13814_v8 = vld [vmem:[#allocation6 + $0xa0] ss:$16 sps:$4 sm:$0xff]  }
 0x947   :  { %9378 = vmatprep.subr.bf16.mxu0 %v13798_v0  ;;  %9419 = vmatprep.subr.bf16.mxu1 %v13801_v44  ;;  %v13817_v0 = vld [vmem:[#allocation6 + $0xa8] ss:$16 sps:$4 sm:$0xff]   ;;  %v13822_v44 = vld [vmem:[#allocation6 + $0xc4] ss:$16 sps:$4 sm:$0xff]  }
 0x94a   :  { %9379 = vmatpush1.bf16.msra.mxu0 %v13796_v12  ;;  %9420 = vmatpush1.bf16.msra.mxu1 %v13799_v45  ;;  %v13825_v12 = vld [vmem:[#allocation6 + $0xcc] ss:$16 sps:$4 sm:$0xff]   ;;  %v13820_v45 = vld [vmem:[#allocation6 + $0xc0] ss:$16 sps:$4 sm:$0xff]  }
 0x94b   :  { %9380 = vmatprep.subr.bf16.mxu0 %v13804_v56  ;;  %9421 = vmatprep.subr.bf16.mxu1 %v13807_v38  ;;  %v13823_v56 = vld [vmem:[#allocation6 + $0xc8] ss:$16 sps:$4 sm:$0xff]   ;;  %v13828_v38 = vld [vmem:[#allocation6 + $0xe4] ss:$16 sps:$4 sm:$0xff]  }
 0x94e   :  { %9381 = vmatpush1.bf16.msra.mxu0 %v13802_v36  ;;  %9422 = vmatpush1.bf16.msra.mxu1 %v13805_v29  ;;  %v13831_v36 = vld [vmem:[#allocation6 + $0xec] ss:$16 sps:$4 sm:$0xff]   ;;  %v13826_v29 = vld [vmem:[#allocation6 + $0xe0] ss:$16 sps:$4 sm:$0xff]  }
 0x94f   :  { %9382 = vmatprep.subr.bf16.mxu0 %v13810_v32  ;;  %9423 = vmatprep.subr.bf16.mxu1 %v13813_v17  ;;  %v13829_v32 = vld [vmem:[#allocation6 + $0xe8] ss:$16 sps:$4 sm:$0xff]   ;;  %v17966_v17 = vld [vmem:[#allocation45_spill] sm:$0xff] }
 0x952   :  { %9383 = vmatpush1.bf16.msra.mxu0 %v13808_v24  ;;  %9424 = vmatpush1.bf16.msra.mxu1 %v13811_v63 }
 0x953   :  { %9384 = vmatprep.subr.bf16.mxu0 %v13816_v26  ;;  %9425 = vmatprep.subr.bf16.mxu1 %v13819_v31 }
 0x956   :  { %9385 = vmatpush1.bf16.msra.mxu0 %v13814_v8  ;;  %9426 = vmatpush1.bf16.msra.mxu1 %v13817_v0  ;;  %v17967_v8 = vld [vmem:[#allocation44_spill] sm:$0xff] }
 0x957   :  { %9386 = vmatprep.subr.bf16.mxu0 %v13822_v44  ;;  %9427 = vmatprep.subr.bf16.mxu1 %v13825_v12  ;;  %v17968_v44 = vld [vmem:[#allocation47_spill] sm:$0xff] }
 0x95a   :  { %9387 = vmatpush1.bf16.msra.mxu0 %v13820_v45  ;;  %9428 = vmatpush1.bf16.msra.mxu1 %v13823_v56 }
 0x95b   :  { %9388 = vmatprep.subr.bf16.mxu0 %v13828_v38  ;;  %9429 = vmatprep.subr.bf16.mxu1 %v13831_v36 }
 0x95e   :  { %9389 = vmatpush1.bf16.msra.mxu0 %v13826_v29  ;;  %9430 = vmatpush1.bf16.msra.mxu1 %v13829_v32 }
 0x95f   :  { %9694 = vmatprep.subr.bf16.mxu0 %v16486_v5  ;;  %9735 = vmatprep.subr.bf16.mxu1 %v16488_v37 }
 0x961   :  { %9407 = vmatmul.mubr.bf16.vlgmr.msra.gmra.mrb[124].mxu0 %v16700_v10  ;;  %9448 = vmatmul.mubr.bf16.vlgmr.msra.gmra.mrb[124].mxu1 %v16700_v10 }
 0x962   :  { %9695 = vmatpush1.bf16.msra.mxu0 %v16490_v41  ;;  %9736 = vmatpush1.bf16.msra.mxu1 %v16492_v55  ;;  %v17961_v41 = vld [vmem:[#allocation38_spill] sm:$0xff] }
 0x963   :  { %9696 = vmatprep.subr.bf16.mxu0 %v16498_v50  ;;  %9737 = vmatprep.subr.bf16.mxu1 %v16500_v57  ;;  %v17962_v50 = vld [vmem:[#allocation41_spill] sm:$0xff] }
 0x964   :  { %9726 = vmatprep.mubr.bf16.mxu0 %v17512_v6  ;;  %9767 = vmatprep.mubr.bf16.mxu1 %v17512_v6 }
 0x966   :  { %9697 = vmatpush1.bf16.msra.mxu0 %v16502_v39  ;;  %9738 = vmatpush1.bf16.msra.mxu1 %v16504_v13 }
 0x967   :  { %9698 = vmatprep.subr.bf16.mxu0 %v16510_v20  ;;  %9739 = vmatprep.subr.bf16.mxu1 %v16512_v3  ;;  %v17963_v20 = vld [vmem:[#allocation40_spill] sm:$0xff] }
 0x96a   :  { %9699 = vmatpush1.bf16.msra.mxu0 %v16514_v54  ;;  %9740 = vmatpush1.bf16.msra.mxu1 %v16516_v59  ;;  %v17964_v54 = vld [vmem:[#allocation42_spill] sm:$0xff] }
 0x96b   :  { %9700 = vmatprep.subr.bf16.mxu0 %v16522_v40  ;;  %9741 = vmatprep.subr.bf16.mxu1 %v16524_v33 }
 0x96e   :  { %9701 = vmatpush1.bf16.msra.mxu0 %v16526_v1  ;;  %9742 = vmatpush1.bf16.msra.mxu1 %v16528_v49 }
 0x96f   :  { %9702 = vmatprep.subr.bf16.mxu0 %v16534_v58  ;;  %9743 = vmatprep.subr.bf16.mxu1 %v16536_v9 }
 0x972   :  { %9703 = vmatpush1.bf16.msra.mxu0 %v16538_v21  ;;  %9744 = vmatpush1.bf16.msra.mxu1 %v16540_v62 }
 0x973   :  { %9704 = vmatprep.subr.bf16.mxu0 %v16546_v52  ;;  %9745 = vmatprep.subr.bf16.mxu1 %v16548_v53 }
 0x976   :  { %9705 = vmatpush1.bf16.msra.mxu0 %v16550_v22  ;;  %9746 = vmatpush1.bf16.msra.mxu1 %v16552_v25 }
 0x977   :  { %9706 = vmatprep.subr.bf16.mxu0 %v16558_v4  ;;  %9747 = vmatprep.subr.bf16.mxu1 %v16560_v11 }
 0x97a   :  { %9707 = vmatpush1.bf16.msra.mxu0 %v16562_v60  ;;  %9748 = vmatpush1.bf16.msra.mxu1 %v16564_v43 }
 0x97b   :  { %9708 = vmatprep.subr.bf16.mxu0 %v16570_v19  ;;  %9749 = vmatprep.subr.bf16.mxu1 %v16572_v61 }
 0x97e   :  { %9709 = vmatpush1.bf16.msra.mxu0 %v16574_v35  ;;  %9750 = vmatpush1.bf16.msra.mxu1 %v16576_v48 }
 0x97f   :  { %9980 = vmatprep.subr.bf16.mxu0 %v16582_v46  ;;  %10021 = vmatprep.subr.bf16.mxu1 %v16584_v16  ;;  %v17965_v16 = vld [vmem:[#allocation43_spill] sm:$0xff] }
 0xa14   :  { %v9126_v5 = vpop.f32.mrb[120].mxu0  ;;  %v9167_v37 = vpop.f32.mrb[120].mxu1 }
 0xa15   :  { %v9174_v55 = vadd.f32 %v9126_v5, %v17961_v41  ;;  %v9176_v57 = vadd.f32 %v9167_v37, %v17962_v50  ;;  %v9128_v39 = vpop.f32.mrb[121].mxu0  ;;  %v9169_v13 = vpop.f32.mrb[121].mxu1 }
 0xa16   :  { %v9175_v3 = vadd.f32 %v9128_v39, %v17963_v20  ;;  %v9177_v59 = vadd.f32 %v9169_v13, %v17964_v54  ;;  %v9130_v40 = vpop.f32.mrb[122].mxu0  ;;  %v9171_v33 = vpop.f32.mrb[122].mxu1  ;;  %v17971_v39 = vld [vmem:[#allocation23_spill] sm:$0xff]  ;;  %v17972_v13 = vld [vmem:[#allocation62_spill] sm:$0xff]  ;;  %v17973_v20 = vld [vmem:[#allocation65_spill] sm:$0xff] }
 0xa17   :  { %v9460_v1 = vmul.f32 0.5, %v9174_v55  ;;  %v9131_v49 = vpop.f32.mrb[123].mxu0  ;;  %v9172_v58 = vpop.f32.mrb[123].mxu1  ;;  %v17979_v40 = vld [vmem:[#allocation28_spill] sm:$0xff] }
 0xa18   :  { %v9464_v9 = vmul.f32 0.5, %v9175_v3  ;;  %v9469_v21 = vmul.f32 0.5, %v9177_v59  ;;  %v17977_v3 = vld [vmem:[#allocation127_spill] sm:$0xff]  ;;  %v17978_v59 = vld [vmem:[#allocation29_spill] sm:$0xff]  ;;  %v17981_v49 = vld [vmem:[#allocation54_spill] sm:$0xff] }
 0xa19   :  { %14116 = vtanh.f32 %v9460_v1  ;;  %v17980_v1 = vld [vmem:[#allocation31_spill] sm:$0xff]  ;;  %v17982_v58 = vld [vmem:[#allocation57_spill] sm:$0xff] }
 0xa1a   :  { %14118 = vtanh.f32 %v9464_v9  ;;  %v17983_v9 = vld [vmem:[#allocation56_spill] sm:$0xff] }
 0xa1b   :  { %14120 = vtanh.f32 %v9176_v57 }
 0xa1c   :  { %14122 = vtanh.f32 %v9469_v21 }
 0xa23   :  { %v14117_v62 = vpop.eup %14116 }
 0xa24   :  { %v14119_v52 = vpop.eup %14118  ;;  %v9462_v53 = vadd.f32 1.0, %v14117_v62  ;;  %v17984_v62 = vld [vmem:[#allocation58_spill] sm:$0xff] }
 0xa25   :  { %v9466_v22 = vadd.f32 1.0, %v14119_v52  ;;  %v14121_v4 = vpop.eup %14120  ;;  %v17985_v52 = vld [vmem:[#allocation30_spill] sm:$0xff] }
 0xa26   :  { %v9463_v25 = vmul.f32 0.5, %v9462_v53  ;;  %v14123_v61 = vpop.eup %14122  ;;  %v16792_v53 = vld [vmem:[#allocation11 + $0x4] ss:$16 sps:$4 sm:$0xff]  }
 0xa27   :  { %v9467_v11 = vmul.f32 0.5, %v9466_v22  ;;  %v9471_v35 = vadd.f32 1.0, %v14123_v61  ;;  %v16794_v22 = vld [vmem:[#allocation11 + $0xc] ss:$16 sps:$4 sm:$0xff]  }
 0xa28   :  { %v9474_v60 = vmul.f32 %v14121_v4, %v9463_v25 }
 0xa29   :  { %v9473_v43 = vmul.f32 %v9467_v11, %v16593_v27  ;;  %v9472_v31 = vmul.f32 0.5, %v9471_v35  ;;  %v17986_v11 = vld [vmem:[#allocation33_spill] sm:$0xff] }
 0xa2a   :  { %v16804_v35 = vld [vmem:[#allocation11 + $0x24] ss:$16 sps:$4 sm:$0xff]  }
 0xa2b   :  { %v9475_v19 = vadd.f32 %v9474_v60, %v9473_v43  ;;  %v17987_v60 = vld [vmem:[#allocation32_spill] sm:$0xff]  ;;  %v16798_v43 = vld [vmem:[#allocation11] ss:$16 sps:$4 sm:$0xff]  }
 0xa2d   :  { %14124 = vtanh.f32 %v9475_v19  ;;  %v16800_v19 = vld [vmem:[#allocation11 + $0x8] ss:$16 sps:$4 sm:$0xff]  }
 0xa34   :  { %v9408_v48 = vpop.f32.mrb[124].mxu0  ;;  %v9449_v46 = vpop.f32.mrb[124].mxu1 }
 0xa35   :  { %v9456_v10 = vadd.f32 %v9408_v48, %v17965_v16  ;;  %v9458_v24 = vadd.f32 %v9449_v46, %v17966_v17  ;;  %v9410_v63 = vpop.f32.mrb[125].mxu0  ;;  %v9451_v26 = vpop.f32.mrb[125].mxu1  ;;  %v16806_v48 = vld [vmem:[#allocation11 + $0x2c] ss:$16 sps:$4 sm:$0xff]   ;;  %v16810_v46 = vld [vmem:[#allocation11 + $0x20] ss:$16 sps:$4 sm:$0xff]  }
 0xa36   :  { %v9457_v0 = vadd.f32 %v9410_v63, %v17967_v8  ;;  %v9459_v12 = vadd.f32 %v9451_v26, %v17968_v44  ;;  %v9412_v45 = vpop.f32.mrb[126].mxu0  ;;  %v9453_v56 = vpop.f32.mrb[126].mxu1  ;;  %v16812_v16 = vld [vmem:[#allocation11 + $0x28] ss:$16 sps:$4 sm:$0xff]   ;;  %v16818_v17 = vld [vmem:[#allocation11 + $0x4c] ss:$16 sps:$4 sm:$0xff]  }
 0xa37   :  { %v14125_v27 = vpop.eup %14124  ;;  %v9478_v38 = vmul.f32 0.5, %v9456_v10  ;;  %v9413_v36 = vpop.f32.mrb[127].mxu0  ;;  %v16816_v10 = vld [vmem:[#allocation11 + $0x44] ss:$16 sps:$4 sm:$0xff]   ;;  %v16826_v63 = vld [vmem:[#allocation11 + $0x48] ss:$16 sps:$4 sm:$0xff]  }
 0xa38   :  { %v9454_v29 = vpop.f32.mrb[127].mxu1  ;;  %v9477_v32 = vmul.f32 %v14125_v27, %v9472_v31  ;;  %v9482_v5 = vmul.f32 0.5, %v9457_v0  ;;  %v9487_v41 = vmul.f32 0.5, %v9459_v12  ;;  %v16830_v26 = vld [vmem:[#allocation11 + $0x64] ss:$16 sps:$4 sm:$0xff]  }
 0xa39   :  { %14126 = vtanh.f32 %v9478_v38  ;;  %v16832_v31 = vld [vmem:[#allocation11 + $0x6c] ss:$16 sps:$4 sm:$0xff]   ;;  %v16836_v8 = vld [vmem:[#allocation11 + $0x60] ss:$16 sps:$4 sm:$0xff]   ;;  %v16838_v0 = vld [vmem:[#allocation11 + $0x68] ss:$16 sps:$4 sm:$0xff]  }
 0xa3a   :  { %v16757_v37 = vpack.c.bf16 %v9477_v32, %v9477_v32  ;;  %14128 = vtanh.f32 %v9482_v5  ;;  %v16842_v44 = vld [vmem:[#allocation11 + $0x84] ss:$16 sps:$4 sm:$0xff]   ;;  %v16844_v12 = vld [vmem:[#allocation11 + $0x8c] ss:$16 sps:$4 sm:$0xff]   ;;  %v16848_v45 = vld [vmem:[#allocation11 + $0x80] ss:$16 sps:$4 sm:$0xff]  }
 0xa3b   :  { %14130 = vtanh.f32 %v9458_v24  ;;  %v16824_v24 = vld [vmem:[#allocation11 + $0x40] ss:$16 sps:$4 sm:$0xff]   ;;  %v16850_v56 = vld [vmem:[#allocation11 + $0x88] ss:$16 sps:$4 sm:$0xff]   ;;  %v16854_v27 = vld [vmem:[#allocation11 + $0xa4] ss:$16 sps:$4 sm:$0xff]  }
 0xa3c   :  { %9727 = vmatmul.mubr.bf16.vlgmr.msra.gmra.mrb[44].mxu0 %v16757_v37  ;;  %9768 = vmatmul.mubr.bf16.vlgmr.msra.gmra.mrb[44].mxu1 %v16757_v37  ;;  %14132 = vtanh.f32 %v9487_v41  ;;  %v16856_v38 = vld [vmem:[#allocation11 + $0xac] ss:$16 sps:$4 sm:$0xff]   ;;  %v16860_v36 = vld [vmem:[#allocation11 + $0xa0] ss:$16 sps:$4 sm:$0xff]   ;;  %v16862_v29 = vld [vmem:[#allocation11 + $0xa8] ss:$16 sps:$4 sm:$0xff]  }
 0xa3d   :  { %9981 = vmatpush1.bf16.msra.mxu0 %v16600_v47  ;;  %10022 = vmatpush1.bf16.msra.mxu1 %v16602_v2  ;;  %v16866_v32 = vld [vmem:[#allocation11 + $0xc4] ss:$16 sps:$4 sm:$0xff]   ;;  %v16868_v5 = vld [vmem:[#allocation11 + $0xcc] ss:$16 sps:$4 sm:$0xff]   ;;  %v16872_v41 = vld [vmem:[#allocation11 + $0xc0] ss:$16 sps:$4 sm:$0xff]  }
 0xa3e   :  { %9982 = vmatprep.subr.bf16.mxu0 %v16606_v23  ;;  %10023 = vmatprep.subr.bf16.mxu1 %v16608_v30 }
 0xa3f   :  { %10012 = vmatprep.mubr.bf16.mxu0 %v17512_v6  ;;  %10053 = vmatprep.mubr.bf16.mxu1 %v17512_v6 }
 0xa41   :  { %9983 = vmatpush1.bf16.msra.mxu0 %v16614_v51  ;;  %10024 = vmatpush1.bf16.msra.mxu1 %v16616_v15 }
 0xa42   :  { %9984 = vmatprep.subr.bf16.mxu0 %v16620_v28  ;;  %10025 = vmatprep.subr.bf16.mxu1 %v16622_v14  ;;  %v17969_v28 = vld [vmem:[#allocation27_spill] sm:$0xff]  ;;  %v17970_v14 = vld [vmem:[#allocation20_spill] sm:$0xff] }
 0xa43   :  { %v14127_v47 = vpop.eup %14126 }
 0xa44   :  { %v14129_v55 = vpop.eup %14128  ;;  %v9480_v2 = vadd.f32 1.0, %v14127_v47  ;;  %v16874_v47 = vld [vmem:[#allocation11 + $0xc8] ss:$16 sps:$4 sm:$0xff]  }
 0xa45   :  { %v9484_v50 = vadd.f32 1.0, %v14129_v55  ;;  %9985 = vmatpush1.bf16.msra.mxu0 %v16628_v34  ;;  %10026 = vmatpush1.bf16.msra.mxu1 %v16630_v18  ;;  %v14131_v30 = vpop.eup %14130  ;;  %v17974_v18 = vld [vmem:[#allocation64_spill] sm:$0xff]  ;;  %v16878_v55 = vld [vmem:[#allocation11 + $0xe4] ss:$16 sps:$4 sm:$0xff]  }
 0xa46   :  { %v9481_v23 = vmul.f32 0.5, %v9480_v2  ;;  %9986 = vmatprep.subr.bf16.mxu0 %v16634_v7  ;;  %10027 = vmatprep.subr.bf16.mxu1 %v16636_v42  ;;  %v17975_v7 = vld [vmem:[#allocation66_spill] sm:$0xff]  ;;  %v14133_v54 = vpop.eup %14132 }
 0xa47   :  { %v9485_v51 = vmul.f32 0.5, %v9484_v50  ;;  %v17976_v42 = vld [vmem:[#allocation126_spill] sm:$0xff]  ;;  %v9489_v33 = vadd.f32 1.0, %v14133_v54  ;;  %v16884_v50 = vld [vmem:[#allocation11 + $0xe0] ss:$16 sps:$4 sm:$0xff]  }
 0xa48   :  { %v9492_v15 = vmul.f32 %v14131_v30, %v9481_v23  ;;  %v16880_v2 = vld [vmem:[#allocation11 + $0xec] ss:$16 sps:$4 sm:$0xff]   ;;  %v16886_v23 = vld [vmem:[#allocation11 + $0xe8] ss:$16 sps:$4 sm:$0xff]   ;;  %v624_v30 = vld [vmem:[%s17232_s8] sm:$0xf] }
 0xa49   :  { %v9491_v57 = vmul.f32 %v9485_v51, %v17969_v28  ;;  %9987 = vmatpush1.bf16.msra.mxu0 %v17970_v14  ;;  %10028 = vmatpush1.bf16.msra.mxu1 %v17971_v39  ;;  %v9490_v21 = vmul.f32 0.5, %v9489_v33  ;;  %v17988_v51 = vld [vmem:[#allocation17_spill] sm:$0xff]  ;;  %v17989_v28 = vld [vmem:[#allocation15_spill] sm:$0xff] }
 0xa4a   :  { %9988 = vmatprep.subr.bf16.mxu0 %v17972_v13  ;;  %10029 = vmatprep.subr.bf16.mxu1 %v17973_v20 }
 0xa4b   :  { %v9493_v34 = vadd.f32 %v9492_v15, %v9491_v57  ;;  %v16934_v15 = vrot.slane %v624_v30, %v17988_v51  ;;  %v17990_v57 = vsub.s32 1, %v17989_v28 }
 0xa4d   :  { %14134 = vtanh.f32 %v9493_v34  ;;  %9989 = vmatpush1.bf16.msra.mxu0 %v17974_v18  ;;  %10030 = vmatpush1.bf16.msra.mxu1 %v17975_v7  ;;  %v16938_v14 = vrot.slane %v624_v30, %v17990_v57  ;;  %v17991_v34 = vld [vmem:[#allocation16_spill] sm:$0xff] }
 0xa4e   :  { %9990 = vmatprep.subr.bf16.mxu0 %v17976_v42  ;;  %10031 = vmatprep.subr.bf16.mxu1 %v17977_v3  ;;  %v16942_v18 = vrot.slane %v624_v30, %v17991_v34 }
 0xa51   :  { %9991 = vmatpush1.bf16.msra.mxu0 %v17978_v59  ;;  %10032 = vmatpush1.bf16.msra.mxu1 %v17979_v40 }
 0xa52   :  { %9992 = vmatprep.subr.bf16.mxu0 %v17980_v1  ;;  %10033 = vmatprep.subr.bf16.mxu1 %v17981_v49 }
 0xa55   :  { %9993 = vmatpush1.bf16.msra.mxu0 %v17982_v58  ;;  %10034 = vmatpush1.bf16.msra.mxu1 %v17983_v9  ;;  %v17992_v9 = vld [vmem:[#allocation18_spill] sm:$0xff] }
 0xa56   :  { %9994 = vmatprep.subr.bf16.mxu0 %v17984_v62  ;;  %10035 = vmatprep.subr.bf16.mxu1 %v17985_v52 }
 0xa57   :  { %v14135_v25 = vpop.eup %14134 }
 0xa58   :  { %v9495_v4 = vmul.f32 %v14135_v25, %v9490_v21  ;;  %v16947_v21 = vrot.slane %v624_v30, %v17992_v9 }
 0xa59   :  { %9995 = vmatpush1.bf16.msra.mxu0 %v17986_v11  ;;  %10036 = vmatpush1.bf16.msra.mxu1 %v17987_v60 }
 0xa5a   :  { %v9497_v61 = vpack.c.bf16 %v9495_v4, %v9495_v4  ;;  %10266 = vmatprep.subr.bf16.mxu0 %v16792_v53  ;;  %10307 = vmatprep.subr.bf16.mxu1 %v16794_v22 }
 0xa5c   :  { %10013 = vmatmul.mubr.bf16.vlgmr.msra.gmra.mrb[40].mxu0 %v9497_v61  ;;  %10054 = vmatmul.mubr.bf16.vlgmr.msra.gmra.mrb[40].mxu1 %v9497_v61 }
 0xa5d   :  { %10267 = vmatpush1.bf16.msra.mxu0 %v16798_v43  ;;  %10308 = vmatpush1.bf16.msra.mxu1 %v16800_v19 }
 0xa5e   :  { %10268 = vmatprep.subr.bf16.mxu0 %v16804_v35  ;;  %10309 = vmatprep.subr.bf16.mxu1 %v16806_v48 }
 0xa5f   :  { %10298 = vmatprep.mubr.bf16.mxu0 %v17512_v6  ;;  %10339 = vmatprep.mubr.bf16.mxu1 %v17512_v6 }
 0xa61   :  { %10269 = vmatpush1.bf16.msra.mxu0 %v16810_v46  ;;  %10310 = vmatpush1.bf16.msra.mxu1 %v16812_v16 }
 0xa62   :  { %10270 = vmatprep.subr.bf16.mxu0 %v16816_v10  ;;  %10311 = vmatprep.subr.bf16.mxu1 %v16818_v17 }
 0xa65   :  { %10271 = vmatpush1.bf16.msra.mxu0 %v16824_v24  ;;  %10312 = vmatpush1.bf16.msra.mxu1 %v16826_v63 }
 0xa66   :  { %10272 = vmatprep.subr.bf16.mxu0 %v16830_v26  ;;  %10313 = vmatprep.subr.bf16.mxu1 %v16832_v31 }
 0xa69   :  { %10273 = vmatpush1.bf16.msra.mxu0 %v16836_v8  ;;  %10314 = vmatpush1.bf16.msra.mxu1 %v16838_v0 }
 0xa6a   :  { %10274 = vmatprep.subr.bf16.mxu0 %v16842_v44  ;;  %10315 = vmatprep.subr.bf16.mxu1 %v16844_v12 }
 0xa6d   :  { %10275 = vmatpush1.bf16.msra.mxu0 %v16848_v45  ;;  %10316 = vmatpush1.bf16.msra.mxu1 %v16850_v56 }
 0xa6e   :  { %10276 = vmatprep.subr.bf16.mxu0 %v16854_v27  ;;  %10317 = vmatprep.subr.bf16.mxu1 %v16856_v38 }
 0xa71   :  { %10277 = vmatpush1.bf16.msra.mxu0 %v16860_v36  ;;  %10318 = vmatpush1.bf16.msra.mxu1 %v16862_v29 }
 0xa72   :  { %10278 = vmatprep.subr.bf16.mxu0 %v16866_v32  ;;  %10319 = vmatprep.subr.bf16.mxu1 %v16868_v5 }
 0xa75   :  { %10279 = vmatpush1.bf16.msra.mxu0 %v16872_v41  ;;  %10320 = vmatpush1.bf16.msra.mxu1 %v16874_v47 }
 0xa76   :  { %10280 = vmatprep.subr.bf16.mxu0 %v16878_v55  ;;  %10321 = vmatprep.subr.bf16.mxu1 %v16880_v2 }
 0xa79   :  { %10281 = vmatpush1.bf16.msra.mxu0 %v16884_v50  ;;  %10322 = vmatpush1.bf16.msra.mxu1 %v16886_v23 }
 0xa7a   :  { %10375 = vmatprep.subr.bf16.mxu0 %v16792_v53  ;;  %10416 = vmatprep.subr.bf16.mxu1 %v16794_v22 }
 0xa7c   :  { %10299 = vmatmul.mubr.bf16.vlgmr.msra.gmra.mrb[40].mxu0 %v17512_v6  ;;  %10340 = vmatmul.mubr.bf16.vlgmr.msra.gmra.mrb[40].mxu1 %v17512_v6 }
 0xa7d   :  { %10376 = vmatpush1.bf16.msra.mxu0 %v16798_v43  ;;  %10417 = vmatpush1.bf16.msra.mxu1 %v16800_v19 }
 0xa7e   :  { %10377 = vmatprep.subr.bf16.mxu0 %v16804_v35  ;;  %10418 = vmatprep.subr.bf16.mxu1 %v16806_v48 }
 0xa7f   :  { %10407 = vmatprep.mubr.bf16.mxu0 %v17512_v6  ;;  %10448 = vmatprep.mubr.bf16.mxu1 %v17512_v6 }
 0xa81   :  { %10378 = vmatpush1.bf16.msra.mxu0 %v16810_v46  ;;  %10419 = vmatpush1.bf16.msra.mxu1 %v16812_v16 }
 0xa82   :  { %10379 = vmatprep.subr.bf16.mxu0 %v16816_v10  ;;  %10420 = vmatprep.subr.bf16.mxu1 %v16818_v17 }
 0xa85   :  { %10380 = vmatpush1.bf16.msra.mxu0 %v16824_v24  ;;  %10421 = vmatpush1.bf16.msra.mxu1 %v16826_v63 }
 0xa86   :  { %10381 = vmatprep.subr.bf16.mxu0 %v16830_v26  ;;  %10422 = vmatprep.subr.bf16.mxu1 %v16832_v31 }
 0xa89   :  { %10382 = vmatpush1.bf16.msra.mxu0 %v16836_v8  ;;  %10423 = vmatpush1.bf16.msra.mxu1 %v16838_v0 }
 0xa8a   :  { %10383 = vmatprep.subr.bf16.mxu0 %v16842_v44  ;;  %10424 = vmatprep.subr.bf16.mxu1 %v16844_v12 }
 0xa8d   :  { %10384 = vmatpush1.bf16.msra.mxu0 %v16848_v45  ;;  %10425 = vmatpush1.bf16.msra.mxu1 %v16850_v56 }
 0xa8e   :  { %10385 = vmatprep.subr.bf16.mxu0 %v16854_v27  ;;  %10426 = vmatprep.subr.bf16.mxu1 %v16856_v38 }
 0xa91   :  { %10386 = vmatpush1.bf16.msra.mxu0 %v16860_v36  ;;  %10427 = vmatpush1.bf16.msra.mxu1 %v16862_v29 }
 0xa92   :  { %10387 = vmatprep.subr.bf16.mxu0 %v16866_v32  ;;  %10428 = vmatprep.subr.bf16.mxu1 %v16868_v5 }
 0xa95   :  { %10388 = vmatpush1.bf16.msra.mxu0 %v16872_v41  ;;  %10429 = vmatpush1.bf16.msra.mxu1 %v16874_v47 }
 0xa96   :  { %10389 = vmatprep.subr.bf16.mxu0 %v16878_v55  ;;  %10430 = vmatprep.subr.bf16.mxu1 %v16880_v2 }
 0xa99   :  { %10390 = vmatpush1.bf16.msra.mxu0 %v16884_v50  ;;  %10431 = vmatpush1.bf16.msra.mxu1 %v16886_v23 }
 0xa9a   :  { %10484 = vmatprep.subr.bf16.mxu0 %v16792_v53  ;;  %10525 = vmatprep.subr.bf16.mxu1 %v16794_v22 }
 0xb4f   :  { %v10300_v39 = vpop.f32.mrb[40].mxu0  ;;  %v10341_v13 = vpop.f32.mrb[40].mxu1 }
 0xb50   :  { %v12792_v20 = vadd.f32 %v10300_v39, %v16934_v15  ;;  %v10302_v7 = vpop.f32.mrb[41].mxu0  ;;  %v10343_v42 = vpop.f32.mrb[41].mxu1  ;;  %v12794_v58 = vadd.f32 %v10341_v13, %v16942_v18 }
 0xb51   :  { %v12793_v3 = vadd.f32 %v10302_v7, %v16938_v14  ;;  %v10304_v54 = vpop.f32.mrb[42].mxu0  ;;  %v10345_v59 = vpop.f32.mrb[42].mxu1  ;;  %v12795_v62 = vadd.f32 %v10343_v42, %v16947_v21 }
 0xb52   :  { %v10352_v40 = vmul.f32 0.5, %v12792_v20  ;;  %v10305_v33 = vpop.f32.mrb[43].mxu0  ;;  %v10346_v1 = vpop.f32.mrb[43].mxu1 }
 0xb53   :  { %v10356_v49 = vmul.f32 0.5, %v12793_v3  ;;  %v10361_v52 = vmul.f32 0.5, %v12795_v62 }
 0xb54   :  { %14136 = vtanh.f32 %v10352_v40 }
 0xb55   :  { %14138 = vtanh.f32 %v10356_v49 }
 0xb56   :  { %14140 = vtanh.f32 %v12794_v58 }
 0xb57   :  { %14142 = vtanh.f32 %v10361_v52 }
 0xb5e   :  { %v14137_v25 = vpop.eup %14136 }
 0xb5f   :  { %v14139_v4 = vpop.eup %14138  ;;  %v10354_v11 = vadd.f32 1.0, %v14137_v25 }
 0xb60   :  { %v10358_v60 = vadd.f32 1.0, %v14139_v4  ;;  %v14141_v28 = vpop.eup %14140 }
 0xb61   :  { %v10355_v61 = vmul.f32 0.5, %v10354_v11  ;;  %v14143_v30 = vpop.eup %14142 }
 0xb62   :  { %v10359_v57 = vmul.f32 0.5, %v10358_v60  ;;  %v10363_v13 = vadd.f32 1.0, %v14143_v30 }
 0xb63   :  { %v10366_v39 = vmul.f32 %v14141_v28, %v10355_v61 }
 0xb64   :  { %v10365_v20 = vmul.f32 0.0, %v10359_v57  ;;  %v10364_v3 = vmul.f32 0.5, %v10363_v13 }
 0xb66   :  { %v16950_v7 = vadd.f32 %v10366_v39, %v10365_v20 }
 0xb68   :  { %14144 = vtanh.f32 %v16950_v7 }
 0xb72   :  { %v14145_v54 = vpop.eup %14144 }
 0xb73   :  { %v10369_v42 = vmul.f32 %v14145_v54, %v10364_v3 }
 0xb75   :  { %v10370_v59 = vpack.c.bf16 %v10369_v42, %v10369_v42 }
 0xb77   :  { %10408 = vmatmul.mubr.bf16.vlgmr.msra.gmra.mrb[56].mxu0 %v10370_v59  ;;  %10449 = vmatmul.mubr.bf16.vlgmr.msra.gmra.mrb[56].mxu1 %v10370_v59 }
 0xb78   :  { %10485 = vmatpush1.bf16.msra.mxu0 %v16798_v43  ;;  %10526 = vmatpush1.bf16.msra.mxu1 %v16800_v19 }
 0xb79   :  { %10486 = vmatprep.subr.bf16.mxu0 %v16804_v35  ;;  %10527 = vmatprep.subr.bf16.mxu1 %v16806_v48 }
 0xb7a   :  { %10516 = vmatprep.mubr.bf16.mxu0 %v17512_v6  ;;  %10557 = vmatprep.mubr.bf16.mxu1 %v17512_v6 }
 0xb7c   :  { %10487 = vmatpush1.bf16.msra.mxu0 %v16810_v46  ;;  %10528 = vmatpush1.bf16.msra.mxu1 %v16812_v16 }
 0xb7d   :  { %10488 = vmatprep.subr.bf16.mxu0 %v16816_v10  ;;  %10529 = vmatprep.subr.bf16.mxu1 %v16818_v17 }
 0xb80   :  { %10489 = vmatpush1.bf16.msra.mxu0 %v16824_v24  ;;  %10530 = vmatpush1.bf16.msra.mxu1 %v16826_v63 }
 0xb81   :  { %10490 = vmatprep.subr.bf16.mxu0 %v16830_v26  ;;  %10531 = vmatprep.subr.bf16.mxu1 %v16832_v31 }
 0xb84   :  { %10491 = vmatpush1.bf16.msra.mxu0 %v16836_v8  ;;  %10532 = vmatpush1.bf16.msra.mxu1 %v16838_v0 }
 0xb85   :  { %10492 = vmatprep.subr.bf16.mxu0 %v16842_v44  ;;  %10533 = vmatprep.subr.bf16.mxu1 %v16844_v12 }
 0xb88   :  { %10493 = vmatpush1.bf16.msra.mxu0 %v16848_v45  ;;  %10534 = vmatpush1.bf16.msra.mxu1 %v16850_v56 }
 0xb89   :  { %10494 = vmatprep.subr.bf16.mxu0 %v16854_v27  ;;  %10535 = vmatprep.subr.bf16.mxu1 %v16856_v38 }
 0xb8c   :  { %10495 = vmatpush1.bf16.msra.mxu0 %v16860_v36  ;;  %10536 = vmatpush1.bf16.msra.mxu1 %v16862_v29 }
 0xb8d   :  { %10496 = vmatprep.subr.bf16.mxu0 %v16866_v32  ;;  %10537 = vmatprep.subr.bf16.mxu1 %v16868_v5 }
 0xb90   :  { %10497 = vmatpush1.bf16.msra.mxu0 %v16872_v41  ;;  %10538 = vmatpush1.bf16.msra.mxu1 %v16874_v47 }
 0xb91   :  { %10498 = vmatprep.subr.bf16.mxu0 %v16878_v55  ;;  %10539 = vmatprep.subr.bf16.mxu1 %v16880_v2 }
 0xb94   :  { %10499 = vmatpush1.bf16.msra.mxu0 %v16884_v50  ;;  %10540 = vmatpush1.bf16.msra.mxu1 %v16886_v23 }
 0xb95   :  { %10593 = vmatprep.subr.bf16.mxu0 %v16792_v53  ;;  %10634 = vmatprep.subr.bf16.mxu1 %v16794_v22 }
 0xc4a   :  { %v10409_v40 = vpop.f32.mrb[56].mxu0  ;;  %v10450_v33 = vpop.f32.mrb[56].mxu1 }
 0xc4b   :  { %v12800_v1 = vadd.f32 %v10409_v40, %v16934_v15  ;;  %v10411_v49 = vpop.f32.mrb[57].mxu0  ;;  %v10452_v58 = vpop.f32.mrb[57].mxu1  ;;  %v12802_v28 = vadd.f32 %v10450_v33, %v16942_v18 }
 0xc4c   :  { %v12801_v62 = vadd.f32 %v10411_v49, %v16938_v14  ;;  %v10413_v52 = vpop.f32.mrb[58].mxu0  ;;  %v10454_v25 = vpop.f32.mrb[58].mxu1  ;;  %v12803_v57 = vadd.f32 %v10452_v58, %v16947_v21 }
 0xc4d   :  { %v10461_v4 = vmul.f32 0.5, %v12800_v1  ;;  %v10414_v11 = vpop.f32.mrb[59].mxu0  ;;  %v10455_v60 = vpop.f32.mrb[59].mxu1 }
 0xc4e   :  { %v10465_v61 = vmul.f32 0.5, %v12801_v62  ;;  %v10470_v39 = vmul.f32 0.5, %v12803_v57 }
 0xc4f   :  { %14146 = vtanh.f32 %v10461_v4 }
 0xc50   :  { %14148 = vtanh.f32 %v10465_v61 }
 0xc51   :  { %14150 = vtanh.f32 %v12802_v28 }
 0xc52   :  { %14152 = vtanh.f32 %v10470_v39 }
 0xc59   :  { %v14147_v20 = vpop.eup %14146 }
 0xc5a   :  { %v14149_v30 = vpop.eup %14148  ;;  %v10463_v13 = vadd.f32 1.0, %v14147_v20 }
 0xc5b   :  { %v10467_v3 = vadd.f32 1.0, %v14149_v30  ;;  %v14151_v42 = vpop.eup %14150 }
 0xc5c   :  { %v10464_v54 = vmul.f32 0.5, %v10463_v13  ;;  %v14153_v33 = vpop.eup %14152 }
 0xc5d   :  { %v10468_v59 = vmul.f32 0.5, %v10467_v3  ;;  %v10472_v62 = vadd.f32 1.0, %v14153_v33 }
 0xc5e   :  { %v10475_v40 = vmul.f32 %v14151_v42, %v10464_v54 }
 0xc5f   :  { %v10474_v1 = vmul.f32 %v10468_v59, %v16950_v7  ;;  %v10473_v52 = vmul.f32 0.5, %v10472_v62 }
 0xc61   :  { %v16992_v49 = vadd.f32 %v10475_v40, %v10474_v1 }
 0xc63   :  { %14154 = vtanh.f32 %v16992_v49 }
 0xc6d   :  { %v14155_v58 = vpop.eup %14154 }
 0xc6e   :  { %v10478_v25 = vmul.f32 %v14155_v58, %v10473_v52 }
 0xc70   :  { %v10479_v4 = vpack.c.bf16 %v10478_v25, %v10478_v25 }
 0xc72   :  { %10517 = vmatmul.mubr.bf16.vlgmr.msra.gmra.mrb[72].mxu0 %v10479_v4  ;;  %10558 = vmatmul.mubr.bf16.vlgmr.msra.gmra.mrb[72].mxu1 %v10479_v4 }
 0xc73   :  { %10594 = vmatpush1.bf16.msra.mxu0 %v16798_v43  ;;  %10635 = vmatpush1.bf16.msra.mxu1 %v16800_v19 }
 0xc74   :  { %10595 = vmatprep.subr.bf16.mxu0 %v16804_v35  ;;  %10636 = vmatprep.subr.bf16.mxu1 %v16806_v48 }
 0xc75   :  { %10625 = vmatprep.mubr.bf16.mxu0 %v17512_v6  ;;  %10666 = vmatprep.mubr.bf16.mxu1 %v17512_v6 }
 0xc77   :  { %10596 = vmatpush1.bf16.msra.mxu0 %v16810_v46  ;;  %10637 = vmatpush1.bf16.msra.mxu1 %v16812_v16 }
 0xc78   :  { %10597 = vmatprep.subr.bf16.mxu0 %v16816_v10  ;;  %10638 = vmatprep.subr.bf16.mxu1 %v16818_v17 }
 0xc7b   :  { %10598 = vmatpush1.bf16.msra.mxu0 %v16824_v24  ;;  %10639 = vmatpush1.bf16.msra.mxu1 %v16826_v63 }
 0xc7c   :  { %10599 = vmatprep.subr.bf16.mxu0 %v16830_v26  ;;  %10640 = vmatprep.subr.bf16.mxu1 %v16832_v31 }
 0xc7f   :  { %10600 = vmatpush1.bf16.msra.mxu0 %v16836_v8  ;;  %10641 = vmatpush1.bf16.msra.mxu1 %v16838_v0 }
 0xc80   :  { %10601 = vmatprep.subr.bf16.mxu0 %v16842_v44  ;;  %10642 = vmatprep.subr.bf16.mxu1 %v16844_v12 }
 0xc83   :  { %10602 = vmatpush1.bf16.msra.mxu0 %v16848_v45  ;;  %10643 = vmatpush1.bf16.msra.mxu1 %v16850_v56 }
 0xc84   :  { %10603 = vmatprep.subr.bf16.mxu0 %v16854_v27  ;;  %10644 = vmatprep.subr.bf16.mxu1 %v16856_v38 }
 0xc87   :  { %10604 = vmatpush1.bf16.msra.mxu0 %v16860_v36  ;;  %10645 = vmatpush1.bf16.msra.mxu1 %v16862_v29 }
 0xc88   :  { %10605 = vmatprep.subr.bf16.mxu0 %v16866_v32  ;;  %10646 = vmatprep.subr.bf16.mxu1 %v16868_v5 }
 0xc8b   :  { %10606 = vmatpush1.bf16.msra.mxu0 %v16872_v41  ;;  %10647 = vmatpush1.bf16.msra.mxu1 %v16874_v47 }
 0xc8c   :  { %10607 = vmatprep.subr.bf16.mxu0 %v16878_v55  ;;  %10648 = vmatprep.subr.bf16.mxu1 %v16880_v2 }
 0xc8f   :  { %10608 = vmatpush1.bf16.msra.mxu0 %v16884_v50  ;;  %10649 = vmatpush1.bf16.msra.mxu1 %v16886_v23 }
 0xc90   :  { %10702 = vmatprep.subr.bf16.mxu0 %v16792_v53  ;;  %10743 = vmatprep.subr.bf16.mxu1 %v16794_v22 }
 0xd45   :  { %v10518_v7 = vpop.f32.mrb[72].mxu0  ;;  %v10559_v11 = vpop.f32.mrb[72].mxu1 }
 0xd46   :  { %v12808_v60 = vadd.f32 %v10518_v7, %v16934_v15  ;;  %v10520_v61 = vpop.f32.mrb[73].mxu0  ;;  %v10561_v28 = vpop.f32.mrb[73].mxu1  ;;  %v12810_v42 = vadd.f32 %v10559_v11, %v16942_v18 }
 0xd47   :  { %v12809_v57 = vadd.f32 %v10520_v61, %v16938_v14  ;;  %v10522_v39 = vpop.f32.mrb[74].mxu0  ;;  %v10563_v20 = vpop.f32.mrb[74].mxu1  ;;  %v12811_v59 = vadd.f32 %v10561_v28, %v16947_v21 }
 0xd48   :  { %v10570_v30 = vmul.f32 0.5, %v12808_v60  ;;  %v10523_v13 = vpop.f32.mrb[75].mxu0  ;;  %v10564_v3 = vpop.f32.mrb[75].mxu1 }
 0xd49   :  { %v10574_v54 = vmul.f32 0.5, %v12809_v57  ;;  %v10579_v40 = vmul.f32 0.5, %v12811_v59 }
 0xd4a   :  { %14156 = vtanh.f32 %v10570_v30 }
 0xd4b   :  { %14158 = vtanh.f32 %v10574_v54 }
 0xd4c   :  { %14160 = vtanh.f32 %v12810_v42 }
 0xd4d   :  { %14162 = vtanh.f32 %v10579_v40 }
 0xd54   :  { %v14157_v1 = vpop.eup %14156 }
 0xd55   :  { %v14159_v33 = vpop.eup %14158  ;;  %v10572_v62 = vadd.f32 1.0, %v14157_v1 }
 0xd56   :  { %v10576_v52 = vadd.f32 1.0, %v14159_v33  ;;  %v14161_v25 = vpop.eup %14160 }
 0xd57   :  { %v10573_v58 = vmul.f32 0.5, %v10572_v62  ;;  %v14163_v11 = vpop.eup %14162 }
 0xd58   :  { %v10577_v4 = vmul.f32 0.5, %v10576_v52  ;;  %v10581_v57 = vadd.f32 1.0, %v14163_v11 }
 0xd59   :  { %v10584_v7 = vmul.f32 %v14161_v25, %v10573_v58 }
 0xd5a   :  { %v10583_v60 = vmul.f32 %v10577_v4, %v16992_v49  ;;  %v10582_v39 = vmul.f32 0.5, %v10581_v57 }
 0xd5c   :  { %v17034_v61 = vadd.f32 %v10584_v7, %v10583_v60 }
 0xd5e   :  { %14164 = vtanh.f32 %v17034_v61 }
 0xd68   :  { %v14165_v28 = vpop.eup %14164 }
 0xd69   :  { %v10587_v20 = vmul.f32 %v14165_v28, %v10582_v39 }
 0xd6b   :  { %v10588_v30 = vpack.c.bf16 %v10587_v20, %v10587_v20 }
 0xd6d   :  { %10626 = vmatmul.mubr.bf16.vlgmr.msra.gmra.mrb[88].mxu0 %v10588_v30  ;;  %10667 = vmatmul.mubr.bf16.vlgmr.msra.gmra.mrb[88].mxu1 %v10588_v30 }
 0xd6e   :  { %10703 = vmatpush1.bf16.msra.mxu0 %v16798_v43  ;;  %10744 = vmatpush1.bf16.msra.mxu1 %v16800_v19 }
 0xd6f   :  { %10704 = vmatprep.subr.bf16.mxu0 %v16804_v35  ;;  %10745 = vmatprep.subr.bf16.mxu1 %v16806_v48 }
 0xd70   :  { %10734 = vmatprep.mubr.bf16.mxu0 %v17512_v6  ;;  %10775 = vmatprep.mubr.bf16.mxu1 %v17512_v6 }
 0xd72   :  { %10705 = vmatpush1.bf16.msra.mxu0 %v16810_v46  ;;  %10746 = vmatpush1.bf16.msra.mxu1 %v16812_v16 }
 0xd73   :  { %10706 = vmatprep.subr.bf16.mxu0 %v16816_v10  ;;  %10747 = vmatprep.subr.bf16.mxu1 %v16818_v17 }
 0xd76   :  { %10707 = vmatpush1.bf16.msra.mxu0 %v16824_v24  ;;  %10748 = vmatpush1.bf16.msra.mxu1 %v16826_v63 }
 0xd77   :  { %10708 = vmatprep.subr.bf16.mxu0 %v16830_v26  ;;  %10749 = vmatprep.subr.bf16.mxu1 %v16832_v31 }
 0xd7a   :  { %10709 = vmatpush1.bf16.msra.mxu0 %v16836_v8  ;;  %10750 = vmatpush1.bf16.msra.mxu1 %v16838_v0 }
 0xd7b   :  { %10710 = vmatprep.subr.bf16.mxu0 %v16842_v44  ;;  %10751 = vmatprep.subr.bf16.mxu1 %v16844_v12 }
 0xd7e   :  { %10711 = vmatpush1.bf16.msra.mxu0 %v16848_v45  ;;  %10752 = vmatpush1.bf16.msra.mxu1 %v16850_v56 }
 0xd7f   :  { %10712 = vmatprep.subr.bf16.mxu0 %v16854_v27  ;;  %10753 = vmatprep.subr.bf16.mxu1 %v16856_v38 }
 0xd82   :  { %10713 = vmatpush1.bf16.msra.mxu0 %v16860_v36  ;;  %10754 = vmatpush1.bf16.msra.mxu1 %v16862_v29 }
 0xd83   :  { %10714 = vmatprep.subr.bf16.mxu0 %v16866_v32  ;;  %10755 = vmatprep.subr.bf16.mxu1 %v16868_v5 }
 0xd86   :  { %10715 = vmatpush1.bf16.msra.mxu0 %v16872_v41  ;;  %10756 = vmatpush1.bf16.msra.mxu1 %v16874_v47 }
 0xd87   :  { %10716 = vmatprep.subr.bf16.mxu0 %v16878_v55  ;;  %10757 = vmatprep.subr.bf16.mxu1 %v16880_v2 }
 0xd8a   :  { %10717 = vmatpush1.bf16.msra.mxu0 %v16884_v50  ;;  %10758 = vmatpush1.bf16.msra.mxu1 %v16886_v23 }
 0xd8b   :  { %10811 = vmatprep.subr.bf16.mxu0 %v16792_v53  ;;  %10852 = vmatprep.subr.bf16.mxu1 %v16794_v22 }
 0xe40   :  { %v10627_v49 = vpop.f32.mrb[88].mxu0  ;;  %v10668_v13 = vpop.f32.mrb[88].mxu1 }
 0xe41   :  { %v12816_v3 = vadd.f32 %v10627_v49, %v16934_v15  ;;  %v10629_v54 = vpop.f32.mrb[89].mxu0  ;;  %v10670_v42 = vpop.f32.mrb[89].mxu1  ;;  %v12818_v25 = vadd.f32 %v10668_v13, %v16942_v18 }
 0xe42   :  { %v12817_v59 = vadd.f32 %v10629_v54, %v16938_v14  ;;  %v10631_v40 = vpop.f32.mrb[90].mxu0  ;;  %v10672_v1 = vpop.f32.mrb[90].mxu1  ;;  %v12819_v4 = vadd.f32 %v10670_v42, %v16947_v21 }
 0xe43   :  { %v10679_v33 = vmul.f32 0.5, %v12816_v3  ;;  %v10632_v62 = vpop.f32.mrb[91].mxu0  ;;  %v10673_v52 = vpop.f32.mrb[91].mxu1 }
 0xe44   :  { %v10683_v58 = vmul.f32 0.5, %v12817_v59  ;;  %v10688_v7 = vmul.f32 0.5, %v12819_v4 }
 0xe45   :  { %14166 = vtanh.f32 %v10679_v33 }
 0xe46   :  { %14168 = vtanh.f32 %v10683_v58 }
 0xe47   :  { %14170 = vtanh.f32 %v12818_v25 }
 0xe48   :  { %14172 = vtanh.f32 %v10688_v7 }
 0xe4f   :  { %v14167_v60 = vpop.eup %14166 }
 0xe50   :  { %v14169_v11 = vpop.eup %14168  ;;  %v10681_v57 = vadd.f32 1.0, %v14167_v60 }
 0xe51   :  { %v10685_v39 = vadd.f32 1.0, %v14169_v11  ;;  %v14171_v20 = vpop.eup %14170 }
 0xe52   :  { %v10682_v28 = vmul.f32 0.5, %v10681_v57  ;;  %v14173_v13 = vpop.eup %14172 }
 0xe53   :  { %v10686_v30 = vmul.f32 0.5, %v10685_v39  ;;  %v10690_v59 = vadd.f32 1.0, %v14173_v13 }
 0xe54   :  { %v10693_v49 = vmul.f32 %v14171_v20, %v10682_v28 }
 0xe55   :  { %v10692_v3 = vmul.f32 %v10686_v30, %v17034_v61  ;;  %v10691_v40 = vmul.f32 0.5, %v10690_v59 }
 0xe57   :  { %v17076_v54 = vadd.f32 %v10693_v49, %v10692_v3 }
 0xe59   :  { %14174 = vtanh.f32 %v17076_v54 }
 0xe63   :  { %v14175_v42 = vpop.eup %14174 }
 0xe64   :  { %v10696_v1 = vmul.f32 %v14175_v42, %v10691_v40 }
 0xe66   :  { %v10697_v33 = vpack.c.bf16 %v10696_v1, %v10696_v1 }
 0xe68   :  { %10735 = vmatmul.mubr.bf16.vlgmr.msra.gmra.mrb[92].mxu0 %v10697_v33  ;;  %10776 = vmatmul.mubr.bf16.vlgmr.msra.gmra.mrb[92].mxu1 %v10697_v33 }
 0xe69   :  { %10812 = vmatpush1.bf16.msra.mxu0 %v16798_v43  ;;  %10853 = vmatpush1.bf16.msra.mxu1 %v16800_v19 }
 0xe6a   :  { %10813 = vmatprep.subr.bf16.mxu0 %v16804_v35  ;;  %10854 = vmatprep.subr.bf16.mxu1 %v16806_v48 }
 0xe6b   :  { %10843 = vmatprep.mubr.bf16.mxu0 %v17512_v6  ;;  %10884 = vmatprep.mubr.bf16.mxu1 %v17512_v6 }
 0xe6d   :  { %10814 = vmatpush1.bf16.msra.mxu0 %v16810_v46  ;;  %10855 = vmatpush1.bf16.msra.mxu1 %v16812_v16 }
 0xe6e   :  { %10815 = vmatprep.subr.bf16.mxu0 %v16816_v10  ;;  %10856 = vmatprep.subr.bf16.mxu1 %v16818_v17 }
 0xe71   :  { %10816 = vmatpush1.bf16.msra.mxu0 %v16824_v24  ;;  %10857 = vmatpush1.bf16.msra.mxu1 %v16826_v63 }
 0xe72   :  { %10817 = vmatprep.subr.bf16.mxu0 %v16830_v26  ;;  %10858 = vmatprep.subr.bf16.mxu1 %v16832_v31 }
 0xe75   :  { %10818 = vmatpush1.bf16.msra.mxu0 %v16836_v8  ;;  %10859 = vmatpush1.bf16.msra.mxu1 %v16838_v0 }
 0xe76   :  { %10819 = vmatprep.subr.bf16.mxu0 %v16842_v44  ;;  %10860 = vmatprep.subr.bf16.mxu1 %v16844_v12 }
 0xe79   :  { %10820 = vmatpush1.bf16.msra.mxu0 %v16848_v45  ;;  %10861 = vmatpush1.bf16.msra.mxu1 %v16850_v56 }
 0xe7a   :  { %10821 = vmatprep.subr.bf16.mxu0 %v16854_v27  ;;  %10862 = vmatprep.subr.bf16.mxu1 %v16856_v38 }
 0xe7d   :  { %10822 = vmatpush1.bf16.msra.mxu0 %v16860_v36  ;;  %10863 = vmatpush1.bf16.msra.mxu1 %v16862_v29 }
 0xe7e   :  { %10823 = vmatprep.subr.bf16.mxu0 %v16866_v32  ;;  %10864 = vmatprep.subr.bf16.mxu1 %v16868_v5 }
 0xe81   :  { %10824 = vmatpush1.bf16.msra.mxu0 %v16872_v41  ;;  %10865 = vmatpush1.bf16.msra.mxu1 %v16874_v47 }
 0xe82   :  { %10825 = vmatprep.subr.bf16.mxu0 %v16878_v55  ;;  %10866 = vmatprep.subr.bf16.mxu1 %v16880_v2 }
 0xe85   :  { %10826 = vmatpush1.bf16.msra.mxu0 %v16884_v50  ;;  %10867 = vmatpush1.bf16.msra.mxu1 %v16886_v23 }
 0xe86   :  { %10920 = vmatprep.subr.bf16.mxu0 %v16792_v53  ;;  %10961 = vmatprep.subr.bf16.mxu1 %v16794_v22 }
 0xf3b   :  { %v10736_v61 = vpop.f32.mrb[92].mxu0  ;;  %v10777_v62 = vpop.f32.mrb[92].mxu1 }
 0xf3c   :  { %v12820_v52 = vadd.f32 %v10736_v61, %v16934_v15  ;;  %v10738_v58 = vpop.f32.mrb[93].mxu0  ;;  %v10779_v25 = vpop.f32.mrb[93].mxu1  ;;  %v12822_v20 = vadd.f32 %v10777_v62, %v16942_v18 }
 0xf3d   :  { %v12821_v4 = vadd.f32 %v10738_v58, %v16938_v14  ;;  %v10740_v7 = vpop.f32.mrb[94].mxu0  ;;  %v10781_v60 = vpop.f32.mrb[94].mxu1  ;;  %v12823_v30 = vadd.f32 %v10779_v25, %v16947_v21 }
 0xf3e   :  { %v10788_v11 = vmul.f32 0.5, %v12820_v52  ;;  %v10741_v57 = vpop.f32.mrb[95].mxu0  ;;  %v10782_v39 = vpop.f32.mrb[95].mxu1 }
 0xf3f   :  { %v10792_v28 = vmul.f32 0.5, %v12821_v4  ;;  %v10797_v49 = vmul.f32 0.5, %v12823_v30 }
 0xf40   :  { %14176 = vtanh.f32 %v10788_v11 }
 0xf41   :  { %14178 = vtanh.f32 %v10792_v28 }
 0xf42   :  { %14180 = vtanh.f32 %v12822_v20 }
 0xf43   :  { %14182 = vtanh.f32 %v10797_v49 }
 0xf4a   :  { %v14177_v3 = vpop.eup %14176 }
 0xf4b   :  { %v14179_v13 = vpop.eup %14178  ;;  %v10790_v59 = vadd.f32 1.0, %v14177_v3 }
 0xf4c   :  { %v10794_v40 = vadd.f32 1.0, %v14179_v13  ;;  %v14181_v1 = vpop.eup %14180 }
 0xf4d   :  { %v10791_v42 = vmul.f32 0.5, %v10790_v59  ;;  %v14183_v62 = vpop.eup %14182 }
 0xf4e   :  { %v10795_v33 = vmul.f32 0.5, %v10794_v40  ;;  %v10799_v4 = vadd.f32 1.0, %v14183_v62 }
 0xf4f   :  { %v10802_v61 = vmul.f32 %v14181_v1, %v10791_v42 }
 0xf50   :  { %v10801_v52 = vmul.f32 %v10795_v33, %v17076_v54  ;;  %v10800_v7 = vmul.f32 0.5, %v10799_v4 }
 0xf52   :  { %v17118_v58 = vadd.f32 %v10802_v61, %v10801_v52 }
 0xf54   :  { %14184 = vtanh.f32 %v17118_v58 }
 0xf5e   :  { %v14185_v25 = vpop.eup %14184 }
 0xf5f   :  { %v10805_v60 = vmul.f32 %v14185_v25, %v10800_v7 }
 0xf61   :  { %v10806_v11 = vpack.c.bf16 %v10805_v60, %v10805_v60 }
 0xf63   :  { %10844 = vmatmul.mubr.bf16.vlgmr.msra.gmra.mrb[76].mxu0 %v10806_v11  ;;  %10885 = vmatmul.mubr.bf16.vlgmr.msra.gmra.mrb[76].mxu1 %v10806_v11 }
 0xf64   :  { %10921 = vmatpush1.bf16.msra.mxu0 %v16798_v43  ;;  %10962 = vmatpush1.bf16.msra.mxu1 %v16800_v19 }
 0xf65   :  { %10922 = vmatprep.subr.bf16.mxu0 %v16804_v35  ;;  %10963 = vmatprep.subr.bf16.mxu1 %v16806_v48 }
 0xf66   :  { %10952 = vmatprep.mubr.bf16.mxu0 %v17512_v6  ;;  %10993 = vmatprep.mubr.bf16.mxu1 %v17512_v6 }
 0xf68   :  { %10923 = vmatpush1.bf16.msra.mxu0 %v16810_v46  ;;  %10964 = vmatpush1.bf16.msra.mxu1 %v16812_v16 }
 0xf69   :  { %10924 = vmatprep.subr.bf16.mxu0 %v16816_v10  ;;  %10965 = vmatprep.subr.bf16.mxu1 %v16818_v17 }
 0xf6c   :  { %10925 = vmatpush1.bf16.msra.mxu0 %v16824_v24  ;;  %10966 = vmatpush1.bf16.msra.mxu1 %v16826_v63 }
 0xf6d   :  { %10926 = vmatprep.subr.bf16.mxu0 %v16830_v26  ;;  %10967 = vmatprep.subr.bf16.mxu1 %v16832_v31 }
 0xf70   :  { %10927 = vmatpush1.bf16.msra.mxu0 %v16836_v8  ;;  %10968 = vmatpush1.bf16.msra.mxu1 %v16838_v0 }
 0xf71   :  { %10928 = vmatprep.subr.bf16.mxu0 %v16842_v44  ;;  %10969 = vmatprep.subr.bf16.mxu1 %v16844_v12 }
 0xf74   :  { %10929 = vmatpush1.bf16.msra.mxu0 %v16848_v45  ;;  %10970 = vmatpush1.bf16.msra.mxu1 %v16850_v56 }
 0xf75   :  { %10930 = vmatprep.subr.bf16.mxu0 %v16854_v27  ;;  %10971 = vmatprep.subr.bf16.mxu1 %v16856_v38 }
 0xf78   :  { %10931 = vmatpush1.bf16.msra.mxu0 %v16860_v36  ;;  %10972 = vmatpush1.bf16.msra.mxu1 %v16862_v29 }
 0xf79   :  { %10932 = vmatprep.subr.bf16.mxu0 %v16866_v32  ;;  %10973 = vmatprep.subr.bf16.mxu1 %v16868_v5 }
 0xf7c   :  { %10933 = vmatpush1.bf16.msra.mxu0 %v16872_v41  ;;  %10974 = vmatpush1.bf16.msra.mxu1 %v16874_v47 }
 0xf7d   :  { %10934 = vmatprep.subr.bf16.mxu0 %v16878_v55  ;;  %10975 = vmatprep.subr.bf16.mxu1 %v16880_v2 }
 0xf80   :  { %10935 = vmatpush1.bf16.msra.mxu0 %v16884_v50  ;;  %10976 = vmatpush1.bf16.msra.mxu1 %v16886_v23 }
 0xf81   :  { %11029 = vmatprep.subr.bf16.mxu0 %v16792_v53  ;;  %11070 = vmatprep.subr.bf16.mxu1 %v16794_v22 }
0x1036   :  { %v10845_v54 = vpop.f32.mrb[76].mxu0  ;;  %v10886_v57 = vpop.f32.mrb[76].mxu1 }
0x1037   :  { %v12812_v39 = vadd.f32 %v10845_v54, %v16934_v15  ;;  %v10847_v28 = vpop.f32.mrb[77].mxu0  ;;  %v10888_v20 = vpop.f32.mrb[77].mxu1  ;;  %v12814_v1 = vadd.f32 %v10886_v57, %v16942_v18 }
0x1038   :  { %v12813_v30 = vadd.f32 %v10847_v28, %v16938_v14  ;;  %v10849_v49 = vpop.f32.mrb[78].mxu0  ;;  %v10890_v3 = vpop.f32.mrb[78].mxu1  ;;  %v12815_v53 = vadd.f32 %v10888_v20, %v16947_v21 }
0x1039   :  { %v10897_v13 = vmul.f32 0.5, %v12812_v39  ;;  %v10850_v59 = vpop.f32.mrb[79].mxu0  ;;  %v10891_v40 = vpop.f32.mrb[79].mxu1  ;;  %v13880_v3 = vld [vmem:[#allocation9] ss:$16 sps:$4 sm:$0xff]  }
0x103a   :  { %v10901_v42 = vmul.f32 0.5, %v12813_v30  ;;  %v10906_v22 = vmul.f32 0.5, %v12815_v53  ;;  %v13888_v40 = vld [vmem:[#allocation9 + $0x24] ss:$16 sps:$4 sm:$0xff]   ;;  %v13889_v53 = vld [vmem:[#allocation9 + $0x28] ss:$16 sps:$4 sm:$0xff]  }
0x103b   :  { %14186 = vtanh.f32 %v10897_v13  ;;  %v13883_v13 = vld [vmem:[#allocation9 + $0x8] ss:$16 sps:$4 sm:$0xff]  }
0x103c   :  { %14188 = vtanh.f32 %v10901_v42  ;;  %v13891_v42 = vld [vmem:[#allocation9 + $0x2c] ss:$16 sps:$4 sm:$0xff]  }
0x103d   :  { %14190 = vtanh.f32 %v12814_v1  ;;  %v13886_v1 = vld [vmem:[#allocation9 + $0x20] ss:$16 sps:$4 sm:$0xff]  }
0x103e   :  { %14192 = vtanh.f32 %v10906_v22  ;;  %v17993_v22 = vld [vmem:[#allocation67_spill] sm:$0xff] }
0x1045   :  { %v14187_v33 = vpop.eup %14186 }
0x1046   :  { %v14189_v61 = vpop.eup %14188  ;;  %v10899_v52 = vadd.f32 1.0, %v14187_v33  ;;  %v13894_v33 = vld [vmem:[#allocation9 + $0x44] ss:$16 sps:$4 sm:$0xff]  }
0x1047   :  { %v10903_v62 = vadd.f32 1.0, %v14189_v61  ;;  %v14191_v7 = vpop.eup %14190  ;;  %v13897_v61 = vld [vmem:[#allocation9 + $0x4c] ss:$16 sps:$4 sm:$0xff]  }
0x1048   :  { %v10900_v4 = vmul.f32 0.5, %v10899_v52  ;;  %v14193_v57 = vpop.eup %14192  ;;  %v13892_v52 = vld [vmem:[#allocation9 + $0x40] ss:$16 sps:$4 sm:$0xff]  }
0x1049   :  { %v10904_v25 = vmul.f32 0.5, %v10903_v62  ;;  %v10908_v39 = vadd.f32 1.0, %v14193_v57  ;;  %v13895_v62 = vld [vmem:[#allocation9 + $0x48] ss:$16 sps:$4 sm:$0xff]   ;;  %v13904_v57 = vld [vmem:[#allocation9 + $0x80] ss:$16 sps:$4 sm:$0xff]  }
0x104a   :  { %v10911_v60 = vmul.f32 %v14191_v7, %v10900_v4  ;;  %v13900_v4 = vld [vmem:[#allocation9 + $0x64] ss:$16 sps:$4 sm:$0xff]   ;;  %v13903_v7 = vld [vmem:[#allocation9 + $0x6c] ss:$16 sps:$4 sm:$0xff]  }
0x104b   :  { %v10910_v11 = vmul.f32 %v10904_v25, %v17118_v58  ;;  %v10909_v28 = vmul.f32 0.5, %v10908_v39  ;;  %v13898_v25 = vld [vmem:[#allocation9 + $0x60] ss:$16 sps:$4 sm:$0xff]   ;;  %v13907_v39 = vld [vmem:[#allocation9 + $0x88] ss:$16 sps:$4 sm:$0xff]  }
0x104d   :  { %v17160_v54 = vadd.f32 %v10911_v60, %v10910_v11  ;;  %v13901_v60 = vld [vmem:[#allocation9 + $0x68] ss:$16 sps:$4 sm:$0xff]   ;;  %v13906_v11 = vld [vmem:[#allocation9 + $0x84] ss:$16 sps:$4 sm:$0xff]  }
0x104f   :  { %14194 = vtanh.f32 %v17160_v54 }
0x1059   :  { %v14195_v20 = vpop.eup %14194 }
0x105a   :  { %v10914_v30 = vmul.f32 %v14195_v20, %v10909_v28  ;;  %v13912_v28 = vld [vmem:[#allocation9 + $0xa4] ss:$16 sps:$4 sm:$0xff]   ;;  %v13915_v20 = vld [vmem:[#allocation9 + $0xac] ss:$16 sps:$4 sm:$0xff]  }
0x105c   :  { %v10915_v49 = vpack.c.bf16 %v10914_v30, %v10914_v30  ;;  %v13910_v30 = vld [vmem:[#allocation9 + $0xa0] ss:$16 sps:$4 sm:$0xff]  }
0x105e   :  { %10953 = vmatmul.mubr.bf16.vlgmr.msra.gmra.mrb[60].mxu0 %v10915_v49  ;;  %10994 = vmatmul.mubr.bf16.vlgmr.msra.gmra.mrb[60].mxu1 %v10915_v49  ;;  %v13913_v49 = vld [vmem:[#allocation9 + $0xa8] ss:$16 sps:$4 sm:$0xff]  }
0x105f   :  { %11030 = vmatpush1.bf16.msra.mxu0 %v16798_v43  ;;  %11071 = vmatpush1.bf16.msra.mxu1 %v16800_v19  ;;  %v13885_v43 = vld [vmem:[#allocation9 + $0xc] ss:$16 sps:$4 sm:$0xff]  }
0x1060   :  { %11031 = vmatprep.subr.bf16.mxu0 %v16804_v35  ;;  %11072 = vmatprep.subr.bf16.mxu1 %v16806_v48 }
0x1061   :  { %11061 = vmatprep.mubr.bf16.mxu0 %v17512_v6  ;;  %11102 = vmatprep.mubr.bf16.mxu1 %v17512_v6  ;;  %v13882_v6 = vld [vmem:[#allocation9 + $0x4] ss:$16 sps:$4 sm:$0xff]  }
0x1063   :  { %11032 = vmatpush1.bf16.msra.mxu0 %v16810_v46  ;;  %11073 = vmatpush1.bf16.msra.mxu1 %v16812_v16 }
0x1064   :  { %11033 = vmatprep.subr.bf16.mxu0 %v16816_v10  ;;  %11074 = vmatprep.subr.bf16.mxu1 %v16818_v17 }
0x1067   :  { %11034 = vmatpush1.bf16.msra.mxu0 %v16824_v24  ;;  %11075 = vmatpush1.bf16.msra.mxu1 %v16826_v63 }
0x1068   :  { %11035 = vmatprep.subr.bf16.mxu0 %v16830_v26  ;;  %11076 = vmatprep.subr.bf16.mxu1 %v16832_v31 }
0x106b   :  { %11036 = vmatpush1.bf16.msra.mxu0 %v16836_v8  ;;  %11077 = vmatpush1.bf16.msra.mxu1 %v16838_v0 }
0x106c   :  { %11037 = vmatprep.subr.bf16.mxu0 %v16842_v44  ;;  %11078 = vmatprep.subr.bf16.mxu1 %v16844_v12 }
0x106f   :  { %11038 = vmatpush1.bf16.msra.mxu0 %v16848_v45  ;;  %11079 = vmatpush1.bf16.msra.mxu1 %v16850_v56 }
0x1070   :  { %11039 = vmatprep.subr.bf16.mxu0 %v16854_v27  ;;  %11080 = vmatprep.subr.bf16.mxu1 %v16856_v38 }
0x1073   :  { %11040 = vmatpush1.bf16.msra.mxu0 %v16860_v36  ;;  %11081 = vmatpush1.bf16.msra.mxu1 %v16862_v29 }
0x1074   :  { %11041 = vmatprep.subr.bf16.mxu0 %v16866_v32  ;;  %11082 = vmatprep.subr.bf16.mxu1 %v16868_v5 }
0x1077   :  { %11042 = vmatpush1.bf16.msra.mxu0 %v16872_v41  ;;  %11083 = vmatpush1.bf16.msra.mxu1 %v16874_v47 }
0x1078   :  { %11043 = vmatprep.subr.bf16.mxu0 %v16878_v55  ;;  %11084 = vmatprep.subr.bf16.mxu1 %v16880_v2 }
0x107b   :  { %11044 = vmatpush1.bf16.msra.mxu0 %v16884_v50  ;;  %11085 = vmatpush1.bf16.msra.mxu1 %v16886_v23 }
0x107c   :  { %11534 = vmatprep.subr.bf16.mxu0 %v13882_v6  ;;  %11574 = vmatprep.subr.bf16.mxu1 %v13885_v43  ;;  %v13918_v6 = vld [vmem:[#allocation9 + $0xc4] ss:$16 sps:$4 sm:$0xff]   ;;  %v13921_v43 = vld [vmem:[#allocation9 + $0xcc] ss:$16 sps:$4 sm:$0xff]  }
0x1131   :  { %v10954_v19 = vpop.f32.mrb[60].mxu0  ;;  %v10995_v35 = vpop.f32.mrb[60].mxu1 }
0x1132   :  { %v12804_v48 = vadd.f32 %v10954_v19, %v16934_v15  ;;  %v10956_v46 = vpop.f32.mrb[61].mxu0  ;;  %v10997_v16 = vpop.f32.mrb[61].mxu1  ;;  %v12806_v0 = vadd.f32 %v10995_v35, %v16942_v18  ;;  %v13916_v19 = vld [vmem:[#allocation9 + $0xc0] ss:$16 sps:$4 sm:$0xff]   ;;  %v13919_v35 = vld [vmem:[#allocation9 + $0xc8] ss:$16 sps:$4 sm:$0xff]  }
0x1133   :  { %v12805_v10 = vadd.f32 %v10956_v46, %v16938_v14  ;;  %v10958_v17 = vpop.f32.mrb[62].mxu0  ;;  %v10999_v24 = vpop.f32.mrb[62].mxu1  ;;  %v12807_v44 = vadd.f32 %v10997_v16, %v16947_v21  ;;  %v13927_v46 = vld [vmem:[#allocation9 + $0xec] ss:$16 sps:$4 sm:$0xff]   ;;  %v13922_v16 = vld [vmem:[#allocation9 + $0xe0] ss:$16 sps:$4 sm:$0xff]  }
0x1134   :  { %v11006_v63 = vmul.f32 0.5, %v12804_v48  ;;  %v10959_v26 = vpop.f32.mrb[63].mxu0  ;;  %v11000_v31 = vpop.f32.mrb[63].mxu1  ;;  %v13924_v48 = vld [vmem:[#allocation9 + $0xe4] ss:$16 sps:$4 sm:$0xff]  }
0x1135   :  { %v11010_v8 = vmul.f32 0.5, %v12805_v10  ;;  %v11015_v12 = vmul.f32 0.5, %v12807_v44  ;;  %v13925_v10 = vld [vmem:[#allocation9 + $0xe8] ss:$16 sps:$4 sm:$0xff]   ;;  %v13930_v17 = vld [vmem:[#allocation9 + $0x104] ss:$16 sps:$4 sm:$0xff]  }
0x1136   :  { %14196 = vtanh.f32 %v11006_v63  ;;  %v13933_v24 = vld [vmem:[#allocation9 + $0x10c] ss:$16 sps:$4 sm:$0xff]   ;;  %v13928_v63 = vld [vmem:[#allocation9 + $0x100] ss:$16 sps:$4 sm:$0xff]   ;;  %v13931_v26 = vld [vmem:[#allocation9 + $0x108] ss:$16 sps:$4 sm:$0xff]  }
0x1137   :  { %14198 = vtanh.f32 %v11010_v8  ;;  %v13936_v31 = vld [vmem:[#allocation9 + $0x124] ss:$16 sps:$4 sm:$0xff]   ;;  %v13939_v8 = vld [vmem:[#allocation9 + $0x12c] ss:$16 sps:$4 sm:$0xff]   ;;  %v13937_v44 = vld [vmem:[#allocation9 + $0x128] ss:$16 sps:$4 sm:$0xff]  }
0x1138   :  { %14200 = vtanh.f32 %v12806_v0  ;;  %v13934_v0 = vld [vmem:[#allocation9 + $0x120] ss:$16 sps:$4 sm:$0xff]  }
0x1139   :  { %14202 = vtanh.f32 %v11015_v12  ;;  %v13942_v12 = vld [vmem:[#allocation9 + $0x144] ss:$16 sps:$4 sm:$0xff]  }
0x1140   :  { %v14197_v45 = vpop.eup %14196 }
0x1141   :  { %v14199_v56 = vpop.eup %14198  ;;  %v11008_v27 = vadd.f32 1.0, %v14197_v45  ;;  %v13945_v45 = vld [vmem:[#allocation9 + $0x14c] ss:$16 sps:$4 sm:$0xff]  }
0x1142   :  { %v11012_v38 = vadd.f32 1.0, %v14199_v56  ;;  %v14201_v29 = vpop.eup %14200  ;;  %v13940_v56 = vld [vmem:[#allocation9 + $0x140] ss:$16 sps:$4 sm:$0xff]  }
0x1143   :  { %v11009_v36 = vmul.f32 0.5, %v11008_v27  ;;  %v14203_v55 = vpop.eup %14202  ;;  %v13943_v27 = vld [vmem:[#allocation9 + $0x148] ss:$16 sps:$4 sm:$0xff]  }
0x1144   :  { %v11013_v32 = vmul.f32 0.5, %v11012_v38  ;;  %v11017_v2 = vadd.f32 1.0, %v14203_v55  ;;  %v13948_v38 = vld [vmem:[#allocation9 + $0x164] ss:$16 sps:$4 sm:$0xff]   ;;  %v13952_v55 = vld [vmem:[#allocation9 + $0x180] ss:$16 sps:$4 sm:$0xff]  }
0x1145   :  { %v11020_v5 = vmul.f32 %v14201_v29, %v11009_v36  ;;  %v13951_v36 = vld [vmem:[#allocation9 + $0x16c] ss:$16 sps:$4 sm:$0xff]   ;;  %v13946_v29 = vld [vmem:[#allocation9 + $0x160] ss:$16 sps:$4 sm:$0xff]  }
0x1146   :  { %v11019_v41 = vmul.f32 %v11013_v32, %v17160_v54  ;;  %v11018_v50 = vmul.f32 0.5, %v11017_v2  ;;  %v13909_v54 = vld [vmem:[#allocation9 + $0x8c] ss:$16 sps:$4 sm:$0xff]   ;;  %v13949_v32 = vld [vmem:[#allocation9 + $0x168] ss:$16 sps:$4 sm:$0xff]  }
0x1147   :  { %v13955_v2 = vld [vmem:[#allocation9 + $0x188] ss:$16 sps:$4 sm:$0xff]  }
0x1148   :  { %v17200_v47 = vadd.f32 %v11020_v5, %v11019_v41  ;;  %v13954_v5 = vld [vmem:[#allocation9 + $0x184] ss:$16 sps:$4 sm:$0xff]   ;;  %v13957_v41 = vld [vmem:[#allocation9 + $0x18c] ss:$16 sps:$4 sm:$0xff]  }
0x114a   :  { %14204 = vtanh.f32 %v17200_v47 }
0x1154   :  { %v14205_v23 = vpop.eup %14204 }
0x1155   :  { %v11023_v58 = vmul.f32 %v14205_v23, %v11018_v50  ;;  %v13960_v50 = vld [vmem:[#allocation9 + $0x1a4] ss:$16 sps:$4 sm:$0xff]   ;;  %v13963_v23 = vld [vmem:[#allocation9 + $0x1ac] ss:$16 sps:$4 sm:$0xff]  }
0x1157   :  { %v11024_v59 = vpack.c.bf16 %v11023_v58, %v11023_v58  ;;  %v13958_v58 = vld [vmem:[#allocation9 + $0x1a0] ss:$16 sps:$4 sm:$0xff]  }
0x1159   :  { %11062 = vmatmul.mubr.bf16.vlgmr.msra.gmra.mrb[44].mxu0 %v11024_v59  ;;  %11103 = vmatmul.mubr.bf16.vlgmr.msra.gmra.mrb[44].mxu1 %v11024_v59  ;;  %v13969_v59 = vld [vmem:[#allocation9 + $0x1cc] ss:$16 sps:$4 sm:$0xff]  }
0x115a   :  { %11535 = vmatpush1.bf16.msra.mxu0 %v13880_v3  ;;  %11575 = vmatpush1.bf16.msra.mxu1 %v13883_v13  ;;  %v13961_v3 = vld [vmem:[#allocation9 + $0x1a8] ss:$16 sps:$4 sm:$0xff]   ;;  %v13966_v13 = vld [vmem:[#allocation9 + $0x1c4] ss:$16 sps:$4 sm:$0xff]  }
0x115b   :  { %11566 = vmatprep.mubr.bf16.mxu0 %v17993_v22  ;;  %11606 = vmatprep.mubr.bf16.mxu1 %v17993_v22  ;;  %v13970_v22 = vld [vmem:[#allocation9 + $0x1e0] ss:$16 sps:$4 sm:$0xff]  }
0x115c   :  { %11536 = vmatprep.subr.bf16.mxu0 %v13888_v40  ;;  %11576 = vmatprep.subr.bf16.mxu1 %v13891_v42  ;;  %v13964_v40 = vld [vmem:[#allocation9 + $0x1c0] ss:$16 sps:$4 sm:$0xff]   ;;  %v13967_v42 = vld [vmem:[#allocation9 + $0x1c8] ss:$16 sps:$4 sm:$0xff]  }
0x115e   :  { %11537 = vmatpush1.bf16.msra.mxu0 %v13886_v1  ;;  %11577 = vmatpush1.bf16.msra.mxu1 %v13889_v53  ;;  %v13972_v1 = vld [vmem:[#allocation9 + $0x1e4] ss:$16 sps:$4 sm:$0xff]   ;;  %v13975_v53 = vld [vmem:[#allocation9 + $0x1ec] ss:$16 sps:$4 sm:$0xff]  }
0x115f   :  { %11538 = vmatprep.subr.bf16.mxu0 %v13894_v33  ;;  %11578 = vmatprep.subr.bf16.mxu1 %v13897_v61  ;;  %v13973_v33 = vld [vmem:[#allocation9 + $0x1e8] ss:$16 sps:$4 sm:$0xff]  }
0x1162   :  { %11539 = vmatpush1.bf16.msra.mxu0 %v13892_v52  ;;  %11579 = vmatpush1.bf16.msra.mxu1 %v13895_v62 }
0x1163   :  { %11540 = vmatprep.subr.bf16.mxu0 %v13900_v4  ;;  %11580 = vmatprep.subr.bf16.mxu1 %v13903_v7 }
0x1166   :  { %11541 = vmatpush1.bf16.msra.mxu0 %v13898_v25  ;;  %11581 = vmatpush1.bf16.msra.mxu1 %v13901_v60 }
0x1167   :  { %11542 = vmatprep.subr.bf16.mxu0 %v13906_v11  ;;  %11582 = vmatprep.subr.bf16.mxu1 %v13909_v54 }
0x116a   :  { %11543 = vmatpush1.bf16.msra.mxu0 %v13904_v57  ;;  %11583 = vmatpush1.bf16.msra.mxu1 %v13907_v39 }
0x116b   :  { %11544 = vmatprep.subr.bf16.mxu0 %v13912_v28  ;;  %11584 = vmatprep.subr.bf16.mxu1 %v13915_v20 }
0x116e   :  { %11545 = vmatpush1.bf16.msra.mxu0 %v13910_v30  ;;  %11585 = vmatpush1.bf16.msra.mxu1 %v13913_v49 }
0x116f   :  { %11546 = vmatprep.subr.bf16.mxu0 %v13918_v6  ;;  %11586 = vmatprep.subr.bf16.mxu1 %v13921_v43 }
0x1172   :  { %11547 = vmatpush1.bf16.msra.mxu0 %v13916_v19  ;;  %11587 = vmatpush1.bf16.msra.mxu1 %v13919_v35 }
0x1173   :  { %11548 = vmatprep.subr.bf16.mxu0 %v13924_v48  ;;  %11588 = vmatprep.subr.bf16.mxu1 %v13927_v46 }
0x1176   :  { %11549 = vmatpush1.bf16.msra.mxu0 %v13922_v16  ;;  %11589 = vmatpush1.bf16.msra.mxu1 %v13925_v10 }
0x1177   :  { %11550 = vmatprep.subr.bf16.mxu0 %v13930_v17  ;;  %11590 = vmatprep.subr.bf16.mxu1 %v13933_v24 }
0x117a   :  { %11551 = vmatpush1.bf16.msra.mxu0 %v13928_v63  ;;  %11591 = vmatpush1.bf16.msra.mxu1 %v13931_v26 }
0x117b   :  { %11552 = vmatprep.subr.bf16.mxu0 %v13936_v31  ;;  %11592 = vmatprep.subr.bf16.mxu1 %v13939_v8 }
0x117e   :  { %11553 = vmatpush1.bf16.msra.mxu0 %v13934_v0  ;;  %11593 = vmatpush1.bf16.msra.mxu1 %v13937_v44 }
0x117f   :  { %11554 = vmatprep.subr.bf16.mxu0 %v13942_v12  ;;  %11594 = vmatprep.subr.bf16.mxu1 %v13945_v45 }
0x1182   :  { %11555 = vmatpush1.bf16.msra.mxu0 %v13940_v56  ;;  %11595 = vmatpush1.bf16.msra.mxu1 %v13943_v27 }
0x1183   :  { %11556 = vmatprep.subr.bf16.mxu0 %v13948_v38  ;;  %11596 = vmatprep.subr.bf16.mxu1 %v13951_v36 }
0x1186   :  { %11557 = vmatpush1.bf16.msra.mxu0 %v13946_v29  ;;  %11597 = vmatpush1.bf16.msra.mxu1 %v13949_v32 }
0x1187   :  { %11558 = vmatprep.subr.bf16.mxu0 %v13954_v5  ;;  %11598 = vmatprep.subr.bf16.mxu1 %v13957_v41 }
0x118a   :  { %11559 = vmatpush1.bf16.msra.mxu0 %v13952_v55  ;;  %11599 = vmatpush1.bf16.msra.mxu1 %v13955_v2 }
0x118b   :  { %11560 = vmatprep.subr.bf16.mxu0 %v13960_v50  ;;  %11600 = vmatprep.subr.bf16.mxu1 %v13963_v23 }
0x118e   :  { %11561 = vmatpush1.bf16.msra.mxu0 %v13958_v58  ;;  %11601 = vmatpush1.bf16.msra.mxu1 %v13961_v3 }
0x118f   :  { %11562 = vmatprep.subr.bf16.mxu0 %v13966_v13  ;;  %11602 = vmatprep.subr.bf16.mxu1 %v13969_v59 }
0x1192   :  { %11563 = vmatpush1.bf16.msra.mxu0 %v13964_v40  ;;  %11603 = vmatpush1.bf16.msra.mxu1 %v13967_v42 }
0x1193   :  { %11564 = vmatprep.subr.bf16.mxu0 %v13972_v1  ;;  %11604 = vmatprep.subr.bf16.mxu1 %v13975_v53 }
0x1196   :  { %11565 = vmatpush1.bf16.msra.mxu0 %v13970_v22  ;;  %11605 = vmatpush1.bf16.msra.mxu1 %v13973_v33 }
0x1199   :  { %11567 = vmatmul.mubr.bf16.vlgmr.msra.gmra.mrb[128].mxu0 %v16757_v37  ;;  %11607 = vmatmul.mubr.bf16.vlgmr.msra.gmra.mrb[128].mxu1 %v16757_v37 }
0x122c   :  { %v11063_v61 = vpop.f32.mrb[44].mxu0  ;;  %v11104_v52 = vpop.f32.mrb[44].mxu1 }
0x122d   :  { %v12796_v62 = vadd.f32 %v11063_v61, %v16934_v15  ;;  %v11065_v4 = vpop.f32.mrb[45].mxu0  ;;  %v11106_v7 = vpop.f32.mrb[45].mxu1  ;;  %v12798_v20 = vadd.f32 %v11104_v52, %v16942_v18 }
0x122e   :  { %v12797_v25 = vadd.f32 %v11065_v4, %v16938_v14  ;;  %v11067_v60 = vpop.f32.mrb[46].mxu0  ;;  %v11108_v11 = vpop.f32.mrb[46].mxu1  ;;  %v12799_v37 = vadd.f32 %v11106_v7, %v16947_v21  ;;  %v11197_v21 = vld [vmem:[%s17233_s9] sm:$0xf] }
0x122f   :  { %v11115_v54 = vmul.f32 0.5, %v12796_v62  ;;  %v11068_v57 = vpop.f32.mrb[47].mxu0  ;;  %v11109_v39 = vpop.f32.mrb[47].mxu1  ;;  %v11202_v26 = vrot.slane %v11197_v21, %v17988_v51  ;;  %v11206_v0 = vrot.slane %v11197_v21, %v17991_v34  ;;  %v11210_v45 = vrot.slane %v11197_v21, %v17992_v9 }
0x1230   :  { %v11119_v28 = vmul.f32 0.5, %v12797_v25  ;;  %v11124_v30 = vmul.f32 0.5, %v12799_v37 }
0x1231   :  { %14206 = vtanh.f32 %v11115_v54 }
0x1232   :  { %14208 = vtanh.f32 %v11119_v28 }
0x1233   :  { %14210 = vtanh.f32 %v12798_v20 }
0x1234   :  { %14212 = vtanh.f32 %v11124_v30 }
0x123b   :  { %v14207_v49 = vpop.eup %14206 }
0x123c   :  { %v14209_v15 = vpop.eup %14208  ;;  %v11117_v6 = vadd.f32 1.0, %v14207_v49 }
0x123d   :  { %v11121_v43 = vadd.f32 1.0, %v14209_v15  ;;  %v14211_v19 = vpop.eup %14210 }
0x123e   :  { %v11118_v14 = vmul.f32 0.5, %v11117_v6  ;;  %v14213_v10 = vpop.eup %14212 }
0x123f   :  { %v11122_v35 = vmul.f32 0.5, %v11121_v43  ;;  %v11126_v18 = vadd.f32 1.0, %v14213_v10 }
0x1240   :  { %v11129_v48 = vmul.f32 %v14211_v19, %v11118_v14 }
0x1241   :  { %v11128_v46 = vmul.f32 %v11122_v35, %v17200_v47  ;;  %v11127_v17 = vmul.f32 0.5, %v11126_v18 }
0x1243   :  { %v11130_v16 = vadd.f32 %v11129_v48, %v11128_v46 }
0x1245   :  { %14214 = vtanh.f32 %v11130_v16 }
0x124f   :  { %v14215_v24 = vpop.eup %14214 }
0x1250   :  { %v11132_v63 = vmul.f32 %v14215_v24, %v11127_v17 }
0x1252   :  { %11627 = vst [vmem:[%s17234_s10] sm:$0xff] %v11132_v63 }
0x126c   :  { %v11568_v31 = vpop.f32.mrb[128].mxu0  ;;  %v11608_v8 = vpop.f32.mrb[128].mxu1 }
0x126d   :  { %v11569_v47 = vadd.f32 %v11568_v31, %v11202_v26  ;;  %v11570_v44 = vpop.f32.mrb[129].mxu0  ;;  %v11610_v12 = vpop.f32.mrb[129].mxu1  ;;  %v11609_v32 = vadd.f32 %v11608_v8, %v11206_v0 }
0x126e   :  { %v11571_v56 = vpop.f32.mrb[130].mxu0  ;;  %v11612_v27 = vpop.f32.mrb[130].mxu1  ;;  %v11611_v5 = vadd.f32 %v11610_v12, %v11210_v45 }
0x126f   :  { %v11615_v38 = vmul.f32 0.5, %v11569_v47  ;;  %v11572_v36 = vpop.f32.mrb[131].mxu0  ;;  %v11613_v29 = vpop.f32.mrb[131].mxu1 }
0x1270   :  { %v11620_v41 = vmul.f32 0.5, %v11611_v5 }
0x1271   :  { %14216 = vtanh.f32 %v11615_v38 }
0x1272   :  { %14218 = vtanh.f32 %v11609_v32 }
0x1273   :  { %14220 = vtanh.f32 %v11620_v41 }
0x127b   :  { %v14217_v51 = vpop.eup %14216 }
0x127c   :  { %v11617_v55 = vadd.f32 1.0, %v14217_v51  ;;  %v14219_v50 = vpop.eup %14218 }
0x127d   :  { %v14221_v23 = vpop.eup %14220 }
0x127e   :  { %v11618_v2 = vmul.f32 0.5, %v11617_v55  ;;  %v11622_v58 = vadd.f32 1.0, %v14221_v23 }
0x1280   :  { %v11624_v34 = vmul.f32 %v14219_v50, %v11618_v2  ;;  %v11623_v9 = vmul.f32 0.5, %v11622_v58 }
0x1282   :  { %14222 = vtanh.f32 %v11624_v34 }
0x128c   :  { %v14223_v3 = vpop.eup %14222 }
0x128d   :  { %v11626_v13 = vmul.f32 %v14223_v3, %v11623_v9 }
0x128f   :  { %11628 = vst [vmem:[%s17234_s10 + $0x8] sm:$0xff] %v11626_v13 }
0x1290   :  { %11633 = vsyncpa [#allocation5], 1 }
0x1291   :  { %11634 = vsyncpa [#allocation7], 1 }
0x1292   :  { %11635 = vsyncpa [#allocation10], 1 }

</bundles_post_ra>
